<compile_context>
chip_gen: v7x
topology: tpu7x:2x2x1
jax: 0.10.0
libtpu: 0.0.40
codegen_flags: <defaults>
</compile_context>

<pallas_src>
import functools

import jax
import jax.numpy as jnp
from jax.experimental import pallas as pl
from jax.experimental.pallas import tpu as pltpu


def _dy_mixprop_kernel(x_ref, w1_ref, b1_ref, w2_ref, b2_ref,
                       wm1_ref, bm1_ref, wm2_ref, bm2_ref, o_ref,
                       *, gdep, alpha):
    f32 = jnp.float32
    x = x_ref[...].astype(f32)                        # (Lb, V, C)
    lb, v, c_in = x.shape
    rows = lb * v
    one_m_alpha = 1.0 - alpha

    # Leading-dim merge only (last two dims untouched) -> layout-trivial reshape.
    xf = x.reshape(rows, c_in)                        # (Lb*V, C)

    w1 = w1_ref[...].astype(f32)                      # (C, C)  pre-transposed [c_in, c_out]
    w2 = w2_ref[...].astype(f32)
    b1 = b1_ref[...].astype(f32)                      # (1, C)
    b2 = b2_ref[...].astype(f32)

    # lin1 / lin2 (1x1 conv over channels) + tanh, as single flat MXU matmuls.
    x1 = jnp.tanh(jnp.dot(xf, w1, preferred_element_type=f32) + b1).reshape(lb, v, c_in)
    x2 = jnp.tanh(jnp.dot(xf, w2, preferred_element_type=f32) + b2).reshape(lb, v, c_in)

    # adj[b,i,j] = sum_c x1[b,i,c] * x2[b,j,c]; adj^T built by swapping operands
    # (no in-kernel transpose).
    adj = jnp.einsum('bic,bjc->bij', x1, x2, preferred_element_type=f32)    # (Lb, V, V)
    adjT = jnp.einsum('bic,bjc->bij', x2, x1, preferred_element_type=f32)

    def softmax_sublane(t):                           # softmax over axis 1 (sublane axis)
        m = jnp.max(t, axis=1, keepdims=True)
        e = jnp.exp(t - m)
        return e / jnp.sum(e, axis=1, keepdims=True)

    # p1[b,w,v] = adj0[b,v,w]  and  p2[b,w,v] = adj1[b,v,w]: laid out so that propagation is
    # the plain batched matmul  h_new[b,w,c] = sum_v p[b,w,v] * h[b,v,c].
    p1 = softmax_sublane(adjT)
    p2 = softmax_sublane(adj)

    ax = alpha * x                                    # hoisted: shared by both branches/hops

    # Hop 0 of both branches uses h == x -> fold both MLP weight slices into one matmul.
    wm0 = (wm1_ref[0] + wm2_ref[0]).astype(f32)       # (C, c_out)
    y = jnp.dot(xf, wm0, preferred_element_type=f32)  # (Lb*V, c_out)

    def branch(p, wm_ref, y):
        h = x
        for i in range(1, gdep + 1):
            prop = jnp.einsum('bwv,bvc->bwc', p, h, preferred_element_type=f32)
            h = ax + one_m_alpha * prop
            # Fused "concat + 1x1 conv": accumulate this hop's contribution.
            y = y + jnp.dot(h.reshape(rows, c_in), wm_ref[i].astype(f32),
                            preferred_element_type=f32)
        return y

    y = branch(p1, wm1_ref, y)
    y = branch(p2, wm2_ref, y)
    y = y + (bm1_ref[...] + bm2_ref[...]).astype(f32)
    o_ref[...] = y.astype(o_ref.dtype)


def dy_mixprop(x, w_lin1, b_lin1, w_lin2, b_lin2,
               w_mlp1, b_mlp1, w_mlp2, b_mlp2,
               *, gdep, alpha, block_rows=128):
    """x: (N, C, V, L). Conv2d 1x1 weights given as 2-D (c_out, c_in), biases 1-D."""
    N, C, V, L = x.shape
    c_out = w_mlp1.shape[0]
    K = (gdep + 1) * C
    assert w_lin1.shape == (C, C) and w_lin2.shape == (C, C)
    assert w_mlp1.shape == (c_out, K) and w_mlp2.shape == (c_out, K)

    # One independent graph problem per (n, l): rows of shape (V, C).
    R = N * L
    xr = jnp.transpose(x, (0, 3, 2, 1)).reshape(R, V, C)
    Lb = max(1, min(block_rows, R))       # rows per grid step (size against V^2 blocks & VMEM)

    # Pre-transpose 1x1-conv weights so every in-kernel contraction is row x col.
    w1t = jnp.transpose(w_lin1)                       # (C, C)
    w2t = jnp.transpose(w_lin2)
    # MLP weights per hop: wm[hop, c, o] = w_mlp[o, hop*C + c]  (matches torch cat order).
    wm1t = jnp.transpose(w_mlp1).reshape(gdep + 1, C, c_out)
    wm2t = jnp.transpose(w_mlp2).reshape(gdep + 1, C, c_out)
    b1 = b_lin1.reshape(1, C)
    b2 = b_lin2.reshape(1, C)
    bm1 = b_mlp1.reshape(1, c_out)
    bm2 = b_mlp2.reshape(1, c_out)

    kernel = functools.partial(_dy_mixprop_kernel, gdep=int(gdep), alpha=float(alpha))

    out_flat = pl.pallas_call(
        kernel,
        out_shape=jax.ShapeDtypeStruct((R * V, c_out), x.dtype),
        grid_spec=pltpu.PrefetchScalarGridSpec(
            num_scalar_prefetch=0,
            grid=(pl.cdiv(R, Lb),),
            in_specs=[
                pl.BlockSpec((Lb, V, C), lambda i: (i, 0, 0)),
                pl.BlockSpec((C, C), lambda i: (0, 0)),
                pl.BlockSpec((1, C), lambda i: (0, 0)),
                pl.BlockSpec((C, C), lambda i: (0, 0)),
                pl.BlockSpec((1, C), lambda i: (0, 0)),
                pl.BlockSpec((gdep + 1, C, c_out), lambda i: (0, 0, 0)),
                pl.BlockSpec((1, c_out), lambda i: (0, 0)),
                pl.BlockSpec((gdep + 1, C, c_out), lambda i: (0, 0, 0)),
                pl.BlockSpec((1, c_out), lambda i: (0, 0)),
            ],
            out_specs=pl.BlockSpec((Lb * V, c_out), lambda i: (i, 0)),
        ),
        compiler_params=pltpu.CompilerParams(
            dimension_semantics=("parallel",),
            vmem_limit_bytes=32 * 1024 * 1024,
        ),
    )(xr, w1t, b1, w2t, b2, wm1t, bm1, wm2t, bm2)

    return jnp.transpose(out_flat.reshape(N, L, V, c_out), (0, 3, 2, 1))   # (N, c_out, V, L)


def _reference(x, w_lin1, b_lin1, w_lin2, b_lin2, w_mlp1, b_mlp1, w_mlp2, b_mlp2,
               gdep, alpha):
    hi = jax.lax.Precision.HIGHEST

    def conv1x1(t, w, b):
        return jnp.einsum('oc,ncvl->novl', w, t, precision=hi) + b[None, :, None, None]

    def nconv(h, A):
        return jnp.einsum('ncvl,nvwl->ncwl', h, A, precision=hi)

    x1 = jnp.tanh(conv1x1(x, w_lin1, b_lin1))
    x2 = jnp.tanh(conv1x1(x, w_lin2, b_lin2))
    # adj = nconv(x1.transpose(2,1), x2) in torch notation.
    adj = jnp.einsum('ncvl,nvwl->ncwl', jnp.transpose(x1, (0, 2, 1, 3)), x2, precision=hi)
    adj0 = jax.nn.softmax(adj, axis=2)
    adj1 = jax.nn.softmax(jnp.transpose(adj, (0, 2, 1, 3)), axis=2)

    def branch(A, wm, bm):
        h = x
        outs = [h]
        for _ in range(gdep):
            h = alpha * x + (1.0 - alpha) * nconv(h, A)
            outs.append(h)
        ho = jnp.concatenate(outs, axis=1)
        return conv1x1(ho, wm, bm)

    return branch(adj0, w_mlp1, b_mlp1) + branch(adj1, w_mlp2, b_mlp2)


if __name__ == "__main__":
    key = jax.random.PRNGKey(0)
    ks = jax.random.split(key, 9)

    N, C, V, L = 2, 16, 16, 16          # batch, channels, nodes, time
    gdep, alpha, c_out = 2, 0.05, 32
    K = (gdep + 1) * C

    x = jax.random.normal(ks[0], (N, C, V, L), dtype=jnp.float32)
    w_lin1 = jax.random.normal(ks[1], (C, C), dtype=jnp.float32) / (C ** 0.5)
    b_lin1 = jax.random.normal(ks[2], (C,), dtype=jnp.float32) * 0.1
    w_lin2 = jax.random.normal(ks[3], (C, C), dtype=jnp.float32) / (C ** 0.5)
    b_lin2 = jax.random.normal(ks[4], (C,), dtype=jnp.float32) * 0.1
    w_mlp1 = jax.random.normal(ks[5], (c_out, K), dtype=jnp.float32) / (K ** 0.5)
    b_mlp1 = jax.random.normal(ks[6], (c_out,), dtype=jnp.float32) * 0.1
    w_mlp2 = jax.random.normal(ks[7], (c_out, K), dtype=jnp.float32) / (K ** 0.5)
    b_mlp2 = jax.random.normal(ks[8], (c_out,), dtype=jnp.float32) * 0.1

    out = dy_mixprop(x, w_lin1, b_lin1, w_lin2, b_lin2,
                     w_mlp1, b_mlp1, w_mlp2, b_mlp2,
                     gdep=gdep, alpha=alpha)
    out = jax.block_until_ready(out)

    ref = _reference(x, w_lin1, b_lin1, w_lin2, b_lin2,
                     w_mlp1, b_mlp1, w_mlp2, b_mlp2, gdep, alpha)
    assert out.shape == (N, c_out, V, L)
    max_err = float(jnp.max(jnp.abs(out - ref)))
    assert jnp.allclose(out, ref, atol=2e-3, rtol=2e-3), max_err

    print("KERNEL_OK")
</pallas_src>

<mosaic_0001>
module attributes {stable_mosaic.version = 11 : i64} {
  func.func @_dy_mixprop_kernel(%arg0: i32, %arg1: memref<32x16x16xf32, #tpu.memory_space<vmem>>, %arg2: memref<16x16xf32, #tpu.memory_space<vmem>>, %arg3: memref<1x16xf32, #tpu.memory_space<vmem>>, %arg4: memref<16x16xf32, #tpu.memory_space<vmem>>, %arg5: memref<1x16xf32, #tpu.memory_space<vmem>>, %arg6: memref<3x16x32xf32, #tpu.memory_space<vmem>>, %arg7: memref<1x32xf32, #tpu.memory_space<vmem>>, %arg8: memref<3x16x32xf32, #tpu.memory_space<vmem>>, %arg9: memref<1x32xf32, #tpu.memory_space<vmem>>, %arg10: memref<512x32xf32, #tpu.memory_space<vmem>>) attributes {dimension_semantics = [#tpu.dimension_semantics<parallel>], iteration_bounds = array<i64: 1>, scalar_prefetch = 0 : i64, scratch_operands = 0 : i64, tpu.core_type = #tpu.core_type<tc>, window_params = [{transform_indices = @transform_0, window_bounds = array<i64: 32, 16, 16>}, {pipeline_mode = #tpu.pipeline_mode<synchronous>, transform_indices = @transform_1, window_bounds = array<i64: 16, 16>}, {pipeline_mode = #tpu.pipeline_mode<synchronous>, transform_indices = @transform_2, window_bounds = array<i64: 1, 16>}, {pipeline_mode = #tpu.pipeline_mode<synchronous>, transform_indices = @transform_3, window_bounds = array<i64: 16, 16>}, {pipeline_mode = #tpu.pipeline_mode<synchronous>, transform_indices = @transform_4, window_bounds = array<i64: 1, 16>}, {pipeline_mode = #tpu.pipeline_mode<synchronous>, transform_indices = @transform_5, window_bounds = array<i64: 3, 16, 32>}, {pipeline_mode = #tpu.pipeline_mode<synchronous>, transform_indices = @transform_6, window_bounds = array<i64: 1, 32>}, {pipeline_mode = #tpu.pipeline_mode<synchronous>, transform_indices = @transform_7, window_bounds = array<i64: 3, 16, 32>}, {pipeline_mode = #tpu.pipeline_mode<synchronous>, transform_indices = @transform_8, window_bounds = array<i64: 1, 32>}, {transform_indices = @transform_9, window_bounds = array<i64: 512, 32>}]} {
    %c0 = arith.constant 0 : index
    %c0_0 = arith.constant 0 : index
    %c0_1 = arith.constant 0 : index
    %0 = vector.load %arg1[%c0, %c0_0, %c0_1] : memref<32x16x16xf32, #tpu.memory_space<vmem>>, vector<32x16x16xf32>
    %1 = vector.shape_cast %0 : vector<32x16x16xf32> to vector<512x16xf32>
    %c0_2 = arith.constant 0 : index
    %c0_3 = arith.constant 0 : index
    %2 = vector.load %arg2[%c0_2, %c0_3] : memref<16x16xf32, #tpu.memory_space<vmem>>, vector<16x16xf32>
    %c0_4 = arith.constant 0 : index
    %c0_5 = arith.constant 0 : index
    %3 = vector.load %arg4[%c0_4, %c0_5] : memref<16x16xf32, #tpu.memory_space<vmem>>, vector<16x16xf32>
    %c0_6 = arith.constant 0 : index
    %c0_7 = arith.constant 0 : index
    %4 = vector.load %arg3[%c0_6, %c0_7] : memref<1x16xf32, #tpu.memory_space<vmem>>, vector<1x16xf32>
    %c0_8 = arith.constant 0 : index
    %c0_9 = arith.constant 0 : index
    %5 = vector.load %arg5[%c0_8, %c0_9] : memref<1x16xf32, #tpu.memory_space<vmem>>, vector<1x16xf32>
    %cst = arith.constant dense<0.000000e+00> : vector<512x16xf32>
    %6 = tpu.matmul %1, %2, %cst {dimension_numbers = #tpu.dot_dimension_numbers<[1], [0], [0], [1], [0, 0, 1, 1], [], []>} : vector<512x16xf32>, vector<16x16xf32>, vector<512x16xf32> -> vector<512x16xf32>
    %7 = vector.broadcast %4 : vector<1x16xf32> to vector<512x16xf32>
    %8 = arith.addf %6, %7 : vector<512x16xf32>
    %9 = math.tanh %8 : vector<512x16xf32>
    %10 = vector.shape_cast %9 : vector<512x16xf32> to vector<32x16x16xf32>
    %cst_10 = arith.constant dense<0.000000e+00> : vector<512x16xf32>
    %11 = tpu.matmul %1, %3, %cst_10 {dimension_numbers = #tpu.dot_dimension_numbers<[1], [0], [0], [1], [0, 0, 1, 1], [], []>} : vector<512x16xf32>, vector<16x16xf32>, vector<512x16xf32> -> vector<512x16xf32>
    %12 = vector.broadcast %5 : vector<1x16xf32> to vector<512x16xf32>
    %13 = arith.addf %11, %12 : vector<512x16xf32>
    %14 = math.tanh %13 : vector<512x16xf32>
    %15 = vector.shape_cast %14 : vector<512x16xf32> to vector<32x16x16xf32>
    "tpu.trace_start"() <{level = 10 : i32, message = "bic,bjc->bij"}> : () -> ()
    %cst_11 = arith.constant dense<0.000000e+00> : vector<32x16x16xf32>
    %16 = tpu.matmul %10, %15, %cst_11 {dimension_numbers = #tpu.dot_dimension_numbers<[2], [2], [1], [1], [0, 0, 0, 1, 1, 1], [0], [0]>} : vector<32x16x16xf32>, vector<32x16x16xf32>, vector<32x16x16xf32> -> vector<32x16x16xf32>
    %cst_12 = arith.constant dense<0.000000e+00> : vector<32x16x16xf32>
    %17 = tpu.matmul %15, %10, %cst_12 {dimension_numbers = #tpu.dot_dimension_numbers<[2], [2], [1], [1], [0, 0, 0, 1, 1, 1], [0], [0]>} : vector<32x16x16xf32>, vector<32x16x16xf32>, vector<32x16x16xf32> -> vector<32x16x16xf32>
    "tpu.trace_stop"() : () -> ()
    %cst_13 = arith.constant dense<0xFF800000> : vector<32x16xf32>
    %18 = vector.multi_reduction <maximumf>, %17, %cst_13 [1] : vector<32x16x16xf32> to vector<32x16xf32>
    %19 = vector.shape_cast %18 : vector<32x16xf32> to vector<32x1x16xf32>
    %20 = vector.broadcast %19 : vector<32x1x16xf32> to vector<32x16x16xf32>
    %21 = arith.subf %17, %20 : vector<32x16x16xf32>
    %22 = math.exp %21 : vector<32x16x16xf32>
    %cst_14 = arith.constant dense<0.000000e+00> : vector<32x16xf32>
    %23 = vector.multi_reduction <add>, %22, %cst_14 [1] : vector<32x16x16xf32> to vector<32x16xf32>
    %24 = vector.shape_cast %23 : vector<32x16xf32> to vector<32x1x16xf32>
    %25 = vector.broadcast %24 : vector<32x1x16xf32> to vector<32x16x16xf32>
    %26 = arith.divf %22, %25 : vector<32x16x16xf32>
    %cst_15 = arith.constant dense<0xFF800000> : vector<32x16xf32>
    %27 = vector.multi_reduction <maximumf>, %16, %cst_15 [1] : vector<32x16x16xf32> to vector<32x16xf32>
    %28 = vector.shape_cast %27 : vector<32x16xf32> to vector<32x1x16xf32>
    %29 = vector.broadcast %28 : vector<32x1x16xf32> to vector<32x16x16xf32>
    %30 = arith.subf %16, %29 : vector<32x16x16xf32>
    %31 = math.exp %30 : vector<32x16x16xf32>
    %cst_16 = arith.constant dense<0.000000e+00> : vector<32x16xf32>
    %32 = vector.multi_reduction <add>, %31, %cst_16 [1] : vector<32x16x16xf32> to vector<32x16xf32>
    %33 = vector.shape_cast %32 : vector<32x16xf32> to vector<32x1x16xf32>
    %34 = vector.broadcast %33 : vector<32x1x16xf32> to vector<32x16x16xf32>
    %35 = arith.divf %31, %34 : vector<32x16x16xf32>
    %cst_17 = arith.constant 5.000000e-02 : f32
    %36 = vector.broadcast %cst_17 : f32 to vector<32x16x16xf32>
    %37 = arith.mulf %36, %0 : vector<32x16x16xf32>
    %c0_18 = arith.constant 0 : index
    %c0_19 = arith.constant 0 : index
    %c0_20 = arith.constant 0 : index
    %38 = vector.load %arg6[%c0_18, %c0_19, %c0_20] : memref<3x16x32xf32, #tpu.memory_space<vmem>>, vector<1x16x32xf32>
    %39 = vector.shape_cast %38 : vector<1x16x32xf32> to vector<16x32xf32>
    %c0_21 = arith.constant 0 : index
    %c0_22 = arith.constant 0 : index
    %c0_23 = arith.constant 0 : index
    %40 = vector.load %arg8[%c0_21, %c0_22, %c0_23] : memref<3x16x32xf32, #tpu.memory_space<vmem>>, vector<1x16x32xf32>
    %41 = vector.shape_cast %40 : vector<1x16x32xf32> to vector<16x32xf32>
    %42 = arith.addf %39, %41 : vector<16x32xf32>
    %cst_24 = arith.constant dense<0.000000e+00> : vector<512x32xf32>
    %43 = tpu.matmul %1, %42, %cst_24 {dimension_numbers = #tpu.dot_dimension_numbers<[1], [0], [0], [1], [0, 0, 1, 1], [], []>} : vector<512x16xf32>, vector<16x32xf32>, vector<512x32xf32> -> vector<512x32xf32>
    "tpu.trace_start"() <{level = 10 : i32, message = "bwv,bvc->bwc"}> : () -> ()
    %cst_25 = arith.constant dense<0.000000e+00> : vector<32x16x16xf32>
    %44 = tpu.matmul %26, %0, %cst_25 {dimension_numbers = #tpu.dot_dimension_numbers<[2], [1], [1], [2], [0, 0, 0, 1, 1, 2], [0], [0]>} : vector<32x16x16xf32>, vector<32x16x16xf32>, vector<32x16x16xf32> -> vector<32x16x16xf32>
    "tpu.trace_stop"() : () -> ()
    %cst_26 = arith.constant 0.949999988 : f32
    %45 = vector.broadcast %cst_26 : f32 to vector<32x16x16xf32>
    %46 = arith.mulf %45, %44 : vector<32x16x16xf32>
    %47 = arith.addf %37, %46 : vector<32x16x16xf32>
    %48 = vector.shape_cast %47 : vector<32x16x16xf32> to vector<512x16xf32>
    %c1 = arith.constant 1 : index
    %c0_27 = arith.constant 0 : index
    %c0_28 = arith.constant 0 : index
    %49 = vector.load %arg6[%c1, %c0_27, %c0_28] : memref<3x16x32xf32, #tpu.memory_space<vmem>>, vector<1x16x32xf32>
    %50 = vector.shape_cast %49 : vector<1x16x32xf32> to vector<16x32xf32>
    %cst_29 = arith.constant dense<0.000000e+00> : vector<512x32xf32>
    %51 = tpu.matmul %48, %50, %cst_29 {dimension_numbers = #tpu.dot_dimension_numbers<[1], [0], [0], [1], [0, 0, 1, 1], [], []>} : vector<512x16xf32>, vector<16x32xf32>, vector<512x32xf32> -> vector<512x32xf32>
    %52 = arith.addf %43, %51 : vector<512x32xf32>
    "tpu.trace_start"() <{level = 10 : i32, message = "bwv,bvc->bwc"}> : () -> ()
    %cst_30 = arith.constant dense<0.000000e+00> : vector<32x16x16xf32>
    %53 = tpu.matmul %26, %47, %cst_30 {dimension_numbers = #tpu.dot_dimension_numbers<[2], [1], [1], [2], [0, 0, 0, 1, 1, 2], [0], [0]>} : vector<32x16x16xf32>, vector<32x16x16xf32>, vector<32x16x16xf32> -> vector<32x16x16xf32>
    "tpu.trace_stop"() : () -> ()
    %cst_31 = arith.constant 0.949999988 : f32
    %54 = vector.broadcast %cst_31 : f32 to vector<32x16x16xf32>
    %55 = arith.mulf %54, %53 : vector<32x16x16xf32>
    %56 = arith.addf %37, %55 : vector<32x16x16xf32>
    %57 = vector.shape_cast %56 : vector<32x16x16xf32> to vector<512x16xf32>
    %c2 = arith.constant 2 : index
    %c0_32 = arith.constant 0 : index
    %c0_33 = arith.constant 0 : index
    %58 = vector.load %arg6[%c2, %c0_32, %c0_33] : memref<3x16x32xf32, #tpu.memory_space<vmem>>, vector<1x16x32xf32>
    %59 = vector.shape_cast %58 : vector<1x16x32xf32> to vector<16x32xf32>
    %cst_34 = arith.constant dense<0.000000e+00> : vector<512x32xf32>
    %60 = tpu.matmul %57, %59, %cst_34 {dimension_numbers = #tpu.dot_dimension_numbers<[1], [0], [0], [1], [0, 0, 1, 1], [], []>} : vector<512x16xf32>, vector<16x32xf32>, vector<512x32xf32> -> vector<512x32xf32>
    %61 = arith.addf %52, %60 : vector<512x32xf32>
    "tpu.trace_start"() <{level = 10 : i32, message = "bwv,bvc->bwc"}> : () -> ()
    %cst_35 = arith.constant dense<0.000000e+00> : vector<32x16x16xf32>
    %62 = tpu.matmul %35, %0, %cst_35 {dimension_numbers = #tpu.dot_dimension_numbers<[2], [1], [1], [2], [0, 0, 0, 1, 1, 2], [0], [0]>} : vector<32x16x16xf32>, vector<32x16x16xf32>, vector<32x16x16xf32> -> vector<32x16x16xf32>
    "tpu.trace_stop"() : () -> ()
    %cst_36 = arith.constant 0.949999988 : f32
    %63 = vector.broadcast %cst_36 : f32 to vector<32x16x16xf32>
    %64 = arith.mulf %63, %62 : vector<32x16x16xf32>
    %65 = arith.addf %37, %64 : vector<32x16x16xf32>
    %66 = vector.shape_cast %65 : vector<32x16x16xf32> to vector<512x16xf32>
    %c1_37 = arith.constant 1 : index
    %c0_38 = arith.constant 0 : index
    %c0_39 = arith.constant 0 : index
    %67 = vector.load %arg8[%c1_37, %c0_38, %c0_39] : memref<3x16x32xf32, #tpu.memory_space<vmem>>, vector<1x16x32xf32>
    %68 = vector.shape_cast %67 : vector<1x16x32xf32> to vector<16x32xf32>
    %cst_40 = arith.constant dense<0.000000e+00> : vector<512x32xf32>
    %69 = tpu.matmul %66, %68, %cst_40 {dimension_numbers = #tpu.dot_dimension_numbers<[1], [0], [0], [1], [0, 0, 1, 1], [], []>} : vector<512x16xf32>, vector<16x32xf32>, vector<512x32xf32> -> vector<512x32xf32>
    %70 = arith.addf %61, %69 : vector<512x32xf32>
    "tpu.trace_start"() <{level = 10 : i32, message = "bwv,bvc->bwc"}> : () -> ()
    %cst_41 = arith.constant dense<0.000000e+00> : vector<32x16x16xf32>
    %71 = tpu.matmul %35, %65, %cst_41 {dimension_numbers = #tpu.dot_dimension_numbers<[2], [1], [1], [2], [0, 0, 0, 1, 1, 2], [0], [0]>} : vector<32x16x16xf32>, vector<32x16x16xf32>, vector<32x16x16xf32> -> vector<32x16x16xf32>
    "tpu.trace_stop"() : () -> ()
    %cst_42 = arith.constant 0.949999988 : f32
    %72 = vector.broadcast %cst_42 : f32 to vector<32x16x16xf32>
    %73 = arith.mulf %72, %71 : vector<32x16x16xf32>
    %74 = arith.addf %37, %73 : vector<32x16x16xf32>
    %75 = vector.shape_cast %74 : vector<32x16x16xf32> to vector<512x16xf32>
    %c2_43 = arith.constant 2 : index
    %c0_44 = arith.constant 0 : index
    %c0_45 = arith.constant 0 : index
    %76 = vector.load %arg8[%c2_43, %c0_44, %c0_45] : memref<3x16x32xf32, #tpu.memory_space<vmem>>, vector<1x16x32xf32>
    %77 = vector.shape_cast %76 : vector<1x16x32xf32> to vector<16x32xf32>
    %cst_46 = arith.constant dense<0.000000e+00> : vector<512x32xf32>
    %78 = tpu.matmul %75, %77, %cst_46 {dimension_numbers = #tpu.dot_dimension_numbers<[1], [0], [0], [1], [0, 0, 1, 1], [], []>} : vector<512x16xf32>, vector<16x32xf32>, vector<512x32xf32> -> vector<512x32xf32>
    %79 = arith.addf %70, %78 : vector<512x32xf32>
    %c0_47 = arith.constant 0 : index
    %c0_48 = arith.constant 0 : index
    %80 = vector.load %arg7[%c0_47, %c0_48] : memref<1x32xf32, #tpu.memory_space<vmem>>, vector<1x32xf32>
    %c0_49 = arith.constant 0 : index
    %c0_50 = arith.constant 0 : index
    %81 = vector.load %arg9[%c0_49, %c0_50] : memref<1x32xf32, #tpu.memory_space<vmem>>, vector<1x32xf32>
    %82 = arith.addf %80, %81 : vector<1x32xf32>
    %83 = vector.broadcast %82 : vector<1x32xf32> to vector<512x32xf32>
    %84 = arith.addf %79, %83 : vector<512x32xf32>
    %c0_51 = arith.constant 0 : index
    %c0_52 = arith.constant 0 : index
    %85 = vector.load %arg10[%c0_51, %c0_52] : memref<512x32xf32, #tpu.memory_space<vmem>>, vector<512x32xf32>
    tpu.vector_store %arg10[%c0_51, %c0_52], %84 {strides = array<i32>} : memref<512x32xf32, #tpu.memory_space<vmem>>, vector<512x32xf32>,
    return
  }
  func.func @transform_0(%arg0: i32) -> (i32, i32, i32) {
    %c0_i32 = arith.constant 0 : i32
    %c0_i32_0 = arith.constant 0 : i32
    %c0_i32_1 = arith.constant 0 : i32
    return %arg0, %c0_i32, %c0_i32_0 : i32, i32, i32
  }
  func.func @transform_1(%arg0: i32) -> (i32, i32) {
    %c0_i32 = arith.constant 0 : i32
    %c0_i32_0 = arith.constant 0 : i32
    %c0_i32_1 = arith.constant 0 : i32
    return %c0_i32, %c0_i32_0 : i32, i32
  }
  func.func @transform_2(%arg0: i32) -> (i32, i32) {
    %c0_i32 = arith.constant 0 : i32
    %c0_i32_0 = arith.constant 0 : i32
    %c0_i32_1 = arith.constant 0 : i32
    return %c0_i32, %c0_i32_0 : i32, i32
  }
  func.func @transform_3(%arg0: i32) -> (i32, i32) {
    %c0_i32 = arith.constant 0 : i32
    %c0_i32_0 = arith.constant 0 : i32
    %c0_i32_1 = arith.constant 0 : i32
    return %c0_i32, %c0_i32_0 : i32, i32
  }
  func.func @transform_4(%arg0: i32) -> (i32, i32) {
    %c0_i32 = arith.constant 0 : i32
    %c0_i32_0 = arith.constant 0 : i32
    %c0_i32_1 = arith.constant 0 : i32
    return %c0_i32, %c0_i32_0 : i32, i32
  }
  func.func @transform_5(%arg0: i32) -> (i32, i32, i32) {
    %c0_i32 = arith.constant 0 : i32
    %c0_i32_0 = arith.constant 0 : i32
    %c0_i32_1 = arith.constant 0 : i32
    %c0_i32_2 = arith.constant 0 : i32
    return %c0_i32, %c0_i32_0, %c0_i32_1 : i32, i32, i32
  }
  func.func @transform_6(%arg0: i32) -> (i32, i32) {
    %c0_i32 = arith.constant 0 : i32
    %c0_i32_0 = arith.constant 0 : i32
    %c0_i32_1 = arith.constant 0 : i32
    return %c0_i32, %c0_i32_0 : i32, i32
  }
  func.func @transform_7(%arg0: i32) -> (i32, i32, i32) {
    %c0_i32 = arith.constant 0 : i32
    %c0_i32_0 = arith.constant 0 : i32
    %c0_i32_1 = arith.constant 0 : i32
    %c0_i32_2 = arith.constant 0 : i32
    return %c0_i32, %c0_i32_0, %c0_i32_1 : i32, i32, i32
  }
  func.func @transform_8(%arg0: i32) -> (i32, i32) {
    %c0_i32 = arith.constant 0 : i32
    %c0_i32_0 = arith.constant 0 : i32
    %c0_i32_1 = arith.constant 0 : i32
    return %c0_i32, %c0_i32_0 : i32, i32
  }
  func.func @transform_9(%arg0: i32) -> (i32, i32) {
    %c0_i32 = arith.constant 0 : i32
    %c0_i32_0 = arith.constant 0 : i32
    return %arg0, %c0_i32 : i32, i32
  }
}

</mosaic_0001>

<bundles_post_ra>
// kernel: tpu_custom_call.1
= control target key start
LH: loop header
LB: loop body
LE: loop exit
PB: predicated region body
PF: predicated region fallthrough
CT: control target
= control target key end

     0   :  { %vm108_vm0 = vcmask 130048   ;;  %vm21653_vm2 = vcmask 261120   ;;  %s33932_s3 = inlined_call_operand.vmem [shape: f32[16,16], index: 3, kind: input, shape index: {}]   ;;  %s33933_s0 = inlined_call_operand.vmem [shape: f32[32,16,16], index: 0, kind: input, shape index: {}]   ;;  %s33934_s1 = inlined_call_operand.vmem [shape: f32[16,16], index: 1, kind: input, shape index: {}]   ;;  %s33935_s4 = inlined_call_operand.vmem [shape: f32[1,16], index: 4, kind: input, shape index: {}]   ;;  %s33936_s2 = inlined_call_operand.vmem [shape: f32[1,16], index: 2, kind: input, shape index: {}]   ;;  %s33937_s5 = inlined_call_operand.vmem [shape: f32[3,16,32], index: 5, kind: input, shape index: {}]   ;;  %s33938_s7 = inlined_call_operand.vmem [shape: f32[3,16,32], index: 7, kind: input, shape index: {}]   ;;  %s33939_s6 = inlined_call_operand.vmem [shape: f32[1,32], index: 6, kind: input, shape index: {}]   ;;  %s33940_s8 = inlined_call_operand.vmem [shape: f32[1,32], index: 8, kind: input, shape index: {}]   ;;  %s33941_s9 = inlined_call_operand.vmem [shape: f32[512,32], index: 9, kind: output, shape index: {}]  }
   0x1   :  { %v98_v0 = vld [vmem:[%s33932_s3] sm:$0xff]  ;;  %v99_v1 = vld [vmem:[%s33932_s3 + $0x8] sm:$0xff]  ;;  %v34_v8 = vld [vmem:[%s33933_s0 + $0x10] sm:$0xff] }
   0x2   :  { %v32_v2 = vld [vmem:[%s33933_s0] sm:$0xff]  ;;  %v25970_v3 = vpack.c.bf16 %v99_v1, %v98_v0  ;;  %v97_v5 = vld [vmem:[%s33934_s1 + $0x8] sm:$0xff]  ;;  %v35_v9 = vld [vmem:[%s33933_s0 + $0x18] sm:$0xff] }
   0x3   :  { %24026 = vmatprep.mubr.msk.f32.mxu1 %vm108_vm0, %v32_v2  ;;  %23926 = vmatprep.mubr.msk.f32.mxu0 %vm108_vm0, %v32_v2  ;;  %v96_v4 = vld [vmem:[%s33934_s1] sm:$0xff]  ;;  %v33_v7 = vld [vmem:[%s33933_s0 + $0x8] sm:$0xff]  ;;  %v38_v12 = vld [vmem:[%s33933_s0 + $0x30] sm:$0xff] }
   0x4   :  { %25971 = vmatprep.subr.bf16.mxu1 %v25970_v3  ;;  %v25966_v6 = vpack.c.bf16 %v97_v5, %v96_v4  ;;  %v36_v10 = vld [vmem:[%s33933_s0 + $0x20] sm:$0xff]  ;;  %v37_v11 = vld [vmem:[%s33933_s0 + $0x28] sm:$0xff]  ;;  %v39_v13 = vld [vmem:[%s33933_s0 + $0x38] sm:$0xff] }
   0x5   :  { %25973 = vmatpush3.bf16.msra.mxu1 %v25970_v3  ;;  %v40_v14 = vld [vmem:[%s33933_s0 + $0x40] sm:$0xff]  ;;  %v41_v15 = vld [vmem:[%s33933_s0 + $0x48] sm:$0xff]  ;;  %v42_v16 = vld [vmem:[%s33933_s0 + $0x50] sm:$0xff] }
   0x6   :  { %25967 = vmatprep.subr.bf16.mxu0 %v25966_v6  ;;  %v43_v17 = vld [vmem:[%s33933_s0 + $0x58] sm:$0xff]  ;;  %v44_v18 = vld [vmem:[%s33933_s0 + $0x60] sm:$0xff]  ;;  %v45_v19 = vld [vmem:[%s33933_s0 + $0x68] sm:$0xff] }
   0x7   :  { %25969 = vmatpush3.bf16.msra.mxu0 %v25966_v6  ;;  %v46_v20 = vld [vmem:[%s33933_s0 + $0x70] sm:$0xff]  ;;  %v47_v21 = vld [vmem:[%s33933_s0 + $0x78] sm:$0xff]  ;;  %v48_v22 = vld [vmem:[%s33933_s0 + $0x80] sm:$0xff] }
   0x8   :  { %24027 = vmatmul.mubr.msk.f32.vlgmr.msra.gmra.mrb[0].mxu1 %vm108_vm0, %v33_v7  ;;  %v49_v23 = vld [vmem:[%s33933_s0 + $0x88] sm:$0xff]  ;;  %v50_v24 = vld [vmem:[%s33933_s0 + $0x90] sm:$0xff]  ;;  %v51_v25 = vld [vmem:[%s33933_s0 + $0x98] sm:$0xff] }
   0x9   :  { %24029 = vmatprep.mubr.msk.f32.mxu1 %vm108_vm0, %v34_v8  ;;  %v52_v26 = vld [vmem:[%s33933_s0 + $0xa0] sm:$0xff]  ;;  %v53_v27 = vld [vmem:[%s33933_s0 + $0xa8] sm:$0xff]  ;;  %v54_v28 = vld [vmem:[%s33933_s0 + $0xb0] sm:$0xff] }
   0xa   :  { %23927 = vmatmul.mubr.msk.f32.vlgmr.msra.gmra.mrb[0].mxu0 %vm108_vm0, %v33_v7  ;;  %v55_v29 = vld [vmem:[%s33933_s0 + $0xb8] sm:$0xff]  ;;  %v56_v30 = vld [vmem:[%s33933_s0 + $0xc0] sm:$0xff]  ;;  %v57_v31 = vld [vmem:[%s33933_s0 + $0xc8] sm:$0xff] }
   0xb   :  { %23929 = vmatprep.mubr.msk.f32.mxu0 %vm108_vm0, %v34_v8  ;;  %v58_v32 = vld [vmem:[%s33933_s0 + $0xd0] sm:$0xff]  ;;  %v59_v33 = vld [vmem:[%s33933_s0 + $0xd8] sm:$0xff]  ;;  %v60_v34 = vld [vmem:[%s33933_s0 + $0xe0] sm:$0xff] }
   0xc   :  { %24030 = vmatmul.mubr.msk.f32.gmra.mrb[2].mxu1 %vm108_vm0, %v35_v9  ;;  %v61_v35 = vld [vmem:[%s33933_s0 + $0xe8] sm:$0xff]  ;;  %v62_v36 = vld [vmem:[%s33933_s0 + $0xf0] sm:$0xff]  ;;  %v63_v37 = vld [vmem:[%s33933_s0 + $0xf8] sm:$0xff] }
   0xd   :  { %24032 = vmatprep.mubr.msk.f32.mxu1 %vm108_vm0, %v36_v10  ;;  %v64_v38 = vld [vmem:[%s33933_s0 + $0x100] sm:$0xff]  ;;  %v65_v39 = vld [vmem:[%s33933_s0 + $0x108] sm:$0xff]  ;;  %v66_v40 = vld [vmem:[%s33933_s0 + $0x110] sm:$0xff] }
   0xe   :  { %23930 = vmatmul.mubr.msk.f32.gmra.mrb[2].mxu0 %vm108_vm0, %v35_v9  ;;  %v67_v41 = vld [vmem:[%s33933_s0 + $0x118] sm:$0xff]  ;;  %v68_v42 = vld [vmem:[%s33933_s0 + $0x120] sm:$0xff]  ;;  %v69_v43 = vld [vmem:[%s33933_s0 + $0x128] sm:$0xff] }
   0xf   :  { %23932 = vmatprep.mubr.msk.f32.mxu0 %vm108_vm0, %v36_v10  ;;  %v70_v44 = vld [vmem:[%s33933_s0 + $0x130] sm:$0xff]  ;;  %v71_v45 = vld [vmem:[%s33933_s0 + $0x138] sm:$0xff]  ;;  %v72_v46 = vld [vmem:[%s33933_s0 + $0x140] sm:$0xff] }
  0x10   :  { %24033 = vmatmul.mubr.msk.f32.gmra.mrb[4].mxu1 %vm108_vm0, %v37_v11  ;;  %v73_v47 = vld [vmem:[%s33933_s0 + $0x148] sm:$0xff]  ;;  %v74_v48 = vld [vmem:[%s33933_s0 + $0x150] sm:$0xff]  ;;  %v75_v49 = vld [vmem:[%s33933_s0 + $0x158] sm:$0xff] }
  0x11   :  { %24035 = vmatprep.mubr.msk.f32.mxu1 %vm108_vm0, %v38_v12  ;;  %v76_v50 = vld [vmem:[%s33933_s0 + $0x160] sm:$0xff]  ;;  %v77_v51 = vld [vmem:[%s33933_s0 + $0x168] sm:$0xff]  ;;  %v78_v52 = vld [vmem:[%s33933_s0 + $0x170] sm:$0xff] }
  0x12   :  { %23933 = vmatmul.mubr.msk.f32.gmra.mrb[4].mxu0 %vm108_vm0, %v37_v11  ;;  %v79_v53 = vld [vmem:[%s33933_s0 + $0x178] sm:$0xff]  ;;  %v80_v54 = vld [vmem:[%s33933_s0 + $0x180] sm:$0xff]  ;;  %v81_v55 = vld [vmem:[%s33933_s0 + $0x188] sm:$0xff] }
  0x13   :  { %23935 = vmatprep.mubr.msk.f32.mxu0 %vm108_vm0, %v38_v12  ;;  %v82_v56 = vld [vmem:[%s33933_s0 + $0x190] sm:$0xff]  ;;  %v83_v57 = vld [vmem:[%s33933_s0 + $0x198] sm:$0xff]  ;;  %v84_v58 = vld [vmem:[%s33933_s0 + $0x1a0] sm:$0xff] }
  0x14   :  { %24036 = vmatmul.mubr.msk.f32.gmra.mrb[6].mxu1 %vm108_vm0, %v39_v13  ;;  %v85_v59 = vld [vmem:[%s33933_s0 + $0x1a8] sm:$0xff]  ;;  %v86_v60 = vld [vmem:[%s33933_s0 + $0x1b0] sm:$0xff]  ;;  %v87_v61 = vld [vmem:[%s33933_s0 + $0x1b8] sm:$0xff] }
  0x15   :  { %24038 = vmatprep.mubr.msk.f32.mxu1 %vm108_vm0, %v40_v14  ;;  %v88_v62 = vld [vmem:[%s33933_s0 + $0x1c0] sm:$0xff]  ;;  %v89_v63 = vld [vmem:[%s33933_s0 + $0x1c8] sm:$0xff]  ;;  %v90_v0 = vld [vmem:[%s33933_s0 + $0x1d0] sm:$0xff] }
  0x16   :  { %23936 = vmatmul.mubr.msk.f32.gmra.mrb[6].mxu0 %vm108_vm0, %v39_v13  ;;  %v91_v1 = vld [vmem:[%s33933_s0 + $0x1d8] sm:$0xff]  ;;  %v92_v2 = vld [vmem:[%s33933_s0 + $0x1e0] sm:$0xff]  ;;  %v93_v3 = vld [vmem:[%s33933_s0 + $0x1e8] sm:$0xff] }
  0x17   :  { %23938 = vmatprep.mubr.msk.f32.mxu0 %vm108_vm0, %v40_v14  ;;  %v94_v4 = vld [vmem:[%s33933_s0 + $0x1f0] sm:$0xff]  ;;  %v95_v5 = vld [vmem:[%s33933_s0 + $0x1f8] sm:$0xff]  ;;  %v28301_v6 = vld [vmem:[%s33935_s4] ss:$0 sm:$0xff] }
  0x18   :  { %24039 = vmatmul.mubr.msk.f32.gmra.mrb[8].mxu1 %vm108_vm0, %v41_v15  ;;  %v28306_v8 = vld [vmem:[%s33936_s2] ss:$0 sm:$0xff]  ;;  %vm28328_vm1 = vmpackc.low %vm108_vm0, %vm108_vm0 }
  0x19   :  { %24041 = vmatprep.mubr.msk.f32.mxu1 %vm108_vm0, %v42_v16 }
  0x1a   :  { %23939 = vmatmul.mubr.msk.f32.gmra.mrb[8].mxu0 %vm108_vm0, %v41_v15 }
  0x1b   :  { %23941 = vmatprep.mubr.msk.f32.mxu0 %vm108_vm0, %v42_v16 }
  0x1c   :  { %24042 = vmatmul.mubr.msk.f32.gmra.mrb[10].mxu1 %vm108_vm0, %v43_v17 }
  0x1d   :  { %24044 = vmatprep.mubr.msk.f32.mxu1 %vm108_vm0, %v44_v18 }
  0x1e   :  { %23942 = vmatmul.mubr.msk.f32.gmra.mrb[10].mxu0 %vm108_vm0, %v43_v17 }
  0x1f   :  { %23944 = vmatprep.mubr.msk.f32.mxu0 %vm108_vm0, %v44_v18 }
  0x20   :  { %24045 = vmatmul.mubr.msk.f32.gmra.mrb[12].mxu1 %vm108_vm0, %v45_v19 }
  0x21   :  { %24047 = vmatprep.mubr.msk.f32.mxu1 %vm108_vm0, %v46_v20 }
  0x22   :  { %23945 = vmatmul.mubr.msk.f32.gmra.mrb[12].mxu0 %vm108_vm0, %v45_v19 }
  0x23   :  { %23947 = vmatprep.mubr.msk.f32.mxu0 %vm108_vm0, %v46_v20 }
  0x24   :  { %24048 = vmatmul.mubr.msk.f32.gmra.mrb[14].mxu1 %vm108_vm0, %v47_v21 }
  0x25   :  { %24050 = vmatprep.mubr.msk.f32.mxu1 %vm108_vm0, %v48_v22 }
  0x26   :  { %23948 = vmatmul.mubr.msk.f32.gmra.mrb[14].mxu0 %vm108_vm0, %v47_v21 }
  0x27   :  { %23950 = vmatprep.mubr.msk.f32.mxu0 %vm108_vm0, %v48_v22 }
  0x28   :  { %24051 = vmatmul.mubr.msk.f32.gmra.mrb[16].mxu1 %vm108_vm0, %v49_v23 }
  0x29   :  { %24053 = vmatprep.mubr.msk.f32.mxu1 %vm108_vm0, %v50_v24 }
  0x2a   :  { %23951 = vmatmul.mubr.msk.f32.gmra.mrb[16].mxu0 %vm108_vm0, %v49_v23 }
  0x2b   :  { %23953 = vmatprep.mubr.msk.f32.mxu0 %vm108_vm0, %v50_v24 }
  0x2c   :  { %24054 = vmatmul.mubr.msk.f32.gmra.mrb[18].mxu1 %vm108_vm0, %v51_v25 }
  0x2d   :  { %24056 = vmatprep.mubr.msk.f32.mxu1 %vm108_vm0, %v52_v26 }
  0x2e   :  { %23954 = vmatmul.mubr.msk.f32.gmra.mrb[18].mxu0 %vm108_vm0, %v51_v25 }
  0x2f   :  { %23956 = vmatprep.mubr.msk.f32.mxu0 %vm108_vm0, %v52_v26 }
  0x30   :  { %24057 = vmatmul.mubr.msk.f32.gmra.mrb[20].mxu1 %vm108_vm0, %v53_v27 }
  0x31   :  { %24059 = vmatprep.mubr.msk.f32.mxu1 %vm108_vm0, %v54_v28 }
  0x32   :  { %23957 = vmatmul.mubr.msk.f32.gmra.mrb[20].mxu0 %vm108_vm0, %v53_v27 }
  0x33   :  { %23959 = vmatprep.mubr.msk.f32.mxu0 %vm108_vm0, %v54_v28 }
  0x34   :  { %24060 = vmatmul.mubr.msk.f32.gmra.mrb[22].mxu1 %vm108_vm0, %v55_v29 }
  0x35   :  { %24062 = vmatprep.mubr.msk.f32.mxu1 %vm108_vm0, %v56_v30 }
  0x36   :  { %23960 = vmatmul.mubr.msk.f32.gmra.mrb[22].mxu0 %vm108_vm0, %v55_v29 }
  0x37   :  { %23962 = vmatprep.mubr.msk.f32.mxu0 %vm108_vm0, %v56_v30 }
  0x38   :  { %24063 = vmatmul.mubr.msk.f32.gmra.mrb[24].mxu1 %vm108_vm0, %v57_v31 }
  0x39   :  { %24065 = vmatprep.mubr.msk.f32.mxu1 %vm108_vm0, %v58_v32 }
  0x3a   :  { %23963 = vmatmul.mubr.msk.f32.gmra.mrb[24].mxu0 %vm108_vm0, %v57_v31 }
  0x3b   :  { %23965 = vmatprep.mubr.msk.f32.mxu0 %vm108_vm0, %v58_v32 }
  0x3c   :  { %24066 = vmatmul.mubr.msk.f32.gmra.mrb[26].mxu1 %vm108_vm0, %v59_v33 }
  0x3d   :  { %24068 = vmatprep.mubr.msk.f32.mxu1 %vm108_vm0, %v60_v34 }
  0x3e   :  { %23966 = vmatmul.mubr.msk.f32.gmra.mrb[26].mxu0 %vm108_vm0, %v59_v33 }
  0x3f   :  { %23968 = vmatprep.mubr.msk.f32.mxu0 %vm108_vm0, %v60_v34 }
  0x40   :  { %24069 = vmatmul.mubr.msk.f32.gmra.mrb[28].mxu1 %vm108_vm0, %v61_v35 }
  0x41   :  { %24071 = vmatprep.mubr.msk.f32.mxu1 %vm108_vm0, %v62_v36 }
  0x42   :  { %23969 = vmatmul.mubr.msk.f32.gmra.mrb[28].mxu0 %vm108_vm0, %v61_v35 }
  0x43   :  { %23971 = vmatprep.mubr.msk.f32.mxu0 %vm108_vm0, %v62_v36 }
  0x44   :  { %24072 = vmatmul.mubr.msk.f32.gmra.mrb[30].mxu1 %vm108_vm0, %v63_v37 }
  0x45   :  { %24074 = vmatprep.mubr.msk.f32.mxu1 %vm108_vm0, %v64_v38 }
  0x46   :  { %23972 = vmatmul.mubr.msk.f32.gmra.mrb[30].mxu0 %vm108_vm0, %v63_v37 }
  0x47   :  { %23974 = vmatprep.mubr.msk.f32.mxu0 %vm108_vm0, %v64_v38 }
  0x48   :  { %24075 = vmatmul.mubr.msk.f32.gmra.mrb[32].mxu1 %vm108_vm0, %v65_v39 }
  0x49   :  { %24077 = vmatprep.mubr.msk.f32.mxu1 %vm108_vm0, %v66_v40 }
  0x4a   :  { %23975 = vmatmul.mubr.msk.f32.gmra.mrb[32].mxu0 %vm108_vm0, %v65_v39 }
  0x4b   :  { %23977 = vmatprep.mubr.msk.f32.mxu0 %vm108_vm0, %v66_v40 }
  0x4c   :  { %24078 = vmatmul.mubr.msk.f32.gmra.mrb[34].mxu1 %vm108_vm0, %v67_v41 }
  0x4d   :  { %24080 = vmatprep.mubr.msk.f32.mxu1 %vm108_vm0, %v68_v42 }
  0x4e   :  { %23978 = vmatmul.mubr.msk.f32.gmra.mrb[34].mxu0 %vm108_vm0, %v67_v41 }
  0x4f   :  { %23980 = vmatprep.mubr.msk.f32.mxu0 %vm108_vm0, %v68_v42 }
  0x50   :  { %24081 = vmatmul.mubr.msk.f32.gmra.mrb[36].mxu1 %vm108_vm0, %v69_v43 }
  0x51   :  { %24083 = vmatprep.mubr.msk.f32.mxu1 %vm108_vm0, %v70_v44 }
  0x52   :  { %23981 = vmatmul.mubr.msk.f32.gmra.mrb[36].mxu0 %vm108_vm0, %v69_v43 }
  0x53   :  { %23983 = vmatprep.mubr.msk.f32.mxu0 %vm108_vm0, %v70_v44 }
  0x54   :  { %24084 = vmatmul.mubr.msk.f32.gmra.mrb[38].mxu1 %vm108_vm0, %v71_v45 }
  0x55   :  { %24086 = vmatprep.mubr.msk.f32.mxu1 %vm108_vm0, %v72_v46 }
  0x56   :  { %23984 = vmatmul.mubr.msk.f32.gmra.mrb[38].mxu0 %vm108_vm0, %v71_v45 }
  0x57   :  { %23986 = vmatprep.mubr.msk.f32.mxu0 %vm108_vm0, %v72_v46 }
  0x58   :  { %24087 = vmatmul.mubr.msk.f32.gmra.mrb[40].mxu1 %vm108_vm0, %v73_v47 }
  0x59   :  { %24089 = vmatprep.mubr.msk.f32.mxu1 %vm108_vm0, %v74_v48 }
  0x5a   :  { %23987 = vmatmul.mubr.msk.f32.gmra.mrb[40].mxu0 %vm108_vm0, %v73_v47 }
  0x5b   :  { %23989 = vmatprep.mubr.msk.f32.mxu0 %vm108_vm0, %v74_v48 }
  0x5c   :  { %24090 = vmatmul.mubr.msk.f32.gmra.mrb[42].mxu1 %vm108_vm0, %v75_v49 }
  0x5d   :  { %24092 = vmatprep.mubr.msk.f32.mxu1 %vm108_vm0, %v76_v50 }
  0x5e   :  { %23990 = vmatmul.mubr.msk.f32.gmra.mrb[42].mxu0 %vm108_vm0, %v75_v49 }
  0x5f   :  { %23992 = vmatprep.mubr.msk.f32.mxu0 %vm108_vm0, %v76_v50 }
  0x60   :  { %24093 = vmatmul.mubr.msk.f32.gmra.mrb[44].mxu1 %vm108_vm0, %v77_v51 }
  0x61   :  { %24095 = vmatprep.mubr.msk.f32.mxu1 %vm108_vm0, %v78_v52 }
  0x62   :  { %23993 = vmatmul.mubr.msk.f32.gmra.mrb[44].mxu0 %vm108_vm0, %v77_v51 }
  0x63   :  { %23995 = vmatprep.mubr.msk.f32.mxu0 %vm108_vm0, %v78_v52 }
  0x64   :  { %24096 = vmatmul.mubr.msk.f32.gmra.mrb[46].mxu1 %vm108_vm0, %v79_v53 }
  0x65   :  { %24098 = vmatprep.mubr.msk.f32.mxu1 %vm108_vm0, %v80_v54 }
  0x66   :  { %23996 = vmatmul.mubr.msk.f32.gmra.mrb[46].mxu0 %vm108_vm0, %v79_v53 }
  0x67   :  { %23998 = vmatprep.mubr.msk.f32.mxu0 %vm108_vm0, %v80_v54 }
  0x68   :  { %24099 = vmatmul.mubr.msk.f32.gmra.mrb[48].mxu1 %vm108_vm0, %v81_v55 }
  0x69   :  { %24101 = vmatprep.mubr.msk.f32.mxu1 %vm108_vm0, %v82_v56 }
  0x6a   :  { %23999 = vmatmul.mubr.msk.f32.gmra.mrb[48].mxu0 %vm108_vm0, %v81_v55 }
  0x6b   :  { %24001 = vmatprep.mubr.msk.f32.mxu0 %vm108_vm0, %v82_v56 }
  0x6c   :  { %24102 = vmatmul.mubr.msk.f32.gmra.mrb[50].mxu1 %vm108_vm0, %v83_v57 }
  0x6d   :  { %24104 = vmatprep.mubr.msk.f32.mxu1 %vm108_vm0, %v84_v58 }
  0x6e   :  { %24002 = vmatmul.mubr.msk.f32.gmra.mrb[50].mxu0 %vm108_vm0, %v83_v57 }
  0x6f   :  { %24004 = vmatprep.mubr.msk.f32.mxu0 %vm108_vm0, %v84_v58 }
  0x70   :  { %24105 = vmatmul.mubr.msk.f32.gmra.mrb[52].mxu1 %vm108_vm0, %v85_v59 }
  0x71   :  { %24107 = vmatprep.mubr.msk.f32.mxu1 %vm108_vm0, %v86_v60 }
  0x72   :  { %24005 = vmatmul.mubr.msk.f32.gmra.mrb[52].mxu0 %vm108_vm0, %v85_v59 }
  0x73   :  { %24007 = vmatprep.mubr.msk.f32.mxu0 %vm108_vm0, %v86_v60 }
  0x74   :  { %24108 = vmatmul.mubr.msk.f32.gmra.mrb[54].mxu1 %vm108_vm0, %v87_v61 }
  0x75   :  { %24110 = vmatprep.mubr.msk.f32.mxu1 %vm108_vm0, %v88_v62 }
  0x76   :  { %24008 = vmatmul.mubr.msk.f32.gmra.mrb[54].mxu0 %vm108_vm0, %v87_v61 }
  0x77   :  { %24010 = vmatprep.mubr.msk.f32.mxu0 %vm108_vm0, %v88_v62 }
  0x78   :  { %24111 = vmatmul.mubr.msk.f32.gmra.mrb[56].mxu1 %vm108_vm0, %v89_v63 }
  0x79   :  { %24113 = vmatprep.mubr.msk.f32.mxu1 %vm108_vm0, %v90_v0 }
  0x7a   :  { %24011 = vmatmul.mubr.msk.f32.gmra.mrb[56].mxu0 %vm108_vm0, %v89_v63 }
  0x7b   :  { %24013 = vmatprep.mubr.msk.f32.mxu0 %vm108_vm0, %v90_v0 }
  0x7c   :  { %24114 = vmatmul.mubr.msk.f32.gmra.mrb[58].mxu1 %vm108_vm0, %v91_v1 }
  0x7d   :  { %24116 = vmatprep.mubr.msk.f32.mxu1 %vm108_vm0, %v92_v2 }
  0x7e   :  { %24014 = vmatmul.mubr.msk.f32.gmra.mrb[58].mxu0 %vm108_vm0, %v91_v1 }
  0x7f   :  { %24016 = vmatprep.mubr.msk.f32.mxu0 %vm108_vm0, %v92_v2 }
  0x80   :  { %24117 = vmatmul.mubr.msk.f32.gmra.mrb[60].mxu1 %vm108_vm0, %v93_v3 }
  0x81   :  { %24119 = vmatprep.mubr.msk.f32.mxu1 %vm108_vm0, %v94_v4 }
  0x82   :  { %24017 = vmatmul.mubr.msk.f32.gmra.mrb[60].mxu0 %vm108_vm0, %v93_v3 }
  0x83   :  { %24019 = vmatprep.mubr.msk.f32.mxu0 %vm108_vm0, %v94_v4 }
  0x84   :  { %24120 = vmatmul.mubr.msk.f32.gmra.mrb[62].mxu1 %vm108_vm0, %v95_v5 }
  0x86   :  { %24020 = vmatmul.mubr.msk.f32.gmra.mrb[62].mxu0 %vm108_vm0, %v95_v5 }
  0xdb   :  { %v24028_v7 = vpop.f32.mrb[0].mxu1 }
  0xdc   :  { %v828_v9 = vadd.f32 %v24028_v7, %v28301_v6  ;;  %v822_v10 = vpop.f32.mrb[1].mxu1 }
  0xdd   :  { %v823_v11 = vadd.f32 %v28301_v6, %v822_v10  ;;  %v23928_v12 = vpop.f32.mrb[0].mxu0 }
  0xde   :  { %27146 = vtanh.f32 %v828_v9  ;;  %v373_v13 = vadd.f32 %v23928_v12, %v28306_v8  ;;  %v367_v14 = vpop.f32.mrb[1].mxu0 }
  0xdf   :  { %27148 = vtanh.f32 %v823_v11  ;;  %v24031_v15 = vpop.f32.mrb[2].mxu1  ;;  %v368_v16 = vadd.f32 %v28306_v8, %v367_v14 }
  0xe0   :  { %v838_v17 = vadd.f32 %v24031_v15, %v28301_v6  ;;  %v832_v18 = vpop.f32.mrb[3].mxu1  ;;  %27150 = vtanh.f32 %v373_v13 }
  0xe1   :  { %v833_v19 = vadd.f32 %v28301_v6, %v832_v18  ;;  %27152 = vtanh.f32 %v368_v16  ;;  %v23931_v20 = vpop.f32.mrb[2].mxu0 }
  0xe2   :  { %27154 = vtanh.f32 %v838_v17  ;;  %v383_v21 = vadd.f32 %v23931_v20, %v28306_v8  ;;  %v377_v22 = vpop.f32.mrb[3].mxu0 }
  0xe3   :  { %27156 = vtanh.f32 %v833_v19  ;;  %v24034_v23 = vpop.f32.mrb[4].mxu1  ;;  %v378_v24 = vadd.f32 %v28306_v8, %v377_v22 }
  0xe4   :  { %v848_v25 = vadd.f32 %v24034_v23, %v28301_v6  ;;  %v842_v26 = vpop.f32.mrb[5].mxu1  ;;  %27158 = vtanh.f32 %v383_v21 }
  0xe5   :  { %v843_v27 = vadd.f32 %v28301_v6, %v842_v26  ;;  %27160 = vtanh.f32 %v378_v24  ;;  %v23934_v28 = vpop.f32.mrb[4].mxu0 }
  0xe6   :  { %27162 = vtanh.f32 %v848_v25  ;;  %v393_v29 = vadd.f32 %v23934_v28, %v28306_v8  ;;  %v387_v30 = vpop.f32.mrb[5].mxu0 }
  0xe7   :  { %27164 = vtanh.f32 %v843_v27  ;;  %v24037_v31 = vpop.f32.mrb[6].mxu1  ;;  %v388_v32 = vadd.f32 %v28306_v8, %v387_v30 }
  0xe8   :  { %v28320_v33 = vpop.eup %27146  ;;  %v858_v34 = vadd.f32 %v24037_v31, %v28301_v6  ;;  %v852_v35 = vpop.f32.mrb[7].mxu1  ;;  %27166 = vtanh.f32 %v393_v29 }
  0xe9   :  { %v28323_v36 = vpop.eup %27148  ;;  %v853_v37 = vadd.f32 %v28301_v6, %v852_v35  ;;  %27168 = vtanh.f32 %v388_v32  ;;  %v23937_v39 = vpop.f32.mrb[6].mxu0 }
  0xea   :  { %v27151_v40 = vpop.eup %27150  ;;  %27170 = vtanh.f32 %v858_v34  ;;  %v25974_v41 = vpack.c.bf16 %v28320_v33, %v28323_v36  ;;  %v403_v42 = vadd.f32 %v23937_v39, %v28306_v8  ;;  %v397_v43 = vpop.f32.mrb[7].mxu0 }
  0xeb   :  { %v27153_v44 = vpop.eup %27152  ;;  %27172 = vtanh.f32 %v853_v37  ;;  %v24040_v45 = vpop.f32.mrb[8].mxu1  ;;  %v398_v46 = vadd.f32 %v28306_v8, %v397_v43 }
  0xec   :  { %v28336_v47 = vpop.eup %27154  ;;  %v868_v48 = vadd.f32 %v24040_v45, %v28301_v6  ;;  %v862_v49 = vpop.f32.mrb[9].mxu1  ;;  %25976 = vmatprep.subr.msk.bf16.mxu0 %vm28328_vm1, %v25974_v41  ;;  %27174 = vtanh.f32 %v403_v42  ;;  %24126 = vmatprep.mubr.msk.f32.mxu0 %vm108_vm0, %v27153_v44  ;;  %v28342_v50 = vpack.c.bf16 %v27151_v40, %v27153_v44 }
  0xed   :  { %v28344_v51 = vpop.eup %27156  ;;  %v863_v52 = vadd.f32 %v28301_v6, %v862_v49  ;;  %25979 = vmatpush3.bf16.xpose.msk.msra.mxu0 %vm28328_vm1, %v25974_v41  ;;  %27176 = vtanh.f32 %v398_v46  ;;  %v23940_v53 = vpop.f32.mrb[8].mxu0 }
  0xee   :  { %v27159_v54 = vpop.eup %27158  ;;  %27178 = vtanh.f32 %v868_v48  ;;  %v25980_v55 = vpack.c.bf16 %v28336_v47, %v28344_v51  ;;  %v413_v56 = vadd.f32 %v23940_v53, %v28306_v8  ;;  %v407_v57 = vpop.f32.mrb[9].mxu0 }
  0xef   :  { %v27161_v58 = vpop.eup %27160  ;;  %27180 = vtanh.f32 %v863_v52  ;;  %v24043_v59 = vpop.f32.mrb[10].mxu1  ;;  %v408_v60 = vadd.f32 %v28306_v8, %v407_v57 }
  0xf0   :  { %v28353_v61 = vpop.eup %27162  ;;  %v878_v62 = vadd.f32 %v24043_v59, %v28301_v6  ;;  %v872_v63 = vpop.f32.mrb[11].mxu1  ;;  %25982 = vmatprep.subr.msk.bf16.mxu1 %vm28328_vm1, %v25980_v55  ;;  %27182 = vtanh.f32 %v413_v56  ;;  %24133 = vmatprep.mubr.msk.f32.mxu1 %vm108_vm0, %v27161_v58  ;;  %v28359_v0 = vpack.c.bf16 %v27159_v54, %v27161_v58 }
  0xf1   :  { %v28361_v1 = vpop.eup %27164  ;;  %v873_v2 = vadd.f32 %v28301_v6, %v872_v63  ;;  %25985 = vmatpush3.bf16.xpose.msk.msra.mxu1 %vm28328_vm1, %v25980_v55  ;;  %27184 = vtanh.f32 %v408_v60  ;;  %v23943_v3 = vpop.f32.mrb[10].mxu0 }
  0xf2   :  { %v27167_v4 = vpop.eup %27166  ;;  %27186 = vtanh.f32 %v878_v62  ;;  %v25986_v5 = vpack.c.bf16 %v28353_v61, %v28361_v1  ;;  %v423_v7 = vadd.f32 %v23943_v3, %v28306_v8  ;;  %v417_v9 = vpop.f32.mrb[11].mxu0 }
  0xf3   :  { %v27169_v10 = vpop.eup %27168  ;;  %27188 = vtanh.f32 %v873_v2  ;;  %v24046_v11 = vpop.f32.mrb[12].mxu1  ;;  %v418_v12 = vadd.f32 %v28306_v8, %v417_v9 }
  0xf4   :  { %v28370_v13 = vpop.eup %27170  ;;  %v888_v14 = vadd.f32 %v24046_v11, %v28301_v6  ;;  %v882_v15 = vpop.f32.mrb[13].mxu1  ;;  %25988 = vmatprep.subr.msk.bf16.mxu0 %vm28328_vm1, %v25986_v5  ;;  %24127 = vmatmul.mubr.msk.f32.vlgmr.msra.gmra.mrb[64].mxu0 %vm108_vm0, %v27151_v40  ;;  %27190 = vtanh.f32 %v423_v7  ;;  %v28376_v16 = vpack.c.bf16 %v27167_v4, %v27169_v10 }
  0xf5   :  { %v28378_v17 = vpop.eup %27172  ;;  %v883_v18 = vadd.f32 %v28301_v6, %v882_v15  ;;  %25991 = vmatpush3.bf16.xpose.msk.msra.mxu0 %vm28328_vm1, %v25986_v5  ;;  %27192 = vtanh.f32 %v418_v12  ;;  %24140 = vmatprep.mubr.msk.f32.mxu0 %vm108_vm0, %v27169_v10  ;;  %v23946_v19 = vpop.f32.mrb[12].mxu0 }
  0xf6   :  { %v27175_v20 = vpop.eup %27174  ;;  %27194 = vtanh.f32 %v888_v14  ;;  %v25992_v21 = vpack.c.bf16 %v28370_v13, %v28378_v17  ;;  %v433_v22 = vadd.f32 %v23946_v19, %v28306_v8  ;;  %v427_v23 = vpop.f32.mrb[13].mxu0 }
  0xf7   :  { %v27177_v24 = vpop.eup %27176  ;;  %27196 = vtanh.f32 %v883_v18  ;;  %v24049_v25 = vpop.f32.mrb[14].mxu1  ;;  %v428_v26 = vadd.f32 %v28306_v8, %v427_v23 }
  0xf8   :  { %v28388_v27 = vpop.eup %27178  ;;  %v898_v28 = vadd.f32 %v24049_v25, %v28301_v6  ;;  %v892_v29 = vpop.f32.mrb[15].mxu1  ;;  %25994 = vmatprep.subr.msk.bf16.mxu1 %vm28328_vm1, %v25992_v21  ;;  %24134 = vmatmul.mubr.msk.f32.vlgmr.msra.gmra.mrb[64].mxu1 %vm108_vm0, %v27159_v54  ;;  %27198 = vtanh.f32 %v433_v22  ;;  %v28394_v30 = vpack.c.bf16 %v27175_v20, %v27177_v24 }
  0xf9   :  { %v28396_v31 = vpop.eup %27180  ;;  %v893_v32 = vadd.f32 %v28301_v6, %v892_v29  ;;  %25997 = vmatpush3.bf16.xpose.msk.msra.mxu1 %vm28328_vm1, %v25992_v21  ;;  %27200 = vtanh.f32 %v428_v26  ;;  %24147 = vmatprep.mubr.msk.f32.mxu1 %vm108_vm0, %v27177_v24  ;;  %v23949_v34 = vpop.f32.mrb[14].mxu0 }
  0xfa   :  { %v27183_v35 = vpop.eup %27182  ;;  %27202 = vtanh.f32 %v898_v28  ;;  %v25998_v37 = vpack.c.bf16 %v28388_v27, %v28396_v31  ;;  %v443_v39 = vadd.f32 %v23949_v34, %v28306_v8  ;;  %v437_v40 = vpop.f32.mrb[15].mxu0 }
  0xfb   :  { %v27185_v41 = vpop.eup %27184  ;;  %27204 = vtanh.f32 %v893_v32  ;;  %v24052_v42 = vpop.f32.mrb[16].mxu1  ;;  %v438_v43 = vadd.f32 %v28306_v8, %v437_v40 }
  0xfc   :  { %v28406_v44 = vpop.eup %27186  ;;  %v908_v45 = vadd.f32 %v24052_v42, %v28301_v6  ;;  %v902_v46 = vpop.f32.mrb[17].mxu1  ;;  %26000 = vmatprep.subr.msk.bf16.mxu0 %vm28328_vm1, %v25998_v37  ;;  %24141 = vmatmul.mubr.msk.f32.vlgmr.msra.gmra.mrb[66].mxu0 %vm108_vm0, %v27167_v4  ;;  %27206 = vtanh.f32 %v443_v39  ;;  %v28412_v48 = vpack.c.bf16 %v27183_v35, %v27185_v41 }
  0xfd   :  { %v28414_v49 = vpop.eup %27188  ;;  %v903_v52 = vadd.f32 %v28301_v6, %v902_v46  ;;  %26003 = vmatpush3.bf16.xpose.msk.msra.mxu0 %vm28328_vm1, %v25998_v37  ;;  %27208 = vtanh.f32 %v438_v43  ;;  %24154 = vmatprep.mubr.msk.f32.mxu0 %vm108_vm0, %v27185_v41  ;;  %v23952_v53 = vpop.f32.mrb[16].mxu0 }
  0xfe   :  { %v27191_v54 = vpop.eup %27190  ;;  %27210 = vtanh.f32 %v908_v45  ;;  %v26004_v55 = vpack.c.bf16 %v28406_v44, %v28414_v49  ;;  %v453_v56 = vadd.f32 %v23952_v53, %v28306_v8  ;;  %v447_v57 = vpop.f32.mrb[17].mxu0 }
  0xff   :  { %v27193_v58 = vpop.eup %27192  ;;  %27212 = vtanh.f32 %v903_v52  ;;  %v24055_v59 = vpop.f32.mrb[18].mxu1  ;;  %v448_v60 = vadd.f32 %v28306_v8, %v447_v57 }
 0x100   :  { %v28424_v62 = vpop.eup %27194  ;;  %v918_v63 = vadd.f32 %v24055_v59, %v28301_v6  ;;  %v912_v2 = vpop.f32.mrb[19].mxu1  ;;  %26006 = vmatprep.subr.msk.bf16.mxu1 %vm28328_vm1, %v26004_v55  ;;  %24148 = vmatmul.mubr.msk.f32.vlgmr.msra.gmra.mrb[66].mxu1 %vm108_vm0, %v27175_v20  ;;  %27214 = vtanh.f32 %v453_v56  ;;  %v28430_v3 = vpack.c.bf16 %v27191_v54, %v27193_v58 }
 0x101   :  { %v28432_v4 = vpop.eup %27196  ;;  %v913_v5 = vadd.f32 %v28301_v6, %v912_v2  ;;  %26009 = vmatpush3.bf16.xpose.msk.msra.mxu1 %vm28328_vm1, %v26004_v55  ;;  %27216 = vtanh.f32 %v448_v60  ;;  %24161 = vmatprep.mubr.msk.f32.mxu1 %vm108_vm0, %v27193_v58  ;;  %v23955_v7 = vpop.f32.mrb[18].mxu0 }
 0x102   :  { %v27199_v9 = vpop.eup %27198  ;;  %27218 = vtanh.f32 %v918_v63  ;;  %v26010_v10 = vpack.c.bf16 %v28424_v62, %v28432_v4  ;;  %v463_v11 = vadd.f32 %v23955_v7, %v28306_v8  ;;  %v457_v12 = vpop.f32.mrb[19].mxu0 }
 0x103   :  { %v27201_v14 = vpop.eup %27200  ;;  %27220 = vtanh.f32 %v913_v5  ;;  %v24058_v15 = vpop.f32.mrb[20].mxu1  ;;  %v458_v18 = vadd.f32 %v28306_v8, %v457_v12 }
 0x104   :  { %v28442_v19 = vpop.eup %27202  ;;  %v928_v20 = vadd.f32 %v24058_v15, %v28301_v6  ;;  %v922_v21 = vpop.f32.mrb[21].mxu1  ;;  %26012 = vmatprep.subr.msk.bf16.mxu0 %vm28328_vm1, %v26010_v10  ;;  %24155 = vmatmul.mubr.msk.f32.vlgmr.msra.gmra.mrb[68].mxu0 %vm108_vm0, %v27183_v35  ;;  %27222 = vtanh.f32 %v463_v11  ;;  %v28448_v22 = vpack.c.bf16 %v27199_v9, %v27201_v14 }
 0x105   :  { %v28450_v23 = vpop.eup %27204  ;;  %v923_v24 = vadd.f32 %v28301_v6, %v922_v21  ;;  %26015 = vmatpush3.bf16.xpose.msk.msra.mxu0 %vm28328_vm1, %v26010_v10  ;;  %27224 = vtanh.f32 %v458_v18  ;;  %24168 = vmatprep.mubr.msk.f32.mxu0 %vm108_vm0, %v27201_v14  ;;  %v23958_v25 = vpop.f32.mrb[20].mxu0 }
 0x106   :  { %v27207_v26 = vpop.eup %27206  ;;  %27226 = vtanh.f32 %v928_v20  ;;  %v26016_v28 = vpack.c.bf16 %v28442_v19, %v28450_v23  ;;  %v473_v29 = vadd.f32 %v23958_v25, %v28306_v8  ;;  %v467_v32 = vpop.f32.mrb[21].mxu0 }
 0x107   :  { %v27209_v34 = vpop.eup %27208  ;;  %27228 = vtanh.f32 %v923_v24  ;;  %v24061_v35 = vpop.f32.mrb[22].mxu1  ;;  %v468_v37 = vadd.f32 %v28306_v8, %v467_v32 }
 0x108   :  { %v28460_v39 = vpop.eup %27210  ;;  %v938_v40 = vadd.f32 %v24061_v35, %v28301_v6  ;;  %v932_v41 = vpop.f32.mrb[23].mxu1  ;;  %26018 = vmatprep.subr.msk.bf16.mxu1 %vm28328_vm1, %v26016_v28  ;;  %24162 = vmatmul.mubr.msk.f32.vlgmr.msra.gmra.mrb[68].mxu1 %vm108_vm0, %v27191_v54  ;;  %27230 = vtanh.f32 %v473_v29  ;;  %v28466_v42 = vpack.c.bf16 %v27207_v26, %v27209_v34 }
 0x109   :  { %v28468_v43 = vpop.eup %27212  ;;  %v933_v45 = vadd.f32 %v28301_v6, %v932_v41  ;;  %26021 = vmatpush3.bf16.xpose.msk.msra.mxu1 %vm28328_vm1, %v26016_v28  ;;  %27232 = vtanh.f32 %v468_v37  ;;  %24175 = vmatprep.mubr.msk.f32.mxu1 %vm108_vm0, %v27209_v34  ;;  %v23961_v46 = vpop.f32.mrb[22].mxu0 }
 0x10a   :  { %v27215_v52 = vpop.eup %27214  ;;  %27234 = vtanh.f32 %v938_v40  ;;  %v26022_v53 = vpack.c.bf16 %v28460_v39, %v28468_v43  ;;  %v483_v54 = vadd.f32 %v23961_v46, %v28306_v8  ;;  %v477_v55 = vpop.f32.mrb[23].mxu0 }
 0x10b   :  { %v27217_v56 = vpop.eup %27216  ;;  %27236 = vtanh.f32 %v933_v45  ;;  %v24064_v57 = vpop.f32.mrb[24].mxu1  ;;  %v478_v58 = vadd.f32 %v28306_v8, %v477_v55 }
 0x10c   :  { %v28478_v59 = vpop.eup %27218  ;;  %v948_v60 = vadd.f32 %v24064_v57, %v28301_v6  ;;  %v942_v63 = vpop.f32.mrb[25].mxu1  ;;  %26024 = vmatprep.subr.msk.bf16.mxu0 %vm28328_vm1, %v26022_v53  ;;  %24169 = vmatmul.mubr.msk.f32.vlgmr.msra.gmra.mrb[70].mxu0 %vm108_vm0, %v27199_v9  ;;  %27238 = vtanh.f32 %v483_v54  ;;  %v28484_v2 = vpack.c.bf16 %v27215_v52, %v27217_v56 }
 0x10d   :  { %v28486_v5 = vpop.eup %27220  ;;  %v943_v7 = vadd.f32 %v28301_v6, %v942_v63  ;;  %26027 = vmatpush3.bf16.xpose.msk.msra.mxu0 %vm28328_vm1, %v26022_v53  ;;  %27240 = vtanh.f32 %v478_v58  ;;  %24182 = vmatprep.mubr.msk.f32.mxu0 %vm108_vm0, %v27217_v56  ;;  %v23964_v10 = vpop.f32.mrb[24].mxu0 }
 0x10e   :  { %v27223_v11 = vpop.eup %27222  ;;  %27242 = vtanh.f32 %v948_v60  ;;  %v26028_v12 = vpack.c.bf16 %v28478_v59, %v28486_v5  ;;  %v493_v9 = vadd.f32 %v23964_v10, %v28306_v8  ;;  %v487_v14 = vpop.f32.mrb[25].mxu0 }
 0x10f   :  { %v27225_v15 = vpop.eup %27224  ;;  %27244 = vtanh.f32 %v943_v7  ;;  %v24067_v18 = vpop.f32.mrb[26].mxu1  ;;  %v488_v20 = vadd.f32 %v28306_v8, %v487_v14 }
 0x110   :  { %v28496_v21 = vpop.eup %27226  ;;  %v958_v24 = vadd.f32 %v24067_v18, %v28301_v6  ;;  %v952_v25 = vpop.f32.mrb[27].mxu1  ;;  %26030 = vmatprep.subr.msk.bf16.mxu1 %vm28328_vm1, %v26028_v12  ;;  %24176 = vmatmul.mubr.msk.f32.vlgmr.msra.gmra.mrb[70].mxu1 %vm108_vm0, %v27207_v26  ;;  %27246 = vtanh.f32 %v493_v9  ;;  %v28502_v28 = vpack.c.bf16 %v27223_v11, %v27225_v15 }
 0x111   :  { %v28504_v29 = vpop.eup %27228  ;;  %v953_v32 = vadd.f32 %v28301_v6, %v952_v25  ;;  %26033 = vmatpush3.bf16.xpose.msk.msra.mxu1 %vm28328_vm1, %v26028_v12  ;;  %27248 = vtanh.f32 %v488_v20  ;;  %24189 = vmatprep.mubr.msk.f32.mxu1 %vm108_vm0, %v27225_v15  ;;  %v23967_v34 = vpop.f32.mrb[26].mxu0 }
 0x112   :  { %v27231_v35 = vpop.eup %27230  ;;  %27250 = vtanh.f32 %v958_v24  ;;  %v26034_v37 = vpack.c.bf16 %v28496_v21, %v28504_v29  ;;  %v503_v26 = vadd.f32 %v23967_v34, %v28306_v8  ;;  %v497_v40 = vpop.f32.mrb[27].mxu0 }
 0x113   :  { %v27233_v41 = vpop.eup %27232  ;;  %27252 = vtanh.f32 %v953_v32  ;;  %v24070_v45 = vpop.f32.mrb[28].mxu1  ;;  %v498_v46 = vadd.f32 %v28306_v8, %v497_v40 }
 0x114   :  { %v28514_v53 = vpop.eup %27234  ;;  %v968_v54 = vadd.f32 %v24070_v45, %v28301_v6  ;;  %v962_v55 = vpop.f32.mrb[29].mxu1  ;;  %26036 = vmatprep.subr.msk.bf16.mxu0 %vm28328_vm1, %v26034_v37  ;;  %24183 = vmatmul.mubr.msk.f32.vlgmr.msra.gmra.mrb[72].mxu0 %vm108_vm0, %v27215_v52  ;;  %27254 = vtanh.f32 %v503_v26  ;;  %v28520_v56 = vpack.c.bf16 %v27231_v35, %v27233_v41 }
 0x115   :  { %v28522_v57 = vpop.eup %27236  ;;  %v963_v58 = vadd.f32 %v28301_v6, %v962_v55  ;;  %26039 = vmatpush3.bf16.xpose.msk.msra.mxu0 %vm28328_vm1, %v26034_v37  ;;  %27256 = vtanh.f32 %v498_v46  ;;  %24196 = vmatprep.mubr.msk.f32.mxu0 %vm108_vm0, %v27233_v41  ;;  %v23970_v60 = vpop.f32.mrb[28].mxu0 }
 0x116   :  { %v27239_v63 = vpop.eup %27238  ;;  %27258 = vtanh.f32 %v968_v54  ;;  %v26040_v7 = vpack.c.bf16 %v28514_v53, %v28522_v57  ;;  %v513_v52 = vadd.f32 %v23970_v60, %v28306_v8  ;;  %v507_v10 = vpop.f32.mrb[29].mxu0 }
 0x117   :  { %v27241_v12 = vpop.eup %27240  ;;  %27260 = vtanh.f32 %v963_v58  ;;  %v24073_v9 = vpop.f32.mrb[30].mxu1  ;;  %v508_v14 = vadd.f32 %v28306_v8, %v507_v10 }
 0x118   :  { %v28532_v15 = vpop.eup %27242  ;;  %v978_v18 = vadd.f32 %v24073_v9, %v28301_v6  ;;  %v972_v20 = vpop.f32.mrb[31].mxu1  ;;  %26042 = vmatprep.subr.msk.bf16.mxu1 %vm28328_vm1, %v26040_v7  ;;  %24190 = vmatmul.mubr.msk.f32.vlgmr.msra.gmra.mrb[72].mxu1 %vm108_vm0, %v27223_v11  ;;  %27262 = vtanh.f32 %v513_v52  ;;  %v28538_v24 = vpack.c.bf16 %v27239_v63, %v27241_v12 }
 0x119   :  { %v28540_v25 = vpop.eup %27244  ;;  %v973_v32 = vadd.f32 %v28301_v6, %v972_v20  ;;  %26045 = vmatpush3.bf16.xpose.msk.msra.mxu1 %vm28328_vm1, %v26040_v7  ;;  %27264 = vtanh.f32 %v508_v14  ;;  %24203 = vmatprep.mubr.msk.f32.mxu1 %vm108_vm0, %v27241_v12  ;;  %v23973_v34 = vpop.f32.mrb[30].mxu0 }
 0x11a   :  { %v27247_v37 = vpop.eup %27246  ;;  %27266 = vtanh.f32 %v978_v18  ;;  %v26046_v26 = vpack.c.bf16 %v28532_v15, %v28540_v25  ;;  %v523_v11 = vadd.f32 %v23973_v34, %v28306_v8  ;;  %v517_v40 = vpop.f32.mrb[31].mxu0 }
 0x11b   :  { %v27249_v41 = vpop.eup %27248  ;;  %27268 = vtanh.f32 %v973_v32  ;;  %v24076_v45 = vpop.f32.mrb[32].mxu1  ;;  %v518_v46 = vadd.f32 %v28306_v8, %v517_v40 }
 0x11c   :  { %v28550_v54 = vpop.eup %27250  ;;  %v988_v55 = vadd.f32 %v24076_v45, %v28301_v6  ;;  %v982_v58 = vpop.f32.mrb[33].mxu1  ;;  %26048 = vmatprep.subr.msk.bf16.mxu0 %vm28328_vm1, %v26046_v26  ;;  %24197 = vmatmul.mubr.msk.f32.vlgmr.msra.gmra.mrb[74].mxu0 %vm108_vm0, %v27231_v35  ;;  %27270 = vtanh.f32 %v523_v11  ;;  %v28556_v60 = vpack.c.bf16 %v27247_v37, %v27249_v41 }
 0x11d   :  { %34466 = vst [vmem:[#allocation2_spill] sm:$0xff] %v28550_v54  ;;  %v28558_v7 = vpop.eup %27252  ;;  %v983_v52 = vadd.f32 %v28301_v6, %v982_v58  ;;  %26051 = vmatpush3.bf16.xpose.msk.msra.mxu0 %vm28328_vm1, %v26046_v26  ;;  %27272 = vtanh.f32 %v518_v46  ;;  %24210 = vmatprep.mubr.msk.f32.mxu0 %vm108_vm0, %v27249_v41  ;;  %v23976_v10 = vpop.f32.mrb[32].mxu0 }
 0x11e   :  { %v27255_v12 = vpop.eup %27254  ;;  %27274 = vtanh.f32 %v988_v55  ;;  %v26052_v9 = vpack.c.bf16 %v28550_v54, %v28558_v7  ;;  %v533_v35 = vadd.f32 %v23976_v10, %v28306_v8  ;;  %v527_v14 = vpop.f32.mrb[33].mxu0 }
 0x11f   :  { %v27257_v18 = vpop.eup %27256  ;;  %27276 = vtanh.f32 %v983_v52  ;;  %v24079_v20 = vpop.f32.mrb[34].mxu1  ;;  %v528_v32 = vadd.f32 %v28306_v8, %v527_v14 }
 0x120   :  { %v28568_v34 = vpop.eup %27258  ;;  %v998_v26 = vadd.f32 %v24079_v20, %v28301_v6  ;;  %v992_v11 = vpop.f32.mrb[35].mxu1  ;;  %26054 = vmatprep.subr.msk.bf16.mxu1 %vm28328_vm1, %v26052_v9  ;;  %24204 = vmatmul.mubr.msk.f32.vlgmr.msra.gmra.mrb[74].mxu1 %vm108_vm0, %v27239_v63  ;;  %27278 = vtanh.f32 %v533_v35  ;;  %v28574_v40 = vpack.c.bf16 %v27255_v12, %v27257_v18 }
 0x121   :  { %34467 = vst [vmem:[#allocation3_spill] sm:$0xff] %v28568_v34  ;;  %v28576_v41 = vpop.eup %27260  ;;  %v993_v45 = vadd.f32 %v28301_v6, %v992_v11  ;;  %26057 = vmatpush3.bf16.xpose.msk.msra.mxu1 %vm28328_vm1, %v26052_v9  ;;  %27280 = vtanh.f32 %v528_v32  ;;  %24217 = vmatprep.mubr.msk.f32.mxu1 %vm108_vm0, %v27257_v18  ;;  %v23979_v46 = vpop.f32.mrb[34].mxu0 }
 0x122   :  { %34468 = vst [vmem:[#allocation4_spill] sm:$0xff] %v28576_v41  ;;  %v27263_v55 = vpop.eup %27262  ;;  %27282 = vtanh.f32 %v998_v26  ;;  %v26058_v58 = vpack.c.bf16 %v28568_v34, %v28576_v41  ;;  %v543_v63 = vadd.f32 %v23979_v46, %v28306_v8  ;;  %v537_v52 = vpop.f32.mrb[35].mxu0 }
 0x123   :  { %v27265_v10 = vpop.eup %27264  ;;  %27284 = vtanh.f32 %v993_v45  ;;  %v24082_v35 = vpop.f32.mrb[36].mxu1  ;;  %v538_v14 = vadd.f32 %v28306_v8, %v537_v52 }
 0x124   :  { %v28586_v20 = vpop.eup %27266  ;;  %v1008_v9 = vadd.f32 %v24082_v35, %v28301_v6  ;;  %v1002_v32 = vpop.f32.mrb[37].mxu1  ;;  %26060 = vmatprep.subr.msk.bf16.mxu0 %vm28328_vm1, %v26058_v58  ;;  %24211 = vmatmul.mubr.msk.f32.vlgmr.msra.gmra.mrb[76].mxu0 %vm108_vm0, %v27247_v37  ;;  %27286 = vtanh.f32 %v543_v63  ;;  %v28592_v18 = vpack.c.bf16 %v27263_v55, %v27265_v10 }
 0x125   :  { %34469 = vst [vmem:[#allocation5_spill] sm:$0xff] %v28586_v20  ;;  %v28594_v26 = vpop.eup %27268  ;;  %v1003_v11 = vadd.f32 %v28301_v6, %v1002_v32  ;;  %26063 = vmatpush3.bf16.xpose.msk.msra.mxu0 %vm28328_vm1, %v26058_v58  ;;  %27288 = vtanh.f32 %v538_v14  ;;  %24224 = vmatprep.mubr.msk.f32.mxu0 %vm108_vm0, %v27265_v10  ;;  %v23982_v45 = vpop.f32.mrb[36].mxu0 }
 0x126   :  { %34470 = vst [vmem:[#allocation6_spill] sm:$0xff] %v28594_v26  ;;  %v27271_v46 = vpop.eup %27270  ;;  %27290 = vtanh.f32 %v1008_v9  ;;  %v26064_v52 = vpack.c.bf16 %v28586_v20, %v28594_v26  ;;  %v553_v37 = vadd.f32 %v23982_v45, %v28306_v8  ;;  %v547_v63 = vpop.f32.mrb[37].mxu0 }
 0x127   :  { %v27273_v35 = vpop.eup %27272  ;;  %27292 = vtanh.f32 %v1003_v11  ;;  %v24085_v34 = vpop.f32.mrb[38].mxu1  ;;  %v548_v32 = vadd.f32 %v28306_v8, %v547_v63 }
 0x128   :  { %v28604_v54 = vpop.eup %27274  ;;  %v1018_v58 = vadd.f32 %v24085_v34, %v28301_v6  ;;  %v1012_v14 = vpop.f32.mrb[39].mxu1  ;;  %26066 = vmatprep.subr.msk.bf16.mxu1 %vm28328_vm1, %v26064_v52  ;;  %24218 = vmatmul.mubr.msk.f32.vlgmr.msra.gmra.mrb[76].mxu1 %vm108_vm0, %v27255_v12  ;;  %27294 = vtanh.f32 %v553_v37  ;;  %v28610_v10 = vpack.c.bf16 %v27271_v46, %v27273_v35 }
 0x129   :  { %34471 = vst [vmem:[#allocation7_spill] sm:$0xff] %v28604_v54  ;;  %v28612_v9 = vpop.eup %27276  ;;  %v1013_v11 = vadd.f32 %v28301_v6, %v1012_v14  ;;  %26069 = vmatpush3.bf16.xpose.msk.msra.mxu1 %vm28328_vm1, %v26064_v52  ;;  %27296 = vtanh.f32 %v548_v32  ;;  %24231 = vmatprep.mubr.msk.f32.mxu1 %vm108_vm0, %v27273_v35  ;;  %v23985_v34 = vpop.f32.mrb[38].mxu0 }
 0x12a   :  { %34472 = vst [vmem:[#allocation8_spill] sm:$0xff] %v28612_v9  ;;  %v27279_v45 = vpop.eup %27278  ;;  %27298 = vtanh.f32 %v1018_v58  ;;  %v26070_v63 = vpack.c.bf16 %v28604_v54, %v28612_v9  ;;  %v563_v12 = vadd.f32 %v23985_v34, %v28306_v8  ;;  %v557_v37 = vpop.f32.mrb[39].mxu0 }
 0x12b   :  { %v27281_v20 = vpop.eup %27280  ;;  %27300 = vtanh.f32 %v1013_v11  ;;  %v24088_v26 = vpop.f32.mrb[40].mxu1  ;;  %v558_v14 = vadd.f32 %v28306_v8, %v557_v37 }
 0x12c   :  { %v28622_v41 = vpop.eup %27282  ;;  %v1028_v52 = vadd.f32 %v24088_v26, %v28301_v6  ;;  %v1022_v32 = vpop.f32.mrb[41].mxu1  ;;  %26072 = vmatprep.subr.msk.bf16.mxu0 %vm28328_vm1, %v26070_v63  ;;  %24225 = vmatmul.mubr.msk.f32.vlgmr.msra.gmra.mrb[78].mxu0 %vm108_vm0, %v27263_v55  ;;  %27302 = vtanh.f32 %v563_v12  ;;  %v28628_v35 = vpack.c.bf16 %v27279_v45, %v27281_v20 }
 0x12d   :  { %34473 = vst [vmem:[#allocation9_spill] sm:$0xff] %v28622_v41  ;;  %v28630_v58 = vpop.eup %27284  ;;  %v1023_v11 = vadd.f32 %v28301_v6, %v1022_v32  ;;  %26075 = vmatpush3.bf16.xpose.msk.msra.mxu0 %vm28328_vm1, %v26070_v63  ;;  %27304 = vtanh.f32 %v558_v14  ;;  %24238 = vmatprep.mubr.msk.f32.mxu0 %vm108_vm0, %v27281_v20  ;;  %v23988_v26 = vpop.f32.mrb[40].mxu0 }
 0x12e   :  { %34474 = vst [vmem:[#allocation10_spill] sm:$0xff] %v28628_v35  ;;  %34475 = vst [vmem:[#allocation11_spill] sm:$0xff] %v28630_v58  ;;  %v27287_v34 = vpop.eup %27286  ;;  %27306 = vtanh.f32 %v1028_v52  ;;  %v26076_v37 = vpack.c.bf16 %v28622_v41, %v28630_v58  ;;  %v573_v55 = vadd.f32 %v23988_v26, %v28306_v8  ;;  %v567_v12 = vpop.f32.mrb[41].mxu0 }
 0x12f   :  { %v27289_v54 = vpop.eup %27288  ;;  %27308 = vtanh.f32 %v1023_v11  ;;  %v24091_v9 = vpop.f32.mrb[42].mxu1  ;;  %v568_v32 = vadd.f32 %v28306_v8, %v567_v12 }
 0x130   :  { %v28640_v35 = vpop.eup %27290  ;;  %v1038_v63 = vadd.f32 %v24091_v9, %v28301_v6  ;;  %v1032_v14 = vpop.f32.mrb[43].mxu1  ;;  %26078 = vmatprep.subr.msk.bf16.mxu1 %vm28328_vm1, %v26076_v37  ;;  %24232 = vmatmul.mubr.msk.f32.vlgmr.msra.gmra.mrb[78].mxu1 %vm108_vm0, %v27271_v46  ;;  %27310 = vtanh.f32 %v573_v55  ;;  %v28646_v20 = vpack.c.bf16 %v27287_v34, %v27289_v54 }
 0x131   :  { %34476 = vst [vmem:[#allocation12_spill] sm:$0xff] %v28640_v35  ;;  %v28648_v52 = vpop.eup %27292  ;;  %v1033_v11 = vadd.f32 %v28301_v6, %v1032_v14  ;;  %26081 = vmatpush3.bf16.xpose.msk.msra.mxu1 %vm28328_vm1, %v26076_v37  ;;  %27312 = vtanh.f32 %v568_v32  ;;  %24245 = vmatprep.mubr.msk.f32.mxu1 %vm108_vm0, %v27289_v54  ;;  %v23991_v9 = vpop.f32.mrb[42].mxu0 }
 0x132   :  { %34477 = vst [vmem:[#allocation13_spill] sm:$0xff] %v28646_v20  ;;  %34478 = vst [vmem:[#allocation14_spill] sm:$0xff] %v28648_v52  ;;  %v27295_v26 = vpop.eup %27294  ;;  %27314 = vtanh.f32 %v1038_v63  ;;  %v26082_v12 = vpack.c.bf16 %v28640_v35, %v28648_v52  ;;  %v583_v46 = vadd.f32 %v23991_v9, %v28306_v8  ;;  %v577_v55 = vpop.f32.mrb[43].mxu0 }
 0x133   :  { %v27297_v41 = vpop.eup %27296  ;;  %27316 = vtanh.f32 %v1033_v11  ;;  %v24094_v58 = vpop.f32.mrb[44].mxu1  ;;  %v578_v14 = vadd.f32 %v28306_v8, %v577_v55 }
 0x134   :  { %v28658_v20 = vpop.eup %27298  ;;  %v1048_v37 = vadd.f32 %v24094_v58, %v28301_v6  ;;  %v1042_v32 = vpop.f32.mrb[45].mxu1  ;;  %26084 = vmatprep.subr.msk.bf16.mxu0 %vm28328_vm1, %v26082_v12  ;;  %24239 = vmatmul.mubr.msk.f32.vlgmr.msra.gmra.mrb[80].mxu0 %vm108_vm0, %v27279_v45  ;;  %27318 = vtanh.f32 %v583_v46  ;;  %v28664_v54 = vpack.c.bf16 %v27295_v26, %v27297_v41 }
 0x135   :  { %34479 = vst [vmem:[#allocation15_spill] sm:$0xff] %v28658_v20  ;;  %v28666_v63 = vpop.eup %27300  ;;  %v1043_v11 = vadd.f32 %v28301_v6, %v1042_v32  ;;  %26087 = vmatpush3.bf16.xpose.msk.msra.mxu0 %vm28328_vm1, %v26082_v12  ;;  %27320 = vtanh.f32 %v578_v14  ;;  %24252 = vmatprep.mubr.msk.f32.mxu0 %vm108_vm0, %v27297_v41  ;;  %v23994_v58 = vpop.f32.mrb[44].mxu0 }
 0x136   :  { %34480 = vst [vmem:[#allocation16_spill] sm:$0xff] %v28664_v54  ;;  %34481 = vst [vmem:[#allocation17_spill] sm:$0xff] %v28666_v63  ;;  %v27303_v9 = vpop.eup %27302  ;;  %27322 = vtanh.f32 %v1048_v37  ;;  %v26088_v55 = vpack.c.bf16 %v28658_v20, %v28666_v63  ;;  %v593_v45 = vadd.f32 %v23994_v58, %v28306_v8  ;;  %v587_v46 = vpop.f32.mrb[45].mxu0 }
 0x137   :  { %v27305_v35 = vpop.eup %27304  ;;  %27324 = vtanh.f32 %v1043_v11  ;;  %v24097_v52 = vpop.f32.mrb[46].mxu1  ;;  %v588_v32 = vadd.f32 %v28306_v8, %v587_v46 }
 0x138   :  { %v28676_v54 = vpop.eup %27306  ;;  %v1058_v12 = vadd.f32 %v24097_v52, %v28301_v6  ;;  %v1052_v14 = vpop.f32.mrb[47].mxu1  ;;  %26090 = vmatprep.subr.msk.bf16.mxu1 %vm28328_vm1, %v26088_v55  ;;  %24246 = vmatmul.mubr.msk.f32.vlgmr.msra.gmra.mrb[80].mxu1 %vm108_vm0, %v27287_v34  ;;  %27326 = vtanh.f32 %v593_v45  ;;  %v28682_v41 = vpack.c.bf16 %v27303_v9, %v27305_v35 }
 0x139   :  { %34482 = vst [vmem:[#allocation18_spill] sm:$0xff] %v28676_v54  ;;  %v28684_v37 = vpop.eup %27308  ;;  %v1053_v11 = vadd.f32 %v28301_v6, %v1052_v14  ;;  %26093 = vmatpush3.bf16.xpose.msk.msra.mxu1 %vm28328_vm1, %v26088_v55  ;;  %27328 = vtanh.f32 %v588_v32  ;;  %24259 = vmatprep.mubr.msk.f32.mxu1 %vm108_vm0, %v27305_v35  ;;  %v23997_v52 = vpop.f32.mrb[46].mxu0 }
 0x13a   :  { %34483 = vst [vmem:[#allocation19_spill] sm:$0xff] %v28682_v41  ;;  %34484 = vst [vmem:[#allocation20_spill] sm:$0xff] %v28684_v37  ;;  %v27311_v58 = vpop.eup %27310  ;;  %27330 = vtanh.f32 %v1058_v12  ;;  %v26094_v46 = vpack.c.bf16 %v28676_v54, %v28684_v37  ;;  %v603_v34 = vadd.f32 %v23997_v52, %v28306_v8  ;;  %v597_v45 = vpop.f32.mrb[47].mxu0 }
 0x13b   :  { %v27313_v20 = vpop.eup %27312  ;;  %27332 = vtanh.f32 %v1053_v11  ;;  %v24100_v63 = vpop.f32.mrb[48].mxu1  ;;  %v598_v14 = vadd.f32 %v28306_v8, %v597_v45 }
 0x13c   :  { %v28694_v41 = vpop.eup %27314  ;;  %v1068_v55 = vadd.f32 %v24100_v63, %v28301_v6  ;;  %v1062_v32 = vpop.f32.mrb[49].mxu1  ;;  %26096 = vmatprep.subr.msk.bf16.mxu0 %vm28328_vm1, %v26094_v46  ;;  %24253 = vmatmul.mubr.msk.f32.vlgmr.msra.gmra.mrb[82].mxu0 %vm108_vm0, %v27295_v26  ;;  %27334 = vtanh.f32 %v603_v34  ;;  %v28700_v35 = vpack.c.bf16 %v27311_v58, %v27313_v20 }
 0x13d   :  { %34485 = vst [vmem:[#allocation21_spill] sm:$0xff] %v28694_v41  ;;  %v28702_v12 = vpop.eup %27316  ;;  %v1063_v11 = vadd.f32 %v28301_v6, %v1062_v32  ;;  %26099 = vmatpush3.bf16.xpose.msk.msra.mxu0 %vm28328_vm1, %v26094_v46  ;;  %27336 = vtanh.f32 %v598_v14  ;;  %24266 = vmatprep.mubr.msk.f32.mxu0 %vm108_vm0, %v27313_v20  ;;  %v24000_v63 = vpop.f32.mrb[48].mxu0  ;;  %v28714_v6 = vld [vmem:[%s33936_s2] ss:$0 sm:$0xff] }
 0x13e   :  { %34486 = vst [vmem:[#allocation22_spill] sm:$0xff] %v28700_v35  ;;  %34487 = vst [vmem:[#allocation23_spill] sm:$0xff] %v28702_v12  ;;  %v27319_v52 = vpop.eup %27318  ;;  %27338 = vtanh.f32 %v1068_v55  ;;  %v26100_v45 = vpack.c.bf16 %v28694_v41, %v28702_v12  ;;  %v613_v26 = vadd.f32 %v24000_v63, %v28306_v8  ;;  %v607_v34 = vpop.f32.mrb[49].mxu0  ;;  %v28722_v14 = vld [vmem:[%s33935_s4] ss:$0 sm:$0xff] }
 0x13f   :  { %v27321_v54 = vpop.eup %27320  ;;  %27340 = vtanh.f32 %v1063_v11  ;;  %v24103_v37 = vpop.f32.mrb[50].mxu1  ;;  %v608_v46 = vadd.f32 %v28714_v6, %v607_v34 }
 0x140   :  { %v28717_v20 = vpop.eup %27322  ;;  %v1078_v8 = vadd.f32 %v28722_v14, %v24103_v37  ;;  %v1072_v55 = vpop.f32.mrb[51].mxu1  ;;  %26102 = vmatprep.subr.msk.bf16.mxu1 %vm28328_vm1, %v26100_v45  ;;  %24260 = vmatmul.mubr.msk.f32.vlgmr.msra.gmra.mrb[82].mxu1 %vm108_vm0, %v27303_v9  ;;  %27342 = vtanh.f32 %v613_v26  ;;  %v28728_v32 = vpack.c.bf16 %v27319_v52, %v27321_v54 }
 0x141   :  { %34488 = vst [vmem:[#allocation24_spill] sm:$0xff] %v28717_v20  ;;  %v28730_v11 = vpop.eup %27324  ;;  %v1073_v63 = vadd.f32 %v28722_v14, %v1072_v55  ;;  %26105 = vmatpush3.bf16.xpose.msk.msra.mxu1 %vm28328_vm1, %v26100_v45  ;;  %27344 = vtanh.f32 %v608_v46  ;;  %24273 = vmatprep.mubr.msk.f32.mxu1 %vm108_vm0, %v27321_v54  ;;  %v24003_v37 = vpop.f32.mrb[50].mxu0 }
 0x142   :  { %34489 = vst [vmem:[#allocation25_spill] sm:$0xff] %v28728_v32  ;;  %34490 = vst [vmem:[#allocation26_spill] sm:$0xff] %v28730_v11  ;;  %v27327_v34 = vpop.eup %27326  ;;  %27346 = vtanh.f32 %v1078_v8  ;;  %v26106_v41 = vpack.c.bf16 %v28717_v20, %v28730_v11  ;;  %v623_v9 = vadd.f32 %v28714_v6, %v24003_v37  ;;  %v617_v26 = vpop.f32.mrb[51].mxu0 }
 0x143   :  { %v27329_v12 = vpop.eup %27328  ;;  %27348 = vtanh.f32 %v1073_v63  ;;  %v24106_v32 = vpop.f32.mrb[52].mxu1  ;;  %v618_v55 = vadd.f32 %v28714_v6, %v617_v26 }
 0x144   :  { %v28740_v35 = vpop.eup %27330  ;;  %v1088_v45 = vadd.f32 %v28722_v14, %v24106_v32  ;;  %v1082_v46 = vpop.f32.mrb[53].mxu1  ;;  %26108 = vmatprep.subr.msk.bf16.mxu0 %vm28328_vm1, %v26106_v41  ;;  %24267 = vmatmul.mubr.msk.f32.vlgmr.msra.gmra.mrb[84].mxu0 %vm108_vm0, %v27311_v58  ;;  %27350 = vtanh.f32 %v623_v9  ;;  %v28746_v54 = vpack.c.bf16 %v27327_v34, %v27329_v12 }
 0x145   :  { %34491 = vst [vmem:[#allocation27_spill] sm:$0xff] %v28740_v35  ;;  %v28748_v8 = vpop.eup %27332  ;;  %v1083_v63 = vadd.f32 %v28722_v14, %v1082_v46  ;;  %26111 = vmatpush3.bf16.xpose.msk.msra.mxu0 %vm28328_vm1, %v26106_v41  ;;  %27352 = vtanh.f32 %v618_v55  ;;  %24280 = vmatprep.mubr.msk.f32.mxu0 %vm108_vm0, %v27329_v12  ;;  %v24006_v32 = vpop.f32.mrb[52].mxu0 }
 0x146   :  { %34492 = vst [vmem:[#allocation28_spill] sm:$0xff] %v28746_v54  ;;  %34493 = vst [vmem:[#allocation29_spill] sm:$0xff] %v28748_v8  ;;  %v27335_v37 = vpop.eup %27334  ;;  %27354 = vtanh.f32 %v1088_v45  ;;  %v26112_v26 = vpack.c.bf16 %v28740_v35, %v28748_v8  ;;  %v633_v58 = vadd.f32 %v28714_v6, %v24006_v32  ;;  %v627_v9 = vpop.f32.mrb[53].mxu0 }
 0x147   :  { %v27337_v20 = vpop.eup %27336  ;;  %27356 = vtanh.f32 %v1083_v63  ;;  %v24109_v11 = vpop.f32.mrb[54].mxu1  ;;  %v628_v46 = vadd.f32 %v28714_v6, %v627_v9 }
 0x148   :  { %v28758_v54 = vpop.eup %27338  ;;  %v1098_v41 = vadd.f32 %v28722_v14, %v24109_v11  ;;  %v1092_v55 = vpop.f32.mrb[55].mxu1  ;;  %26114 = vmatprep.subr.msk.bf16.mxu1 %vm28328_vm1, %v26112_v26  ;;  %24274 = vmatmul.mubr.msk.f32.vlgmr.msra.gmra.mrb[84].mxu1 %vm108_vm0, %v27319_v52  ;;  %27358 = vtanh.f32 %v633_v58  ;;  %v28764_v12 = vpack.c.bf16 %v27335_v37, %v27337_v20 }
 0x149   :  { %34494 = vst [vmem:[#allocation30_spill] sm:$0xff] %v28758_v54  ;;  %v28766_v45 = vpop.eup %27340  ;;  %v1093_v63 = vadd.f32 %v28722_v14, %v1092_v55  ;;  %26117 = vmatpush3.bf16.xpose.msk.msra.mxu1 %vm28328_vm1, %v26112_v26  ;;  %27360 = vtanh.f32 %v628_v46  ;;  %24287 = vmatprep.mubr.msk.f32.mxu1 %vm108_vm0, %v27337_v20  ;;  %v24009_v11 = vpop.f32.mrb[54].mxu0 }
 0x14a   :  { %34495 = vst [vmem:[#allocation31_spill] sm:$0xff] %v28764_v12  ;;  %34496 = vst [vmem:[#allocation32_spill] sm:$0xff] %v28766_v45  ;;  %v27343_v32 = vpop.eup %27342  ;;  %27362 = vtanh.f32 %v1098_v41  ;;  %v26118_v9 = vpack.c.bf16 %v28758_v54, %v28766_v45  ;;  %v643_v52 = vadd.f32 %v28714_v6, %v24009_v11  ;;  %v637_v58 = vpop.f32.mrb[55].mxu0 }
 0x14b   :  { %v27345_v35 = vpop.eup %27344  ;;  %27364 = vtanh.f32 %v1093_v63  ;;  %v24112_v8 = vpop.f32.mrb[56].mxu1  ;;  %v638_v55 = vadd.f32 %v28714_v6, %v637_v58 }
 0x14c   :  { %v28776_v12 = vpop.eup %27346  ;;  %v1108_v26 = vadd.f32 %v28722_v14, %v24112_v8  ;;  %v1102_v46 = vpop.f32.mrb[57].mxu1  ;;  %26120 = vmatprep.subr.msk.bf16.mxu0 %vm28328_vm1, %v26118_v9  ;;  %24281 = vmatmul.mubr.msk.f32.vlgmr.msra.gmra.mrb[86].mxu0 %vm108_vm0, %v27327_v34  ;;  %27366 = vtanh.f32 %v643_v52  ;;  %v28782_v20 = vpack.c.bf16 %v27343_v32, %v27345_v35 }
 0x14d   :  { %34497 = vst [vmem:[#allocation33_spill] sm:$0xff] %v28776_v12  ;;  %v28784_v41 = vpop.eup %27348  ;;  %v1103_v63 = vadd.f32 %v28722_v14, %v1102_v46  ;;  %26123 = vmatpush3.bf16.xpose.msk.msra.mxu0 %vm28328_vm1, %v26118_v9  ;;  %27368 = vtanh.f32 %v638_v55  ;;  %24294 = vmatprep.mubr.msk.f32.mxu0 %vm108_vm0, %v27345_v35  ;;  %v24012_v8 = vpop.f32.mrb[56].mxu0 }
 0x14e   :  { %34498 = vst [vmem:[#allocation34_spill] sm:$0xff] %v28782_v20  ;;  %34499 = vst [vmem:[#allocation35_spill] sm:$0xff] %v28784_v41  ;;  %v27351_v11 = vpop.eup %27350  ;;  %27370 = vtanh.f32 %v1108_v26  ;;  %v26124_v58 = vpack.c.bf16 %v28776_v12, %v28784_v41  ;;  %v653_v34 = vadd.f32 %v28714_v6, %v24012_v8  ;;  %v647_v52 = vpop.f32.mrb[57].mxu0 }
 0x14f   :  { %v27353_v54 = vpop.eup %27352  ;;  %27372 = vtanh.f32 %v1103_v63  ;;  %v24115_v45 = vpop.f32.mrb[58].mxu1  ;;  %v648_v46 = vadd.f32 %v28714_v6, %v647_v52 }
 0x150   :  { %v28794_v20 = vpop.eup %27354  ;;  %v1118_v9 = vadd.f32 %v28722_v14, %v24115_v45  ;;  %v1112_v55 = vpop.f32.mrb[59].mxu1  ;;  %26126 = vmatprep.subr.msk.bf16.mxu1 %vm28328_vm1, %v26124_v58  ;;  %24288 = vmatmul.mubr.msk.f32.vlgmr.msra.gmra.mrb[86].mxu1 %vm108_vm0, %v27335_v37  ;;  %27374 = vtanh.f32 %v653_v34  ;;  %v28800_v35 = vpack.c.bf16 %v27351_v11, %v27353_v54 }
 0x151   :  { %34500 = vst [vmem:[#allocation36_spill] sm:$0xff] %v28794_v20  ;;  %v28802_v26 = vpop.eup %27356  ;;  %v1113_v63 = vadd.f32 %v28722_v14, %v1112_v55  ;;  %26129 = vmatpush3.bf16.xpose.msk.msra.mxu1 %vm28328_vm1, %v26124_v58  ;;  %27376 = vtanh.f32 %v648_v46  ;;  %24301 = vmatprep.mubr.msk.f32.mxu1 %vm108_vm0, %v27353_v54  ;;  %v24015_v45 = vpop.f32.mrb[58].mxu0 }
 0x152   :  { %34501 = vst [vmem:[#allocation37_spill] sm:$0xff] %v28800_v35  ;;  %34502 = vst [vmem:[#allocation38_spill] sm:$0xff] %v28802_v26  ;;  %v27359_v8 = vpop.eup %27358  ;;  %27378 = vtanh.f32 %v1118_v9  ;;  %v26130_v52 = vpack.c.bf16 %v28794_v20, %v28802_v26  ;;  %v663_v37 = vadd.f32 %v28714_v6, %v24015_v45  ;;  %v657_v34 = vpop.f32.mrb[59].mxu0 }
 0x153   :  { %v27361_v12 = vpop.eup %27360  ;;  %27380 = vtanh.f32 %v1113_v63  ;;  %v24118_v41 = vpop.f32.mrb[60].mxu1  ;;  %v658_v55 = vadd.f32 %v28714_v6, %v657_v34 }
 0x154   :  { %v28812_v35 = vpop.eup %27362  ;;  %v1128_v58 = vadd.f32 %v28722_v14, %v24118_v41  ;;  %v1122_v46 = vpop.f32.mrb[61].mxu1  ;;  %26132 = vmatprep.subr.msk.bf16.mxu0 %vm28328_vm1, %v26130_v52  ;;  %24295 = vmatmul.mubr.msk.f32.vlgmr.msra.gmra.mrb[88].mxu0 %vm108_vm0, %v27343_v32  ;;  %27382 = vtanh.f32 %v663_v37  ;;  %v28818_v54 = vpack.c.bf16 %v27359_v8, %v27361_v12 }
 0x155   :  { %34503 = vst [vmem:[#allocation39_spill] sm:$0xff] %v28812_v35  ;;  %v28820_v9 = vpop.eup %27364  ;;  %v1123_v63 = vadd.f32 %v28722_v14, %v1122_v46  ;;  %26135 = vmatpush3.bf16.xpose.msk.msra.mxu0 %vm28328_vm1, %v26130_v52  ;;  %27384 = vtanh.f32 %v658_v55  ;;  %v24018_v45 = vpop.f32.mrb[60].mxu0  ;;  %24308 = vmatprep.mubr.msk.f32.mxu0 %vm108_vm0, %v27361_v12 }
 0x156   :  { %34504 = vst [vmem:[#allocation40_spill] sm:$0xff] %v28818_v54  ;;  %34505 = vst [vmem:[#allocation41_spill] sm:$0xff] %v28820_v9  ;;  %v27367_v41 = vpop.eup %27366  ;;  %27386 = vtanh.f32 %v1128_v58  ;;  %v26136_v34 = vpack.c.bf16 %v28812_v35, %v28820_v9  ;;  %v673_v32 = vadd.f32 %v28714_v6, %v24018_v45  ;;  %v667_v37 = vpop.f32.mrb[61].mxu0 }
 0x157   :  { %v27369_v20 = vpop.eup %27368  ;;  %27388 = vtanh.f32 %v1123_v63  ;;  %v24121_v26 = vpop.f32.mrb[62].mxu1  ;;  %v668_v46 = vadd.f32 %v28714_v6, %v667_v37 }
 0x158   :  { %v28830_v54 = vpop.eup %27370  ;;  %v1138_v52 = vadd.f32 %v28722_v14, %v24121_v26  ;;  %v1132_v55 = vpop.f32.mrb[63].mxu1  ;;  %26138 = vmatprep.subr.msk.bf16.mxu1 %vm28328_vm1, %v26136_v34  ;;  %24302 = vmatmul.mubr.msk.f32.vlgmr.msra.gmra.mrb[88].mxu1 %vm108_vm0, %v27351_v11  ;;  %27390 = vtanh.f32 %v673_v32  ;;  %v28836_v12 = vpack.c.bf16 %v27367_v41, %v27369_v20 }
 0x159   :  { %v28838_v58 = vpop.eup %27372  ;;  %v1133_v63 = vadd.f32 %v28722_v14, %v1132_v55  ;;  %26141 = vmatpush3.bf16.xpose.msk.msra.mxu1 %vm28328_vm1, %v26136_v34  ;;  %27392 = vtanh.f32 %v668_v46  ;;  %v24021_v45 = vpop.f32.mrb[62].mxu0  ;;  %24315 = vmatprep.mubr.msk.f32.mxu1 %vm108_vm0, %v27369_v20 }
 0x15a   :  { %v27375_v26 = vpop.eup %27374  ;;  %27394 = vtanh.f32 %v1138_v52  ;;  %v26142_v37 = vpack.c.bf16 %v28830_v54, %v28838_v58  ;;  %v683_v11 = vadd.f32 %v28714_v6, %v24021_v45  ;;  %v677_v32 = vpop.f32.mrb[63].mxu0 }
 0x15b   :  { %v27377_v35 = vpop.eup %27376  ;;  %27396 = vtanh.f32 %v1133_v63  ;;  %v678_v9 = vadd.f32 %v28714_v6, %v677_v32 }
 0x15c   :  { %v28848_v14 = vpop.eup %27378  ;;  %26144 = vmatprep.subr.msk.bf16.mxu0 %vm28328_vm1, %v26142_v37  ;;  %24309 = vmatmul.mubr.msk.f32.vlgmr.msra.gmra.mrb[90].mxu0 %vm108_vm0, %v27359_v8  ;;  %27398 = vtanh.f32 %v683_v11  ;;  %v28853_v20 = vpack.c.bf16 %v27375_v26, %v27377_v35 }
 0x15d   :  { %v28855_v34 = vpop.eup %27380  ;;  %26147 = vmatpush3.bf16.xpose.msk.msra.mxu0 %vm28328_vm1, %v26142_v37  ;;  %27400 = vtanh.f32 %v678_v9  ;;  %24322 = vmatprep.mubr.msk.f32.mxu0 %vm108_vm0, %v27377_v35 }
 0x15e   :  { %v27383_v46 = vpop.eup %27382  ;;  %v26148_v6 = vpack.c.bf16 %v28848_v14, %v28855_v34 }
 0x15f   :  { %v27385_v52 = vpop.eup %27384 }
 0x160   :  { %v28862_v55 = vpop.eup %27386  ;;  %26150 = vmatprep.subr.msk.bf16.mxu1 %vm28328_vm1, %v26148_v6  ;;  %24316 = vmatmul.mubr.msk.f32.vlgmr.msra.gmra.mrb[90].mxu1 %vm108_vm0, %v27367_v41  ;;  %v28867_v8 = vpack.c.bf16 %v27383_v46, %v27385_v52 }
 0x161   :  { %v28869_v63 = vpop.eup %27388  ;;  %26153 = vmatpush3.bf16.xpose.msk.msra.mxu1 %vm28328_vm1, %v26148_v6  ;;  %24329 = vmatprep.mubr.msk.f32.mxu1 %vm108_vm0, %v27385_v52 }
 0x162   :  { %v27391_v35 = vpop.eup %27390  ;;  %v26154_v9 = vpack.c.bf16 %v28862_v55, %v28869_v63 }
 0x163   :  { %v27393_v45 = vpop.eup %27392 }
 0x164   :  { %v28876_v37 = vpop.eup %27394  ;;  %26156 = vmatprep.subr.msk.bf16.mxu0 %vm28328_vm1, %v26154_v9  ;;  %24323 = vmatmul.mubr.msk.f32.vlgmr.msra.gmra.mrb[92].mxu0 %vm108_vm0, %v27375_v26  ;;  %v28881_v41 = vpack.c.bf16 %v27391_v35, %v27393_v45 }
 0x165   :  { %v28883_v11 = vpop.eup %27396  ;;  %26159 = vmatpush3.bf16.xpose.msk.msra.mxu0 %vm28328_vm1, %v26154_v9  ;;  %24336 = vmatprep.mubr.msk.f32.mxu0 %vm108_vm0, %v27393_v45  ;;  %v34538_v9 = vld [vmem:[#allocation27_spill] sm:$0xff] }
 0x166   :  { %v27399_v32 = vpop.eup %27398  ;;  %v26160_v6 = vpack.c.bf16 %v28876_v37, %v28883_v11  ;;  %26168 = vmatprep.subr.msk.bf16.mxu0 %vm28328_vm1, %v28342_v50 }
 0x167   :  { %v27401_v52 = vpop.eup %27400 }
 0x168   :  { %26162 = vmatprep.subr.msk.bf16.mxu1 %vm28328_vm1, %v26160_v6  ;;  %24330 = vmatmul.mubr.msk.f32.vlgmr.msra.gmra.mrb[92].mxu1 %vm108_vm0, %v27383_v46  ;;  %v28896_v26 = vpack.c.bf16 %v27399_v32, %v27401_v52 }
 0x169   :  { %26165 = vmatpush3.bf16.xpose.msk.msra.mxu1 %vm28328_vm1, %v26160_v6  ;;  %24343 = vmatprep.mubr.msk.f32.mxu1 %vm108_vm0, %v27401_v52 }
 0x16a   :  { %26174 = vmatprep.subr.msk.bf16.mxu1 %vm28328_vm1, %v28359_v0 }
 0x16c   :  { %24337 = vmatmul.mubr.msk.f32.vlgmr.msra.gmra.mrb[94].mxu0 %vm108_vm0, %v27391_v35 }
 0x16d   :  { %26171 = vmatpush3.bf16.xpose.msk.msra.mxu0 %vm28328_vm1, %v28342_v50  ;;  %24350 = vmatprep.mubr.msk.f32.mxu0 %vm108_vm0, %v28323_v36  ;;  %v34507_v36 = vld [vmem:[#allocation10_spill] sm:$0xff] }
 0x16e   :  { %26180 = vmatprep.subr.msk.bf16.mxu0 %vm28328_vm1, %v28376_v16  ;;  %v34509_v50 = vld [vmem:[#allocation6_spill] sm:$0xff] }
 0x170   :  { %24344 = vmatmul.mubr.msk.f32.vlgmr.msra.gmra.mrb[94].mxu1 %vm108_vm0, %v27399_v32 }
 0x171   :  { %26177 = vmatpush3.bf16.xpose.msk.msra.mxu1 %vm28328_vm1, %v28359_v0  ;;  %24357 = vmatprep.mubr.msk.f32.mxu1 %vm108_vm0, %v28344_v51  ;;  %v34510_v51 = vld [vmem:[#allocation13_spill] sm:$0xff]  ;;  %v34512_v0 = vld [vmem:[#allocation8_spill] sm:$0xff] }
 0x172   :  { %26186 = vmatprep.subr.msk.bf16.mxu1 %vm28328_vm1, %v28394_v30 }
 0x174   :  { %24351 = vmatmul.mubr.msk.f32.vlgmr.msra.gmra.mrb[96].mxu0 %vm108_vm0, %v28320_v33  ;;  %v34506_v33 = vld [vmem:[#allocation4_spill] sm:$0xff] }
 0x175   :  { %26183 = vmatpush3.bf16.xpose.msk.msra.mxu0 %vm28328_vm1, %v28376_v16  ;;  %24364 = vmatprep.mubr.msk.f32.mxu0 %vm108_vm0, %v28361_v1  ;;  %v34513_v1 = vld [vmem:[#allocation16_spill] sm:$0xff]  ;;  %v34515_v16 = vld [vmem:[#allocation11_spill] sm:$0xff] }
 0x176   :  { %26192 = vmatprep.subr.msk.bf16.mxu0 %vm28328_vm1, %v28412_v48 }
 0x178   :  { %24358 = vmatmul.mubr.msk.f32.vlgmr.msra.gmra.mrb[96].mxu1 %vm108_vm0, %v28336_v47  ;;  %v34508_v47 = vld [vmem:[#allocation2_spill] sm:$0xff] }
 0x179   :  { %26189 = vmatpush3.bf16.xpose.msk.msra.mxu1 %vm28328_vm1, %v28394_v30  ;;  %24371 = vmatprep.mubr.msk.f32.mxu1 %vm108_vm0, %v28378_v17  ;;  %v34516_v17 = vld [vmem:[#allocation19_spill] sm:$0xff]  ;;  %v34518_v30 = vld [vmem:[#allocation14_spill] sm:$0xff] }
 0x17a   :  { %26198 = vmatprep.subr.msk.bf16.mxu1 %vm28328_vm1, %v28430_v3 }
 0x17c   :  { %24365 = vmatmul.mubr.msk.f32.vlgmr.msra.gmra.mrb[98].mxu0 %vm108_vm0, %v28353_v61  ;;  %v34511_v61 = vld [vmem:[#allocation3_spill] sm:$0xff] }
 0x17d   :  { %26195 = vmatpush3.bf16.xpose.msk.msra.mxu0 %vm28328_vm1, %v28412_v48  ;;  %24378 = vmatprep.mubr.msk.f32.mxu0 %vm108_vm0, %v28396_v31  ;;  %v34519_v31 = vld [vmem:[#allocation22_spill] sm:$0xff]  ;;  %v34521_v48 = vld [vmem:[#allocation17_spill] sm:$0xff] }
 0x17e   :  { %26204 = vmatprep.subr.msk.bf16.mxu0 %vm28328_vm1, %v28448_v22 }
 0x180   :  { %24372 = vmatmul.mubr.msk.f32.vlgmr.msra.gmra.mrb[98].mxu1 %vm108_vm0, %v28370_v13  ;;  %v34514_v13 = vld [vmem:[#allocation5_spill] sm:$0xff] }
 0x181   :  { %26201 = vmatpush3.bf16.xpose.msk.msra.mxu1 %vm28328_vm1, %v28430_v3  ;;  %24385 = vmatprep.mubr.msk.f32.mxu1 %vm108_vm0, %v28414_v49  ;;  %v34522_v49 = vld [vmem:[#allocation25_spill] sm:$0xff]  ;;  %v34524_v3 = vld [vmem:[#allocation20_spill] sm:$0xff] }
 0x182   :  { %26210 = vmatprep.subr.msk.bf16.mxu1 %vm28328_vm1, %v28466_v42 }
 0x184   :  { %24379 = vmatmul.mubr.msk.f32.vlgmr.msra.gmra.mrb[100].mxu0 %vm108_vm0, %v28388_v27  ;;  %v34517_v27 = vld [vmem:[#allocation7_spill] sm:$0xff] }
 0x185   :  { %26207 = vmatpush3.bf16.xpose.msk.msra.mxu0 %vm28328_vm1, %v28448_v22  ;;  %24392 = vmatprep.mubr.msk.f32.mxu0 %vm108_vm0, %v28432_v4  ;;  %v34525_v4 = vld [vmem:[#allocation28_spill] sm:$0xff]  ;;  %v34527_v22 = vld [vmem:[#allocation23_spill] sm:$0xff] }
 0x186   :  { %26216 = vmatprep.subr.msk.bf16.mxu0 %vm28328_vm1, %v28484_v2 }
 0x188   :  { %24386 = vmatmul.mubr.msk.f32.vlgmr.msra.gmra.mrb[100].mxu1 %vm108_vm0, %v28406_v44  ;;  %v34520_v44 = vld [vmem:[#allocation9_spill] sm:$0xff] }
 0x189   :  { %26213 = vmatpush3.bf16.xpose.msk.msra.mxu1 %vm28328_vm1, %v28466_v42  ;;  %24399 = vmatprep.mubr.msk.f32.mxu1 %vm108_vm0, %v28450_v23  ;;  %v34528_v23 = vld [vmem:[#allocation31_spill] sm:$0xff]  ;;  %v34530_v42 = vld [vmem:[#allocation26_spill] sm:$0xff] }
 0x18a   :  { %26222 = vmatprep.subr.msk.bf16.mxu1 %vm28328_vm1, %v28502_v28 }
 0x18c   :  { %24393 = vmatmul.mubr.msk.f32.vlgmr.msra.gmra.mrb[102].mxu0 %vm108_vm0, %v28424_v62  ;;  %v34523_v62 = vld [vmem:[#allocation12_spill] sm:$0xff] }
 0x18d   :  { %26219 = vmatpush3.bf16.xpose.msk.msra.mxu0 %vm28328_vm1, %v28484_v2  ;;  %24406 = vmatprep.mubr.msk.f32.mxu0 %vm108_vm0, %v28468_v43  ;;  %v34531_v43 = vld [vmem:[#allocation34_spill] sm:$0xff]  ;;  %v34532_v2 = vld [vmem:[#allocation21_spill] sm:$0xff] }
 0x18e   :  { %26228 = vmatprep.subr.msk.bf16.mxu0 %vm28328_vm1, %v28520_v56 }
 0x190   :  { %24400 = vmatmul.mubr.msk.f32.vlgmr.msra.gmra.mrb[102].mxu1 %vm108_vm0, %v28442_v19  ;;  %v34526_v19 = vld [vmem:[#allocation15_spill] sm:$0xff] }
 0x191   :  { %26225 = vmatpush3.bf16.xpose.msk.msra.mxu1 %vm28328_vm1, %v28502_v28  ;;  %24413 = vmatprep.mubr.msk.f32.mxu1 %vm108_vm0, %v28486_v5  ;;  %v34533_v28 = vld [vmem:[#allocation29_spill] sm:$0xff] }
 0x192   :  { %26234 = vmatprep.subr.msk.bf16.mxu1 %vm28328_vm1, %v28538_v24 }
 0x194   :  { %24407 = vmatmul.mubr.msk.f32.vlgmr.msra.gmra.mrb[104].mxu0 %vm108_vm0, %v28460_v39  ;;  %v34529_v39 = vld [vmem:[#allocation18_spill] sm:$0xff] }
 0x195   :  { %26231 = vmatpush3.bf16.xpose.msk.msra.mxu0 %vm28328_vm1, %v28520_v56  ;;  %24420 = vmatprep.mubr.msk.f32.mxu0 %vm108_vm0, %v28504_v29 }
 0x196   :  { %26240 = vmatprep.subr.msk.bf16.mxu0 %vm28328_vm1, %v28556_v60 }
 0x198   :  { %24414 = vmatmul.mubr.msk.f32.vlgmr.msra.gmra.mrb[104].mxu1 %vm108_vm0, %v28478_v59 }
 0x199   :  { %26237 = vmatpush3.bf16.xpose.msk.msra.mxu1 %vm28328_vm1, %v28538_v24  ;;  %24427 = vmatprep.mubr.msk.f32.mxu1 %vm108_vm0, %v28522_v57 }
 0x19a   :  { %26246 = vmatprep.subr.msk.bf16.mxu1 %vm28328_vm1, %v28574_v40 }
 0x19c   :  { %24421 = vmatmul.mubr.msk.f32.vlgmr.msra.gmra.mrb[106].mxu0 %vm108_vm0, %v28496_v21 }
 0x19d   :  { %26243 = vmatpush3.bf16.xpose.msk.msra.mxu0 %vm28328_vm1, %v28556_v60  ;;  %24434 = vmatprep.mubr.msk.f32.mxu0 %vm108_vm0, %v28540_v25 }
 0x19e   :  { %26252 = vmatprep.subr.msk.bf16.mxu0 %vm28328_vm1, %v28592_v18 }
 0x1a0   :  { %24428 = vmatmul.mubr.msk.f32.vlgmr.msra.gmra.mrb[106].mxu1 %vm108_vm0, %v28514_v53  ;;  %v34534_v53 = vld [vmem:[#allocation37_spill] sm:$0xff] }
 0x1a1   :  { %26249 = vmatpush3.bf16.xpose.msk.msra.mxu1 %vm28328_vm1, %v28574_v40  ;;  %24441 = vmatprep.mubr.msk.f32.mxu1 %vm108_vm0, %v28558_v7  ;;  %v34536_v7 = vld [vmem:[#allocation32_spill] sm:$0xff] }
 0x1a2   :  { %26258 = vmatprep.subr.msk.bf16.mxu1 %vm28328_vm1, %v28610_v10 }
 0x1a4   :  { %24435 = vmatmul.mubr.msk.f32.vlgmr.msra.gmra.mrb[108].mxu0 %vm108_vm0, %v28532_v15  ;;  %v34535_v15 = vld [vmem:[#allocation24_spill] sm:$0xff] }
 0x1a5   :  { %26255 = vmatpush3.bf16.xpose.msk.msra.mxu0 %vm28328_vm1, %v28592_v18  ;;  %24448 = vmatprep.mubr.msk.f32.mxu0 %vm108_vm0, %v34506_v33  ;;  %v34537_v18 = vld [vmem:[#allocation40_spill] sm:$0xff]  ;;  %v34539_v33 = vld [vmem:[#allocation35_spill] sm:$0xff] }
 0x1a6   :  { %26264 = vmatprep.subr.msk.bf16.mxu0 %vm28328_vm1, %v34507_v36 }
 0x1a8   :  { %24442 = vmatmul.mubr.msk.f32.vlgmr.msra.gmra.mrb[108].mxu1 %vm108_vm0, %v34508_v47 }
 0x1a9   :  { %26261 = vmatpush3.bf16.xpose.msk.msra.mxu1 %vm28328_vm1, %v28610_v10  ;;  %24455 = vmatprep.mubr.msk.f32.mxu1 %vm108_vm0, %v34509_v50 }
 0x1aa   :  { %26270 = vmatprep.subr.msk.bf16.mxu1 %vm28328_vm1, %v34510_v51 }
 0x1ac   :  { %24449 = vmatmul.mubr.msk.f32.vlgmr.msra.gmra.mrb[110].mxu0 %vm108_vm0, %v34511_v61 }
 0x1ad   :  { %26267 = vmatpush3.bf16.xpose.msk.msra.mxu0 %vm28328_vm1, %v34507_v36  ;;  %24462 = vmatprep.mubr.msk.f32.mxu0 %vm108_vm0, %v34512_v0  ;;  %v34540_v0 = vld [vmem:[#allocation30_spill] sm:$0xff] }
 0x1ae   :  { %26276 = vmatprep.subr.msk.bf16.mxu0 %vm28328_vm1, %v34513_v1 }
 0x1b0   :  { %24456 = vmatmul.mubr.msk.f32.vlgmr.msra.gmra.mrb[110].mxu1 %vm108_vm0, %v34514_v13 }
 0x1b1   :  { %26273 = vmatpush3.bf16.xpose.msk.msra.mxu1 %vm28328_vm1, %v34510_v51  ;;  %24469 = vmatprep.mubr.msk.f32.mxu1 %vm108_vm0, %v34515_v16 }
 0x1b2   :  { %26282 = vmatprep.subr.msk.bf16.mxu1 %vm28328_vm1, %v34516_v17 }
 0x1b4   :  { %24463 = vmatmul.mubr.msk.f32.vlgmr.msra.gmra.mrb[112].mxu0 %vm108_vm0, %v34517_v27 }
 0x1b5   :  { %26279 = vmatpush3.bf16.xpose.msk.msra.mxu0 %vm28328_vm1, %v34513_v1  ;;  %24476 = vmatprep.mubr.msk.f32.mxu0 %vm108_vm0, %v34518_v30  ;;  %v34541_v30 = vld [vmem:[#allocation38_spill] sm:$0xff] }
 0x1b6   :  { %26288 = vmatprep.subr.msk.bf16.mxu0 %vm28328_vm1, %v34519_v31 }
 0x1b8   :  { %24470 = vmatmul.mubr.msk.f32.vlgmr.msra.gmra.mrb[112].mxu1 %vm108_vm0, %v34520_v44 }
 0x1b9   :  { %26285 = vmatpush3.bf16.xpose.msk.msra.mxu1 %vm28328_vm1, %v34516_v17  ;;  %24483 = vmatprep.mubr.msk.f32.mxu1 %vm108_vm0, %v34521_v48 }
 0x1ba   :  { %26294 = vmatprep.subr.msk.bf16.mxu1 %vm28328_vm1, %v34522_v49 }
 0x1bc   :  { %24477 = vmatmul.mubr.msk.f32.vlgmr.msra.gmra.mrb[114].mxu0 %vm108_vm0, %v34523_v62 }
 0x1bd   :  { %26291 = vmatpush3.bf16.xpose.msk.msra.mxu0 %vm28328_vm1, %v34519_v31  ;;  %24490 = vmatprep.mubr.msk.f32.mxu0 %vm108_vm0, %v34524_v3 }
 0x1be   :  { %26300 = vmatprep.subr.msk.bf16.mxu0 %vm28328_vm1, %v34525_v4 }
 0x1c0   :  { %24484 = vmatmul.mubr.msk.f32.vlgmr.msra.gmra.mrb[114].mxu1 %vm108_vm0, %v34526_v19 }
 0x1c1   :  { %26297 = vmatpush3.bf16.xpose.msk.msra.mxu1 %vm28328_vm1, %v34522_v49  ;;  %24497 = vmatprep.mubr.msk.f32.mxu1 %vm108_vm0, %v34527_v22 }
 0x1c2   :  { %26306 = vmatprep.subr.msk.bf16.mxu1 %vm28328_vm1, %v34528_v23 }
 0x1c4   :  { %24491 = vmatmul.mubr.msk.f32.vlgmr.msra.gmra.mrb[116].mxu0 %vm108_vm0, %v34529_v39 }
 0x1c5   :  { %26303 = vmatpush3.bf16.xpose.msk.msra.mxu0 %vm28328_vm1, %v34525_v4  ;;  %24504 = vmatprep.mubr.msk.f32.mxu0 %vm108_vm0, %v34530_v42  ;;  %v34542_v4 = vld [vmem:[#allocation33_spill] sm:$0xff] }
 0x1c6   :  { %26312 = vmatprep.subr.msk.bf16.mxu0 %vm28328_vm1, %v34531_v43 }
 0x1c7   :  { %v24128_v59 = vpop.f32.mrb[64].mxu0 }
 0x1c8   :  { %24498 = vmatmul.mubr.msk.f32.vlgmr.msra.gmra.mrb[116].mxu1 %vm108_vm0, %v34532_v2  ;;  %v7254_v5 = vsel %vm108_vm0, %v24128_v59, -inf  ;;  %v1283_v21 = vpop.f32.mrb[65].mxu0 }
 0x1c9   :  { %26309 = vmatpush3.bf16.xpose.msk.msra.mxu1 %vm28328_vm1, %v34528_v23  ;;  %24511 = vmatprep.mubr.msk.f32.mxu1 %vm108_vm0, %v34533_v28  ;;  %v7253_v29 = vsel %vm108_vm0, %v1283_v21, -inf }
 0x1ca   :  { %26318 = vmatprep.subr.msk.bf16.mxu1 %vm28328_vm1, %v34534_v53  ;;  %v7255_v56 = vmax.f32 %v7253_v29, %v7254_v5 }
 0x1cb   :  { %v29144_v57 = vpop.f32.mrb[64].mxu1 }
 0x1cc   :  { %24505 = vmatmul.mubr.msk.f32.vlgmr.msra.gmra.mrb[118].mxu0 %vm108_vm0, %v34535_v15  ;;  %v7256_v24 = vrot.slane %v7255_v56, 4  ;;  %v7263_v25 = vsel %vm108_vm0, %v29144_v57, -inf  ;;  %v29150_v60 = vpop.f32.mrb[65].mxu1 }
 0x1cd   :  { %26315 = vmatpush3.bf16.xpose.msk.msra.mxu0 %vm28328_vm1, %v34531_v43  ;;  %24518 = vmatprep.mubr.msk.f32.mxu0 %vm108_vm0, %v34536_v7  ;;  %v7262_v40 = vsel %vm108_vm0, %v29150_v60, -inf  ;;  %v34543_v43 = vld [vmem:[#allocation41_spill] sm:$0xff] }
 0x1ce   :  { %26324 = vmatprep.subr.msk.bf16.mxu0 %vm28328_vm1, %v34537_v18  ;;  %v7257_v10 = vmax.f32 %v7255_v56, %v7256_v24  ;;  %v7264_v46 = vmax.f32 %v7262_v40, %v7263_v25  ;;  %v34544_v24 = vld [vmem:[#allocation36_spill] sm:$0xff] }
 0x1cf   :  { %v29162_v35 = vpop.f32.mrb[66].mxu0 }
 0x1d0   :  { %24512 = vmatmul.mubr.msk.f32.vlgmr.msra.gmra.mrb[118].mxu1 %vm108_vm0, %v34538_v9  ;;  %v7258_v45 = vrot.slane %v7257_v10, 2  ;;  %v7265_v32 = vrot.slane %v7264_v46, 4  ;;  %v7272_v6 = vsel %vm108_vm0, %v29162_v35, -inf  ;;  %v29168_v52 = vpop.f32.mrb[67].mxu0 }
 0x1d1   :  { %26321 = vmatpush3.bf16.xpose.msk.msra.mxu1 %vm28328_vm1, %v34534_v53  ;;  %24525 = vmatprep.mubr.msk.f32.mxu1 %vm108_vm0, %v34539_v33  ;;  %v7271_v36 = vsel %vm108_vm0, %v29168_v52, -inf }
 0x1d2   :  { %26330 = vmatprep.subr.msk.bf16.mxu1 %vm28328_vm1, %v28836_v12  ;;  %v7259_v47 = vmax.f32 %v7257_v10, %v7258_v45  ;;  %v7266_v50 = vmax.f32 %v7264_v46, %v7265_v32  ;;  %v7273_v51 = vmax.f32 %v7271_v36, %v7272_v6  ;;  %v34545_v36 = vld [vmem:[#allocation39_spill] sm:$0xff] }
 0x1d3   :  { %v29180_v61 = vpop.f32.mrb[66].mxu1 }
 0x1d4   :  { %24519 = vmatmul.mubr.msk.f32.vlgmr.msra.gmra.mrb[120].mxu0 %vm108_vm0, %v34540_v0  ;;  %v7260_v1 = vrot.slane %v7259_v47, 1  ;;  %v7267_v13 = vrot.slane %v7266_v50, 2  ;;  %v7274_v16 = vrot.slane %v7273_v51, 4  ;;  %v7281_v17 = vsel %vm108_vm0, %v29180_v61, -inf  ;;  %v29186_v27 = vpop.f32.mrb[67].mxu1 }
 0x1d5   :  { %26327 = vmatpush3.bf16.xpose.msk.msra.mxu0 %vm28328_vm1, %v34537_v18  ;;  %24532 = vmatprep.mubr.msk.f32.mxu0 %vm108_vm0, %v34541_v30  ;;  %v7280_v31 = vsel %vm108_vm0, %v29186_v27, -inf }
 0x1d6   :  { %26336 = vmatprep.subr.msk.bf16.mxu0 %vm28328_vm1, %v28853_v20  ;;  %v7261_v44 = vmax.f32 %v7259_v47, %v7260_v1  ;;  %v7268_v48 = vmax.f32 %v7266_v50, %v7267_v13  ;;  %v7275_v49 = vmax.f32 %v7273_v51, %v7274_v16  ;;  %v7282_v62 = vmax.f32 %v7280_v31, %v7281_v17 }
 0x1d7   :  { %v29198_v3 = vpop.f32.mrb[68].mxu0 }
 0x1d8   :  { %24526 = vmatmul.mubr.msk.f32.vlgmr.msra.gmra.mrb[120].mxu1 %vm108_vm0, %v34542_v4  ;;  %v7541_v19 = vsub.f32 %v1283_v21, %v7261_v44  ;;  %v7542_v22 = vsub.f32 %v24128_v59, %v7261_v44  ;;  %v7269_v23 = vrot.slane %v7268_v48, 1  ;;  %v7276_v39 = vrot.slane %v7275_v49, 2  ;;  %v29202_v42 = vpop.f32.mrb[69].mxu0 }
 0x1d9   :  { %26333 = vmatpush3.bf16.xpose.msk.msra.mxu1 %vm28328_vm1, %v28836_v12  ;;  %24539 = vmatprep.mubr.msk.f32.mxu1 %vm108_vm0, %v34543_v43  ;;  %v7283_v2 = vrot.slane %v7282_v62, 4  ;;  %v7290_v5 = vsel %vm108_vm0, %v29198_v3, -inf  ;;  %v7289_v28 = vsel %vm108_vm0, %v29202_v42, -inf }
 0x1da   :  { %26342 = vmatprep.subr.msk.bf16.mxu1 %vm28328_vm1, %v28867_v8  ;;  %v7605_v59 = vmul.f32 1.442695, %v7541_v19  ;;  %v7607_v21 = vmul.f32 1.442695, %v7542_v22  ;;  %v7270_v29 = vmax.f32 %v7268_v48, %v7269_v23  ;;  %v7277_v53 = vmax.f32 %v7275_v49, %v7276_v39 }
 0x1db   :  { %v7284_v56 = vmax.f32 %v7282_v62, %v7283_v2  ;;  %v7291_v12 = vmax.f32 %v7289_v28, %v7290_v5  ;;  %v29216_v15 = vpop.f32.mrb[68].mxu1 }
 0x1dc   :  { %24533 = vmatmul.mubr.msk.f32.vlgmr.msra.gmra.mrb[122].mxu0 %vm108_vm0, %v34544_v24  ;;  %27402 = vpow2.f32 %v7605_v59  ;;  %v7543_v25 = vsub.f32 %v29150_v60, %v7270_v29  ;;  %v7544_v7 = vsub.f32 %v29144_v57, %v7270_v29  ;;  %v7278_v40 = vrot.slane %v7277_v53, 1  ;;  %v29222_v18 = vpop.f32.mrb[69].mxu1 }
 0x1dd   :  { %26339 = vmatpush3.bf16.xpose.msk.msra.mxu0 %vm28328_vm1, %v28853_v20  ;;  %24546 = vmatprep.mubr.msk.f32.mxu0 %vm108_vm0, %v28838_v58  ;;  %27404 = vpow2.f32 %v7607_v21  ;;  %v7285_v10 = vrot.slane %v7284_v56, 2  ;;  %v7292_v46 = vrot.slane %v7291_v12, 4  ;;  %v7299_v9 = vsel %vm108_vm0, %v29216_v15, -inf }
 0x1de   :  { %26348 = vmatprep.subr.msk.bf16.mxu0 %vm28328_vm1, %v28881_v41  ;;  %v7609_v57 = vmul.f32 1.442695, %v7543_v25  ;;  %v7611_v60 = vmul.f32 1.442695, %v7544_v7  ;;  %v7279_v45 = vmax.f32 %v7277_v53, %v7278_v40  ;;  %v7298_v32 = vsel %vm108_vm0, %v29222_v18, -inf }
 0x1df   :  { %v7286_v20 = vmax.f32 %v7284_v56, %v7285_v10  ;;  %v7293_v6 = vmax.f32 %v7291_v12, %v7292_v46  ;;  %v7300_v33 = vmax.f32 %v7298_v32, %v7299_v9  ;;  %v29236_v58 = vpop.f32.mrb[70].mxu0 }
 0x1e0   :  { %24540 = vmatmul.mubr.msk.f32.vlgmr.msra.gmra.mrb[122].mxu1 %vm108_vm0, %v34545_v36  ;;  %27406 = vpow2.f32 %v7609_v57  ;;  %v7545_v47 = vsub.f32 %v29168_v52, %v7279_v45  ;;  %v7546_v50 = vsub.f32 %v29162_v35, %v7279_v45  ;;  %v7308_v51 = vsel %vm108_vm0, %v29236_v58, -inf  ;;  %v29244_v0 = vpop.f32.mrb[71].mxu0 }
 0x1e1   :  { %26345 = vmatpush3.bf16.xpose.msk.msra.mxu1 %vm28328_vm1, %v28867_v8  ;;  %24553 = vmatprep.mubr.msk.f32.mxu1 %vm108_vm0, %v28855_v34  ;;  %27408 = vpow2.f32 %v7611_v60  ;;  %v7287_v1 = vrot.slane %v7286_v20, 1  ;;  %v7294_v13 = vrot.slane %v7293_v6, 2  ;;  %v7301_v16 = vrot.slane %v7300_v33, 4 }
 0x1e2   :  { %26354 = vmatprep.subr.msk.bf16.mxu1 %vm28328_vm1, %v28896_v26  ;;  %v7613_v35 = vmul.f32 1.442695, %v7545_v47  ;;  %v7615_v52 = vmul.f32 1.442695, %v7546_v50  ;;  %v7307_v17 = vsel %vm108_vm0, %v29244_v0, -inf }
 0x1e3   :  { %v7288_v30 = vmax.f32 %v7286_v20, %v7287_v1  ;;  %v7295_v31 = vmax.f32 %v7293_v6, %v7294_v13  ;;  %v7302_v44 = vmax.f32 %v7300_v33, %v7301_v16  ;;  %v7309_v8 = vmax.f32 %v7307_v17, %v7308_v51  ;;  %v29256_v48 = vpop.f32.mrb[70].mxu1 }
 0x1e4   :  { %24547 = vmatmul.mubr.msk.f32.vlgmr.msra.gmra.mrb[124].mxu0 %vm108_vm0, %v28830_v54  ;;  %27410 = vpow2.f32 %v7613_v35  ;;  %v7317_v34 = vsel %vm108_vm0, %v29256_v48, -inf  ;;  %v29262_v49 = vpop.f32.mrb[71].mxu1 }
 0x1e5   :  { %26351 = vmatpush3.bf16.xpose.msk.msra.mxu0 %vm28328_vm1, %v28881_v41  ;;  %24560 = vmatprep.mubr.msk.f32.mxu0 %vm108_vm0, %v28869_v63  ;;  %27412 = vpow2.f32 %v7615_v52  ;;  %v7547_v62 = vsub.f32 %v29186_v27, %v7288_v30  ;;  %v7548_v4 = vsub.f32 %v29180_v61, %v7288_v30  ;;  %v7296_v19 = vrot.slane %v7295_v31, 1 }
 0x1e6   :  { %v29271_v54 = vpop.eup %27402  ;;  %v7303_v22 = vrot.slane %v7302_v44, 2  ;;  %v7310_v23 = vrot.slane %v7309_v8, 4  ;;  %v7316_v39 = vsel %vm108_vm0, %v29262_v49, -inf }
 0x1e7   :  { %34546 = vst [vmem:[#allocation4_spill] sm:$0xff] %v29271_v54  ;;  %v29275_v43 = vpop.eup %27404  ;;  %v7733_v41 = vsel %vm108_vm0, %v29271_v54, 0.0  ;;  %v7617_v2 = vmul.f32 1.442695, %v7547_v62  ;;  %v7619_v63 = vmul.f32 1.442695, %v7548_v4  ;;  %v7297_v5 = vmax.f32 %v7295_v31, %v7296_v19 }
 0x1e8   :  { %v29279_v28 = vpop.f32.mrb[72].mxu0  ;;  %24554 = vmatmul.mubr.msk.f32.vlgmr.msra.gmra.mrb[124].mxu1 %vm108_vm0, %v28848_v14  ;;  %v7734_v61 = vsel %vm108_vm0, %v29275_v43, 0.0  ;;  %v7304_v27 = vmax.f32 %v7302_v44, %v7303_v22  ;;  %v7311_v59 = vmax.f32 %v7309_v8, %v7310_v23  ;;  %v7318_v21 = vmax.f32 %v7316_v39, %v7317_v34 }
 0x1e9   :  { %v29285_v29 = vpop.f32.mrb[73].mxu0  ;;  %26357 = vmatpush3.bf16.xpose.msk.msra.mxu1 %vm28328_vm1, %v28896_v26  ;;  %24567 = vmatprep.mubr.msk.f32.mxu1 %vm108_vm0, %v28883_v11  ;;  %v7735_v53 = vadd.f32 %v7734_v61, %v7733_v41  ;;  %27414 = vpow2.f32 %v7617_v2  ;;  %v7549_v56 = vsub.f32 %v29202_v42, %v7297_v5  ;;  %v7550_v14 = vsub.f32 %v29198_v3, %v7297_v5 }
 0x1ea   :  { %v29294_v12 = vpop.eup %27406  ;;  %27416 = vpow2.f32 %v7619_v63  ;;  %v7305_v24 = vrot.slane %v7304_v27, 1  ;;  %v7312_v25 = vrot.slane %v7311_v59, 2  ;;  %v7319_v7 = vrot.slane %v7318_v21, 4 }
 0x1eb   :  { %34547 = vst [vmem:[#allocation10_spill] sm:$0xff] %v29294_v12  ;;  %v29296_v40 = vpop.eup %27408  ;;  %v7736_v10 = vrot.slane %v7735_v53, 4  ;;  %v7742_v38 = vsel %vm108_vm0, %v29294_v12, 0.0  ;;  %v7621_v26 = vmul.f32 1.442695, %v7549_v56  ;;  %v29304_v57 = vpop.f32.mrb[72].mxu1 }
 0x1ec   :  { %34548 = vst [vmem:[#allocation2_spill] sm:$0xff] %v29296_v40  ;;  %v7623_v11 = vmul.f32 1.442695, %v7550_v14  ;;  %24561 = vmatmul.mubr.msk.f32.vlgmr.msra.gmra.mrb[126].mxu0 %vm108_vm0, %v28862_v55  ;;  %v7743_v3 = vsel %vm108_vm0, %v29296_v40, 0.0  ;;  %v7306_v42 = vmax.f32 %v7304_v27, %v7305_v24  ;;  %v7313_v46 = vmax.f32 %v7311_v59, %v7312_v25  ;;  %v29308_v32 = vpop.f32.mrb[73].mxu1 }
 0x1ed   :  { %v7320_v9 = vmax.f32 %v7318_v21, %v7319_v7  ;;  %v7737_v60 = vadd.f32 %v7736_v10, %v7735_v53  ;;  %v29306_v45 = vadd.f32 %v7743_v3, %v7742_v38  ;;  %27418 = vpow2.f32 %v7621_v26 }
 0x1ee   :  { %v29310_v20 = vpop.eup %27410  ;;  %27420 = vpow2.f32 %v7623_v11  ;;  %v7551_v6 = vsub.f32 %v29222_v18, %v7306_v42  ;;  %v7552_v55 = vsub.f32 %v29216_v15, %v7306_v42  ;;  %v7314_v33 = vrot.slane %v7313_v46, 1 }
 0x1ef   :  { %34549 = vst [vmem:[#allocation6_spill] sm:$0xff] %v29310_v20  ;;  %v29314_v36 = vpop.eup %27412  ;;  %v7738_v47 = vrot.slane %v7737_v60, 2  ;;  %v7751_v50 = vsel %vm108_vm0, %v29310_v20, 0.0  ;;  %v7321_v51 = vrot.slane %v7320_v9, 2  ;;  %v29318_v1 = vpop.f32.mrb[74].mxu0  ;;  %v7326_v31 = vsel %vm108_vm0, %v29279_v28, -inf }
 0x1f0   :  { %24568 = vmatmul.mubr.msk.f32.vlgmr.msra.gmra.mrb[126].mxu1 %vm108_vm0, %v28876_v37  ;;  %v7752_v13 = vsel %vm108_vm0, %v29314_v36, 0.0  ;;  %v7625_v16 = vmul.f32 1.442695, %v7551_v6  ;;  %v7627_v18 = vmul.f32 1.442695, %v7552_v55  ;;  %v7315_v35 = vmax.f32 %v7313_v46, %v7314_v33  ;;  %v29324_v15 = vpop.f32.mrb[75].mxu0 }
 0x1f1   :  { %v7739_v52 = vadd.f32 %v7738_v47, %v7737_v60  ;;  %v7753_v17 = vadd.f32 %v7752_v13, %v7751_v50  ;;  %v7322_v30 = vmax.f32 %v7320_v9, %v7321_v51  ;;  %v7325_v37 = vsel %vm108_vm0, %v29285_v29, -inf }
 0x1f2   :  { %27422 = vpow2.f32 %v7625_v16  ;;  %v7553_v44 = vsub.f32 %v29244_v0, %v7315_v35  ;;  %v7554_v8 = vsub.f32 %v29236_v58, %v7315_v35  ;;  %v7327_v5 = vmax.f32 %v7325_v37, %v7326_v31 }
 0x1f3   :  { %v29332_v34 = vpop.eup %27414  ;;  %v7740_v62 = vrot.slane %v7739_v52, 1  ;;  %v7754_v4 = vrot.slane %v7753_v17, 4  ;;  %27424 = vpow2.f32 %v7627_v18  ;;  %v29334_v19 = vpop.f32.mrb[74].mxu1  ;;  %v7323_v0 = vrot.slane %v7322_v30, 1 }
 0x1f4   :  { %34550 = vst [vmem:[#allocation13_spill] sm:$0xff] %v29332_v34  ;;  %v29336_v22 = vpop.eup %27416  ;;  %v7760_v23 = vsel %vm108_vm0, %v29332_v34, 0.0  ;;  %v7629_v39 = vmul.f32 1.442695, %v7553_v44  ;;  %v7631_v41 = vmul.f32 1.442695, %v7554_v8 }
 0x1f5   :  { %34551 = vst [vmem:[#allocation3_spill] sm:$0xff] %v29336_v22  ;;  %v7741_v2 = vadd.f32 %v7740_v62, %v7739_v52  ;;  %v7755_v58 = vadd.f32 %v7754_v4, %v7753_v17  ;;  %v7761_v63 = vsel %vm108_vm0, %v29336_v22, 0.0  ;;  %v29342_v61 = vpop.f32.mrb[75].mxu1  ;;  %v7324_v59 = vmax.f32 %v7322_v30, %v7323_v0 }
 0x1f6   :  { %v29344_v27 = vadd.f32 %v7761_v63, %v7760_v23  ;;  %27426 = vpow2.f32 %v7629_v39  ;;  %v7344_v21 = vsel %vm108_vm0, %v29318_v1, -inf  ;;  %v7328_v14 = vrot.slane %v7327_v5, 4 }
 0x1f7   :  { %v29348_v53 = vpop.eup %27418  ;;  %27428 = vrcp.f32 %v7741_v2  ;;  %v7756_v56 = vrot.slane %v7755_v58, 2  ;;  %v7343_v24 = vsel %vm108_vm0, %v29324_v15, -inf  ;;  %v29352_v25 = vpop.f32.mrb[76].mxu0  ;;  %v7555_v38 = vsub.f32 %v29262_v49, %v7324_v59 }
 0x1f8   :  { %34552 = vst [vmem:[#allocation8_spill] sm:$0xff] %v29348_v53  ;;  %v29354_v7 = vpop.eup %27420  ;;  %v7769_v10 = vsel %vm108_vm0, %v29348_v53, 0.0  ;;  %27430 = vpow2.f32 %v7631_v41  ;;  %v29359_v26 = vpop.f32.mrb[77].mxu0  ;;  %v7556_v42 = vsub.f32 %v29256_v48, %v7324_v59  ;;  %v7329_v46 = vmax.f32 %v7327_v5, %v7328_v14 }
 0x1f9   :  { %v7757_v11 = vadd.f32 %v7756_v56, %v7755_v58  ;;  %v7770_v3 = vsel %vm108_vm0, %v29354_v7, 0.0  ;;  %v7633_v60 = vmul.f32 1.442695, %v7555_v38  ;;  %v7345_v6 = vmax.f32 %v7343_v24, %v7344_v21 }
 0x1fa   :  { %v7771_v9 = vadd.f32 %v7770_v3, %v7769_v10  ;;  %v7635_v33 = vmul.f32 1.442695, %v7556_v42  ;;  %v7330_v47 = vrot.slane %v7329_v46, 2  ;;  %v7335_v16 = vsel %vm108_vm0, %v29304_v57, -inf }
 0x1fb   :  { %v7758_v55 = vrot.slane %v7757_v11, 1  ;;  %v29364_v50 = vpop.f32.mrb[76].mxu1  ;;  %27432 = vpow2.f32 %v7633_v60  ;;  %v7346_v13 = vrot.slane %v7345_v6, 4  ;;  %v7362_v8 = vsel %vm108_vm0, %v29352_v25, -inf }
 0x1fc   :  { %v29366_v51 = vpop.eup %27422  ;;  %v7772_v49 = vrot.slane %v7771_v9, 4  ;;  %v29370_v18 = vpop.f32.mrb[77].mxu1  ;;  %27434 = vpow2.f32 %v7635_v33  ;;  %v7331_v17 = vmax.f32 %v7329_v46, %v7330_v47  ;;  %v7334_v4 = vsel %vm108_vm0, %v29308_v32, -inf }
 0x1fd   :  { %34553 = vst [vmem:[#allocation16_spill] sm:$0xff] %v29366_v51  ;;  %v29372_v48 = vpop.eup %27424  ;;  %v7759_v35 = vadd.f32 %v7758_v55, %v7757_v11  ;;  %v7778_v52 = vsel %vm108_vm0, %v29366_v51, 0.0  ;;  %v7347_v44 = vmax.f32 %v7345_v6, %v7346_v13  ;;  %v7336_v2 = vmax.f32 %v7334_v4, %v7335_v16 }
 0x1fe   :  { %34554 = vst [vmem:[#allocation5_spill] sm:$0xff] %v29372_v48  ;;  %v7773_v30 = vadd.f32 %v7772_v49, %v7771_v9  ;;  %v7779_v31 = vsel %vm108_vm0, %v29372_v48, 0.0  ;;  %v7332_v62 = vrot.slane %v7331_v17, 1  ;;  %v7361_v58 = vsel %vm108_vm0, %v29359_v26, -inf }
 0x1ff   :  { %27436 = vrcp.f32 %v7759_v35  ;;  %v29380_v37 = vadd.f32 %v7779_v31, %v7778_v52  ;;  %v29384_v23 = vpop.f32.mrb[78].mxu0  ;;  %v7348_v0 = vrot.slane %v7347_v44, 2  ;;  %v7363_v56 = vmax.f32 %v7361_v58, %v7362_v8 }
 0x200   :  { %v29386_v39 = vpop.eup %27426  ;;  %v7774_v41 = vrot.slane %v7773_v30, 2  ;;  %v29390_v63 = vpop.f32.mrb[79].mxu0  ;;  %v7333_v21 = vmax.f32 %v7331_v17, %v7332_v62  ;;  %v7337_v11 = vrot.slane %v7336_v2, 4 }
 0x201   :  { %34555 = vst [vmem:[#allocation11_spill] sm:$0xff] %v29386_v39  ;;  %v29392_v5 = vpop.eup %27428  ;;  %v7787_v59 = vsel %vm108_vm0, %v29386_v39, 0.0  ;;  %v7349_v38 = vmax.f32 %v7347_v44, %v7348_v0  ;;  %v7364_v13 = vrot.slane %v7363_v56, 4  ;;  %v7353_v44 = vsel %vm108_vm0, %v29334_v19, -inf }
 0x202   :  { %34556 = vst [vmem:[#allocation19_spill] sm:$0xff] %v29392_v5  ;;  %v29396_v14 = vpop.eup %27430  ;;  %v29400_v24 = vmul.f32 %v29392_v5, %v29275_v43  ;;  %v7775_v10 = vadd.f32 %v7774_v41, %v7773_v30  ;;  %v7557_v42 = vsub.f32 %v29285_v29, %v7333_v21  ;;  %v7558_v46 = vsub.f32 %v29279_v28, %v7333_v21 }
 0x203   :  { %v7788_v3 = vsel %vm108_vm0, %v29396_v14, 0.0  ;;  %v29406_v9 = vpop.f32.mrb[78].mxu1  ;;  %v7350_v55 = vrot.slane %v7349_v38, 1  ;;  %v7338_v33 = vmax.f32 %v7336_v2, %v7337_v11  ;;  %v7365_v31 = vmax.f32 %v7363_v56, %v7364_v13 }
 0x204   :  { %34557 = vst [vmem:[#allocation7_spill] sm:$0xff] %v29400_v24  ;;  %v7776_v60 = vrot.slane %v7775_v10, 1  ;;  %v7789_v6 = vadd.f32 %v7788_v3, %v7787_v59  ;;  %v29408_v47 = vpop.f32.mrb[79].mxu1  ;;  %v7637_v43 = vmul.f32 1.442695, %v7557_v42  ;;  %v7379_v13 = vsel %vm108_vm0, %v29390_v63, -inf }
 0x205   :  { %v7639_v49 = vmul.f32 1.442695, %v7558_v46  ;;  %v29410_v16 = vpop.eup %27432  ;;  %v7351_v17 = vmax.f32 %v7349_v38, %v7350_v55  ;;  %v7339_v30 = vrot.slane %v7338_v33, 2  ;;  %v7366_v11 = vrot.slane %v7365_v31, 2 }
 0x206   :  { %34558 = vst [vmem:[#allocation14_spill] sm:$0xff] %v29410_v16  ;;  %v7777_v35 = vadd.f32 %v7776_v60, %v7775_v10  ;;  %v7790_v52 = vrot.slane %v7789_v6, 4  ;;  %v29412_v29 = vpop.eup %27434  ;;  %v7796_v28 = vsel %vm108_vm0, %v29410_v16, 0.0  ;;  %27438 = vpow2.f32 %v7637_v43 }
 0x207   :  { %34559 = vst [vmem:[#allocation22_spill] sm:$0xff] %v29412_v29  ;;  %v29418_v8 = vpop.f32.mrb[80].mxu0  ;;  %v7797_v4 = vsel %vm108_vm0, %v29412_v29, 0.0  ;;  %v7561_v41 = vsub.f32 %v29324_v15, %v7351_v17  ;;  %v7562_v59 = vsub.f32 %v29318_v1, %v7351_v17  ;;  %v7340_v21 = vmax.f32 %v7338_v33, %v7339_v30 }
 0x208   :  { %27440 = vrcp.f32 %v7777_v35  ;;  %v7791_v62 = vadd.f32 %v7790_v52, %v7789_v6  ;;  %v29423_v0 = vpop.f32.mrb[81].mxu0  ;;  %v29427_v58 = vadd.f32 %v7797_v4, %v7796_v28  ;;  %v7367_v60 = vmax.f32 %v7365_v31, %v7366_v11 }
 0x209   :  { %v29425_v2 = vpop.eup %27436  ;;  %27442 = vpow2.f32 %v7639_v49  ;;  %v7645_v38 = vmul.f32 1.442695, %v7561_v41  ;;  %v7647_v3 = vmul.f32 1.442695, %v7562_v59  ;;  %v7341_v42 = vrot.slane %v7340_v21, 1 }
 0x20a   :  { %34560 = vst [vmem:[#allocation9_spill] sm:$0xff] %v29425_v2  ;;  %v29432_v56 = vmul.f32 %v29425_v2, %v29314_v36  ;;  %v7792_v10 = vrot.slane %v7791_v62, 2  ;;  %v7352_v6 = vsel %vm108_vm0, %v29342_v61, -inf  ;;  %v7380_v36 = vsel %vm108_vm0, %v29384_v23, -inf }
 0x20b   :  { %v29434_v15 = vpop.f32.mrb[80].mxu1  ;;  %27444 = vpow2.f32 %v7645_v38  ;;  %v7342_v1 = vmax.f32 %v7340_v21, %v7341_v42  ;;  %v7354_v33 = vmax.f32 %v7352_v6, %v7353_v44  ;;  %v7368_v49 = vrot.slane %v7367_v60, 1 }
 0x20c   :  { %34561 = vst [vmem:[#allocation17_spill] sm:$0xff] %v29432_v56  ;;  %v7793_v46 = vadd.f32 %v7792_v10, %v7791_v62  ;;  %v29438_v55 = vpop.f32.mrb[81].mxu1  ;;  %27446 = vpow2.f32 %v7647_v3  ;;  %v7371_v30 = vsel %vm108_vm0, %v29364_v50, -inf  ;;  %v7381_v4 = vmax.f32 %v7379_v13, %v7380_v36 }
 0x20d   :  { %v7559_v35 = vsub.f32 %v29308_v32, %v7342_v1  ;;  %v7560_v52 = vsub.f32 %v29304_v57, %v7342_v1  ;;  %v7355_v17 = vrot.slane %v7354_v33, 4  ;;  %v7369_v62 = vmax.f32 %v7367_v60, %v7368_v49 }
 0x20e   :  { %v7794_v43 = vrot.slane %v7793_v46, 1  ;;  %v7398_v44 = vsel %vm108_vm0, %v29418_v8, -inf  ;;  %v7370_v57 = vsel %vm108_vm0, %v29370_v18, -inf  ;;  %v7382_v1 = vrot.slane %v7381_v4, 4 }
 0x20f   :  { %v29448_v28 = vpop.f32.mrb[82].mxu0  ;;  %v7641_v21 = vmul.f32 1.442695, %v7559_v35  ;;  %v7643_v32 = vmul.f32 1.442695, %v7560_v52  ;;  %v7356_v10 = vmax.f32 %v7354_v33, %v7355_v17  ;;  %v7565_v3 = vsub.f32 %v29359_v26, %v7369_v62 }
 0x210   :  { %v7795_v31 = vadd.f32 %v7794_v43, %v7793_v46  ;;  %v29452_v41 = vpop.f32.mrb[83].mxu0  ;;  %v29454_v59 = vpop.eup %27438  ;;  %v7566_v42 = vsub.f32 %v29352_v25, %v7369_v62  ;;  %v7383_v35 = vmax.f32 %v7381_v4, %v7382_v1  ;;  %v7372_v52 = vmax.f32 %v7370_v57, %v7371_v30 }
 0x211   :  { %34562 = vst [vmem:[#allocation25_spill] sm:$0xff] %v29454_v59  ;;  %v7805_v11 = vsel %vm108_vm0, %v29454_v59, 0.0  ;;  %v7357_v6 = vrot.slane %v7356_v10, 2  ;;  %v7653_v43 = vmul.f32 1.442695, %v7565_v3 }
 0x212   :  { %v29458_v38 = vpop.eup %27440  ;;  %27448 = vrcp.f32 %v7795_v31  ;;  %v7655_v49 = vmul.f32 1.442695, %v7566_v42  ;;  %v7389_v31 = vsel %vm108_vm0, %v29406_v9, -inf  ;;  %v7384_v4 = vrot.slane %v7383_v35, 2 }
 0x213   :  { %34563 = vst [vmem:[#allocation12_spill] sm:$0xff] %v29458_v38  ;;  %v29464_v46 = vpop.eup %27442  ;;  %v29468_v60 = vmul.f32 %v29458_v38, %v29354_v7  ;;  %27450 = vpow2.f32 %v7641_v21  ;;  %v29470_v36 = vpop.f32.mrb[82].mxu1  ;;  %v7358_v13 = vmax.f32 %v7356_v10, %v7357_v6  ;;  %v7397_v7 = vsel %vm108_vm0, %v29423_v0, -inf }
 0x214   :  { %v7806_v33 = vsel %vm108_vm0, %v29464_v46, 0.0  ;;  %27452 = vpow2.f32 %v7643_v32  ;;  %v29474_v26 = vpop.f32.mrb[83].mxu1  ;;  %v7373_v57 = vrot.slane %v7372_v52, 4  ;;  %v7399_v3 = vmax.f32 %v7397_v7, %v7398_v44 }
 0x215   :  { %34564 = vst [vmem:[#allocation20_spill] sm:$0xff] %v29468_v60  ;;  %v7807_v25 = vadd.f32 %v7806_v33, %v7805_v11  ;;  %v29476_v17 = vpop.eup %27444  ;;  %27454 = vpow2.f32 %v7653_v43  ;;  %v7359_v11 = vrot.slane %v7358_v13, 1  ;;  %v7388_v43 = vsel %vm108_vm0, %v29408_v47, -inf }
 0x216   :  { %34565 = vst [vmem:[#allocation28_spill] sm:$0xff] %v29476_v17  ;;  %v29482_v62 = vpop.eup %27446  ;;  %v7823_v32 = vsel %vm108_vm0, %v29476_v17, 0.0  ;;  %27456 = vpow2.f32 %v7655_v49  ;;  %v7385_v60 = vmax.f32 %v7383_v35, %v7384_v4  ;;  %v7374_v56 = vmax.f32 %v7372_v52, %v7373_v57 }
 0x217   :  { %v7808_v21 = vrot.slane %v7807_v25, 4  ;;  %v29486_v10 = vpop.f32.mrb[84].mxu0  ;;  %v7824_v30 = vsel %vm108_vm0, %v29482_v62, 0.0  ;;  %v7360_v33 = vmax.f32 %v7358_v13, %v7359_v11  ;;  %v7400_v49 = vrot.slane %v7399_v3, 4 }
 0x218   :  { %v29490_v42 = vpop.f32.mrb[85].mxu0  ;;  %v7825_v1 = vadd.f32 %v7824_v30, %v7823_v32  ;;  %v7390_v24 = vmax.f32 %v7388_v43, %v7389_v31  ;;  %v7375_v7 = vrot.slane %v7374_v56, 2 }
 0x219   :  { %v7809_v6 = vadd.f32 %v7808_v21, %v7807_v25  ;;  %v7563_v48 = vsub.f32 %v29342_v61, %v7360_v33  ;;  %v7564_v51 = vsub.f32 %v29334_v19, %v7360_v33  ;;  %v7386_v25 = vrot.slane %v7385_v60, 1 }
 0x21a   :  { %v7826_v16 = vrot.slane %v7825_v1, 4  ;;  %v7401_v13 = vmax.f32 %v7399_v3, %v7400_v49  ;;  %v7391_v21 = vrot.slane %v7390_v24, 4  ;;  %v7376_v3 = vmax.f32 %v7374_v56, %v7375_v7 }
 0x21b   :  { %v7810_v29 = vrot.slane %v7809_v6, 2  ;;  %v29496_v22 = vpop.f32.mrb[84].mxu1  ;;  %v7649_v11 = vmul.f32 1.442695, %v7563_v48  ;;  %v7651_v4 = vmul.f32 1.442695, %v7564_v51  ;;  %v7387_v57 = vmax.f32 %v7385_v60, %v7386_v25 }
 0x21c   :  { %v29498_v44 = vpop.eup %27448  ;;  %v29500_v32 = vpop.f32.mrb[85].mxu1  ;;  %v7827_v61 = vadd.f32 %v7826_v16, %v7825_v1  ;;  %v7377_v25 = vrot.slane %v7376_v3, 1 }
 0x21d   :  { %34566 = vst [vmem:[#allocation15_spill] sm:$0xff] %v29498_v44  ;;  %v29502_v35 = vpop.eup %27450  ;;  %v29506_v52 = vmul.f32 %v29498_v44, %v29396_v14  ;;  %v7811_v31 = vadd.f32 %v7810_v29, %v7809_v6  ;;  %27458 = vpow2.f32 %v7649_v11  ;;  %v7569_v48 = vsub.f32 %v29390_v63, %v7387_v57 }
 0x21e   :  { %34567 = vst [vmem:[#allocation23_spill] sm:$0xff] %v29502_v35  ;;  %v29508_v19 = vpop.eup %27452  ;;  %v7814_v30 = vsel %vm108_vm0, %v29502_v35, 0.0  ;;  %v7828_v43 = vrot.slane %v7827_v61, 2  ;;  %27460 = vpow2.f32 %v7651_v4  ;;  %v7570_v29 = vsub.f32 %v29384_v23, %v7387_v57 }
 0x21f   :  { %34568 = vst [vmem:[#allocation31_spill] sm:$0xff] %v29506_v52  ;;  %34569 = vst [vmem:[#allocation18_spill] sm:$0xff] %v29508_v19  ;;  %v7812_v33 = vrot.slane %v7811_v31, 1  ;;  %v7815_v49 = vsel %vm108_vm0, %v29508_v19, 0.0  ;;  %v29514_v34 = vpop.f32.mrb[86].mxu0  ;;  %v29516_v14 = vpop.eup %27454  ;;  %v7402_v57 = vrot.slane %v7401_v13, 2 }
 0x220   :  { %34570 = vst [vmem:[#allocation26_spill] sm:$0xff] %v29516_v14  ;;  %v29518_v16 = vadd.f32 %v7815_v49, %v7814_v30  ;;  %v29522_v51 = vpop.f32.mrb[87].mxu0  ;;  %v29524_v56 = vpop.eup %27456  ;;  %v7829_v6 = vadd.f32 %v7828_v43, %v7827_v61  ;;  %v7841_v1 = vsel %vm108_vm0, %v29516_v14, 0.0  ;;  %v7661_v11 = vmul.f32 1.442695, %v7569_v48 }
 0x221   :  { %v7813_v60 = vadd.f32 %v7812_v33, %v7811_v31  ;;  %v7842_v7 = vsel %vm108_vm0, %v29524_v56, 0.0  ;;  %v7663_v30 = vmul.f32 1.442695, %v7570_v29  ;;  %v7378_v49 = vmax.f32 %v7376_v3, %v7377_v25 }
 0x222   :  { %v7830_v4 = vrot.slane %v7829_v6, 1  ;;  %v7843_v63 = vadd.f32 %v7842_v7, %v7841_v1  ;;  %v7416_v31 = vsel %vm108_vm0, %v29448_v28, -inf  ;;  %v7392_v61 = vmax.f32 %v7390_v24, %v7391_v21 }
 0x223   :  { %27462 = vrcp.f32 %v7813_v60  ;;  %v29530_v23 = vpop.f32.mrb[86].mxu1  ;;  %v7567_v48 = vsub.f32 %v29370_v18, %v7378_v49  ;;  %v7568_v29 = vsub.f32 %v29364_v50, %v7378_v49  ;;  %v7403_v60 = vmax.f32 %v7401_v13, %v7402_v57 }
 0x224   :  { %27464 = vpow2.f32 %v7661_v11  ;;  %v29534_v33 = vpop.f32.mrb[87].mxu1  ;;  %v7831_v43 = vadd.f32 %v7830_v4, %v7829_v6  ;;  %v7844_v52 = vrot.slane %v7843_v63, 4  ;;  %v7393_v1 = vrot.slane %v7392_v61, 2 }
 0x225   :  { %27466 = vpow2.f32 %v7663_v30  ;;  %v7657_v25 = vmul.f32 1.442695, %v7567_v48  ;;  %v7415_v7 = vsel %vm108_vm0, %v29452_v41, -inf  ;;  %v7659_v24 = vmul.f32 1.442695, %v7568_v29 }
 0x226   :  { %27468 = vrcp.f32 %v7831_v43  ;;  %v7845_v3 = vadd.f32 %v7844_v52, %v7843_v63  ;;  %v7404_v21 = vrot.slane %v7403_v60, 1  ;;  %v7394_v19 = vmax.f32 %v7392_v61, %v7393_v1 }
 0x227   :  { %v29540_v11 = vpop.f32.mrb[88].mxu0  ;;  %v7417_v6 = vmax.f32 %v7415_v7, %v7416_v31  ;;  %v29544_v30 = vpop.eup %27458  ;;  %v7745_v50 = vrot.slane %v29306_v45, 4  ;;  %27470 = vpow2.f32 %v7657_v25  ;;  %v7407_v13 = vsel %vm108_vm0, %v29434_v15, -inf }
 0x228   :  { %v29542_v4 = vpop.f32.mrb[89].mxu0  ;;  %34571 = vst [vmem:[#allocation34_spill] sm:$0xff] %v29544_v30  ;;  %v7846_v18 = vrot.slane %v7845_v3, 2  ;;  %v29549_v52 = vpop.eup %27460  ;;  %v7832_v63 = vsel %vm108_vm0, %v29544_v30, 0.0  ;;  %27472 = vpow2.f32 %v7659_v24  ;;  %v7405_v49 = vmax.f32 %v7403_v60, %v7404_v21 }
 0x229   :  { %34572 = vst [vmem:[#allocation21_spill] sm:$0xff] %v29549_v52  ;;  %v7395_v57 = vrot.slane %v7394_v19, 1  ;;  %v7833_v61 = vsel %vm108_vm0, %v29549_v52, 0.0  ;;  %v7418_v43 = vrot.slane %v7417_v6, 4  ;;  %v7406_v48 = vsel %vm108_vm0, %v29438_v55, -inf }
 0x22a   :  { %v7847_v31 = vadd.f32 %v7846_v18, %v7845_v3  ;;  %v29559_v1 = vadd.f32 %v7833_v61, %v7832_v63  ;;  %v7573_v25 = vsub.f32 %v29423_v0, %v7405_v49  ;;  %v7574_v7 = vsub.f32 %v29418_v8, %v7405_v49 }
 0x22b   :  { %v29557_v29 = vpop.f32.mrb[88].mxu1  ;;  %v7396_v30 = vmax.f32 %v7394_v19, %v7395_v57  ;;  %v29568_v3 = vadd.f32 %v7745_v50, %v29306_v45  ;;  %v7419_v18 = vmax.f32 %v7417_v6, %v7418_v43  ;;  %v7408_v52 = vmax.f32 %v7406_v48, %v7407_v13 }
 0x22c   :  { %v29563_v24 = vpop.f32.mrb[89].mxu1  ;;  %v7848_v21 = vrot.slane %v7847_v31, 1  ;;  %v7669_v0 = vmul.f32 1.442695, %v7573_v25  ;;  %v7671_v61 = vmul.f32 1.442695, %v7574_v7 }
 0x22d   :  { %v29565_v60 = vpop.eup %27462  ;;  %34574 = vst [vmem:[#allocation37_spill] sm:$0xff] %v29568_v3  ;;  %v7434_v8 = vsel %vm108_vm0, %v29486_v10, -inf  ;;  %v7571_v6 = vsub.f32 %v29408_v47, %v7396_v30  ;;  %v7572_v50 = vsub.f32 %v29406_v9, %v7396_v30  ;;  %v7420_v57 = vrot.slane %v7419_v18, 2 }
 0x22e   :  { %34573 = vst [vmem:[#allocation29_spill] sm:$0xff] %v29565_v60  ;;  %v29570_v35 = vpop.eup %27464  ;;  %v29574_v63 = vmul.f32 %v29565_v60, %v29464_v46  ;;  %v7849_v49 = vadd.f32 %v7848_v21, %v7847_v31  ;;  %27474 = vpow2.f32 %v7669_v0  ;;  %v7433_v43 = vsel %vm108_vm0, %v29490_v42, -inf }
 0x22f   :  { %34575 = vst [vmem:[#allocation24_spill] sm:$0xff] %v29570_v35  ;;  %v29578_v19 = vpop.eup %27466  ;;  %v7859_v45 = vsel %vm108_vm0, %v29570_v35, 0.0  ;;  %v29584_v13 = vpop.f32.mrb[90].mxu0  ;;  %v7665_v7 = vmul.f32 1.442695, %v7571_v6  ;;  %v7763_v9 = vrot.slane %v29344_v27, 4  ;;  %v7421_v21 = vmax.f32 %v7419_v18, %v7420_v57 }
 0x230   :  { %34576 = vst [vmem:[#allocation32_spill] sm:$0xff] %v29574_v63  ;;  %v7860_v46 = vsel %vm108_vm0, %v29578_v19, 0.0  ;;  %v29590_v48 = vpop.f32.mrb[91].mxu0  ;;  %v29592_v31 = vpop.eup %27468  ;;  %27476 = vrcp.f32 %v7849_v49  ;;  %v7667_v47 = vmul.f32 1.442695, %v7572_v50  ;;  %v7409_v40 = vrot.slane %v7408_v52, 4 }
 0x231   :  { %34577 = vst [vmem:[#allocation40_spill] sm:$0xff] %v29592_v31  ;;  %v7861_v25 = vadd.f32 %v7860_v46, %v7859_v45  ;;  %v29597_v30 = vmul.f32 %v29592_v31, %v29482_v62  ;;  %27478 = vpow2.f32 %v7671_v61  ;;  %v29599_v0 = vpop.eup %27470  ;;  %v7435_v12 = vmax.f32 %v7433_v43, %v7434_v8 }
 0x232   :  { %34579 = vst [vmem:[#allocation35_spill] sm:$0xff] %v29599_v0  ;;  %27480 = vpow2.f32 %v7665_v7  ;;  %v29603_v49 = vpop.eup %27472  ;;  %v7850_v45 = vsel %vm108_vm0, %v29599_v0, 0.0  ;;  %v7422_v6 = vrot.slane %v7421_v21, 1  ;;  %v7425_v62 = vsel %vm108_vm0, %v29470_v36, -inf }
 0x233   :  { %34578 = vst [vmem:[#allocation27_spill] sm:$0xff] %v29597_v30  ;;  %v7862_v63 = vrot.slane %v7861_v25, 4  ;;  %v29601_v35 = vpop.f32.mrb[90].mxu1  ;;  %34580 = vst [vmem:[#allocation30_spill] sm:$0xff] %v29603_v49  ;;  %27482 = vpow2.f32 %v7667_v47  ;;  %v7851_v50 = vsel %vm108_vm0, %v29603_v49, 0.0  ;;  %v7410_v46 = vmax.f32 %v7408_v52, %v7409_v40 }
 0x234   :  { %v29609_v61 = vpop.f32.mrb[91].mxu1  ;;  %v7436_v8 = vrot.slane %v7435_v12, 4  ;;  %v29613_v57 = vadd.f32 %v7851_v50, %v7850_v45  ;;  %v7423_v43 = vmax.f32 %v7421_v21, %v7422_v6  ;;  %v7452_v7 = vsel %vm108_vm0, %v29514_v34, -inf }
 0x235   :  { %v7863_v18 = vadd.f32 %v7862_v63, %v7861_v25  ;;  %v7424_v47 = vsel %vm108_vm0, %v29474_v26, -inf  ;;  %v7411_v0 = vrot.slane %v7410_v46, 2  ;;  %v7781_v63 = vrot.slane %v29380_v37, 4 }
 0x236   :  { %v7437_v14 = vmax.f32 %v7435_v12, %v7436_v8  ;;  %v7426_v31 = vmax.f32 %v7424_v47, %v7425_v62  ;;  %v7577_v40 = vsub.f32 %v29452_v41, %v7423_v43  ;;  %v7578_v52 = vsub.f32 %v29448_v28, %v7423_v43 }
 0x237   :  { %v7864_v30 = vrot.slane %v7863_v18, 2  ;;  %v29619_v17 = vpop.f32.mrb[92].mxu0  ;;  %v7451_v25 = vsel %vm108_vm0, %v29522_v51, -inf  ;;  %v7412_v6 = vmax.f32 %v7410_v46, %v7411_v0  ;;  %v29631_v12 = vadd.f32 %v7763_v9, %v29344_v27 }
 0x238   :  { %v29626_v21 = vpop.f32.mrb[93].mxu0  ;;  %v7438_v50 = vrot.slane %v7437_v14, 2  ;;  %v7427_v49 = vrot.slane %v7426_v31, 4  ;;  %v29628_v60 = vpop.eup %27474  ;;  %v7677_v62 = vmul.f32 1.442695, %v7577_v40  ;;  %v7453_v47 = vmax.f32 %v7451_v25, %v7452_v7 }
 0x239   :  { %v7865_v45 = vadd.f32 %v7864_v30, %v7863_v18  ;;  %34581 = vst [vmem:[#allocation38_spill] sm:$0xff] %v29628_v60  ;;  %34582 = vst [vmem:[#allocation33_spill] sm:$0xff] %v29631_v12  ;;  %v7679_v8 = vmul.f32 1.442695, %v7578_v52  ;;  %v7877_v43 = vsel %vm108_vm0, %v29628_v60, 0.0  ;;  %v7413_v59 = vrot.slane %v7412_v6, 1 }
 0x23a   :  { %v29633_v41 = vpop.eup %27476  ;;  %v7439_v44 = vmax.f32 %v7437_v14, %v7438_v50  ;;  %v29642_v18 = vadd.f32 %v7781_v63, %v29380_v37  ;;  %27484 = vpow2.f32 %v7677_v62  ;;  %v7428_v9 = vmax.f32 %v7426_v31, %v7427_v49 }
 0x23b   :  { %34583 = vst [vmem:[#allocation41_spill] sm:$0xff] %v29633_v41  ;;  %v7866_v28 = vrot.slane %v7865_v45, 1  ;;  %v29637_v30 = vpop.f32.mrb[92].mxu1  ;;  %v29639_v0 = vpop.eup %27478  ;;  %v29646_v27 = vmul.f32 %v29633_v41, %v29524_v56  ;;  %27486 = vpow2.f32 %v7679_v8  ;;  %v7414_v52 = vmax.f32 %v7412_v6, %v7413_v59 }
 0x23c   :  { %34584 = vst [vmem:[#allocation36_spill] sm:$0xff] %v29642_v18  ;;  %v29648_v46 = vpop.f32.mrb[93].mxu1  ;;  %v29650_v7 = vpop.eup %27480  ;;  %v7878_v14 = vsel %vm108_vm0, %v29639_v0, 0.0  ;;  %v7440_v56 = vrot.slane %v7439_v44, 1  ;;  %v7429_v50 = vrot.slane %v7428_v9, 2 }
 0x23d   :  { %34585 = vst [vmem:[#allocation39_spill] sm:$0xff] %v29646_v27  ;;  %34586 = vst [vmem:[#allocation42_spill] sm:$0xff] %v29650_v7  ;;  %v7867_v40 = vadd.f32 %v7866_v28, %v7865_v45  ;;  %v29654_v25 = vpop.eup %27482  ;;  %v7879_v37 = vadd.f32 %v7878_v14, %v7877_v43  ;;  %v7868_v63 = vsel %vm108_vm0, %v29650_v7, 0.0  ;;  %v7575_v49 = vsub.f32 %v29438_v55, %v7414_v52 }
 0x23e   :  { %34587 = vst [vmem:[#allocation43_spill] sm:$0xff] %v29654_v25  ;;  %v7869_v31 = vsel %vm108_vm0, %v29654_v25, 0.0  ;;  %v7576_v45 = vsub.f32 %v29434_v15, %v7414_v52  ;;  %v7441_v6 = vmax.f32 %v7439_v44, %v7440_v56  ;;  %v7430_v28 = vmax.f32 %v7428_v9, %v7429_v50 }
 0x23f   :  { %27488 = vrcp.f32 %v7867_v40  ;;  %v29662_v62 = vpop.f32.mrb[94].mxu0  ;;  %v7880_v8 = vrot.slane %v7879_v37, 4  ;;  %v29664_v59 = vadd.f32 %v7869_v31, %v7868_v63  ;;  %v7673_v27 = vmul.f32 1.442695, %v7575_v49 }
 0x240   :  { %v29666_v43 = vpop.f32.mrb[95].mxu0  ;;  %v7675_v40 = vmul.f32 1.442695, %v7576_v45  ;;  %v7454_v7 = vrot.slane %v7453_v47, 4  ;;  %v7581_v55 = vsub.f32 %v29490_v42, %v7441_v6  ;;  %v7582_v15 = vsub.f32 %v29486_v10, %v7441_v6 }
 0x241   :  { %v7881_v60 = vadd.f32 %v7880_v8, %v7879_v37  ;;  %27490 = vpow2.f32 %v7673_v27  ;;  %v7431_v52 = vrot.slane %v7430_v28, 1  ;;  %v7443_v44 = vsel %vm108_vm0, %v29496_v22, -inf }
 0x242   :  { %v7455_v63 = vmax.f32 %v7453_v47, %v7454_v7  ;;  %27492 = vpow2.f32 %v7675_v40  ;;  %v7685_v31 = vmul.f32 1.442695, %v7581_v55  ;;  %v7687_v37 = vmul.f32 1.442695, %v7582_v15 }
 0x243   :  { %v29674_v9 = vpop.f32.mrb[94].mxu1  ;;  %v7882_v50 = vrot.slane %v7881_v60, 2  ;;  %v7432_v45 = vmax.f32 %v7430_v28, %v7431_v52  ;;  %v7442_v10 = vsel %vm108_vm0, %v29500_v32, -inf  ;;  %v7470_v7 = vsel %vm108_vm0, %v29540_v11, -inf }
 0x244   :  { %v29677_v49 = vpop.f32.mrb[95].mxu1  ;;  %v7456_v42 = vrot.slane %v7455_v63, 2  ;;  %v29681_v27 = vpop.eup %27484  ;;  %27494 = vpow2.f32 %v7685_v31  ;;  %v7444_v8 = vmax.f32 %v7442_v10, %v7443_v44 }
 0x245   :  { %34588 = vst [vmem:[#allocation44_spill] sm:$0xff] %v29681_v27  ;;  %v7883_v47 = vadd.f32 %v7882_v50, %v7881_v60  ;;  %v29685_v6 = vpop.eup %27486  ;;  %v7895_v40 = vsel %vm108_vm0, %v29681_v27, 0.0  ;;  %27496 = vpow2.f32 %v7687_v37  ;;  %v7579_v28 = vsub.f32 %v29474_v26, %v7432_v45 }
 0x246   :  { %v7580_v55 = vsub.f32 %v29470_v36, %v7432_v45  ;;  %v7896_v60 = vsel %vm108_vm0, %v29685_v6, 0.0  ;;  %v7457_v50 = vmax.f32 %v7455_v63, %v7456_v42  ;;  %v7445_v31 = vrot.slane %v7444_v8, 4 }
 0x247   :  { %v29691_v15 = vpop.f32.mrb[96].mxu0  ;;  %v7884_v52 = vrot.slane %v7883_v47, 1  ;;  %v7897_v10 = vadd.f32 %v7896_v60, %v7895_v40  ;;  %v7681_v25 = vmul.f32 1.442695, %v7579_v28  ;;  %v7469_v26 = vsel %vm108_vm0, %v29542_v4, -inf }
 0x248   :  { %v29695_v56 = vpop.f32.mrb[97].mxu0  ;;  %v7683_v14 = vmul.f32 1.442695, %v7580_v55  ;;  %v7458_v45 = vrot.slane %v7457_v50, 1  ;;  %v7446_v27 = vmax.f32 %v7444_v8, %v7445_v31  ;;  %v7799_v63 = vrot.slane %v29427_v58, 4 }
 0x249   :  { %v29697_v44 = vpop.eup %27488  ;;  %v7885_v37 = vadd.f32 %v7884_v52, %v7883_v47  ;;  %v7898_v42 = vrot.slane %v7897_v10, 4  ;;  %27498 = vpow2.f32 %v7681_v25  ;;  %v7471_v41 = vmax.f32 %v7469_v26, %v7470_v7 }
 0x24a   :  { %34589 = vst [vmem:[#allocation45_spill] sm:$0xff] %v29697_v44  ;;  %v29703_v36 = vmul.f32 %v29697_v44, %v29578_v19  ;;  %v7459_v40 = vmax.f32 %v7457_v50, %v7458_v45  ;;  %v7447_v28 = vrot.slane %v7446_v27, 2  ;;  %v7461_v55 = vsel %vm108_vm0, %v29530_v23, -inf }
 0x24b   :  { %v29706_v39 = vpop.f32.mrb[96].mxu1  ;;  %27500 = vrcp.f32 %v7885_v37  ;;  %v29712_v19 = vpop.eup %27490  ;;  %v7899_v47 = vadd.f32 %v7898_v42, %v7897_v10  ;;  %v7472_v8 = vrot.slane %v7471_v41, 4  ;;  %v7460_v52 = vsel %vm108_vm0, %v29534_v33, -inf }
 0x24c   :  { %34590 = vst [vmem:[#allocation46_spill] sm:$0xff] %v29703_v36  ;;  %v29710_v60 = vpop.f32.mrb[97].mxu1  ;;  %34591 = vst [vmem:[#allocation47_spill] sm:$0xff] %v29712_v19  ;;  %27502 = vpow2.f32 %v7683_v14  ;;  %v29716_v25 = vpop.eup %27492  ;;  %v7886_v7 = vsel %vm108_vm0, %v29712_v19, 0.0  ;;  %v7585_v50 = vsub.f32 %v29522_v51, %v7459_v40  ;;  %v7586_v31 = vsub.f32 %v29514_v34, %v7459_v40 }
 0x24d   :  { %34592 = vst [vmem:[#allocation48_spill] sm:$0xff] %v29716_v25  ;;  %v7448_v26 = vmax.f32 %v7446_v27, %v7447_v28  ;;  %v7900_v37 = vrot.slane %v7899_v47, 2  ;;  %v7887_v45 = vsel %vm108_vm0, %v29716_v25, 0.0  ;;  %v7473_v10 = vmax.f32 %v7471_v41, %v7472_v8 }
 0x24e   :  { %v7462_v14 = vmax.f32 %v7460_v52, %v7461_v55  ;;  %v29726_v36 = vpop.eup %27494  ;;  %v29728_v44 = vadd.f32 %v7887_v45, %v7886_v7  ;;  %v7693_v18 = vmul.f32 1.442695, %v7585_v50  ;;  %v7695_v38 = vmul.f32 1.442695, %v7586_v31 }
 0x24f   :  { %v29724_v42 = vpop.f32.mrb[98].mxu0  ;;  %34593 = vst [vmem:[#allocation49_spill] sm:$0xff] %v29726_v36  ;;  %v7449_v19 = vrot.slane %v7448_v26, 1  ;;  %v29732_v51 = vpop.eup %27496  ;;  %v7901_v34 = vadd.f32 %v7900_v37, %v7899_v47  ;;  %v7913_v27 = vsel %vm108_vm0, %v29726_v36, 0.0  ;;  %v7474_v40 = vrot.slane %v7473_v10, 2 }
 0x250   :  { %v29730_v53 = vpop.f32.mrb[99].mxu0  ;;  %v7463_v41 = vrot.slane %v7462_v14, 4  ;;  %v29737_v28 = vadd.f32 %v7799_v63, %v29427_v58  ;;  %v7914_v55 = vsel %vm108_vm0, %v29732_v51, 0.0  ;;  %27504 = vpow2.f32 %v7693_v18 }
 0x251   :  { %v7450_v8 = vmax.f32 %v7448_v26, %v7449_v19  ;;  %v7902_v52 = vrot.slane %v7901_v34, 1  ;;  %v7915_v7 = vadd.f32 %v7914_v55, %v7913_v27  ;;  %27506 = vpow2.f32 %v7695_v38 }
 0x252   :  { %34594 = vst [vmem:[#allocation50_spill] sm:$0xff] %v29737_v28  ;;  %v7475_v50 = vmax.f32 %v7473_v10, %v7474_v40  ;;  %v7488_v45 = vsel %vm108_vm0, %v29584_v13, -inf  ;;  %v7464_v58 = vmax.f32 %v7462_v14, %v7463_v41  ;;  %v7487_v38 = vsel %vm108_vm0, %v29590_v48, -inf }
 0x253   :  { %v29741_v31 = vpop.f32.mrb[98].mxu1  ;;  %v7583_v47 = vsub.f32 %v29500_v32, %v7450_v8  ;;  %v7584_v37 = vsub.f32 %v29496_v22, %v7450_v8  ;;  %v29749_v25 = vpop.eup %27498  ;;  %v7903_v18 = vadd.f32 %v7902_v52, %v7901_v34  ;;  %v7916_v19 = vrot.slane %v7915_v7, 4 }
 0x254   :  { %v29747_v63 = vpop.f32.mrb[99].mxu1  ;;  %34595 = vst [vmem:[#allocation51_spill] sm:$0xff] %v29749_v25  ;;  %v7476_v26 = vrot.slane %v7475_v50, 1  ;;  %v7817_v32 = vrot.slane %v29518_v16, 4  ;;  %v7904_v22 = vsel %vm108_vm0, %v29749_v25, 0.0  ;;  %v7465_v36 = vrot.slane %v7464_v58, 2 }
 0x255   :  { %v29753_v10 = vpop.eup %27500  ;;  %v7689_v27 = vmul.f32 1.442695, %v7583_v47  ;;  %v7691_v40 = vmul.f32 1.442695, %v7584_v37  ;;  %27508 = vrcp.f32 %v7903_v18  ;;  %v7917_v34 = vadd.f32 %v7916_v19, %v7915_v7 }
 0x256   :  { %34596 = vst [vmem:[#allocation52_spill] sm:$0xff] %v29753_v10  ;;  %v29758_v14 = vpop.eup %27502  ;;  %v29762_v41 = vmul.f32 %v29753_v10, %v29639_v0  ;;  %v7477_v55 = vmax.f32 %v7475_v50, %v7476_v26  ;;  %v7489_v12 = vmax.f32 %v7487_v38, %v7488_v45  ;;  %v7466_v50 = vmax.f32 %v7464_v58, %v7465_v36 }
 0x257   :  { %34597 = vst [vmem:[#allocation53_spill] sm:$0xff] %v29758_v14  ;;  %v29764_v8 = vpop.f32.mrb[100].mxu0  ;;  %v7905_v52 = vsel %vm108_vm0, %v29758_v14, 0.0  ;;  %27510 = vpow2.f32 %v7689_v27  ;;  %v7918_v47 = vrot.slane %v7917_v34, 2  ;;  %v29776_v26 = vadd.f32 %v7817_v32, %v29518_v16 }
 0x258   :  { %34598 = vst [vmem:[#allocation54_spill] sm:$0xff] %v29762_v41  ;;  %v29768_v25 = vpop.f32.mrb[101].mxu0  ;;  %v29770_v37 = vadd.f32 %v7905_v52, %v7904_v22  ;;  %27512 = vpow2.f32 %v7691_v40  ;;  %v7589_v0 = vsub.f32 %v29542_v4, %v7477_v55  ;;  %v7590_v7 = vsub.f32 %v29540_v11, %v7477_v55 }
 0x259   :  { %v7490_v19 = vrot.slane %v7489_v12, 4  ;;  %34599 = vst [vmem:[#allocation55_spill] sm:$0xff] %v29776_v26  ;;  %v7919_v27 = vadd.f32 %v7918_v47, %v7917_v34  ;;  %v7479_v45 = vsel %vm108_vm0, %v29557_v29, -inf  ;;  %v7467_v4 = vrot.slane %v7466_v50, 1 }
 0x25a   :  { %v7701_v41 = vmul.f32 1.442695, %v7589_v0  ;;  %v29782_v22 = vpop.eup %27504  ;;  %v7703_v40 = vmul.f32 1.442695, %v7590_v7  ;;  %v7478_v11 = vsel %vm108_vm0, %v29563_v24, -inf  ;;  %v7506_v34 = vsel %vm108_vm0, %v29619_v17, -inf }
 0x25b   :  { %v29780_v38 = vpop.f32.mrb[100].mxu1  ;;  %34600 = vst [vmem:[#allocation56_spill] sm:$0xff] %v29782_v22  ;;  %v7491_v52 = vmax.f32 %v7489_v12, %v7490_v19  ;;  %v29788_v58 = vpop.eup %27506  ;;  %v7920_v16 = vrot.slane %v7919_v27, 1  ;;  %v7931_v32 = vsel %vm108_vm0, %v29782_v22, 0.0  ;;  %v7468_v12 = vmax.f32 %v7466_v50, %v7467_v4 }
 0x25c   :  { %v29786_v36 = vpop.f32.mrb[101].mxu1  ;;  %27514 = vpow2.f32 %v7701_v41  ;;  %v7932_v55 = vsel %vm108_vm0, %v29788_v58, 0.0  ;;  %v7835_v0 = vrot.slane %v29559_v1, 4  ;;  %v7480_v18 = vmax.f32 %v7478_v11, %v7479_v45 }
 0x25d   :  { %27516 = vpow2.f32 %v7703_v40  ;;  %v7492_v47 = vrot.slane %v7491_v52, 2  ;;  %v7921_v7 = vadd.f32 %v7920_v16, %v7919_v27  ;;  %v7933_v19 = vadd.f32 %v7932_v55, %v7931_v32 }
 0x25e   :  { %v7587_v10 = vsub.f32 %v29534_v33, %v7468_v12  ;;  %v7588_v41 = vsub.f32 %v29530_v23, %v7468_v12  ;;  %v7505_v28 = vsel %vm108_vm0, %v29626_v21, -inf  ;;  %v7481_v4 = vrot.slane %v7480_v18, 4 }
 0x25f   :  { %v29797_v14 = vpop.f32.mrb[102].mxu0  ;;  %v7493_v22 = vmax.f32 %v7491_v52, %v7492_v47  ;;  %v29805_v40 = vpop.eup %27508  ;;  %27518 = vrcp.f32 %v7921_v7  ;;  %v7934_v50 = vrot.slane %v7933_v19, 4  ;;  %v7507_v27 = vmax.f32 %v7505_v28, %v7506_v34 }
 0x260   :  { %v29803_v2 = vpop.f32.mrb[103].mxu0  ;;  %34601 = vst [vmem:[#allocation57_spill] sm:$0xff] %v29805_v40  ;;  %v29811_v45 = vmul.f32 %v29805_v40, %v29685_v6  ;;  %v7697_v33 = vmul.f32 1.442695, %v7587_v10  ;;  %v7699_v23 = vmul.f32 1.442695, %v7588_v41  ;;  %v7482_v12 = vmax.f32 %v7480_v18, %v7481_v4 }
 0x261   :  { %v29807_v16 = vpop.eup %27510  ;;  %v7494_v52 = vrot.slane %v7493_v22, 1  ;;  %v7935_v32 = vadd.f32 %v7934_v50, %v7933_v19  ;;  %v7508_v47 = vrot.slane %v7507_v27, 4  ;;  %v29820_v28 = vadd.f32 %v7835_v0, %v29559_v1 }
 0x262   :  { %34602 = vst [vmem:[#allocation58_spill] sm:$0xff] %v29807_v16  ;;  %34603 = vst [vmem:[#allocation59_spill] sm:$0xff] %v29811_v45  ;;  %v29813_v11 = vpop.eup %27512  ;;  %v7922_v55 = vsel %vm108_vm0, %v29807_v16, 0.0  ;;  %27520 = vpow2.f32 %v7697_v33  ;;  %v7483_v19 = vrot.slane %v7482_v12, 2  ;;  %v7496_v33 = vsel %vm108_vm0, %v29609_v61, -inf }
 0x263   :  { %34604 = vst [vmem:[#allocation60_spill] sm:$0xff] %v29813_v11  ;;  %v29817_v7 = vpop.f32.mrb[102].mxu1  ;;  %34605 = vst [vmem:[#allocation61_spill] sm:$0xff] %v29820_v28  ;;  %v7923_v6 = vsel %vm108_vm0, %v29813_v11, 0.0  ;;  %v7495_v10 = vmax.f32 %v7493_v22, %v7494_v52  ;;  %v7936_v41 = vrot.slane %v7935_v32, 2  ;;  %27522 = vpow2.f32 %v7699_v23 }
 0x264   :  { %v29824_v34 = vpop.f32.mrb[103].mxu1  ;;  %v29826_v45 = vadd.f32 %v7923_v6, %v7922_v55  ;;  %v7509_v1 = vmax.f32 %v7507_v27, %v7508_v47  ;;  %v7484_v11 = vmax.f32 %v7482_v12, %v7483_v19  ;;  %v7497_v22 = vsel %vm108_vm0, %v29601_v35, -inf }
 0x265   :  { %v7593_v50 = vsub.f32 %v29590_v48, %v7495_v10  ;;  %v7594_v4 = vsub.f32 %v29584_v13, %v7495_v10  ;;  %v7937_v16 = vadd.f32 %v7936_v41, %v7935_v32  ;;  %v7498_v18 = vmax.f32 %v7496_v33, %v7497_v22 }
 0x266   :  { %v29831_v0 = vpop.eup %27514  ;;  %v7510_v27 = vrot.slane %v7509_v1, 2  ;;  %v7485_v6 = vrot.slane %v7484_v11, 1 }
 0x267   :  { %34606 = vst [vmem:[#allocation62_spill] sm:$0xff] %v29831_v0  ;;  %v29837_v52 = vpop.f32.mrb[104].mxu0  ;;  %v29839_v23 = vpop.eup %27516  ;;  %v7949_v48 = vsel %vm108_vm0, %v29831_v0, 0.0  ;;  %v7709_v55 = vmul.f32 1.442695, %v7593_v50  ;;  %v7938_v32 = vrot.slane %v7937_v16, 1 }
 0x268   :  { %v7711_v13 = vmul.f32 1.442695, %v7594_v4  ;;  %v7950_v12 = vsel %vm108_vm0, %v29839_v23, 0.0  ;;  %v29846_v10 = vpop.f32.mrb[105].mxu0  ;;  %v7511_v19 = vmax.f32 %v7509_v1, %v7510_v27  ;;  %v7486_v50 = vmax.f32 %v7484_v11, %v7485_v6 }
 0x269   :  { %v7951_v41 = vadd.f32 %v7950_v12, %v7949_v48  ;;  %27524 = vpow2.f32 %v7709_v55  ;;  %v29848_v40 = vpop.eup %27518  ;;  %v7939_v26 = vadd.f32 %v7938_v32, %v7937_v16  ;;  %v7524_v4 = vsel %vm108_vm0, %v29662_v62, -inf }
 0x26a   :  { %34607 = vst [vmem:[#allocation63_spill] sm:$0xff] %v29848_v40  ;;  %27526 = vpow2.f32 %v7711_v13  ;;  %v29856_v0 = vmul.f32 %v29848_v40, %v29732_v51  ;;  %v7512_v20 = vrot.slane %v7511_v19, 1  ;;  %v7499_v48 = vrot.slane %v7498_v18, 4 }
 0x26b   :  { %v29852_v47 = vpop.f32.mrb[104].mxu1  ;;  %v7952_v28 = vrot.slane %v7951_v41, 4  ;;  %27528 = vrcp.f32 %v7939_v26  ;;  %v7591_v1 = vsub.f32 %v29563_v24, %v7486_v50  ;;  %v7592_v16 = vsub.f32 %v29557_v29, %v7486_v50 }
 0x26c   :  { %34608 = vst [vmem:[#allocation64_spill] sm:$0xff] %v29856_v0  ;;  %v29858_v55 = vpop.f32.mrb[105].mxu1  ;;  %v7523_v11 = vsel %vm108_vm0, %v29666_v43, -inf  ;;  %v29864_v22 = vpop.eup %27520  ;;  %v7513_v13 = vmax.f32 %v7511_v19, %v7512_v20  ;;  %v7500_v27 = vmax.f32 %v7498_v18, %v7499_v48  ;;  %v7853_v12 = vrot.slane %v29613_v57, 4 }
 0x26d   :  { %34609 = vst [vmem:[#allocation65_spill] sm:$0xff] %v29864_v22  ;;  %v7953_v33 = vadd.f32 %v7952_v28, %v7951_v41  ;;  %v7525_v51 = vmax.f32 %v7523_v11, %v7524_v4  ;;  %v29866_v32 = vpop.eup %27522  ;;  %v7940_v26 = vsel %vm108_vm0, %v29864_v22, 0.0  ;;  %v7705_v6 = vmul.f32 1.442695, %v7591_v1 }
 0x26e   :  { %34610 = vst [vmem:[#allocation66_spill] sm:$0xff] %v29866_v32  ;;  %v7707_v24 = vmul.f32 1.442695, %v7592_v16  ;;  %v7941_v29 = vsel %vm108_vm0, %v29866_v32, 0.0  ;;  %v7597_v50 = vsub.f32 %v29626_v21, %v7513_v13  ;;  %v7598_v28 = vsub.f32 %v29619_v17, %v7513_v13 }
 0x26f   :  { %v7954_v0 = vrot.slane %v7953_v33, 2  ;;  %v29875_v20 = vpop.f32.mrb[106].mxu0  ;;  %v29877_v18 = vadd.f32 %v7941_v29, %v7940_v26  ;;  %27530 = vpow2.f32 %v7705_v6  ;;  %v7501_v41 = vrot.slane %v7500_v27, 2 }
 0x270   :  { %v7526_v19 = vrot.slane %v7525_v51, 4  ;;  %v29879_v4 = vpop.f32.mrb[107].mxu0  ;;  %27532 = vpow2.f32 %v7707_v24  ;;  %v7717_v1 = vmul.f32 1.442695, %v7597_v50  ;;  %v7719_v16 = vmul.f32 1.442695, %v7598_v28 }
 0x271   :  { %v7955_v48 = vadd.f32 %v7954_v0, %v7953_v33  ;;  %v7502_v11 = vmax.f32 %v7500_v27, %v7501_v41  ;;  %v7515_v21 = vsel %vm108_vm0, %v29637_v30, -inf  ;;  %v6390_v17 = vsel %vm108_vm0, %v29691_v15, -inf }
 0x272   :  { %v7527_v22 = vmax.f32 %v7525_v51, %v7526_v19  ;;  %27534 = vpow2.f32 %v7717_v1  ;;  %v7514_v0 = vsel %vm108_vm0, %v29648_v46, -inf  ;;  %v6389_v33 = vsel %vm108_vm0, %v29695_v56, -inf }
 0x273   :  { %v29885_v13 = vpop.f32.mrb[106].mxu1  ;;  %v29887_v26 = vpop.eup %27524  ;;  %v7956_v6 = vrot.slane %v7955_v48, 1  ;;  %v29898_v24 = vadd.f32 %v7853_v12, %v29613_v57  ;;  %27536 = vpow2.f32 %v7719_v16  ;;  %v7503_v50 = vrot.slane %v7502_v11, 1 }
 0x274   :  { %34611 = vst [vmem:[#allocation67_spill] sm:$0xff] %v29887_v26  ;;  %v29893_v27 = vpop.f32.mrb[107].mxu1  ;;  %v29895_v51 = vpop.eup %27526  ;;  %v7967_v29 = vsel %vm108_vm0, %v29887_v26, 0.0  ;;  %v7528_v19 = vrot.slane %v7527_v22, 2  ;;  %v7516_v1 = vmax.f32 %v7514_v0, %v7515_v21  ;;  %v7871_v40 = vrot.slane %v29664_v59, 4 }
 0x275   :  { %34612 = vst [vmem:[#allocation68_spill] sm:$0xff] %v29893_v27  ;;  %34613 = vst [vmem:[#allocation69_spill] sm:$0xff] %v29898_v24  ;;  %v7957_v28 = vadd.f32 %v7956_v6, %v7955_v48  ;;  %v7968_v41 = vsel %vm108_vm0, %v29895_v51, 0.0  ;;  %v29904_v32 = vpop.eup %27528  ;;  %v7504_v5 = vmax.f32 %v7502_v11, %v7503_v50  ;;  %v6391_v54 = vmax.f32 %v6389_v33, %v6390_v17 }
 0x276   :  { %34614 = vst [vmem:[#allocation70_spill] sm:$0xff] %v29904_v32  ;;  %v7969_v3 = vadd.f32 %v7968_v41, %v7967_v29  ;;  %v29911_v12 = vmul.f32 %v29904_v32, %v29788_v58  ;;  %v7529_v48 = vmax.f32 %v7527_v22, %v7528_v19  ;;  %v7517_v16 = vrot.slane %v7516_v1, 4 }
 0x277   :  { %v29907_v57 = vpop.f32.mrb[108].mxu0  ;;  %27538 = vrcp.f32 %v7957_v28  ;;  %v7595_v21 = vsub.f32 %v29609_v61, %v7504_v5  ;;  %v7596_v0 = vsub.f32 %v29601_v35, %v7504_v5  ;;  %v6392_v27 = vrot.slane %v6391_v54, 4 }
 0x278   :  { %34615 = vst [vmem:[#allocation71_spill] sm:$0xff] %v29911_v12  ;;  %v29913_v6 = vpop.f32.mrb[109].mxu0  ;;  %v7970_v26 = vrot.slane %v7969_v3, 4  ;;  %v7530_v29 = vrot.slane %v7529_v48, 1  ;;  %v7518_v11 = vmax.f32 %v7516_v1, %v7517_v16  ;;  %v7533_v17 = vsel %vm108_vm0, %v29674_v9, -inf }
 0x279   :  { %34616 = vst [vmem:[#allocation72_spill] sm:$0xff] %v29913_v6  ;;  %v7532_v58 = vsel %vm108_vm0, %v29677_v49, -inf  ;;  %v29921_v33 = vpop.eup %27530  ;;  %v7713_v50 = vmul.f32 1.442695, %v7595_v21  ;;  %v7715_v28 = vmul.f32 1.442695, %v7596_v0  ;;  %v6393_v41 = vmax.f32 %v6391_v54, %v6392_v27 }
 0x27a   :  { %34617 = vst [vmem:[#allocation73_spill] sm:$0xff] %v29921_v33  ;;  %v7971_v22 = vadd.f32 %v7970_v26, %v7969_v3  ;;  %v29925_v61 = vpop.eup %27532  ;;  %v7958_v5 = vsel %vm108_vm0, %v29921_v33, 0.0  ;;  %v7531_v35 = vmax.f32 %v7529_v48, %v7530_v29  ;;  %v7519_v1 = vrot.slane %v7518_v11, 2 }
 0x27b   :  { %v29923_v19 = vpop.f32.mrb[108].mxu1  ;;  %34618 = vst [vmem:[#allocation74_spill] sm:$0xff] %v29925_v61  ;;  %v7534_v16 = vmax.f32 %v7532_v58, %v7533_v17  ;;  %v7959_v6 = vsel %vm108_vm0, %v29925_v61, 0.0  ;;  %27540 = vpow2.f32 %v7713_v50  ;;  %v6394_v3 = vrot.slane %v6393_v41, 2 }
 0x27c   :  { %v29929_v12 = vpop.f32.mrb[109].mxu1  ;;  %v7972_v32 = vrot.slane %v7971_v22, 2  ;;  %v29933_v26 = vpop.eup %27534  ;;  %v29935_v54 = vadd.f32 %v7959_v6, %v7958_v5  ;;  %27542 = vpow2.f32 %v7715_v28  ;;  %v7601_v27 = vsub.f32 %v29666_v43, %v7531_v35 }
 0x27d   :  { %34619 = vst [vmem:[#allocation75_spill] sm:$0xff] %v29929_v12  ;;  %34620 = vst [vmem:[#allocation76_spill] sm:$0xff] %v29933_v26  ;;  %v7602_v21 = vsub.f32 %v29662_v62, %v7531_v35  ;;  %v29939_v48 = vpop.eup %27536  ;;  %v7985_v29 = vsel %vm108_vm0, %v29933_v26, 0.0  ;;  %v7520_v17 = vmax.f32 %v7518_v11, %v7519_v1  ;;  %v6395_v58 = vmax.f32 %v6393_v41, %v6394_v3 }
 0x27e   :  { %v7973_v0 = vadd.f32 %v7972_v32, %v7971_v22  ;;  %v7986_v6 = vsel %vm108_vm0, %v29939_v48, 0.0  ;;  %v7725_v28 = vmul.f32 1.442695, %v7601_v27  ;;  %v29953_v11 = vadd.f32 %v7871_v40, %v29664_v59 }
 0x27f   :  { %v29943_v61 = vpop.f32.mrb[110].mxu0  ;;  %v7727_v5 = vmul.f32 1.442695, %v7602_v21  ;;  %v7987_v33 = vadd.f32 %v7986_v6, %v7985_v29  ;;  %v7521_v62 = vrot.slane %v7520_v17, 1  ;;  %v6396_v35 = vrot.slane %v6395_v58, 1 }
 0x280   :  { %v7974_v43 = vrot.slane %v7973_v0, 1  ;;  %v29948_v12 = vpop.f32.mrb[111].mxu0  ;;  %34622 = vst [vmem:[#allocation78_spill] sm:$0xff] %v29953_v11  ;;  %v7889_v22 = vrot.slane %v29728_v44, 4  ;;  %27544 = vpow2.f32 %v7725_v28  ;;  %v7535_v41 = vrot.slane %v7534_v16, 4 }
 0x281   :  { %v29950_v32 = vpop.eup %27538  ;;  %v7988_v27 = vrot.slane %v7987_v33, 4  ;;  %27546 = vpow2.f32 %v7727_v5  ;;  %v7522_v29 = vmax.f32 %v7520_v17, %v7521_v62  ;;  %v6397_v6 = vmax.f32 %v6395_v58, %v6396_v35 }
 0x282   :  { %34621 = vst [vmem:[#allocation77_spill] sm:$0xff] %v29950_v32  ;;  %v29958_v1 = vmul.f32 %v29950_v32, %v29839_v23  ;;  %v7975_v3 = vadd.f32 %v7974_v43, %v7973_v0  ;;  %v7536_v50 = vmax.f32 %v7534_v16, %v7535_v41  ;;  %v6399_v59 = vsel %vm108_vm0, %v29706_v39, -inf }
 0x283   :  { %v29960_v21 = vpop.f32.mrb[110].mxu1  ;;  %v7989_v28 = vadd.f32 %v7988_v27, %v7987_v33  ;;  %v6398_v26 = vsel %vm108_vm0, %v29710_v60, -inf  ;;  %v6408_v23 = vsel %vm108_vm0, %v29724_v42, -inf  ;;  %v7599_v0 = vsub.f32 %v29648_v46, %v7522_v29 }
 0x284   :  { %34623 = vst [vmem:[#allocation79_spill] sm:$0xff] %v29958_v1  ;;  %v29964_v40 = vpop.f32.mrb[111].mxu1  ;;  %27548 = vrcp.f32 %v7975_v3  ;;  %v7600_v5 = vsub.f32 %v29637_v30, %v7522_v29  ;;  %v6677_v17 = vsub.f32 %v29695_v56, %v6397_v6  ;;  %v6678_v16 = vsub.f32 %v29691_v15, %v6397_v6 }
 0x285   :  { %34624 = vst [vmem:[#allocation80_spill] sm:$0xff] %v29964_v40  ;;  %v29974_v58 = vpop.eup %27540  ;;  %v7990_v43 = vrot.slane %v7989_v28, 2  ;;  %v7537_v62 = vrot.slane %v7536_v50, 2  ;;  %v6400_v35 = vmax.f32 %v6398_v26, %v6399_v59  ;;  %v6407_v33 = vsel %vm108_vm0, %v29730_v53, -inf }
 0x286   :  { %34625 = vst [vmem:[#allocation81_spill] sm:$0xff] %v29974_v58  ;;  %v29980_v3 = vpop.eup %27542  ;;  %v7976_v46 = vsel %vm108_vm0, %v29974_v58, 0.0  ;;  %v7721_v30 = vmul.f32 1.442695, %v7599_v0  ;;  %v7723_v27 = vmul.f32 1.442695, %v7600_v5  ;;  %v6409_v56 = vmax.f32 %v6407_v33, %v6408_v23 }
 0x287   :  { %v29978_v41 = vpop.f32.mrb[112].mxu0  ;;  %34627 = vst [vmem:[#allocation83_spill] sm:$0xff] %v29980_v3  ;;  %v7991_v15 = vadd.f32 %v7990_v43, %v7989_v28  ;;  %v7977_v6 = vsel %vm108_vm0, %v29980_v3, 0.0  ;;  %v6741_v26 = vmul.f32 1.442695, %v6677_v17  ;;  %v7538_v32 = vmax.f32 %v7536_v50, %v7537_v62 }
 0x288   :  { %34626 = vst [vmem:[#allocation82_spill] sm:$0xff] %v29978_v41  ;;  %v29984_v29 = vpop.f32.mrb[113].mxu0  ;;  %v6743_v59 = vmul.f32 1.442695, %v6678_v16  ;;  %v29988_v1 = vadd.f32 %v7977_v6, %v7976_v46  ;;  %27550 = vpow2.f32 %v7721_v30  ;;  %v6401_v24 = vrot.slane %v6400_v35, 4 }
 0x289   :  { %v7992_v40 = vrot.slane %v7991_v15, 1  ;;  %27552 = vpow2.f32 %v7723_v27  ;;  %v6410_v0 = vrot.slane %v6409_v56, 4  ;;  %v29996_v28 = vadd.f32 %v7889_v22, %v29728_v44 }
 0x28a   :  { %v29993_v23 = vpop.eup %27544  ;;  %27554 = vpow2.f32 %v6741_v26  ;;  %v7539_v17 = vrot.slane %v7538_v32, 1  ;;  %v6402_v16 = vmax.f32 %v6400_v35, %v6401_v24  ;;  %v6417_v44 = vsel %vm108_vm0, %v29741_v31, -inf }
 0x28b   :  { %v29991_v5 = vpop.f32.mrb[112].mxu1  ;;  %34628 = vst [vmem:[#allocation84_spill] sm:$0xff] %v29993_v23  ;;  %34629 = vst [vmem:[#allocation85_spill] sm:$0xff] %v29996_v28  ;;  %v30000_v33 = vpop.eup %27546  ;;  %v7993_v50 = vadd.f32 %v7992_v40, %v7991_v15  ;;  %v8003_v62 = vsel %vm108_vm0, %v29993_v23, 0.0  ;;  %27556 = vpow2.f32 %v6743_v59  ;;  %v6411_v46 = vmax.f32 %v6409_v56, %v6410_v0 }
 0x28c   :  { %v29998_v43 = vpop.f32.mrb[113].mxu1  ;;  %v8004_v30 = vsel %vm108_vm0, %v30000_v33, 0.0  ;;  %v7540_v27 = vmax.f32 %v7538_v32, %v7539_v17  ;;  %v6403_v6 = vrot.slane %v6402_v16, 2  ;;  %v6416_v40 = vsel %vm108_vm0, %v29747_v63, -inf }
 0x28d   :  { %27558 = vrcp.f32 %v7993_v50  ;;  %v8005_v24 = vadd.f32 %v8004_v30, %v8003_v62  ;;  %v6412_v35 = vrot.slane %v6411_v46, 2  ;;  %v6418_v30 = vmax.f32 %v6416_v40, %v6417_v44 }
 0x28e   :  { %v30008_v22 = vpop.eup %27548  ;;  %v7603_v32 = vsub.f32 %v29677_v49, %v7540_v27  ;;  %v7604_v59 = vsub.f32 %v29674_v9, %v7540_v27  ;;  %v6404_v50 = vmax.f32 %v6402_v16, %v6403_v6  ;;  %v6426_v58 = vsel %vm108_vm0, %v29764_v8, -inf }
 0x28f   :  { %34630 = vst [vmem:[#allocation86_spill] sm:$0xff] %v30008_v22  ;;  %v30012_v15 = vpop.f32.mrb[114].mxu0  ;;  %v30017_v26 = vmul.f32 %v30008_v22, %v29895_v51  ;;  %v8006_v17 = vrot.slane %v8005_v24, 4  ;;  %v6413_v62 = vmax.f32 %v6411_v46, %v6412_v35  ;;  %v6425_v56 = vsel %vm108_vm0, %v29768_v25, -inf }
 0x290   :  { %v30021_v0 = vpop.f32.mrb[115].mxu0  ;;  %v7729_v41 = vmul.f32 1.442695, %v7603_v32  ;;  %v7731_v3 = vmul.f32 1.442695, %v7604_v59  ;;  %v6419_v49 = vrot.slane %v6418_v30, 4  ;;  %v6427_v46 = vmax.f32 %v6425_v56, %v6426_v58 }
 0x291   :  { %34631 = vst [vmem:[#allocation87_spill] sm:$0xff] %v30017_v26  ;;  %v8007_v51 = vadd.f32 %v8006_v17, %v8005_v24  ;;  %v6405_v26 = vrot.slane %v6404_v50, 1  ;;  %v6414_v23 = vrot.slane %v6413_v62, 1  ;;  %v7907_v16 = vrot.slane %v29770_v37, 4 }
 0x292   :  { %v30029_v9 = vpop.eup %27550  ;;  %27560 = vpow2.f32 %v7729_v41  ;;  %v6435_v27 = vsel %vm108_vm0, %v29780_v38, -inf  ;;  %v6420_v58 = vmax.f32 %v6418_v30, %v6419_v49  ;;  %v6428_v56 = vrot.slane %v6427_v46, 4 }
 0x293   :  { %v30027_v22 = vpop.f32.mrb[114].mxu1  ;;  %34632 = vst [vmem:[#allocation88_spill] sm:$0xff] %v30029_v9  ;;  %v30036_v44 = vpop.eup %27552  ;;  %v8008_v35 = vrot.slane %v8007_v51, 2  ;;  %v7994_v24 = vsel %vm108_vm0, %v30029_v9, 0.0  ;;  %27562 = vpow2.f32 %v7731_v3  ;;  %v6406_v40 = vmax.f32 %v6404_v50, %v6405_v26 }
 0x294   :  { %v30034_v6 = vpop.f32.mrb[115].mxu1  ;;  %34634 = vst [vmem:[#allocation90_spill] sm:$0xff] %v30036_v44  ;;  %v30040_v32 = vpop.eup %27554  ;;  %v7995_v59 = vsel %vm108_vm0, %v30036_v44, 0.0  ;;  %v6415_v41 = vmax.f32 %v6413_v62, %v6414_v23 }
 0x295   :  { %34633 = vst [vmem:[#allocation89_spill] sm:$0xff] %v30034_v6  ;;  %v30044_v17 = vpop.eup %27556  ;;  %v8009_v28 = vadd.f32 %v8008_v35, %v8007_v51  ;;  %v30046_v11 = vadd.f32 %v7995_v59, %v7994_v24  ;;  %v6869_v6 = vsel %vm108_vm0, %v30040_v32, 0.0  ;;  %v6679_v9 = vsub.f32 %v29710_v60, %v6406_v40 }
 0x296   :  { %v6870_v26 = vsel %vm108_vm0, %v30044_v17, 0.0  ;;  %v6680_v50 = vsub.f32 %v29706_v39, %v6406_v40  ;;  %v6681_v23 = vsub.f32 %v29730_v53, %v6415_v41  ;;  %v6682_v62 = vsub.f32 %v29724_v42, %v6415_v41 }
 0x297   :  { %34635 = vst [vmem:[#allocation91_spill] sm:$0xff] %v30046_v11  ;;  %v30051_v3 = vpop.f32.mrb[116].mxu0  ;;  %v30060_v51 = vpop.eup %27558  ;;  %v8010_v49 = vrot.slane %v8009_v28, 1  ;;  %v6871_v35 = vadd.f32 %v6870_v26, %v6869_v6  ;;  %v6745_v24 = vmul.f32 1.442695, %v6679_v9  ;;  %v6434_v60 = vsel %vm108_vm0, %v29786_v36, -inf }
 0x298   :  { %v30058_v30 = vpop.f32.mrb[117].mxu0  ;;  %34637 = vst [vmem:[#allocation93_spill] sm:$0xff] %v30060_v51  ;;  %v30065_v59 = vadd.f32 %v7907_v16, %v29770_v37  ;;  %v30069_v39 = vmul.f32 %v30060_v51, %v29939_v48  ;;  %v6747_v53 = vmul.f32 1.442695, %v6680_v50  ;;  %v6749_v40 = vmul.f32 1.442695, %v6681_v23 }
 0x299   :  { %34636 = vst [vmem:[#allocation92_spill] sm:$0xff] %v30058_v30  ;;  %v8011_v42 = vadd.f32 %v8010_v49, %v8009_v28  ;;  %v6872_v41 = vrot.slane %v6871_v35, 4  ;;  %27564 = vpow2.f32 %v6745_v24  ;;  %v6751_v44 = vmul.f32 1.442695, %v6682_v62 }
 0x29a   :  { %34638 = vst [vmem:[#allocation94_spill] sm:$0xff] %v30065_v59  ;;  %34639 = vst [vmem:[#allocation95_spill] sm:$0xff] %v30069_v39  ;;  %27566 = vpow2.f32 %v6747_v53  ;;  %v6421_v9 = vrot.slane %v6420_v58, 2  ;;  %v6429_v6 = vmax.f32 %v6427_v46, %v6428_v56  ;;  %v6436_v26 = vmax.f32 %v6434_v60, %v6435_v27 }
 0x29b   :  { %v30071_v11 = vpop.f32.mrb[116].mxu1  ;;  %v7925_v37 = vrot.slane %v29826_v45, 4  ;;  %27568 = vrcp.f32 %v8011_v42  ;;  %v6873_v16 = vadd.f32 %v6872_v41, %v6871_v35  ;;  %v6444_v48 = vsel %vm108_vm0, %v29797_v14, -inf }
 0x29c   :  { %v30073_v30 = vpop.f32.mrb[117].mxu1  ;;  %v30078_v50 = vpop.eup %27560  ;;  %27570 = vpow2.f32 %v6749_v40  ;;  %v6422_v28 = vmax.f32 %v6420_v58, %v6421_v9  ;;  %v6430_v23 = vrot.slane %v6429_v6, 2  ;;  %v6437_v62 = vrot.slane %v6436_v26, 4 }
 0x29d   :  { %34640 = vst [vmem:[#allocation96_spill] sm:$0xff] %v30078_v50  ;;  %v30080_v49 = vpop.eup %27562  ;;  %v7943_v46 = vrot.slane %v29877_v18, 4  ;;  %v8012_v27 = vsel %vm108_vm0, %v30078_v50, 0.0  ;;  %27572 = vpow2.f32 %v6751_v44  ;;  %v6443_v56 = vsel %vm108_vm0, %v29803_v2, -inf }
 0x29e   :  { %34641 = vst [vmem:[#allocation97_spill] sm:$0xff] %v30080_v49  ;;  %v8013_v24 = vsel %vm108_vm0, %v30080_v49, 0.0  ;;  %v6423_v60 = vrot.slane %v6422_v28, 1  ;;  %v6431_v58 = vmax.f32 %v6429_v6, %v6430_v23  ;;  %v6438_v53 = vmax.f32 %v6436_v26, %v6437_v62 }
 0x29f   :  { %v30087_v35 = vpop.f32.mrb[118].mxu0  ;;  %v6874_v42 = vrot.slane %v6873_v16, 2  ;;  %v30093_v41 = vadd.f32 %v8013_v24, %v8012_v27  ;;  %v6445_v9 = vmax.f32 %v6443_v56, %v6444_v48  ;;  %v6453_v44 = vsel %vm108_vm0, %v29817_v7, -inf }
 0x2a0   :  { %34642 = vst [vmem:[#allocation98_spill] sm:$0xff] %v30087_v35  ;;  %v30091_v40 = vpop.f32.mrb[119].mxu0  ;;  %v6424_v39 = vmax.f32 %v6422_v28, %v6423_v60  ;;  %v6432_v50 = vrot.slane %v6431_v58, 1  ;;  %v6439_v51 = vrot.slane %v6438_v53, 2  ;;  %v6452_v59 = vsel %vm108_vm0, %v29824_v34, -inf }
 0x2a1   :  { %34643 = vst [vmem:[#allocation99_spill] sm:$0xff] %v30091_v40  ;;  %34644 = vst [vmem:[#allocation100_spill] sm:$0xff] %v30093_v41  ;;  %v30100_v49 = vadd.f32 %v7925_v37, %v29826_v45  ;;  %v30103_v6 = vadd.f32 %v7943_v46, %v29877_v18  ;;  %v6446_v26 = vrot.slane %v6445_v9, 4  ;;  %v6454_v23 = vmax.f32 %v6452_v59, %v6453_v44 }
 0x2a2   :  { %v6683_v48 = vsub.f32 %v29747_v63, %v6424_v39  ;;  %v6684_v27 = vsub.f32 %v29741_v31, %v6424_v39  ;;  %v6433_v28 = vmax.f32 %v6431_v58, %v6432_v50  ;;  %v6440_v56 = vmax.f32 %v6438_v53, %v6439_v51 }
 0x2a3   :  { %34645 = vst [vmem:[#allocation101_spill] sm:$0xff] %v30100_v49  ;;  %34646 = vst [vmem:[#allocation102_spill] sm:$0xff] %v30103_v6  ;;  %v30105_v62 = vpop.f32.mrb[118].mxu1  ;;  %v30111_v60 = vpop.eup %27564  ;;  %v7961_v45 = vrot.slane %v29935_v54, 4  ;;  %v7979_v37 = vrot.slane %v29988_v1, 4  ;;  %v30115_v18 = vadd.f32 %v6874_v42, %v6873_v16  ;;  %v6447_v46 = vmax.f32 %v6445_v9, %v6446_v26 }
 0x2a4   :  { %34647 = vst [vmem:[#allocation103_spill] sm:$0xff] %v30105_v62  ;;  %v30109_v24 = vpop.f32.mrb[119].mxu1  ;;  %v30117_v59 = vpop.eup %27566  ;;  %v6878_v63 = vsel %vm108_vm0, %v30111_v60, 0.0  ;;  %v6753_v44 = vmul.f32 1.442695, %v6683_v48  ;;  %v6685_v51 = vsub.f32 %v29768_v25, %v6433_v28  ;;  %v6686_v58 = vsub.f32 %v29764_v8, %v6433_v28 }
 0x2a5   :  { %34648 = vst [vmem:[#allocation104_spill] sm:$0xff] %v30109_v24  ;;  %v6755_v31 = vmul.f32 1.442695, %v6684_v27  ;;  %v30122_v39 = vpop.eup %27568  ;;  %v6879_v50 = vsel %vm108_vm0, %v30117_v59, 0.0  ;;  %v6441_v53 = vrot.slane %v6440_v56, 1  ;;  %v6455_v16 = vrot.slane %v6454_v23, 4 }
 0x2a6   :  { %34649 = vst [vmem:[#allocation105_spill] sm:$0xff] %v30122_v39  ;;  %v30129_v9 = vpop.eup %27570  ;;  %v30133_v26 = vmul.f32 %v30122_v39, %v30000_v33  ;;  %v30135_v48 = vadd.f32 %v6879_v50, %v6878_v63  ;;  %27574 = vpow2.f32 %v6753_v44  ;;  %v6757_v25 = vmul.f32 1.442695, %v6685_v51 }
 0x2a7   :  { %v30127_v42 = vpop.f32.mrb[120].mxu0  ;;  %v30139_v41 = vpop.eup %27572  ;;  %v6887_v8 = vsel %vm108_vm0, %v30129_v9, 0.0  ;;  %27576 = vpow2.f32 %v6755_v31  ;;  %v6759_v28 = vmul.f32 1.442695, %v6686_v58  ;;  %v6442_v6 = vmax.f32 %v6440_v56, %v6441_v53 }
 0x2a8   :  { %34650 = vst [vmem:[#allocation106_spill] sm:$0xff] %v30127_v42  ;;  %34651 = vst [vmem:[#allocation107_spill] sm:$0xff] %v30133_v26  ;;  %v30137_v27 = vpop.f32.mrb[121].mxu0  ;;  %v6888_v49 = vsel %vm108_vm0, %v30139_v41, 0.0  ;;  %27578 = vpow2.f32 %v6757_v25  ;;  %v6448_v33 = vrot.slane %v6447_v46, 2  ;;  %v6462_v63 = vsel %vm108_vm0, %v29837_v52, -inf }
 0x2a9   :  { %34652 = vst [vmem:[#allocation108_spill] sm:$0xff] %v30137_v27  ;;  %v6889_v44 = vadd.f32 %v6888_v49, %v6887_v8  ;;  %27580 = vpow2.f32 %v6759_v28  ;;  %v6687_v51 = vsub.f32 %v29786_v36, %v6442_v6  ;;  %v6688_v50 = vsub.f32 %v29780_v38, %v6442_v6 }
 0x2aa   :  { %v30152_v31 = vadd.f32 %v7961_v45, %v29935_v54  ;;  %v6449_v56 = vmax.f32 %v6447_v46, %v6448_v33  ;;  %v6456_v58 = vmax.f32 %v6454_v23, %v6455_v16  ;;  %v6461_v53 = vsel %vm108_vm0, %v29846_v10, -inf }
 0x2ab   :  { %v30149_v26 = vpop.f32.mrb[120].mxu1  ;;  %v6890_v39 = vrot.slane %v6889_v44, 4  ;;  %v6761_v27 = vmul.f32 1.442695, %v6687_v51  ;;  %v6763_v49 = vmul.f32 1.442695, %v6688_v50  ;;  %v6463_v8 = vmax.f32 %v6461_v53, %v6462_v63 }
 0x2ac   :  { %34653 = vst [vmem:[#allocation109_spill] sm:$0xff] %v30149_v26  ;;  %34654 = vst [vmem:[#allocation110_spill] sm:$0xff] %v30152_v31  ;;  %v30156_v25 = vpop.f32.mrb[121].mxu1  ;;  %v30159_v36 = vadd.f32 %v7979_v37, %v29988_v1  ;;  %v6450_v38 = vrot.slane %v6449_v56, 1  ;;  %v6457_v6 = vrot.slane %v6456_v58, 2  ;;  %v6471_v54 = vsel %vm108_vm0, %v29852_v47, -inf }
 0x2ad   :  { %34655 = vst [vmem:[#allocation111_spill] sm:$0xff] %v30156_v25  ;;  %27582 = vpow2.f32 %v6761_v27  ;;  %v6464_v23 = vrot.slane %v6463_v8, 4  ;;  %v6470_v46 = vsel %vm108_vm0, %v29858_v55, -inf  ;;  %v6891_v1 = vadd.f32 %v6890_v39, %v6889_v44 }
 0x2ae   :  { %34656 = vst [vmem:[#allocation112_spill] sm:$0xff] %v30159_v36  ;;  %27584 = vpow2.f32 %v6763_v49  ;;  %v6451_v28 = vmax.f32 %v6449_v56, %v6450_v38  ;;  %v6458_v33 = vmax.f32 %v6456_v58, %v6457_v6  ;;  %v6472_v63 = vmax.f32 %v6470_v46, %v6471_v54 }
 0x2af   :  { %v30166_v16 = vpop.f32.mrb[122].mxu0  ;;  %v6465_v37 = vmax.f32 %v6463_v8, %v6464_v23  ;;  %v6480_v51 = vsel %vm108_vm0, %v29875_v20, -inf  ;;  %v6479_v50 = vsel %vm108_vm0, %v29879_v4, -inf  ;;  %v6881_v27 = vrot.slane %v30135_v48, 4 }
 0x2b0   :  { %34657 = vst [vmem:[#allocation113_spill] sm:$0xff] %v30166_v16  ;;  %v30172_v53 = vpop.eup %27574  ;;  %v6689_v45 = vsub.f32 %v29803_v2, %v6451_v28  ;;  %v6690_v36 = vsub.f32 %v29797_v14, %v6451_v28  ;;  %v6459_v49 = vrot.slane %v6458_v33, 1  ;;  %v6473_v58 = vrot.slane %v6472_v63, 4  ;;  %v30185_v2 = vpop.f32.mrb[123].mxu0 }
 0x2b1   :  { %v30177_v56 = vpop.eup %27576  ;;  %v6896_v39 = vsel %vm108_vm0, %v30172_v53, 0.0  ;;  %v6466_v44 = vrot.slane %v6465_v37, 2  ;;  %v6481_v8 = vmax.f32 %v6479_v50, %v6480_v51  ;;  %34658 = vst [vmem:[#allocation114_spill] sm:$0xff] %v30185_v2  ;;  %v6892_v28 = vrot.slane %v6891_v1, 2 }
 0x2b2   :  { %v30181_v38 = vpop.eup %27578  ;;  %v6897_v6 = vsel %vm108_vm0, %v30177_v56, 0.0  ;;  %v6765_v54 = vmul.f32 1.442695, %v6689_v45  ;;  %v6767_v23 = vmul.f32 1.442695, %v6690_v36  ;;  %v6460_v46 = vmax.f32 %v6458_v33, %v6459_v49 }
 0x2b3   :  { %v30187_v14 = vpop.eup %27580  ;;  %v6898_v31 = vadd.f32 %v6897_v6, %v6896_v39  ;;  %v6905_v16 = vsel %vm108_vm0, %v30181_v38, 0.0  ;;  %v6467_v25 = vmax.f32 %v6465_v37, %v6466_v44  ;;  %v6474_v42 = vmax.f32 %v6472_v63, %v6473_v58  ;;  %v30195_v6 = vpop.f32.mrb[122].mxu1 }
 0x2b4   :  { %34659 = vst [vmem:[#allocation115_spill] sm:$0xff] %v30187_v14  ;;  %v6906_v51 = vsel %vm108_vm0, %v30187_v14, 0.0  ;;  %27586 = vpow2.f32 %v6765_v54  ;;  %v6691_v50 = vsub.f32 %v29824_v34, %v6460_v46  ;;  %v6692_v45 = vsub.f32 %v29817_v7, %v6460_v46  ;;  %34660 = vst [vmem:[#allocation116_spill] sm:$0xff] %v30195_v6  ;;  %v34670_v6 = vld [vmem:[#allocation75_spill] sm:$0xff] }
 0x2b5   :  { %v6899_v36 = vrot.slane %v6898_v31, 4  ;;  %v6907_v33 = vadd.f32 %v6906_v51, %v6905_v16  ;;  %27588 = vpow2.f32 %v6767_v23  ;;  %v6468_v49 = vrot.slane %v6467_v25, 1 }
 0x2b6   :  { %v6769_v2 = vmul.f32 1.442695, %v6691_v50  ;;  %v6771_v26 = vmul.f32 1.442695, %v6692_v45  ;;  %v6482_v39 = vrot.slane %v6481_v8, 4  ;;  %v30200_v37 = vadd.f32 %v6881_v27, %v30135_v48 }
 0x2b7   :  { %v30197_v24 = vpop.eup %27582  ;;  %v30202_v44 = vadd.f32 %v6892_v28, %v6891_v1  ;;  %v6908_v34 = vrot.slane %v6907_v33, 4  ;;  %v6469_v54 = vmax.f32 %v6467_v25, %v6468_v49  ;;  %v6475_v23 = vrot.slane %v6474_v42, 2  ;;  %v30214_v1 = vpop.f32.mrb[123].mxu1 }
 0x2b8   :  { %34661 = vst [vmem:[#allocation117_spill] sm:$0xff] %v30197_v24  ;;  %v30204_v7 = vpop.eup %27584  ;;  %v6914_v16 = vsel %vm108_vm0, %v30197_v24, 0.0  ;;  %27590 = vpow2.f32 %v6769_v2  ;;  %v6483_v63 = vmax.f32 %v6481_v8, %v6482_v39  ;;  %v30208_v58 = vadd.f32 %v6899_v36, %v6898_v31  ;;  %34663 = vst [vmem:[#allocation119_spill] sm:$0xff] %v30214_v1  ;;  %v34664_v31 = vld [vmem:[#allocation68_spill] sm:$0xff] }
 0x2b9   :  { %34662 = vst [vmem:[#allocation118_spill] sm:$0xff] %v30204_v7  ;;  %v6915_v46 = vsel %vm108_vm0, %v30204_v7, 0.0  ;;  %27592 = vpow2.f32 %v6771_v26  ;;  %v6489_v48 = vsel %vm108_vm0, %v29885_v13, -inf  ;;  %v6693_v27 = vsub.f32 %v29846_v10, %v6469_v54  ;;  %v34665_v1 = vld [vmem:[#allocation72_spill] sm:$0xff] }
 0x2ba   :  { %v30216_v25 = vadd.f32 %v6915_v46, %v6914_v16  ;;  %v6694_v28 = vsub.f32 %v29837_v52, %v6469_v54  ;;  %v6476_v2 = vmax.f32 %v6474_v42, %v6475_v23  ;;  %v6909_v51 = vadd.f32 %v6908_v34, %v6907_v33  ;;  %v30228_v42 = vpop.f32.mrb[124].mxu0 }
 0x2bb   :  { %v6484_v8 = vrot.slane %v6483_v63, 2  ;;  %v6488_v50 = vsel %vm108_vm0, %v34664_v31, -inf  ;;  %v6498_v26 = vsel %vm108_vm0, %v29907_v57, -inf  ;;  %v6773_v36 = vmul.f32 1.442695, %v6693_v27  ;;  %34666 = vst [vmem:[#allocation68_spill] sm:$0xff] %v30228_v42 }
 0x2bc   :  { %v6775_v49 = vmul.f32 1.442695, %v6694_v28  ;;  %v6477_v39 = vrot.slane %v6476_v2, 1  ;;  %v6490_v10 = vmax.f32 %v6488_v50, %v6489_v48  ;;  %v6497_v52 = vsel %vm108_vm0, %v34665_v1, -inf  ;;  %v30258_v14 = vpop.f32.mrb[124].mxu1 }
 0x2bd   :  { %v6485_v46 = vmax.f32 %v6483_v63, %v6484_v8  ;;  %27594 = vpow2.f32 %v6773_v36  ;;  %v6499_v23 = vmax.f32 %v6497_v52, %v6498_v26  ;;  %v6910_v27 = vrot.slane %v6909_v51, 2  ;;  %34671 = vst [vmem:[#allocation75_spill] sm:$0xff] %v30258_v14 }
 0x2be   :  { %v30230_v33 = vpop.eup %27586  ;;  %v6478_v54 = vmax.f32 %v6476_v2, %v6477_v39  ;;  %27596 = vpow2.f32 %v6775_v49  ;;  %v6917_v48 = vrot.slane %v30216_v25, 4  ;;  %v6491_v26 = vrot.slane %v6490_v10, 4 }
 0x2bf   :  { %34667 = vst [vmem:[#allocation72_spill] sm:$0xff] %v30230_v33  ;;  %v30233_v45 = vpop.eup %27588  ;;  %v6923_v28 = vsel %vm108_vm0, %v30230_v33, 0.0  ;;  %v6486_v63 = vrot.slane %v6485_v46, 1  ;;  %v6500_v39 = vrot.slane %v6499_v23, 4  ;;  %v6507_v49 = vsel %vm108_vm0, %v29923_v19, -inf }
 0x2c0   :  { %34668 = vst [vmem:[#allocation120_spill] sm:$0xff] %v30233_v45  ;;  %v6924_v8 = vsel %vm108_vm0, %v30233_v45, 0.0  ;;  %v6695_v50 = vsub.f32 %v29858_v55, %v6478_v54  ;;  %v6696_v34 = vsub.f32 %v29852_v47, %v6478_v54  ;;  %v6506_v62 = vsel %vm108_vm0, %v34670_v6, -inf  ;;  %v30254_v54 = vpop.f32.mrb[125].mxu0 }
 0x2c1   :  { %v6925_v36 = vadd.f32 %v6924_v8, %v6923_v28  ;;  %v6487_v2 = vmax.f32 %v6485_v46, %v6486_v63  ;;  %v6492_v28 = vmax.f32 %v6490_v10, %v6491_v26  ;;  %v6501_v63 = vmax.f32 %v6499_v23, %v6500_v39 }
 0x2c2   :  { %v30242_v52 = vpop.eup %27590  ;;  %v6777_v16 = vmul.f32 1.442695, %v6695_v50  ;;  %v6779_v42 = vmul.f32 1.442695, %v6696_v34 }
 0x2c3   :  { %34669 = vst [vmem:[#allocation121_spill] sm:$0xff] %v30242_v52  ;;  %v30248_v7 = vpop.eup %27592  ;;  %v6926_v24 = vrot.slane %v6925_v36, 4  ;;  %v6932_v47 = vsel %vm108_vm0, %v30242_v52, 0.0  ;;  %v6697_v55 = vsub.f32 %v29879_v4, %v6487_v2  ;;  %v6698_v46 = vsub.f32 %v29875_v20, %v6487_v2 }
 0x2c4   :  { %v6933_v34 = vsel %vm108_vm0, %v30248_v7, 0.0  ;;  %27598 = vpow2.f32 %v6777_v16  ;;  %v6493_v40 = vrot.slane %v6492_v28, 2  ;;  %v6502_v35 = vrot.slane %v6501_v63, 2  ;;  %v30264_v16 = vpop.f32.mrb[125].mxu1 }
 0x2c5   :  { %v6927_v8 = vadd.f32 %v6926_v24, %v6925_v36  ;;  %v6934_v50 = vadd.f32 %v6933_v34, %v6932_v47  ;;  %27600 = vpow2.f32 %v6779_v42  ;;  %v6781_v45 = vmul.f32 1.442695, %v6697_v55  ;;  %34672 = vst [vmem:[#allocation122_spill] sm:$0xff] %v30264_v16 }
 0x2c6   :  { %v6783_v33 = vmul.f32 1.442695, %v6698_v46  ;;  %v6508_v52 = vmax.f32 %v6506_v62, %v6507_v49  ;;  %v30260_v4 = vadd.f32 %v6910_v27, %v6909_v51  ;;  %v6516_v2 = vsel %vm108_vm0, %v29943_v61, -inf }
 0x2c7   :  { %v6928_v20 = vrot.slane %v6927_v8, 2  ;;  %27602 = vpow2.f32 %v6781_v45  ;;  %v30266_v10 = vpop.eup %27594  ;;  %v6494_v24 = vmax.f32 %v6492_v28, %v6493_v40  ;;  %v6503_v42 = vmax.f32 %v6501_v63, %v6502_v35  ;;  %v30279_v35 = vpop.f32.mrb[126].mxu0  ;;  %v27788_v28 = vld [vmem:[%s33933_s0] sm:$0xff]  ;;  %v27789_v63 = vld [vmem:[%s33933_s0 + $0x8] sm:$0xff] }
 0x2c8   :  { %27604 = vpow2.f32 %v6783_v33  ;;  %v6509_v23 = vrot.slane %v6508_v52, 4  ;;  %v30268_v36 = vpop.eup %27596  ;;  %v30271_v62 = vadd.f32 %v6917_v48, %v30216_v25  ;;  %v6935_v51 = vrot.slane %v6934_v50, 4  ;;  %34673 = vst [vmem:[#allocation123_spill] sm:$0xff] %v30279_v35 }
 0x2c9   :  { %v6941_v45 = vsel %vm108_vm0, %v30266_v10, 0.0  ;;  %v6515_v27 = vsel %vm108_vm0, %v29948_v12, -inf  ;;  %v6942_v26 = vsel %vm108_vm0, %v30268_v36, 0.0  ;;  %v6495_v39 = vrot.slane %v6494_v24, 1 }
 0x2ca   :  { %v6504_v33 = vrot.slane %v6503_v42, 1  ;;  %v6510_v40 = vmax.f32 %v6508_v52, %v6509_v23  ;;  %v30282_v47 = vadd.f32 %v6928_v20, %v6927_v8  ;;  %v6943_v25 = vadd.f32 %v6942_v26, %v6941_v45 }
 0x2cb   :  { %v6517_v48 = vmax.f32 %v6515_v27, %v6516_v2  ;;  %v6496_v55 = vmax.f32 %v6494_v24, %v6495_v39  ;;  %v30290_v52 = vpack.c.bf16 %v27789_v63, %v27788_v28  ;;  %v30292_v23 = vadd.f32 %v6935_v51, %v6934_v50 }
 0x2cc   :  { %v6505_v46 = vmax.f32 %v6503_v42, %v6504_v33  ;;  %v6511_v34 = vrot.slane %v6510_v40, 2  ;;  %v6944_v49 = vrot.slane %v6943_v25, 4  ;;  %v34675_v20 = vrot.slane %v30115_v18, 1 }
 0x2cd   :  { %34674 = vst [vmem:[#allocation124_spill] sm:$0xff] %v30290_v52  ;;  %v6518_v8 = vrot.slane %v6517_v48, 4  ;;  %v6699_v42 = vsub.f32 %v34664_v31, %v6496_v55  ;;  %v6700_v45 = vsub.f32 %v29885_v13, %v6496_v55  ;;  %26359 = vmatprep.subr.bf16.mxu0 %v30290_v52 }
 0x2ce   :  { %v6877_v2 = vadd.f32 %v34675_v20, %v30115_v18  ;;  %v30297_v24 = vpop.eup %27598  ;;  %v6701_v27 = vsub.f32 %v34665_v1, %v6505_v46  ;;  %v6702_v26 = vsub.f32 %v29907_v57, %v6505_v46  ;;  %v6945_v51 = vadd.f32 %v6944_v49, %v6943_v25  ;;  %26361 = vmatpush3.bf16.msra.mxu0 %v30290_v52  ;;  %v30311_v1 = vpop.f32.mrb[127].mxu0 }
 0x2cf   :  { %v30304_v50 = vpop.eup %27600  ;;  %v6950_v39 = vsel %vm108_vm0, %v30297_v24, 0.0  ;;  %v6512_v33 = vmax.f32 %v6510_v40, %v6511_v34  ;;  %v6519_v18 = vmax.f32 %v6517_v48, %v6518_v8  ;;  %v6785_v13 = vmul.f32 1.442695, %v6699_v42  ;;  %34676 = vst [vmem:[#allocation125_spill] sm:$0xff] %v30311_v1  ;;  %v30325_v42 = vpop.f32.mrb[126].mxu1 }
 0x2d0   :  { %v6951_v31 = vsel %vm108_vm0, %v30304_v50, 0.0  ;;  %v6787_v55 = vmul.f32 1.442695, %v6700_v45  ;;  %27606 = vrcp.f32 %v6877_v2  ;;  %v6946_v46 = vrot.slane %v6945_v51, 2  ;;  %34677 = vst [vmem:[#allocation126_spill] sm:$0xff] %v30325_v42 }
 0x2d1   :  { %v30313_v57 = vpop.eup %27602  ;;  %v6952_v28 = vadd.f32 %v6951_v31, %v6950_v39  ;;  %v6789_v49 = vmul.f32 1.442695, %v6701_v27  ;;  %v6791_v25 = vmul.f32 1.442695, %v6702_v26  ;;  %27608 = vpow2.f32 %v6785_v13  ;;  %v30327_v39 = vpop.f32.mrb[127].mxu1  ;;  %v34679_v13 = vld [vmem:[#allocation80_spill] sm:$0xff] }
 0x2d2   :  { %v30315_v63 = vpop.eup %27604  ;;  %v6959_v40 = vsel %vm108_vm0, %v30313_v57, 0.0  ;;  %v6513_v48 = vrot.slane %v6512_v33, 1  ;;  %v6520_v34 = vrot.slane %v6519_v18, 2  ;;  %v30319_v8 = vadd.f32 %v6946_v46, %v6945_v51  ;;  %34678 = vst [vmem:[#allocation127_spill] sm:$0xff] %v30327_v39  ;;  %v27792_v31 = vld [vmem:[%s33933_s0 + $0x20] sm:$0xff] }
 0x2d3   :  { %v6960_v20 = vsel %vm108_vm0, %v30315_v63, 0.0  ;;  %27610 = vpow2.f32 %v6787_v55  ;;  %v6525_v2 = vsel %vm108_vm0, %v29960_v21, -inf  ;;  %v6524_v46 = vsel %vm108_vm0, %v34679_v13, -inf }
 0x2d4   :  { %v6961_v45 = vadd.f32 %v6960_v20, %v6959_v40  ;;  %27612 = vpow2.f32 %v6789_v49  ;;  %v6514_v27 = vmax.f32 %v6512_v33, %v6513_v48  ;;  %v6521_v26 = vmax.f32 %v6519_v18, %v6520_v34  ;;  %v27790_v48 = vld [vmem:[%s33933_s0 + $0x10] sm:$0xff] }
 0x2d5   :  { %27614 = vpow2.f32 %v6791_v25  ;;  %v6953_v18 = vrot.slane %v6952_v28, 4  ;;  %v6526_v49 = vmax.f32 %v6524_v46, %v6525_v2  ;;  %v27791_v25 = vld [vmem:[%s33933_s0 + $0x18] sm:$0xff]  ;;  %v34682_v46 = vrot.slane %v30200_v37, 2 }
 0x2d6   :  { %v6703_v52 = vsub.f32 %v34670_v6, %v6514_v27  ;;  %v6704_v42 = vsub.f32 %v29923_v19, %v6514_v27  ;;  %v6522_v40 = vrot.slane %v6521_v26, 1  ;;  %v30343_v34 = vpack.c.bf16 %v27791_v25, %v27790_v48  ;;  %v34681_v27 = vld [vmem:[#allocation82_spill] sm:$0xff] }
 0x2d7   :  { %v6962_v20 = vrot.slane %v6961_v45, 4  ;;  %v6527_v19 = vrot.slane %v6526_v49, 4  ;;  %v6534_v2 = vsel %vm108_vm0, %v34681_v27, -inf  ;;  %v6884_v33 = vadd.f32 %v34682_v46, %v30200_v37 }
 0x2d8   :  { %34680 = vst [vmem:[#allocation80_spill] sm:$0xff] %v30343_v34  ;;  %v6793_v55 = vmul.f32 1.442695, %v6703_v52  ;;  %v6795_v6 = vmul.f32 1.442695, %v6704_v42  ;;  %v6523_v51 = vmax.f32 %v6521_v26, %v6522_v40  ;;  %26363 = vmatprep.subr.bf16.mxu1 %v30343_v34  ;;  %v27793_v52 = vld [vmem:[%s33933_s0 + $0x28] sm:$0xff] }
 0x2d9   :  { %v30357_v42 = vpack.c.bf16 %v27793_v52, %v27792_v31  ;;  %26365 = vmatpush3.bf16.msra.mxu1 %v30343_v34  ;;  %v6533_v37 = vsel %vm108_vm0, %v29984_v29, -inf  ;;  %v6528_v46 = vmax.f32 %v6526_v49, %v6527_v19  ;;  %v6963_v34 = vadd.f32 %v6962_v20, %v6961_v45 }
 0x2da   :  { %v27607_v26 = vpop.eup %27606  ;;  %27616 = vpow2.f32 %v6793_v55  ;;  %v6705_v40 = vsub.f32 %v29948_v12, %v6523_v51  ;;  %v6706_v48 = vsub.f32 %v29943_v61, %v6523_v51  ;;  %v30373_v12 = vadd.f32 %v6953_v18, %v6952_v28 }
 0x2db   :  { %34683 = vst [vmem:[#allocation82_spill] sm:$0xff] %v30357_v42  ;;  %27618 = vpow2.f32 %v6795_v6  ;;  %v30365_v25 = vmul.f32 %v27607_v26, %v30040_v32  ;;  %v30368_v39 = vmul.f32 %v27607_v26, %v30044_v17  ;;  %26367 = vmatprep.subr.bf16.mxu0 %v30357_v42  ;;  %v30371_v31 = vpop.eup %27608  ;;  %v6885_v55 = vrot.slane %v6884_v33, 1 }
 0x2dc   :  { %v6797_v61 = vmul.f32 1.442695, %v6705_v40  ;;  %v6799_v51 = vmul.f32 1.442695, %v6706_v48  ;;  %v6968_v32 = vsel %vm108_vm0, %v30371_v31, 0.0  ;;  %v6529_v17 = vrot.slane %v6528_v46, 2 }
 0x2dd   :  { %34684 = vst [vmem:[#allocation128_spill] sm:$0xff] %v30365_v25  ;;  %34685 = vst [vmem:[#allocation129_spill] sm:$0xff] %v30368_v39  ;;  %v30375_v52 = vpop.eup %27610  ;;  %24574 = vmatprep.mubr.msk.f32.mxu0 %vm108_vm0, %v30365_v25  ;;  %v6535_v49 = vmax.f32 %v6533_v37, %v6534_v2  ;;  %v6886_v18 = vadd.f32 %v6885_v55, %v6884_v33  ;;  %v6543_v45 = vsel %vm108_vm0, %v29991_v5, -inf  ;;  %v34689_v33 = vrot.slane %v30202_v44, 1 }
 0x2de   :  { %34686 = vst [vmem:[#allocation130_spill] sm:$0xff] %v30375_v52  ;;  %v30381_v6 = vpop.eup %27612  ;;  %v6969_v28 = vsel %vm108_vm0, %v30375_v52, 0.0  ;;  %27620 = vpow2.f32 %v6797_v61  ;;  %24575 = vmatmul.mubr.msk.f32.vlgmr.msra.gmra.mrb[128].mxu0 %vm108_vm0, %v30368_v39  ;;  %v6530_v2 = vmax.f32 %v6528_v46, %v6529_v17  ;;  %v27794_v17 = vld [vmem:[%s33933_s0 + $0x30] sm:$0xff] }
 0x2df   :  { %34687 = vst [vmem:[#allocation131_spill] sm:$0xff] %v30381_v6  ;;  %v30389_v20 = vpop.eup %27614  ;;  %v6970_v19 = vadd.f32 %v6969_v28, %v6968_v32  ;;  %v6977_v26 = vsel %vm108_vm0, %v30381_v6, 0.0  ;;  %27622 = vpow2.f32 %v6799_v51  ;;  %26369 = vmatpush3.bf16.msra.mxu0 %v30357_v42  ;;  %v6536_v48 = vrot.slane %v6535_v49, 4 }
 0x2e0   :  { %34688 = vst [vmem:[#allocation132_spill] sm:$0xff] %v30389_v20  ;;  %v6978_v40 = vsel %vm108_vm0, %v30389_v20, 0.0  ;;  %27624 = vrcp.f32 %v6886_v18  ;;  %v6895_v37 = vadd.f32 %v34689_v33, %v30202_v44  ;;  %v6531_v32 = vrot.slane %v6530_v2, 1  ;;  %v27795_v18 = vld [vmem:[%s33933_s0 + $0x38] sm:$0xff] }
 0x2e1   :  { %v6979_v55 = vadd.f32 %v6978_v40, %v6977_v26  ;;  %v6542_v28 = vsel %vm108_vm0, %v29998_v43, -inf  ;;  %v6537_v51 = vmax.f32 %v6535_v49, %v6536_v48  ;;  %v30408_v42 = vpack.c.bf16 %v27795_v18, %v27794_v17 }
 0x2e2   :  { %27626 = vrcp.f32 %v6895_v37  ;;  %v6544_v46 = vmax.f32 %v6542_v28, %v6543_v45  ;;  %v6964_v44 = vrot.slane %v6963_v34, 2  ;;  %v6971_v33 = vrot.slane %v6970_v19, 4 }
 0x2e3   :  { %34690 = vst [vmem:[#allocation133_spill] sm:$0xff] %v30408_v42  ;;  %v6980_v26 = vrot.slane %v6979_v55, 4  ;;  %v6532_v40 = vmax.f32 %v6530_v2, %v6531_v32  ;;  %v6538_v39 = vrot.slane %v6537_v51, 2  ;;  %26371 = vmatprep.subr.bf16.mxu1 %v30408_v42  ;;  %v6552_v45 = vsel %vm108_vm0, %v30012_v15, -inf }
 0x2e4   :  { %v30410_v61 = vpop.eup %27616  ;;  %v6545_v49 = vrot.slane %v6544_v46, 4  ;;  %v34692_v48 = vrot.slane %v30208_v58, 2  ;;  %v6551_v32 = vsel %vm108_vm0, %v30021_v0, -inf  ;;  %v30428_v6 = vadd.f32 %v6964_v44, %v6963_v34 }
 0x2e5   :  { %34691 = vst [vmem:[#allocation134_spill] sm:$0xff] %v30410_v61  ;;  %v30418_v28 = vpop.eup %27618  ;;  %v6981_v17 = vadd.f32 %v6980_v26, %v6979_v55  ;;  %v6986_v18 = vsel %vm108_vm0, %v30410_v61, 0.0  ;;  %v6707_v2 = vsub.f32 %v34679_v13, %v6532_v40  ;;  %v6708_v1 = vsub.f32 %v29960_v21, %v6532_v40 }
 0x2e6   :  { %v6902_v37 = vadd.f32 %v34692_v48, %v30208_v58  ;;  %34693 = vst [vmem:[#allocation135_spill] sm:$0xff] %v30418_v28  ;;  %v6987_v25 = vsel %vm108_vm0, %v30418_v28, 0.0  ;;  %v6539_v35 = vmax.f32 %v6537_v51, %v6538_v39  ;;  %v6546_v20 = vmax.f32 %v6544_v46, %v6545_v49 }
 0x2e7   :  { %v30430_v58 = vadd.f32 %v6971_v33, %v6970_v19  ;;  %v30432_v55 = vadd.f32 %v6987_v25, %v6986_v18  ;;  %v6801_v26 = vmul.f32 1.442695, %v6707_v2  ;;  %v6803_v13 = vmul.f32 1.442695, %v6708_v1 }
 0x2e8   :  { %v30434_v48 = vpop.eup %27620  ;;  %v6540_v61 = vrot.slane %v6539_v35, 1  ;;  %v6547_v16 = vrot.slane %v6546_v20, 2  ;;  %v6553_v14 = vmax.f32 %v6551_v32, %v6552_v45  ;;  %v6982_v28 = vrot.slane %v6981_v17, 2 }
 0x2e9   :  { %v30436_v52 = vpop.eup %27622  ;;  %v6995_v21 = vsel %vm108_vm0, %v30434_v48, 0.0  ;;  %27628 = vpow2.f32 %v6801_v26  ;;  %v6903_v39 = vrot.slane %v6902_v37, 1 }
 0x2ea   :  { %v27625_v34 = vpop.eup %27624  ;;  %v6996_v25 = vsel %vm108_vm0, %v30436_v52, 0.0  ;;  %27630 = vpow2.f32 %v6803_v13  ;;  %v6541_v19 = vmax.f32 %v6539_v35, %v6540_v61  ;;  %v6548_v51 = vmax.f32 %v6546_v20, %v6547_v16 }
 0x2eb   :  { %v6997_v44 = vadd.f32 %v6996_v25, %v6995_v21  ;;  %v30445_v33 = vmul.f32 %v27625_v34, %v30111_v60  ;;  %v30450_v18 = vmul.f32 %v27625_v34, %v30117_v59  ;;  %v30452_v32 = vadd.f32 %v6982_v28, %v6981_v17 }
 0x2ec   :  { %v27627_v40 = vpop.eup %27626  ;;  %v6709_v49 = vsub.f32 %v29984_v29, %v6541_v19  ;;  %v6710_v45 = vsub.f32 %v34681_v27, %v6541_v19  ;;  %v6549_v2 = vrot.slane %v6548_v51, 1  ;;  %v6904_v27 = vadd.f32 %v6903_v39, %v6902_v37  ;;  %v34700_v19 = vld [vmem:[#allocation89_spill] sm:$0xff] }
 0x2ed   :  { %34694 = vst [vmem:[#allocation136_spill] sm:$0xff] %v30445_v33  ;;  %34695 = vst [vmem:[#allocation137_spill] sm:$0xff] %v30450_v18  ;;  %v6998_v16 = vrot.slane %v6997_v44, 4  ;;  %24581 = vmatprep.mubr.msk.f32.mxu1 %vm108_vm0, %v30445_v33  ;;  %v30457_v35 = vmul.f32 %v27627_v40, %v30129_v9  ;;  %v30460_v60 = vmul.f32 %v27627_v40, %v30139_v41  ;;  %v6554_v28 = vrot.slane %v6553_v14, 4  ;;  %v27796_v9 = vld [vmem:[%s33933_s0 + $0x40] sm:$0xff]  ;;  %v27797_v41 = vld [vmem:[%s33933_s0 + $0x48] sm:$0xff] }
 0x2ee   :  { %v6805_v20 = vmul.f32 1.442695, %v6709_v49  ;;  %v6807_v29 = vmul.f32 1.442695, %v6710_v45  ;;  %24582 = vmatmul.mubr.msk.f32.vlgmr.msra.gmra.mrb[128].mxu1 %vm108_vm0, %v30450_v18  ;;  %v6550_v59 = vmax.f32 %v6548_v51, %v6549_v2  ;;  %v30473_v17 = vpack.c.bf16 %v27797_v41, %v27796_v9  ;;  %v34733_v18 = vld [vmem:[#allocation121_spill] sm:$0xff] }
 0x2ef   :  { %34696 = vst [vmem:[#allocation138_spill] sm:$0xff] %v30457_v35  ;;  %34697 = vst [vmem:[#allocation139_spill] sm:$0xff] %v30460_v60  ;;  %v6999_v61 = vadd.f32 %v6998_v16, %v6997_v44  ;;  %24588 = vmatprep.mubr.msk.f32.mxu0 %vm108_vm0, %v30457_v35  ;;  %26373 = vmatpush3.bf16.msra.mxu1 %v30408_v42  ;;  %v6561_v37 = vsel %vm108_vm0, %v30027_v22, -inf  ;;  %v34699_v21 = vrot.slane %v30260_v4, 1  ;;  %v6989_v34 = vrot.slane %v30432_v55, 4  ;;  %v34718_v42 = vld [vmem:[#allocation120_spill] sm:$0xff] }
 0x2f0   :  { %34698 = vst [vmem:[#allocation140_spill] sm:$0xff] %v30473_v17  ;;  %27632 = vpow2.f32 %v6805_v20  ;;  %v6711_v26 = vsub.f32 %v29998_v43, %v6550_v59  ;;  %v6712_v13 = vsub.f32 %v29991_v5, %v6550_v59  ;;  %24589 = vmatmul.mubr.msk.f32.vlgmr.msra.gmra.mrb[130].mxu0 %vm108_vm0, %v30460_v60  ;;  %v6555_v25 = vmax.f32 %v6553_v14, %v6554_v28  ;;  %v27798_v14 = vld [vmem:[%s33933_s0 + $0x50] sm:$0xff] }
 0x2f1   :  { %v6913_v39 = vadd.f32 %v34699_v21, %v30260_v4  ;;  %27634 = vpow2.f32 %v6807_v29  ;;  %26375 = vmatprep.subr.bf16.mxu0 %v30473_v17  ;;  %v6560_v51 = vsel %vm108_vm0, %v34700_v19, -inf  ;;  %v7000_v49 = vrot.slane %v6999_v61, 2  ;;  %v27799_v4 = vld [vmem:[%s33933_s0 + $0x58] sm:$0xff]  ;;  %v34703_v21 = vld [vmem:[#allocation92_spill] sm:$0xff] }
 0x2f2   :  { %v6809_v44 = vmul.f32 1.442695, %v6711_v26  ;;  %v6811_v43 = vmul.f32 1.442695, %v6712_v13  ;;  %27636 = vrcp.f32 %v6904_v27  ;;  %26377 = vmatpush3.bf16.msra.mxu0 %v30473_v17  ;;  %v6562_v5 = vmax.f32 %v6560_v51, %v6561_v37 }
 0x2f3   :  { %v30489_v40 = vpop.eup %27628  ;;  %v6556_v45 = vrot.slane %v6555_v25, 2  ;;  %27638 = vrcp.f32 %v6913_v39  ;;  %v30497_v2 = vpack.c.bf16 %v27799_v4, %v27798_v14  ;;  %v6570_v59 = vsel %vm108_vm0, %v30051_v3, -inf }
 0x2f4   :  { %v30499_v16 = vpop.eup %27630  ;;  %v7004_v20 = vsel %vm108_vm0, %v30489_v40, 0.0  ;;  %27640 = vpow2.f32 %v6809_v44  ;;  %v6563_v29 = vrot.slane %v6562_v5, 4  ;;  %v34702_v26 = vrot.slane %v30271_v62, 2 }
 0x2f5   :  { %34701 = vst [vmem:[#allocation89_spill] sm:$0xff] %v30497_v2  ;;  %v7005_v28 = vsel %vm108_vm0, %v30499_v16, 0.0  ;;  %27642 = vpow2.f32 %v6811_v43  ;;  %v6557_v9 = vmax.f32 %v6555_v25, %v6556_v45  ;;  %26379 = vmatprep.subr.bf16.mxu1 %v30497_v2  ;;  %v6569_v39 = vsel %vm108_vm0, %v34703_v21, -inf  ;;  %v27800_v25 = vld [vmem:[%s33933_s0 + $0x60] sm:$0xff]  ;;  %v27801_v43 = vld [vmem:[%s33933_s0 + $0x68] sm:$0xff] }
 0x2f6   :  { %v30509_v41 = vadd.f32 %v7005_v28, %v7004_v20  ;;  %v6564_v37 = vmax.f32 %v6562_v5, %v6563_v29  ;;  %v6920_v13 = vadd.f32 %v34702_v26, %v30271_v62  ;;  %v30517_v51 = vadd.f32 %v6989_v34, %v30432_v55  ;;  %v34710_v20 = vld [vmem:[#allocation115_spill] sm:$0xff] }
 0x2f7   :  { %v6558_v44 = vrot.slane %v6557_v9, 1  ;;  %v6571_v14 = vmax.f32 %v6569_v39, %v6570_v59  ;;  %v30525_v5 = vpack.c.bf16 %v27801_v43, %v27800_v25  ;;  %v30527_v45 = vadd.f32 %v7000_v49, %v6999_v61 }
 0x2f8   :  { %v6565_v62 = vrot.slane %v6564_v37, 2  ;;  %v6921_v4 = vrot.slane %v6920_v13, 1  ;;  %v34705_v55 = vrot.slane %v30282_v47, 1  ;;  %v6579_v28 = vsel %vm108_vm0, %v30071_v11, -inf }
 0x2f9   :  { %34704 = vst [vmem:[#allocation92_spill] sm:$0xff] %v30525_v5  ;;  %v6559_v29 = vmax.f32 %v6557_v9, %v6558_v44  ;;  %v6572_v59 = vrot.slane %v6571_v14, 4  ;;  %26383 = vmatprep.subr.bf16.mxu0 %v30525_v5  ;;  %v6578_v49 = vsel %vm108_vm0, %v30073_v30, -inf }
 0x2fa   :  { %v6931_v34 = vadd.f32 %v34705_v55, %v30282_v47  ;;  %v30536_v26 = vpop.eup %27632  ;;  %v6566_v39 = vmax.f32 %v6564_v37, %v6565_v62  ;;  %v6922_v61 = vadd.f32 %v6921_v4, %v6920_v13  ;;  %v27802_v13 = vld [vmem:[%s33933_s0 + $0x70] sm:$0xff]  ;;  %v27803_v62 = vld [vmem:[%s33933_s0 + $0x78] sm:$0xff] }
 0x2fb   :  { %v30540_v25 = vpop.eup %27634  ;;  %v7013_v47 = vsel %vm108_vm0, %v30536_v26, 0.0  ;;  %v6713_v9 = vsub.f32 %v30021_v0, %v6559_v29  ;;  %v6714_v44 = vsub.f32 %v30012_v15, %v6559_v29  ;;  %v6573_v43 = vmax.f32 %v6571_v14, %v6572_v59 }
 0x2fc   :  { %27644 = vrcp.f32 %v6931_v34  ;;  %v27637_v55 = vpop.eup %27636  ;;  %v7014_v27 = vsel %vm108_vm0, %v30540_v25, 0.0  ;;  %v6567_v37 = vrot.slane %v6566_v39, 1  ;;  %v30554_v4 = vpack.c.bf16 %v27803_v62, %v27802_v13 }
 0x2fd   :  { %27646 = vrcp.f32 %v6922_v61  ;;  %v27639_v0 = vpop.eup %27638  ;;  %v7015_v34 = vadd.f32 %v7014_v27, %v7013_v47  ;;  %v30557_v15 = vmul.f32 %v27637_v55, %v30172_v53  ;;  %v6813_v14 = vmul.f32 1.442695, %v6713_v9 }
 0x2fe   :  { %34706 = vst [vmem:[#allocation141_spill] sm:$0xff] %v30554_v4  ;;  %v6815_v29 = vmul.f32 1.442695, %v6714_v44  ;;  %v30559_v59 = vpop.eup %27640  ;;  %v30562_v61 = vmul.f32 %v27637_v55, %v30177_v56  ;;  %v30565_v46 = vmul.f32 %v27639_v0, %v30181_v38  ;;  %v6568_v1 = vmax.f32 %v6566_v39, %v6567_v37  ;;  %v34712_v55 = vld [vmem:[#allocation98_spill] sm:$0xff] }
 0x2ff   :  { %34707 = vst [vmem:[#allocation142_spill] sm:$0xff] %v30557_v15  ;;  %v30568_v17 = vmul.f32 %v27639_v0, %v34710_v20  ;;  %v30570_v13 = vpop.eup %27642  ;;  %v7016_v27 = vrot.slane %v7015_v34, 4  ;;  %v7022_v53 = vsel %vm108_vm0, %v30559_v59, 0.0  ;;  %24595 = vmatprep.mubr.msk.f32.mxu1 %vm108_vm0, %v30557_v15  ;;  %27648 = vpow2.f32 %v6813_v14 }
 0x300   :  { %34708 = vst [vmem:[#allocation143_spill] sm:$0xff] %v30562_v61  ;;  %34709 = vst [vmem:[#allocation144_spill] sm:$0xff] %v30565_v46  ;;  %v6574_v47 = vrot.slane %v6573_v43, 2  ;;  %v7023_v56 = vsel %vm108_vm0, %v30570_v13, 0.0  ;;  %27650 = vpow2.f32 %v6815_v29  ;;  %24596 = vmatmul.mubr.msk.f32.vlgmr.msra.gmra.mrb[130].mxu1 %vm108_vm0, %v30562_v61  ;;  %24602 = vmatprep.mubr.msk.f32.mxu0 %vm108_vm0, %v30565_v46  ;;  %v6715_v38 = vsub.f32 %v34700_v19, %v6568_v1  ;;  %v34716_v19 = vld [vmem:[#allocation72_spill] sm:$0xff] }
 0x301   :  { %34711 = vst [vmem:[#allocation115_spill] sm:$0xff] %v30568_v17  ;;  %v6716_v20 = vsub.f32 %v30027_v22, %v6568_v1  ;;  %v7017_v39 = vadd.f32 %v7016_v27, %v7015_v34  ;;  %v30584_v9 = vadd.f32 %v7023_v56, %v7022_v53  ;;  %24603 = vmatmul.mubr.msk.f32.vlgmr.msra.gmra.mrb[132].mxu0 %vm108_vm0, %v30568_v17  ;;  %v6588_v37 = vsel %vm108_vm0, %v34712_v55, -inf  ;;  %v34714_v27 = vld [vmem:[#allocation99_spill] sm:$0xff] }
 0x302   :  { %26381 = vmatpush3.bf16.msra.mxu1 %v30497_v2  ;;  %v6575_v44 = vmax.f32 %v6573_v43, %v6574_v47  ;;  %v6817_v62 = vmul.f32 1.442695, %v6715_v38  ;;  %26385 = vmatpush3.bf16.msra.mxu0 %v30525_v5  ;;  %v6580_v14 = vmax.f32 %v6578_v49, %v6579_v28  ;;  %v34713_v22 = vrot.slane %v30292_v23, 2 }
 0x303   :  { %v6819_v0 = vmul.f32 1.442695, %v6716_v20  ;;  %26387 = vmatprep.subr.bf16.mxu1 %v30554_v4  ;;  %v7018_v34 = vrot.slane %v7017_v39, 2  ;;  %v6587_v43 = vsel %vm108_vm0, %v34714_v27, -inf  ;;  %v34715_v49 = vrot.slane %v30509_v41, 4 }
 0x304   :  { %v6938_v1 = vadd.f32 %v34713_v22, %v30292_v23  ;;  %v6576_v29 = vrot.slane %v6575_v44, 1  ;;  %27652 = vpow2.f32 %v6817_v62  ;;  %v6581_v47 = vrot.slane %v6580_v14, 4 }
 0x305   :  { %v6589_v38 = vmax.f32 %v6587_v43, %v6588_v37  ;;  %v30603_v20 = vadd.f32 %v34715_v49, %v30509_v41  ;;  %27654 = vpow2.f32 %v6819_v0  ;;  %v30611_v46 = vadd.f32 %v7018_v34, %v7017_v39  ;;  %v34720_v43 = vld [vmem:[#allocation117_spill] sm:$0xff]  ;;  %v34722_v0 = vld [vmem:[#allocation118_spill] sm:$0xff]  ;;  %v34725_v34 = vld [vmem:[#allocation103_spill] sm:$0xff] }
 0x306   :  { %v27645_v53 = vpop.eup %27644  ;;  %v6939_v56 = vrot.slane %v6938_v1, 1  ;;  %v6577_v23 = vmax.f32 %v6575_v44, %v6576_v29  ;;  %v6582_v2 = vmax.f32 %v6580_v14, %v6581_v47  ;;  %v7025_v37 = vrot.slane %v30584_v9, 4 }
 0x307   :  { %v27647_v22 = vpop.eup %27646  ;;  %v30606_v5 = vmul.f32 %v27645_v53, %v34716_v19  ;;  %v30609_v17 = vmul.f32 %v27645_v53, %v34718_v42  ;;  %v6597_v53 = vsel %vm108_vm0, %v34725_v34, -inf }
 0x308   :  { %v6940_v62 = vadd.f32 %v6939_v56, %v6938_v1  ;;  %v30615_v28 = vmul.f32 %v27647_v22, %v34720_v43  ;;  %v6717_v41 = vsub.f32 %v34703_v21, %v6577_v23  ;;  %v6718_v44 = vsub.f32 %v30051_v3, %v6577_v23  ;;  %v27804_v3 = vld [vmem:[%s33933_s0 + $0x80] sm:$0xff]  ;;  %v27805_v1 = vld [vmem:[%s33933_s0 + $0x88] sm:$0xff] }
 0x309   :  { %34717 = vst [vmem:[#allocation98_spill] sm:$0xff] %v30606_v5  ;;  %34719 = vst [vmem:[#allocation99_spill] sm:$0xff] %v30609_v17  ;;  %v30620_v29 = vmul.f32 %v27647_v22, %v34722_v0  ;;  %24616 = vmatprep.mubr.msk.f32.mxu0 %vm108_vm0, %v30606_v5  ;;  %v6583_v42 = vrot.slane %v6582_v2, 2  ;;  %v30624_v14 = vpop.eup %27648  ;;  %v6590_v21 = vrot.slane %v6589_v38, 4  ;;  %v30636_v19 = vpack.c.bf16 %v27805_v1, %v27804_v3  ;;  %v34727_v0 = vld [vmem:[#allocation104_spill] sm:$0xff] }
 0x30a   :  { %34721 = vst [vmem:[#allocation72_spill] sm:$0xff] %v30615_v28  ;;  %27656 = vrcp.f32 %v6940_v62  ;;  %24609 = vmatprep.mubr.msk.f32.mxu1 %vm108_vm0, %v30615_v28  ;;  %v6821_v39 = vmul.f32 1.442695, %v6717_v41  ;;  %24617 = vmatmul.mubr.msk.f32.vlgmr.msra.gmra.mrb[134].mxu0 %vm108_vm0, %v30609_v17  ;;  %v30640_v47 = vpop.eup %27650  ;;  %v7031_v56 = vsel %vm108_vm0, %v30624_v14, 0.0  ;;  %v6823_v49 = vmul.f32 1.442695, %v6718_v44 }
 0x30b   :  { %34723 = vst [vmem:[#allocation120_spill] sm:$0xff] %v30620_v29  ;;  %34724 = vst [vmem:[#allocation117_spill] sm:$0xff] %v30636_v19  ;;  %24610 = vmatmul.mubr.msk.f32.vlgmr.msra.gmra.mrb[132].mxu1 %vm108_vm0, %v30620_v29  ;;  %v6584_v23 = vmax.f32 %v6582_v2, %v6583_v42  ;;  %v34726_v22 = vrot.slane %v30319_v8, 1  ;;  %v7032_v43 = vsel %vm108_vm0, %v30640_v47, 0.0  ;;  %v6591_v41 = vmax.f32 %v6589_v38, %v6590_v21  ;;  %v27807_v38 = vld [vmem:[%s33933_s0 + $0x98] sm:$0xff]  ;;  %v34729_v21 = vld [vmem:[#allocation106_spill] sm:$0xff] }
 0x30c   :  { %27658 = vpow2.f32 %v6821_v39  ;;  %26389 = vmatpush3.bf16.msra.mxu1 %v30554_v4  ;;  %26391 = vmatprep.subr.bf16.mxu0 %v30636_v19  ;;  %v6596_v44 = vsel %vm108_vm0, %v34727_v0, -inf  ;;  %v7033_v3 = vadd.f32 %v7032_v43, %v7031_v56  ;;  %v6606_v56 = vsel %vm108_vm0, %v34729_v21, -inf }
 0x30d   :  { %v6949_v62 = vadd.f32 %v34726_v22, %v30319_v8  ;;  %27660 = vpow2.f32 %v6823_v49  ;;  %v6585_v1 = vrot.slane %v6584_v23, 1  ;;  %26393 = vmatpush3.bf16.msra.mxu0 %v30636_v19  ;;  %v6598_v2 = vmax.f32 %v6596_v44, %v6597_v53  ;;  %v27806_v8 = vld [vmem:[%s33933_s0 + $0x90] sm:$0xff] }
 0x30e   :  { %v6592_v42 = vrot.slane %v6591_v41, 2  ;;  %v30662_v39 = vpack.c.bf16 %v27807_v38, %v27806_v8  ;;  %v30666_v49 = vpop.eup %27652  ;;  %v7034_v22 = vrot.slane %v7033_v3, 4  ;;  %v34731_v8 = vld [vmem:[#allocation108_spill] sm:$0xff] }
 0x30f   :  { %27662 = vrcp.f32 %v6949_v62  ;;  %v6586_v43 = vmax.f32 %v6584_v23, %v6585_v1  ;;  %v6599_v53 = vrot.slane %v6598_v2, 4  ;;  %v34730_v62 = vrot.slane %v30373_v12, 2  ;;  %v30671_v19 = vpop.eup %27654  ;;  %v27808_v23 = vld [vmem:[%s33933_s0 + $0xa0] sm:$0xff]  ;;  %v27809_v1 = vld [vmem:[%s33933_s0 + $0xa8] sm:$0xff] }
 0x310   :  { %34728 = vst [vmem:[#allocation118_spill] sm:$0xff] %v30662_v39  ;;  %v7040_v4 = vsel %vm108_vm0, %v30666_v49, 0.0  ;;  %v6593_v17 = vmax.f32 %v6591_v41, %v6592_v42  ;;  %26395 = vmatprep.subr.bf16.mxu1 %v30662_v39  ;;  %v6605_v38 = vsel %vm108_vm0, %v34731_v8, -inf  ;;  %v7041_v41 = vsel %vm108_vm0, %v30671_v19, 0.0 }
 0x311   :  { %v6956_v44 = vadd.f32 %v34730_v62, %v30373_v12  ;;  %v30684_v12 = vpack.c.bf16 %v27809_v1, %v27808_v23  ;;  %v30687_v62 = vadd.f32 %v7025_v37, %v30584_v9  ;;  %v6719_v42 = vsub.f32 %v30073_v30, %v6586_v43 }
 0x312   :  { %v6720_v5 = vsub.f32 %v30071_v11, %v6586_v43  ;;  %v30693_v29 = vadd.f32 %v7041_v41, %v7040_v4  ;;  %v6594_v28 = vrot.slane %v6593_v17, 1  ;;  %v6600_v61 = vmax.f32 %v6598_v2, %v6599_v53 }
 0x313   :  { %34732 = vst [vmem:[#allocation103_spill] sm:$0xff] %v30684_v12  ;;  %v6957_v15 = vrot.slane %v6956_v44, 1  ;;  %26399 = vmatprep.subr.bf16.mxu0 %v30684_v12  ;;  %v7035_v23 = vadd.f32 %v7034_v22, %v7033_v3  ;;  %v6825_v1 = vmul.f32 1.442695, %v6719_v42  ;;  %v6607_v9 = vmax.f32 %v6605_v38, %v6606_v56  ;;  %v34738_v42 = vld [vmem:[#allocation109_spill] sm:$0xff] }
 0x314   :  { %v27657_v60 = vpop.eup %27656  ;;  %v6827_v35 = vmul.f32 1.442695, %v6720_v5  ;;  %v6595_v30 = vmax.f32 %v6593_v17, %v6594_v28  ;;  %v6601_v2 = vrot.slane %v6600_v61, 2 }
 0x315   :  { %v30698_v33 = vmul.f32 %v27657_v60, %v34733_v18  ;;  %v30701_v11 = vmul.f32 %v27657_v60, %v30248_v7  ;;  %27664 = vpow2.f32 %v6825_v1  ;;  %v6958_v43 = vadd.f32 %v6957_v15, %v6956_v44 }
 0x316   :  { %v30704_v53 = vpop.eup %27658  ;;  %27666 = vpow2.f32 %v6827_v35  ;;  %v6721_v18 = vsub.f32 %v34714_v27, %v6595_v30  ;;  %v6722_v17 = vsub.f32 %v34712_v55, %v6595_v30  ;;  %v7036_v7 = vrot.slane %v7035_v23, 2 }
 0x317   :  { %34734 = vst [vmem:[#allocation104_spill] sm:$0xff] %v30698_v33  ;;  %34735 = vst [vmem:[#allocation106_spill] sm:$0xff] %v30701_v11  ;;  %24623 = vmatprep.mubr.msk.f32.mxu1 %vm108_vm0, %v30698_v33  ;;  %v30711_v5 = vpop.eup %27660  ;;  %v7049_v60 = vsel %vm108_vm0, %v30704_v53, 0.0  ;;  %v6602_v15 = vmax.f32 %v6600_v61, %v6601_v2  ;;  %27668 = vrcp.f32 %v6958_v43  ;;  %v7043_v35 = vrot.slane %v30693_v29, 4 }
 0x318   :  { %24624 = vmatmul.mubr.msk.f32.vlgmr.msra.gmra.mrb[134].mxu1 %vm108_vm0, %v30701_v11  ;;  %v7050_v56 = vsel %vm108_vm0, %v30711_v5, 0.0  ;;  %v6829_v27 = vmul.f32 1.442695, %v6721_v18  ;;  %v6831_v22 = vmul.f32 1.442695, %v6722_v17  ;;  %v6608_v61 = vrot.slane %v6607_v9, 4 }
 0x319   :  { %v27663_v28 = vpop.eup %27662  ;;  %26397 = vmatpush3.bf16.msra.mxu1 %v30662_v39  ;;  %v7051_v55 = vadd.f32 %v7050_v56, %v7049_v60  ;;  %v6603_v38 = vrot.slane %v6602_v15, 1  ;;  %v6615_v1 = vsel %vm108_vm0, %v34738_v42, -inf  ;;  %v34739_v30 = vrot.slane %v30428_v6, 1  ;;  %v34740_v18 = vld [vmem:[#allocation111_spill] sm:$0xff] }
 0x31a   :  { %v30722_v44 = vmul.f32 %v27663_v28, %v30266_v10  ;;  %v30725_v41 = vmul.f32 %v27663_v28, %v30268_v36  ;;  %27670 = vpow2.f32 %v6829_v27  ;;  %v6614_v17 = vsel %vm108_vm0, %v34740_v18, -inf  ;;  %v27810_v28 = vld [vmem:[%s33933_s0 + $0xb0] sm:$0xff] }
 0x31b   :  { %v6967_v2 = vadd.f32 %v34739_v30, %v30428_v6  ;;  %v7052_v43 = vrot.slane %v7051_v55, 4  ;;  %27672 = vpow2.f32 %v6831_v22  ;;  %v6604_v10 = vmax.f32 %v6602_v15, %v6603_v38  ;;  %v27811_v6 = vld [vmem:[%s33933_s0 + $0xb8] sm:$0xff] }
 0x31c   :  { %34736 = vst [vmem:[#allocation108_spill] sm:$0xff] %v30722_v44  ;;  %34737 = vst [vmem:[#allocation121_spill] sm:$0xff] %v30725_v41  ;;  %24630 = vmatprep.mubr.msk.f32.mxu0 %vm108_vm0, %v30722_v44  ;;  %v6609_v36 = vmax.f32 %v6607_v9, %v6608_v61  ;;  %v6616_v60 = vmax.f32 %v6614_v17, %v6615_v1  ;;  %v30744_v56 = vpack.c.bf16 %v27811_v6, %v27810_v28  ;;  %v34742_v9 = vld [vmem:[#allocation113_spill] sm:$0xff]  ;;  %v34744_v17 = vld [vmem:[#allocation114_spill] sm:$0xff] }
 0x31d   :  { %24631 = vmatmul.mubr.msk.f32.vlgmr.msra.gmra.mrb[136].mxu0 %vm108_vm0, %v30725_v41  ;;  %27674 = vrcp.f32 %v6967_v2  ;;  %v30746_v15 = vadd.f32 %v7036_v7, %v7035_v23  ;;  %v6723_v27 = vsub.f32 %v34727_v0, %v6604_v10  ;;  %v6724_v22 = vsub.f32 %v34725_v34, %v6604_v10  ;;  %v34772_v41 = vld [vmem:[#allocation125_spill] sm:$0xff] }
 0x31e   :  { %34741 = vst [vmem:[#allocation109_spill] sm:$0xff] %v30744_v56  ;;  %26401 = vmatpush3.bf16.msra.mxu0 %v30684_v12  ;;  %v6624_v38 = vsel %vm108_vm0, %v34742_v9, -inf  ;;  %v6610_v61 = vrot.slane %v6609_v36, 2  ;;  %v6617_v1 = vrot.slane %v6616_v60, 4  ;;  %26403 = vmatprep.subr.bf16.mxu1 %v30744_v56  ;;  %v34743_v30 = vrot.slane %v30430_v58, 2 }
 0x31f   :  { %v6623_v23 = vsel %vm108_vm0, %v34744_v17, -inf  ;;  %v30759_v7 = vpop.eup %27664  ;;  %v7053_v0 = vadd.f32 %v7052_v43, %v7051_v55  ;;  %v6833_v34 = vmul.f32 1.442695, %v6723_v27  ;;  %v6835_v10 = vmul.f32 1.442695, %v6724_v22 }
 0x320   :  { %v6974_v2 = vadd.f32 %v34743_v30, %v30430_v58  ;;  %v6625_v28 = vmax.f32 %v6623_v23, %v6624_v38  ;;  %v30761_v6 = vpop.eup %27666  ;;  %v7058_v3 = vsel %vm108_vm0, %v30759_v7, 0.0  ;;  %v6611_v4 = vmax.f32 %v6609_v36, %v6610_v61  ;;  %v27813_v23 = vld [vmem:[%s33933_s0 + $0xc8] sm:$0xff] }
 0x321   :  { %v6618_v37 = vmax.f32 %v6616_v60, %v6617_v1  ;;  %v27669_v39 = vpop.eup %27668  ;;  %v30766_v58 = vadd.f32 %v7043_v35, %v30693_v29  ;;  %v7059_v30 = vsel %vm108_vm0, %v30761_v6, 0.0  ;;  %27676 = vpow2.f32 %v6833_v34 }
 0x322   :  { %v6975_v12 = vrot.slane %v6974_v2, 1  ;;  %v6626_v55 = vrot.slane %v6625_v28, 4  ;;  %v30770_v43 = vadd.f32 %v7059_v30, %v7058_v3  ;;  %27678 = vpow2.f32 %v6835_v10 }
 0x323   :  { %v30773_v27 = vmul.f32 %v27669_v39, %v30297_v24  ;;  %v6612_v22 = vrot.slane %v6611_v4, 1  ;;  %v30777_v60 = vmul.f32 %v27669_v39, %v30304_v50  ;;  %v6619_v38 = vrot.slane %v6618_v37, 2  ;;  %v27812_v24 = vld [vmem:[%s33933_s0 + $0xc0] sm:$0xff] }
 0x324   :  { %v6976_v29 = vadd.f32 %v6975_v12, %v6974_v2  ;;  %v30779_v35 = vpop.eup %27670  ;;  %v7054_v61 = vrot.slane %v7053_v0, 2  ;;  %v6627_v1 = vmax.f32 %v6625_v28, %v6626_v55  ;;  %v30789_v50 = vpack.c.bf16 %v27813_v23, %v27812_v24  ;;  %v34748_v55 = vld [vmem:[#allocation116_spill] sm:$0xff] }
 0x325   :  { %34745 = vst [vmem:[#allocation111_spill] sm:$0xff] %v30773_v27  ;;  %34746 = vst [vmem:[#allocation113_spill] sm:$0xff] %v30777_v60  ;;  %24637 = vmatprep.mubr.msk.f32.mxu1 %vm108_vm0, %v30773_v27  ;;  %v6613_v3 = vmax.f32 %v6611_v4, %v6612_v22  ;;  %v30791_v39 = vpop.eup %27672  ;;  %v7067_v2 = vsel %vm108_vm0, %v30779_v35, 0.0  ;;  %v6620_v4 = vmax.f32 %v6618_v37, %v6619_v38  ;;  %v6633_v22 = vsel %vm108_vm0, %v34748_v55, -inf }
 0x326   :  { %34747 = vst [vmem:[#allocation114_spill] sm:$0xff] %v30789_v50  ;;  %24638 = vmatmul.mubr.msk.f32.vlgmr.msra.gmra.mrb[136].mxu1 %vm108_vm0, %v30777_v60  ;;  %27680 = vrcp.f32 %v6976_v29  ;;  %v7068_v10 = vsel %vm108_vm0, %v30791_v39, 0.0  ;;  %26407 = vmatprep.subr.bf16.mxu0 %v30789_v50  ;;  %v30812_v29 = vadd.f32 %v7054_v61, %v7053_v0  ;;  %v27814_v61 = vld [vmem:[%s33933_s0 + $0xd0] sm:$0xff]  ;;  %v6659_v44 = vsel %vm108_vm0, %v34772_v41, -inf }
 0x327   :  { %v27675_v34 = vpop.eup %27674  ;;  %v6725_v28 = vsub.f32 %v34731_v8, %v6613_v3  ;;  %v6726_v30 = vsub.f32 %v34729_v21, %v6613_v3  ;;  %26405 = vmatpush3.bf16.msra.mxu1 %v30744_v56  ;;  %v7069_v24 = vadd.f32 %v7068_v10, %v7067_v2  ;;  %v6621_v37 = vrot.slane %v6620_v4, 1 }
 0x328   :  { %v30807_v23 = vmul.f32 %v27675_v34, %v30313_v57  ;;  %v30810_v38 = vmul.f32 %v27675_v34, %v30315_v63  ;;  %v6628_v21 = vrot.slane %v6627_v1, 2  ;;  %v34751_v2 = vrot.slane %v30452_v32, 1  ;;  %v34752_v57 = vld [vmem:[#allocation119_spill] sm:$0xff] }
 0x329   :  { %v6837_v8 = vmul.f32 1.442695, %v6725_v28  ;;  %v6839_v12 = vmul.f32 1.442695, %v6726_v30  ;;  %v7070_v3 = vrot.slane %v7069_v24, 4  ;;  %v6622_v36 = vmax.f32 %v6620_v4, %v6621_v37  ;;  %v27815_v4 = vld [vmem:[%s33933_s0 + $0xd8] sm:$0xff] }
 0x32a   :  { %34749 = vst [vmem:[#allocation116_spill] sm:$0xff] %v30807_v23  ;;  %34750 = vst [vmem:[#allocation145_spill] sm:$0xff] %v30810_v38  ;;  %24644 = vmatprep.mubr.msk.f32.mxu0 %vm108_vm0, %v30807_v23  ;;  %v6985_v10 = vadd.f32 %v34751_v2, %v30452_v32  ;;  %v6632_v56 = vsel %vm108_vm0, %v34752_v57, -inf  ;;  %v6629_v63 = vmax.f32 %v6627_v1, %v6628_v21  ;;  %v7061_v21 = vrot.slane %v30770_v43, 4 }
 0x32b   :  { %27682 = vpow2.f32 %v6837_v8  ;;  %24645 = vmatmul.mubr.msk.f32.vlgmr.msra.gmra.mrb[138].mxu0 %vm108_vm0, %v30810_v38  ;;  %v6634_v0 = vmax.f32 %v6632_v56, %v6633_v22  ;;  %v30829_v34 = vpack.c.bf16 %v27815_v4, %v27814_v61  ;;  %v30831_v32 = vpop.eup %27676  ;;  %v7071_v28 = vadd.f32 %v7070_v3, %v7069_v24  ;;  %v34754_v4 = vld [vmem:[#allocation68_spill] sm:$0xff] }
 0x32c   :  { %27684 = vpow2.f32 %v6839_v12  ;;  %v6727_v30 = vsub.f32 %v34740_v18, %v6622_v36  ;;  %v6728_v37 = vsub.f32 %v34738_v42, %v6622_v36  ;;  %26409 = vmatpush3.bf16.msra.mxu0 %v30789_v50  ;;  %v30836_v56 = vpop.eup %27678  ;;  %v7076_v1 = vsel %vm108_vm0, %v30831_v32, 0.0 }
 0x32d   :  { %34753 = vst [vmem:[#allocation119_spill] sm:$0xff] %v30829_v34  ;;  %v6630_v22 = vrot.slane %v6629_v63, 1  ;;  %27686 = vrcp.f32 %v6985_v10  ;;  %v6635_v8 = vrot.slane %v6634_v0, 4  ;;  %26411 = vmatprep.subr.bf16.mxu1 %v30829_v34  ;;  %v7077_v12 = vsel %vm108_vm0, %v30836_v56, 0.0 }
 0x32e   :  { %v6841_v18 = vmul.f32 1.442695, %v6727_v30  ;;  %v6843_v24 = vmul.f32 1.442695, %v6728_v37  ;;  %v7072_v42 = vrot.slane %v7071_v28, 2  ;;  %v30844_v36 = vadd.f32 %v7077_v12, %v7076_v1 }
 0x32f   :  { %v6631_v3 = vmax.f32 %v6629_v63, %v6630_v22  ;;  %v6636_v2 = vmax.f32 %v6634_v0, %v6635_v8  ;;  %v6642_v10 = vsel %vm108_vm0, %v34754_v4, -inf  ;;  %v34755_v50 = vrot.slane %v30517_v51, 2  ;;  %v34757_v22 = vld [vmem:[#allocation130_spill] sm:$0xff] }
 0x330   :  { %v27681_v61 = vpop.eup %27680  ;;  %27688 = vpow2.f32 %v6841_v18  ;;  %v6641_v23 = vsel %vm108_vm0, %v30254_v54, -inf  ;;  %v30859_v0 = vadd.f32 %v7061_v21, %v30770_v43 }
 0x331   :  { %v6992_v38 = vadd.f32 %v34755_v50, %v30517_v51  ;;  %27690 = vpow2.f32 %v6843_v24  ;;  %v30855_v37 = vmul.f32 %v27681_v61, %v30371_v31  ;;  %v6729_v63 = vsub.f32 %v34744_v17, %v6631_v3  ;;  %v34763_v24 = vld [vmem:[#allocation131_spill] sm:$0xff] }
 0x332   :  { %v6730_v1 = vsub.f32 %v34742_v9, %v6631_v3  ;;  %v30863_v8 = vmul.f32 %v27681_v61, %v34757_v22  ;;  %v6637_v51 = vrot.slane %v6636_v2, 2  ;;  %v30865_v50 = vadd.f32 %v7072_v42, %v7071_v28  ;;  %v27816_v9 = vld [vmem:[%s33933_s0 + $0xe0] sm:$0xff]  ;;  %v27817_v28 = vld [vmem:[%s33933_s0 + $0xe8] sm:$0xff] }
 0x333   :  { %34756 = vst [vmem:[#allocation68_spill] sm:$0xff] %v30855_v37  ;;  %24651 = vmatprep.mubr.msk.f32.mxu1 %vm108_vm0, %v30855_v37  ;;  %v6845_v12 = vmul.f32 1.442695, %v6729_v63  ;;  %v6993_v18 = vrot.slane %v6992_v38, 1  ;;  %v6643_v31 = vmax.f32 %v6641_v23, %v6642_v10  ;;  %v30878_v21 = vpack.c.bf16 %v27817_v28, %v27816_v9  ;;  %v34760_v61 = vld [vmem:[#allocation75_spill] sm:$0xff]  ;;  %v34762_v9 = vld [vmem:[#allocation122_spill] sm:$0xff] }
 0x334   :  { %34758 = vst [vmem:[#allocation130_spill] sm:$0xff] %v30863_v8  ;;  %v6847_v17 = vmul.f32 1.442695, %v6730_v1  ;;  %24652 = vmatmul.mubr.msk.f32.vlgmr.msra.gmra.mrb[138].mxu1 %vm108_vm0, %v30863_v8  ;;  %v6638_v43 = vmax.f32 %v6636_v2, %v6637_v51  ;;  %v6651_v2 = vsel %vm108_vm0, %v34760_v61, -inf  ;;  %v34761_v22 = vrot.slane %v30527_v45, 1  ;;  %v34765_v8 = vld [vmem:[#allocation132_spill] sm:$0xff] }
 0x335   :  { %34759 = vst [vmem:[#allocation146_spill] sm:$0xff] %v30878_v21  ;;  %v30880_v42 = vpop.eup %27682  ;;  %27692 = vpow2.f32 %v6845_v12  ;;  %26413 = vmatpush3.bf16.msra.mxu1 %v30829_v34  ;;  %v6994_v23 = vadd.f32 %v6993_v18, %v6992_v38  ;;  %v6644_v3 = vrot.slane %v6643_v31, 4  ;;  %26415 = vmatprep.subr.bf16.mxu0 %v30878_v21  ;;  %v6650_v28 = vsel %vm108_vm0, %v34762_v9, -inf }
 0x336   :  { %v30885_v10 = vpop.eup %27684  ;;  %v7085_v63 = vsel %vm108_vm0, %v30880_v42, 0.0  ;;  %27694 = vpow2.f32 %v6847_v17  ;;  %v6639_v1 = vrot.slane %v6638_v43, 1  ;;  %v7003_v51 = vadd.f32 %v34761_v22, %v30527_v45  ;;  %v27818_v22 = vld [vmem:[%s33933_s0 + $0xf0] sm:$0xff] }
 0x337   :  { %v27687_v12 = vpop.eup %27686  ;;  %v7086_v38 = vsel %vm108_vm0, %v30885_v10, 0.0  ;;  %27696 = vrcp.f32 %v6994_v23  ;;  %v6645_v18 = vmax.f32 %v6643_v31, %v6644_v3  ;;  %v6652_v45 = vmax.f32 %v6650_v28, %v6651_v2  ;;  %v27819_v31 = vld [vmem:[%s33933_s0 + $0xf8] sm:$0xff]  ;;  %v34769_v2 = vld [vmem:[#allocation123_spill] sm:$0xff] }
 0x338   :  { %v7087_v30 = vadd.f32 %v7086_v38, %v7085_v63  ;;  %v30898_v34 = vmul.f32 %v27687_v12, %v34763_v24  ;;  %v6640_v17 = vmax.f32 %v6638_v43, %v6639_v1  ;;  %v30901_v37 = vmul.f32 %v27687_v12, %v34765_v8 }
 0x339   :  { %v6646_v60 = vrot.slane %v6645_v18, 2  ;;  %27698 = vrcp.f32 %v7003_v51  ;;  %v30909_v23 = vpack.c.bf16 %v27819_v31, %v27818_v22  ;;  %v6660_v63 = vsel %vm108_vm0, %v34769_v2, -inf }
 0x33a   :  { %34764 = vst [vmem:[#allocation75_spill] sm:$0xff] %v30898_v34  ;;  %34766 = vst [vmem:[#allocation122_spill] sm:$0xff] %v30901_v37  ;;  %v30911_v3 = vpop.eup %27688  ;;  %v7088_v24 = vrot.slane %v7087_v30, 4  ;;  %24658 = vmatprep.mubr.msk.f32.mxu0 %vm108_vm0, %v30898_v34  ;;  %v6731_v8 = vsub.f32 %v34752_v57, %v6640_v17  ;;  %v6732_v43 = vsub.f32 %v34748_v55, %v6640_v17  ;;  %v6653_v38 = vrot.slane %v6652_v45, 4 }
 0x33b   :  { %34767 = vst [vmem:[#allocation131_spill] sm:$0xff] %v30909_v23  ;;  %34768 = vst [vmem:[#allocation132_spill] sm:$0xff] %v30911_v3  ;;  %v30919_v1 = vpop.eup %27690  ;;  %v7094_v51 = vsel %vm108_vm0, %v30911_v3, 0.0  ;;  %24659 = vmatmul.mubr.msk.f32.vlgmr.msra.gmra.mrb[140].mxu0 %vm108_vm0, %v30901_v37  ;;  %v6647_v12 = vmax.f32 %v6645_v18, %v6646_v60  ;;  %26419 = vmatprep.subr.bf16.mxu1 %v30909_v23  ;;  %v34771_v57 = vrot.slane %v30603_v20, 2 }
 0x33c   :  { %34770 = vst [vmem:[#allocation123_spill] sm:$0xff] %v30919_v1  ;;  %v7089_v55 = vadd.f32 %v7088_v24, %v7087_v30  ;;  %v7095_v17 = vsel %vm108_vm0, %v30919_v1, 0.0  ;;  %v6849_v22 = vmul.f32 1.442695, %v6731_v8  ;;  %v6851_v31 = vmul.f32 1.442695, %v6732_v43  ;;  %26417 = vmatpush3.bf16.msra.mxu0 %v30878_v21 }
 0x33d   :  { %v7010_v28 = vadd.f32 %v34771_v57, %v30603_v20  ;;  %v30932_v34 = vadd.f32 %v7095_v17, %v7094_v51  ;;  %v6648_v27 = vrot.slane %v6647_v12, 1  ;;  %v6654_v37 = vmax.f32 %v6652_v45, %v6653_v38  ;;  %v27820_v20 = vld [vmem:[%s33933_s0 + $0x100] sm:$0xff]  ;;  %v27821_v30 = vld [vmem:[%s33933_s0 + $0x108] sm:$0xff] }
 0x33e   :  { %27700 = vpow2.f32 %v6849_v22  ;;  %v30943_v24 = vpack.c.bf16 %v27821_v30, %v27820_v20  ;;  %v7090_v45 = vrot.slane %v7089_v55, 2  ;;  %v6661_v18 = vmax.f32 %v6659_v44, %v6660_v63  ;;  %v34778_v63 = vld [vmem:[#allocation135_spill] sm:$0xff] }
 0x33f   :  { %v7011_v60 = vrot.slane %v7010_v28, 1  ;;  %v30945_v8 = vpop.eup %27692  ;;  %27702 = vpow2.f32 %v6851_v31  ;;  %v6649_v43 = vmax.f32 %v6647_v12, %v6648_v27  ;;  %v6655_v51 = vrot.slane %v6654_v37, 2 }
 0x340   :  { %34773 = vst [vmem:[#allocation125_spill] sm:$0xff] %v30943_v24  ;;  %v30947_v38 = vpop.eup %27694  ;;  %v7103_v17 = vsel %vm108_vm0, %v30945_v8, 0.0  ;;  %26423 = vmatprep.subr.bf16.mxu0 %v30943_v24  ;;  %v34775_v20 = vrot.slane %v30844_v36, 4  ;;  %v7097_v57 = vrot.slane %v30932_v34, 4  ;;  %v30969_v1 = vadd.f32 %v7090_v45, %v7089_v55  ;;  %v34782_v45 = vld [vmem:[#allocation126_spill] sm:$0xff] }
 0x341   :  { %34774 = vst [vmem:[#allocation147_spill] sm:$0xff] %v30947_v38  ;;  %v7012_v22 = vadd.f32 %v7011_v60, %v7010_v28  ;;  %v27697_v21 = vpop.eup %27696  ;;  %v7104_v27 = vsel %vm108_vm0, %v30947_v38, 0.0  ;;  %v6733_v12 = vsub.f32 %v30254_v54, %v6649_v43  ;;  %v6734_v31 = vsub.f32 %v34754_v4, %v6649_v43  ;;  %v34776_v28 = vld [vmem:[#allocation134_spill] sm:$0xff] }
 0x342   :  { %v30956_v30 = vadd.f32 %v34775_v20, %v30844_v36  ;;  %v7105_v11 = vadd.f32 %v7104_v27, %v7103_v17  ;;  %v30964_v44 = vmul.f32 %v27697_v21, %v34776_v28  ;;  %v30967_v60 = vmul.f32 %v27697_v21, %v34778_v63  ;;  %v27824_v28 = vld [vmem:[%s33933_s0 + $0x120] sm:$0xff]  ;;  %v27825_v63 = vld [vmem:[%s33933_s0 + $0x128] sm:$0xff] }
 0x343   :  { %v27699_v33 = vpop.eup %27698  ;;  %v6853_v36 = vmul.f32 1.442695, %v6733_v12  ;;  %v6855_v20 = vmul.f32 1.442695, %v6734_v31  ;;  %v6656_v3 = vmax.f32 %v6654_v37, %v6655_v51  ;;  %27704 = vrcp.f32 %v7012_v22 }
 0x344   :  { %34777 = vst [vmem:[#allocation134_spill] sm:$0xff] %v30964_v44  ;;  %34779 = vst [vmem:[#allocation135_spill] sm:$0xff] %v30967_v60  ;;  %v7106_v38 = vrot.slane %v7105_v11, 4  ;;  %24665 = vmatprep.mubr.msk.f32.mxu1 %vm108_vm0, %v30964_v44  ;;  %v30974_v54 = vmul.f32 %v27699_v33, %v30434_v48  ;;  %v30977_v4 = vmul.f32 %v27699_v33, %v30436_v52  ;;  %v6662_v55 = vrot.slane %v6661_v18, 4  ;;  %v34784_v33 = vld [vmem:[#allocation127_spill] sm:$0xff] }
 0x345   :  { %27706 = vpow2.f32 %v6853_v36  ;;  %24666 = vmatmul.mubr.msk.f32.vlgmr.msra.gmra.mrb[140].mxu1 %vm108_vm0, %v30967_v60  ;;  %v6657_v21 = vrot.slane %v6656_v3, 1  ;;  %v6669_v37 = vsel %vm108_vm0, %v34782_v45, -inf  ;;  %v34783_v52 = vrot.slane %v30611_v46, 1 }
 0x346   :  { %34780 = vst [vmem:[#allocation148_spill] sm:$0xff] %v30974_v54  ;;  %34781 = vst [vmem:[#allocation149_spill] sm:$0xff] %v30977_v4  ;;  %v7107_v43 = vadd.f32 %v7106_v38, %v7105_v11  ;;  %27708 = vpow2.f32 %v6855_v20  ;;  %24672 = vmatprep.mubr.msk.f32.mxu0 %vm108_vm0, %v30974_v54  ;;  %26421 = vmatpush3.bf16.msra.mxu1 %v30909_v23  ;;  %v6668_v51 = vsel %vm108_vm0, %v34784_v33, -inf  ;;  %v27822_v11 = vld [vmem:[%s33933_s0 + $0x110] sm:$0xff]  ;;  %v27823_v38 = vld [vmem:[%s33933_s0 + $0x118] sm:$0xff] }
 0x347   :  { %v7021_v48 = vadd.f32 %v34783_v52, %v30611_v46  ;;  %v6658_v17 = vmax.f32 %v6656_v3, %v6657_v21  ;;  %24673 = vmatmul.mubr.msk.f32.vlgmr.msra.gmra.mrb[142].mxu0 %vm108_vm0, %v30977_v4  ;;  %v6663_v22 = vmax.f32 %v6661_v18, %v6662_v55  ;;  %v6670_v27 = vmax.f32 %v6668_v51, %v6669_v37 }
 0x348   :  { %v30999_v12 = vpack.c.bf16 %v27823_v38, %v27822_v11  ;;  %v31001_v46 = vpop.eup %27700  ;;  %v7108_v31 = vrot.slane %v7107_v43, 2  ;;  %26425 = vmatpush3.bf16.msra.mxu0 %v30943_v24  ;;  %v34786_v3 = vrot.slane %v30687_v62, 2  ;;  %v31013_v36 = vpack.c.bf16 %v27825_v63, %v27824_v28 }
 0x349   :  { %27710 = vrcp.f32 %v7021_v48  ;;  %v31015_v20 = vpop.eup %27702  ;;  %v7112_v21 = vsel %vm108_vm0, %v31001_v46, 0.0  ;;  %v6735_v55 = vsub.f32 %v34762_v9, %v6658_v17  ;;  %v6736_v37 = vsub.f32 %v34760_v61, %v6658_v17 }
 0x34a   :  { %34785 = vst [vmem:[#allocation126_spill] sm:$0xff] %v30999_v12  ;;  %v7028_v18 = vadd.f32 %v34786_v3, %v30687_v62  ;;  %34787 = vst [vmem:[#allocation127_spill] sm:$0xff] %v31013_v36  ;;  %v6664_v62 = vrot.slane %v6663_v22, 2  ;;  %26427 = vmatprep.subr.bf16.mxu1 %v30999_v12  ;;  %v7113_v48 = vsel %vm108_vm0, %v31015_v20, 0.0  ;;  %v6671_v51 = vrot.slane %v6670_v27, 4  ;;  %26431 = vmatprep.subr.bf16.mxu0 %v31013_v36 }
 0x34b   :  { %v7114_v38 = vadd.f32 %v7113_v48, %v7112_v21  ;;  %v6857_v3 = vmul.f32 1.442695, %v6735_v55  ;;  %v6859_v28 = vmul.f32 1.442695, %v6736_v37  ;;  %v7092_v9 = vrot.slane %v30969_v1, 1  ;;  %v27828_v48 = vld [vmem:[%s33933_s0 + $0x140] sm:$0xff] }
 0x34c   :  { %v7029_v11 = vrot.slane %v7028_v18, 1  ;;  %v6665_v63 = vmax.f32 %v6663_v22, %v6664_v62  ;;  %v31028_v61 = vadd.f32 %v7097_v57, %v30932_v34  ;;  %v6672_v17 = vmax.f32 %v6670_v27, %v6671_v51  ;;  %v27829_v51 = vld [vmem:[%s33933_s0 + $0x148] sm:$0xff] }
 0x34d   :  { %v31030_v23 = vadd.f32 %v7108_v31, %v7107_v43  ;;  %27712 = vpow2.f32 %v6857_v3  ;;  %v34788_v4 = vrot.slane %v30746_v15, 1  ;;  %v27705_v60 = vpop.eup %27704  ;;  %v7115_v21 = vrot.slane %v7114_v38, 4 }
 0x34e   :  { %v7030_v24 = vadd.f32 %v7029_v11, %v7028_v18  ;;  %v6666_v52 = vrot.slane %v6665_v63, 1  ;;  %27714 = vpow2.f32 %v6859_v28  ;;  %v6673_v55 = vrot.slane %v6672_v17, 2 }
 0x34f   :  { %v7039_v54 = vadd.f32 %v34788_v4, %v30746_v15  ;;  %v34789_v22 = vrot.slane %v30766_v58, 2  ;;  %v31038_v34 = vpop.eup %27706  ;;  %v31041_v57 = vmul.f32 %v27705_v60, %v30489_v40  ;;  %v31044_v27 = vmul.f32 %v27705_v60, %v30499_v16  ;;  %v27826_v15 = vld [vmem:[%s33933_s0 + $0x130] sm:$0xff]  ;;  %v27827_v4 = vld [vmem:[%s33933_s0 + $0x138] sm:$0xff] }
 0x350   :  { %v6667_v43 = vmax.f32 %v6665_v63, %v6666_v52  ;;  %v31052_v31 = vpack.c.bf16 %v27827_v4, %v27826_v15  ;;  %v7121_v40 = vsel %vm108_vm0, %v31038_v34, 0.0  ;;  %v6674_v18 = vmax.f32 %v6672_v17, %v6673_v55 }
 0x351   :  { %v7046_v37 = vadd.f32 %v34789_v22, %v30766_v58  ;;  %34790 = vst [vmem:[#allocation150_spill] sm:$0xff] %v31041_v57  ;;  %34791 = vst [vmem:[#allocation151_spill] sm:$0xff] %v31044_v27  ;;  %v31054_v58 = vpop.eup %27708  ;;  %27716 = vrcp.f32 %v7030_v24  ;;  %24679 = vmatprep.mubr.msk.f32.mxu1 %vm108_vm0, %v31041_v57  ;;  %v31070_v24 = vpack.c.bf16 %v27829_v51, %v27828_v48  ;;  %v34796_v15 = vrot.slane %v30812_v29, 1 }
 0x352   :  { %34792 = vst [vmem:[#allocation152_spill] sm:$0xff] %v31052_v31  ;;  %v7122_v16 = vsel %vm108_vm0, %v31054_v58, 0.0  ;;  %v6737_v60 = vsub.f32 %v34772_v41, %v6667_v43  ;;  %v6738_v52 = vsub.f32 %v34769_v2, %v6667_v43  ;;  %24680 = vmatmul.mubr.msk.f32.vlgmr.msra.gmra.mrb[142].mxu1 %vm108_vm0, %v31044_v27  ;;  %v6675_v28 = vrot.slane %v6674_v18, 1 }
 0x353   :  { %v7047_v62 = vrot.slane %v7046_v37, 1  ;;  %34793 = vst [vmem:[#allocation153_spill] sm:$0xff] %v31070_v24  ;;  %v27711_v11 = vpop.eup %27710  ;;  %v7123_v3 = vadd.f32 %v7122_v16, %v7121_v40  ;;  %27718 = vrcp.f32 %v7039_v54  ;;  %26429 = vmatpush3.bf16.msra.mxu1 %v30999_v12  ;;  %v7057_v54 = vadd.f32 %v34796_v15, %v30812_v29 }
 0x354   :  { %v6861_v63 = vmul.f32 1.442695, %v6737_v60  ;;  %v6863_v2 = vmul.f32 1.442695, %v6738_v52  ;;  %v31075_v17 = vmul.f32 %v27711_v11, %v30536_v26  ;;  %v31078_v55 = vmul.f32 %v27711_v11, %v30540_v25  ;;  %26435 = vmatprep.subr.bf16.mxu1 %v31052_v31 }
 0x355   :  { %v7048_v41 = vadd.f32 %v7047_v62, %v7046_v37  ;;  %v7124_v22 = vrot.slane %v7123_v3, 4  ;;  %v6676_v43 = vmax.f32 %v6674_v18, %v6675_v28  ;;  %v7099_v37 = vrot.slane %v31028_v61, 2 }
 0x356   :  { %34794 = vst [vmem:[#allocation154_spill] sm:$0xff] %v31075_v17  ;;  %34795 = vst [vmem:[#allocation155_spill] sm:$0xff] %v31078_v55  ;;  %v31086_v4 = vadd.f32 %v7115_v21, %v7114_v38  ;;  %24686 = vmatprep.mubr.msk.f32.mxu0 %vm108_vm0, %v31075_v17  ;;  %v34797_v26 = vrot.slane %v30859_v0, 2  ;;  %v7110_v38 = vrot.slane %v31030_v23, 1 }
 0x357   :  { %27720 = vrcp.f32 %v7048_v41  ;;  %v7125_v40 = vadd.f32 %v7124_v22, %v7123_v3  ;;  %v6739_v18 = vsub.f32 %v34784_v33, %v6676_v43  ;;  %v6740_v62 = vsub.f32 %v34782_v45, %v6676_v43  ;;  %24687 = vmatmul.mubr.msk.f32.vlgmr.msra.gmra.mrb[144].mxu0 %vm108_vm0, %v31078_v55  ;;  %v31097_v29 = vpop.eup %27712 }
 0x358   :  { %27722 = vpow2.f32 %v6861_v63  ;;  %v7064_v25 = vadd.f32 %v34797_v26, %v30859_v0  ;;  %26433 = vmatpush3.bf16.msra.mxu0 %v31013_v36  ;;  %v34798_v0 = vrot.slane %v30865_v50, 1  ;;  %v31104_v60 = vpop.eup %27714  ;;  %v7130_v45 = vsel %vm108_vm0, %v31097_v29, 0.0 }
 0x359   :  { %27724 = vpow2.f32 %v6863_v2  ;;  %v7126_v33 = vrot.slane %v7125_v40, 2  ;;  %v6865_v52 = vmul.f32 1.442695, %v6739_v18  ;;  %v6867_v48 = vmul.f32 1.442695, %v6740_v62  ;;  %26439 = vmatprep.subr.bf16.mxu0 %v31070_v24  ;;  %v27832_v62 = vld [vmem:[%s33933_s0 + $0x160] sm:$0xff] }
 0x35a   :  { %27726 = vrcp.f32 %v7057_v54  ;;  %v7065_v21 = vrot.slane %v7064_v25, 1  ;;  %v7075_v16 = vadd.f32 %v34798_v0, %v30865_v50  ;;  %v7131_v51 = vsel %vm108_vm0, %v31104_v60, 0.0 }
 0x35b   :  { %v34799_v3 = vrot.slane %v30956_v30, 2  ;;  %v27717_v50 = vpop.eup %27716  ;;  %v7117_v41 = vrot.slane %v31086_v4, 2  ;;  %v31115_v63 = vadd.f32 %v7126_v33, %v7125_v40  ;;  %v7132_v2 = vadd.f32 %v7131_v51, %v7130_v45 }
 0x35c   :  { %v7066_v11 = vadd.f32 %v7065_v21, %v7064_v25  ;;  %27728 = vrcp.f32 %v7075_v16  ;;  %v31118_v22 = vmul.f32 %v27717_v50, %v30559_v59  ;;  %v31121_v43 = vmul.f32 %v27717_v50, %v30570_v13  ;;  %v27831_v25 = vld [vmem:[%s33933_s0 + $0x158] sm:$0xff]  ;;  %v27833_v21 = vld [vmem:[%s33933_s0 + $0x168] sm:$0xff] }
 0x35d   :  { %v7082_v28 = vadd.f32 %v34799_v3, %v30956_v30  ;;  %27730 = vpow2.f32 %v6865_v52  ;;  %v27719_v54 = vpop.eup %27718  ;;  %v7133_v26 = vrot.slane %v7132_v2, 4  ;;  %v27830_v30 = vld [vmem:[%s33933_s0 + $0x150] sm:$0xff]  ;;  %v7093_v59 = vadd.f32 %v7092_v9, %v30969_v1  ;;  %v34809_v3 = vld [vmem:[#allocation91_spill] sm:$0xff] }
 0x35e   :  { %27732 = vpow2.f32 %v6867_v48  ;;  %34800 = vst [vmem:[#allocation156_spill] sm:$0xff] %v31118_v22  ;;  %34801 = vst [vmem:[#allocation157_spill] sm:$0xff] %v31121_v43  ;;  %v31129_v40 = vpack.c.bf16 %v27831_v25, %v27830_v30  ;;  %24693 = vmatprep.mubr.msk.f32.mxu1 %vm108_vm0, %v31118_v22  ;;  %v31137_v13 = vmul.f32 %v27719_v54, %v30624_v14  ;;  %v7128_v16 = vrot.slane %v31115_v63, 1  ;;  %v31978_v22 = vld [vmem:[%s33933_s0 + $0xe0] sm:$0xff] }
 0x35f   :  { %v7083_v15 = vrot.slane %v7082_v28, 1  ;;  %27734 = vrcp.f32 %v7066_v11  ;;  %v31140_v18 = vmul.f32 %v27719_v54, %v30640_v47  ;;  %v31148_v0 = vpack.c.bf16 %v27833_v21, %v27832_v62  ;;  %24694 = vmatmul.mubr.msk.f32.vlgmr.msra.gmra.mrb[144].mxu1 %vm108_vm0, %v31121_v43  ;;  %35024 = vst [vmem:[#allocation199_spill] sm:$0xff] %v31978_v22 }
 0x360   :  { %34802 = vst [vmem:[#allocation158_spill] sm:$0xff] %v31129_v40  ;;  %34803 = vst [vmem:[#allocation159_spill] sm:$0xff] %v31137_v13  ;;  %v7134_v33 = vadd.f32 %v7133_v26, %v7132_v2  ;;  %27736 = vrcp.f32 %v7093_v59  ;;  %v7100_v14 = vadd.f32 %v7099_v37, %v31028_v61  ;;  %24700 = vmatprep.mubr.msk.f32.mxu0 %vm108_vm0, %v31137_v13  ;;  %26437 = vmatpush3.bf16.msra.mxu1 %v31052_v31  ;;  %v27848_v31 = vld [vmem:[%s33933_s0 + $0x1e0] sm:$0xff]  ;;  %v31954_v13 = vld [vmem:[%s33933_s0 + $0xd8] sm:$0xff] }
 0x361   :  { %34804 = vst [vmem:[#allocation160_spill] sm:$0xff] %v31140_v18  ;;  %34805 = vst [vmem:[#allocation161_spill] sm:$0xff] %v31148_v0  ;;  %v7084_v1 = vadd.f32 %v7083_v15, %v7082_v28  ;;  %v27721_v9 = vpop.eup %27720  ;;  %v7111_v48 = vadd.f32 %v7110_v38, %v31030_v23  ;;  %24701 = vmatmul.mubr.msk.f32.vlgmr.msra.gmra.mrb[146].mxu0 %vm108_vm0, %v31140_v18  ;;  %26443 = vmatprep.subr.bf16.mxu1 %v31129_v40  ;;  %v7997_v28 = vrot.slane %v34809_v3, 4  ;;  %v34810_v15 = vld [vmem:[#allocation94_spill] sm:$0xff] }
 0x362   :  { %v31154_v47 = vpop.eup %27722  ;;  %v31160_v45 = vmul.f32 %v27721_v9, %v30666_v49  ;;  %v31163_v52 = vmul.f32 %v27721_v9, %v30671_v19  ;;  %v7135_v11 = vrot.slane %v7134_v33, 2  ;;  %v31176_v49 = vld [vmem:[%s33933_s0 + $0x170] sm:$0xff]  ;;  %v27835_v19 = vld [vmem:[%s33933_s0 + $0x178] sm:$0xff]  ;;  %v7101_v37 = vrot.slane %v7100_v14, 1  ;;  %26441 = vmatpush3.bf16.msra.mxu0 %v31070_v24 }
 0x363   :  { %27738 = vrcp.f32 %v7084_v1  ;;  %v31166_v51 = vpop.eup %27724  ;;  %v7139_v61 = vsel %vm108_vm0, %v31154_v47, 0.0  ;;  %v31182_v23 = vpack.c.bf16 %v27835_v19, %v31176_v49  ;;  %v7118_v2 = vadd.f32 %v7117_v41, %v31086_v4  ;;  %26447 = vmatprep.subr.bf16.mxu0 %v31148_v0  ;;  %v31205_v4 = vld [vmem:[%s33933_s0 + $0x180] sm:$0xff]  ;;  %v31210_v41 = vld [vmem:[%s33933_s0 + $0x188] sm:$0xff] }
 0x364   :  { %34806 = vst [vmem:[#allocation162_spill] sm:$0xff] %v31160_v45  ;;  %34807 = vst [vmem:[#allocation163_spill] sm:$0xff] %v31163_v52  ;;  %v27727_v38 = vpop.eup %27726  ;;  %v7140_v50 = vsel %vm108_vm0, %v31166_v51, 0.0  ;;  %24707 = vmatprep.mubr.msk.f32.mxu1 %vm108_vm0, %v31160_v45  ;;  %27740 = vrcp.f32 %v7111_v48  ;;  %v7129_v21 = vadd.f32 %v7128_v16, %v31115_v63  ;;  %v7136_v19 = vadd.f32 %v7135_v11, %v7134_v33 }
 0x365   :  { %34808 = vst [vmem:[#allocation164_spill] sm:$0xff] %v31182_v23  ;;  %v7141_v26 = vadd.f32 %v7140_v50, %v7139_v61  ;;  %24708 = vmatmul.mubr.msk.f32.vlgmr.msra.gmra.mrb[146].mxu1 %vm108_vm0, %v31163_v52  ;;  %v31195_v30 = vmul.f32 %v27727_v38, %v30704_v53  ;;  %v31198_v25 = vmul.f32 %v27727_v38, %v30711_v5  ;;  %v7119_v62 = vrot.slane %v7118_v2, 1 }
 0x366   :  { %v27729_v59 = vpop.eup %27728  ;;  %26445 = vmatpush3.bf16.msra.mxu1 %v31129_v40  ;;  %v31214_v53 = vpack.c.bf16 %v31210_v41, %v31205_v4  ;;  %v7102_v5 = vadd.f32 %v7101_v37, %v7100_v14  ;;  %v31231_v14 = vadd.f32 %v7997_v28, %v34809_v3  ;;  %v7137_v33 = vrot.slane %v7136_v19, 1 }
 0x367   :  { %34811 = vst [vmem:[#allocation91_spill] sm:$0xff] %v31195_v30  ;;  %34812 = vst [vmem:[#allocation94_spill] sm:$0xff] %v31198_v25  ;;  %v31217_v1 = vpop.eup %27730  ;;  %v7142_v9 = vrot.slane %v7141_v26, 4  ;;  %24714 = vmatprep.mubr.msk.f32.mxu0 %vm108_vm0, %v31195_v30  ;;  %v31222_v48 = vmul.f32 %v27729_v59, %v30779_v35  ;;  %v31225_v61 = vmul.f32 %v27729_v59, %v30791_v39  ;;  %26451 = vmatprep.subr.bf16.mxu1 %v31182_v23  ;;  %v31257_v59 = vld [vmem:[%s33933_s0 + $0x198] sm:$0xff] }
 0x368   :  { %34813 = vst [vmem:[#allocation165_spill] sm:$0xff] %v31214_v53  ;;  %v31228_v38 = vpop.eup %27732  ;;  %v7148_v63 = vsel %vm108_vm0, %v31217_v1, 0.0  ;;  %24715 = vmatmul.mubr.msk.f32.vlgmr.msra.gmra.mrb[148].mxu0 %vm108_vm0, %v31198_v25  ;;  %27742 = vrcp.f32 %v7102_v5  ;;  %v7120_v35 = vadd.f32 %v7119_v62, %v7118_v2  ;;  %v31271_v5 = vld [vmem:[%s33933_s0 + $0x1a8] sm:$0xff]  ;;  %v34842_v25 = vld [vmem:[#allocation110_spill] sm:$0xff]  ;;  %v31981_v55 = vmul.f32 0.05, %v31978_v22 }
 0x369   :  { %34814 = vst [vmem:[#allocation166_spill] sm:$0xff] %v31222_v48  ;;  %34815 = vst [vmem:[#allocation167_spill] sm:$0xff] %v31225_v61  ;;  %v27735_v16 = vpop.eup %27734  ;;  %v7143_v37 = vadd.f32 %v7142_v9, %v7141_v26  ;;  %v7149_v39 = vsel %vm108_vm0, %v31228_v38, 0.0  ;;  %26449 = vmatpush3.bf16.msra.mxu0 %v31148_v0  ;;  %24728 = vmatprep.mubr.msk.f32.mxu0 %vm108_vm0, %v31222_v48  ;;  %27744 = vrcp.f32 %v7129_v21  ;;  %v31252_v26 = vld [vmem:[%s33933_s0 + $0x190] sm:$0xff]  ;;  %v34837_v48 = vld [vmem:[#allocation37_spill] sm:$0xff] }
 0x36a   :  { %v7150_v11 = vadd.f32 %v7149_v39, %v7148_v63  ;;  %v31243_v3 = vmul.f32 %v27735_v16, %v30759_v7  ;;  %v31246_v28 = vmul.f32 %v27735_v16, %v30761_v6  ;;  %26455 = vmatprep.subr.bf16.mxu0 %v31214_v53  ;;  %27746 = vrcp.f32 %v7120_v35  ;;  %v27737_v50 = vpop.eup %27736  ;;  %v31266_v6 = vld [vmem:[%s33933_s0 + $0x1a0] sm:$0xff]  ;;  %v31290_v39 = vld [vmem:[%s33933_s0 + $0x1b0] sm:$0xff]  ;;  %35025 = vst [vmem:[#allocation200_spill] sm:$0xff] %v31981_v55 }
 0x36b   :  { %v7144_v2 = vrot.slane %v7143_v37, 2  ;;  %v31261_v7 = vpack.c.bf16 %v31257_v59, %v31252_v26  ;;  %v31275_v62 = vpack.c.bf16 %v31271_v5, %v31266_v6  ;;  %v7138_v21 = vadd.f32 %v7137_v33, %v7136_v19  ;;  %v27843_v19 = vld [vmem:[%s33933_s0 + $0x1b8] sm:$0xff] }
 0x36c   :  { %34816 = vst [vmem:[#allocation168_spill] sm:$0xff] %v31243_v3  ;;  %34817 = vst [vmem:[#allocation169_spill] sm:$0xff] %v31246_v28  ;;  %v7151_v63 = vrot.slane %v7150_v11, 4  ;;  %24721 = vmatprep.mubr.msk.f32.mxu1 %vm108_vm0, %v31243_v3  ;;  %24729 = vmatmul.mubr.msk.f32.vlgmr.msra.gmra.mrb[150].mxu0 %vm108_vm0, %v31225_v61  ;;  %v31282_v35 = vmul.f32 %v27737_v50, %v30880_v42  ;;  %v31285_v16 = vmul.f32 %v27737_v50, %v30885_v10  ;;  %v22172_v50 = vld [vmem:[%s33937_s5 + $0x10] sm:$0xff] }
 0x36d   :  { %34818 = vst [vmem:[#allocation170_spill] sm:$0xff] %v31261_v7  ;;  %34819 = vst [vmem:[#allocation171_spill] sm:$0xff] %v31275_v62  ;;  %v27739_v9 = vpop.eup %27738  ;;  %v31296_v33 = vpack.c.bf16 %v27843_v19, %v31290_v39  ;;  %v7145_v54 = vadd.f32 %v7144_v2, %v7143_v37  ;;  %24722 = vmatmul.mubr.msk.f32.vlgmr.msra.gmra.mrb[148].mxu1 %vm108_vm0, %v31246_v28  ;;  %26457 = vmatpush3.bf16.msra.mxu0 %v31214_v53  ;;  %27748 = vrcp.f32 %v7138_v21  ;;  %v22173_v37 = vld [vmem:[%s33937_s5 + $0x18] sm:$0xff] }
 0x36e   :  { %34820 = vst [vmem:[#allocation172_spill] sm:$0xff] %v31282_v35  ;;  %34821 = vst [vmem:[#allocation173_spill] sm:$0xff] %v31285_v16  ;;  %v31301_v42 = vmul.f32 %v27739_v9, %v30831_v32  ;;  %v31304_v10 = vmul.f32 %v27739_v9, %v30836_v56  ;;  %v27741_v2 = vpop.eup %27740  ;;  %v34825_v19 = vld [vmem:[#allocation101_spill] sm:$0xff]  ;;  %v7152_v40 = vadd.f32 %v7151_v63, %v7150_v11  ;;  %26453 = vmatpush3.bf16.msra.mxu1 %v31182_v23  ;;  %v31320_v32 = vld [vmem:[%s33933_s0 + $0x1c0] sm:$0xff] }
 0x36f   :  { %34822 = vst [vmem:[#allocation174_spill] sm:$0xff] %v31296_v33  ;;  %24742 = vmatprep.mubr.msk.f32.mxu0 %vm108_vm0, %v31282_v35  ;;  %v31325_v56 = vld [vmem:[%s33933_s0 + $0x1c8] sm:$0xff]  ;;  %v27846_v11 = vld [vmem:[%s33933_s0 + $0x1d0] sm:$0xff]  ;;  %v27847_v9 = vld [vmem:[%s33933_s0 + $0x1d8] sm:$0xff]  ;;  %v7146_v0 = vrot.slane %v7145_v54, 1  ;;  %26459 = vmatprep.subr.bf16.mxu1 %v31261_v7  ;;  %v31343_v53 = vmul.f32 %v27741_v2, %v30945_v8  ;;  %v31367_v12 = vpack.c.bf16 %v22173_v37, %v22172_v50  ;;  %v34838_v28 = vrot.slane %v34837_v48, 2 }
 0x370   :  { %34823 = vst [vmem:[#allocation175_spill] sm:$0xff] %v31301_v42  ;;  %34824 = vst [vmem:[#allocation176_spill] sm:$0xff] %v31304_v10  ;;  %v31329_v21 = vpack.c.bf16 %v31325_v56, %v31320_v32  ;;  %v31337_v63 = vpack.c.bf16 %v27847_v9, %v27846_v11  ;;  %24735 = vmatprep.mubr.msk.f32.mxu1 %vm108_vm0, %v31301_v42  ;;  %v34829_v23 = vld [vmem:[#allocation147_spill] sm:$0xff]  ;;  %v7153_v36 = vrot.slane %v7152_v40, 2  ;;  %24743 = vmatmul.mubr.msk.f32.vlgmr.msra.gmra.mrb[152].mxu0 %vm108_vm0, %v31285_v16  ;;  %v27850_v8 = vld [vmem:[%s33933_s0 + $0x1f0] sm:$0xff] }
 0x371   :  { %34828 = vst [vmem:[#allocation178_spill] sm:$0xff] %v31343_v53  ;;  %v31346_v24 = vmul.f32 %v27741_v2, %v34829_v23  ;;  %v27849_v11 = vld [vmem:[%s33933_s0 + $0x1e8] sm:$0xff]  ;;  %26463 = vmatprep.subr.bf16.mxu0 %v31275_v62  ;;  %v27851_v23 = vld [vmem:[%s33933_s0 + $0x1f8] sm:$0xff]  ;;  %v34836_v42 = vld [vmem:[#allocation102_spill] sm:$0xff]  ;;  %24736 = vmatmul.mubr.msk.f32.vlgmr.msra.gmra.mrb[150].mxu1 %vm108_vm0, %v31304_v10  ;;  %v7147_v61 = vadd.f32 %v7146_v0, %v7145_v54 }
 0x372   :  { %34826 = vst [vmem:[#allocation101_spill] sm:$0xff] %v31329_v21  ;;  %34827 = vst [vmem:[#allocation177_spill] sm:$0xff] %v31337_v63  ;;  %v31354_v9 = vpack.c.bf16 %v27849_v11, %v27848_v31  ;;  %v31365_v2 = vpack.c.bf16 %v27851_v23, %v27850_v8  ;;  %v34833_v31 = vld [vmem:[#allocation4_spill] sm:$0xff]  ;;  %v34834_v11 = vld [vmem:[#allocation19_spill] sm:$0xff]  ;;  %26465 = vmatpush3.bf16.msra.mxu0 %v31275_v62  ;;  %v7748_v3 = vadd.f32 %v34838_v28, %v34837_v48  ;;  %v27743_v37 = vpop.eup %27742 }
 0x373   :  { %34830 = vst [vmem:[#allocation147_spill] sm:$0xff] %v31346_v24  ;;  %v31371_v35 = vmul.f32 %v34834_v11, %v34833_v31  ;;  %v34839_v8 = vld [vmem:[#allocation6_spill] sm:$0xff]  ;;  %v34840_v23 = vld [vmem:[#allocation9_spill] sm:$0xff]  ;;  %26461 = vmatpush3.bf16.msra.mxu1 %v31261_v7  ;;  %24756 = vmatprep.mubr.msk.f32.mxu0 %vm108_vm0, %v31343_v53  ;;  %v7154_v11 = vadd.f32 %v7153_v36, %v7152_v40  ;;  %v34845_v62 = vld [vmem:[#allocation8_spill] sm:$0xff]  ;;  %v27745_v28 = vpop.eup %27744  ;;  %27750 = vrcp.f32 %v7147_v61 }
 0x374   :  { %34831 = vst [vmem:[#allocation179_spill] sm:$0xff] %v31354_v9  ;;  %34832 = vst [vmem:[#allocation180_spill] sm:$0xff] %v31365_v2  ;;  %v31382_v50 = vmul.f32 %v34840_v23, %v34839_v8  ;;  %v34843_v16 = vld [vmem:[#allocation33_spill] sm:$0xff]  ;;  %v34848_v8 = vld [vmem:[#allocation132_spill] sm:$0xff]  ;;  %26467 = vmatprep.subr.bf16.mxu1 %v31296_v33  ;;  %26471 = vmatprep.subr.bf16.mxu0 %v31329_v21  ;;  %v7749_v36 = vrot.slane %v7748_v3, 1  ;;  %v27747_v40 = vpop.eup %27746 }
 0x375   :  { %34835 = vst [vmem:[#allocation4_spill] sm:$0xff] %v31371_v35  ;;  %v34844_v0 = vrot.slane %v34843_v16, 2  ;;  %v34846_v35 = vld [vmem:[#allocation12_spill] sm:$0xff]  ;;  %v31396_v23 = vmul.f32 %v27743_v37, %v34848_v8  ;;  %24757 = vmatmul.mubr.msk.f32.vlgmr.msra.gmra.mrb[154].mxu0 %vm108_vm0, %v31346_v24  ;;  %v31415_v61 = vmul.f32 %v27747_v40, %v31001_v46  ;;  %v31418_v8 = vmul.f32 %v27747_v40, %v31015_v20  ;;  %v34859_v20 = vld [vmem:[#allocation11_spill] sm:$0xff]  ;;  %v34862_v40 = vld [vmem:[#allocation50_spill] sm:$0xff] }
 0x376   :  { %34841 = vst [vmem:[#allocation19_spill] sm:$0xff] %v31382_v50  ;;  %v31393_v48 = vmul.f32 %v34846_v35, %v34845_v62  ;;  %v34850_v50 = vld [vmem:[#allocation123_spill] sm:$0xff]  ;;  %v31406_v62 = vmul.f32 %v27745_v28, %v31038_v34  ;;  %v31409_v35 = vmul.f32 %v27745_v28, %v31054_v58  ;;  %26473 = vmatpush3.bf16.msra.mxu0 %v31329_v21  ;;  %v34863_v7 = vrot.slane %v34862_v40, 2  ;;  %v31892_v53 = vld [vmem:[%s33933_s0 + $0xa0] sm:$0xff] }
 0x377   :  { %v7766_v54 = vadd.f32 %v34844_v0, %v34843_v16  ;;  %34849 = vst [vmem:[#allocation37_spill] sm:$0xff] %v31396_v23  ;;  %v31399_v31 = vmul.f32 %v27743_v37, %v34850_v50  ;;  %v7155_v16 = vrot.slane %v7154_v11, 1  ;;  %v34854_v50 = vld [vmem:[#allocation112_spill] sm:$0xff]  ;;  %24749 = vmatprep.mubr.msk.f32.mxu1 %vm108_vm0, %v31396_v23  ;;  %34855 = vst [vmem:[#allocation33_spill] sm:$0xff] %v31415_v61  ;;  %v27749_v24 = vpop.eup %27748  ;;  %26479 = vmatprep.subr.bf16.mxu0 %v31354_v9  ;;  %v31928_v10 = vld [vmem:[%s33933_s0 + $0xc8] sm:$0xff] }
 0x378   :  { %34847 = vst [vmem:[#allocation102_spill] sm:$0xff] %v31393_v48  ;;  %34852 = vst [vmem:[#allocation9_spill] sm:$0xff] %v31406_v62  ;;  %v7750_v34 = vadd.f32 %v7749_v36, %v7748_v3  ;;  %24770 = vmatprep.mubr.msk.f32.mxu0 %vm108_vm0, %v31406_v62  ;;  %v34857_v37 = vld [vmem:[#allocation36_spill] sm:$0xff]  ;;  %v34860_v3 = vld [vmem:[#allocation15_spill] sm:$0xff]  ;;  %v31931_v30 = vmul.f32 0.05, %v31928_v10 }
 0x379   :  { %34851 = vst [vmem:[#allocation6_spill] sm:$0xff] %v31399_v31  ;;  %34853 = vst [vmem:[#allocation110_spill] sm:$0xff] %v31409_v35  ;;  %v7767_v0 = vrot.slane %v7766_v54, 1  ;;  %24750 = vmatmul.mubr.msk.f32.vlgmr.msra.gmra.mrb[152].mxu1 %vm108_vm0, %v31399_v31  ;;  %v7156_v58 = vadd.f32 %v7155_v16, %v7154_v11  ;;  %v34858_v46 = vrot.slane %v34857_v37, 2  ;;  %v31434_v36 = vmul.f32 %v34860_v3, %v34859_v20  ;;  %v34865_v16 = vld [vmem:[#allocation29_spill] sm:$0xff]  ;;  %v34869_v20 = vld [vmem:[#allocation55_spill] sm:$0xff] }
 0x37a   :  { %34856 = vst [vmem:[#allocation8_spill] sm:$0xff] %v31418_v8  ;;  %26469 = vmatpush3.bf16.msra.mxu1 %v31296_v33  ;;  %24763 = vmatprep.mubr.msk.f32.mxu1 %vm108_vm0, %v31415_v61  ;;  %27752 = vrcp.f32 %v7750_v34  ;;  %v7802_v11 = vadd.f32 %v34863_v7, %v34862_v40  ;;  %v31450_v34 = vmul.f32 %v27749_v24, %v31104_v60  ;;  %v34870_v3 = vrot.slane %v34869_v20, 2  ;;  %v34874_v33 = vld [vmem:[#allocation100_spill] sm:$0xff]  ;;  %v34875_v60 = vld [vmem:[#allocation61_spill] sm:$0xff]  ;;  %v31884_v62 = vld [vmem:[%s33933_s0 + $0xa8] sm:$0xff] }
 0x37b   :  { %v7768_v28 = vadd.f32 %v7767_v0, %v7766_v54  ;;  %v7784_v48 = vadd.f32 %v34858_v46, %v34857_v37  ;;  %34861 = vst [vmem:[#allocation12_spill] sm:$0xff] %v31434_v36  ;;  %v34864_v54 = vld [vmem:[#allocation25_spill] sm:$0xff]  ;;  %24771 = vmatmul.mubr.msk.f32.vlgmr.msra.gmra.mrb[156].mxu0 %vm108_vm0, %v31409_v35  ;;  %26475 = vmatprep.subr.bf16.mxu1 %v31337_v63  ;;  %27754 = vrcp.f32 %v7156_v58  ;;  %v34876_v58 = vrot.slane %v34875_v60, 2 }
 0x37c   :  { %v31441_v0 = vmul.f32 %v34865_v16, %v34864_v54  ;;  %v31447_v37 = vmul.f32 %v27749_v24, %v31097_v29  ;;  %34868 = vst [vmem:[#allocation112_spill] sm:$0xff] %v31450_v34  ;;  %v7803_v7 = vrot.slane %v7802_v11, 1  ;;  %v7820_v40 = vadd.f32 %v34870_v3, %v34869_v20  ;;  %v34871_v54 = vld [vmem:[#allocation28_spill] sm:$0xff]  ;;  %26481 = vmatpush3.bf16.msra.mxu0 %v31354_v9  ;;  %v34878_v36 = vld [vmem:[#allocation41_spill] sm:$0xff] }
 0x37d   :  { %v7785_v46 = vrot.slane %v7784_v48, 1  ;;  %27756 = vrcp.f32 %v7768_v28  ;;  %v34872_v16 = vld [vmem:[#allocation40_spill] sm:$0xff]  ;;  %v8015_v29 = vrot.slane %v34874_v33, 4  ;;  %24764 = vmatmul.mubr.msk.f32.vlgmr.msra.gmra.mrb[154].mxu1 %vm108_vm0, %v31418_v8  ;;  %v7838_v28 = vadd.f32 %v34876_v58, %v34875_v60  ;;  %35016 = vst [vmem:[#allocation191_spill] sm:$0xff] %v31931_v30 }
 0x37e   :  { %34866 = vst [vmem:[#allocation132_spill] sm:$0xff] %v31441_v0  ;;  %34867 = vst [vmem:[#allocation123_spill] sm:$0xff] %v31447_v37  ;;  %v31458_v21 = vmul.f32 %v34872_v16, %v34871_v54  ;;  %v34877_v0 = vld [vmem:[#allocation26_spill] sm:$0xff]  ;;  %26477 = vmatpush3.bf16.msra.mxu1 %v31337_v63  ;;  %24777 = vmatprep.mubr.msk.f32.mxu1 %vm108_vm0, %v31447_v37  ;;  %v7804_v20 = vadd.f32 %v7803_v7, %v7802_v11  ;;  %v7821_v3 = vrot.slane %v7820_v40, 1  ;;  %v34880_v54 = vld [vmem:[#allocation69_spill] sm:$0xff]  ;;  %v27751_v7 = vpop.eup %27750 }
 0x37f   :  { %v7786_v24 = vadd.f32 %v7785_v46, %v7784_v48  ;;  %v31469_v35 = vmul.f32 %v34878_v36, %v34877_v0  ;;  %v34881_v16 = vrot.slane %v34880_v54, 2  ;;  %v34882_v48 = vld [vmem:[#allocation24_spill] sm:$0xff]  ;;  %v34883_v46 = vld [vmem:[#allocation45_spill] sm:$0xff]  ;;  %26483 = vmatprep.subr.bf16.mxu1 %v31365_v2  ;;  %v7839_v36 = vrot.slane %v7838_v28, 1  ;;  %v34885_v0 = vld [vmem:[#allocation78_spill] sm:$0xff] }
 0x380   :  { %34873 = vst [vmem:[#allocation36_spill] sm:$0xff] %v31458_v21  ;;  %v31479_v21 = vmul.f32 %v34883_v46, %v34882_v48  ;;  %v34886_v60 = vrot.slane %v34885_v0, 2  ;;  %v34887_v63 = vld [vmem:[#allocation38_spill] sm:$0xff]  ;;  %v7822_v37 = vadd.f32 %v7821_v3, %v7820_v40  ;;  %v34895_v3 = vld [vmem:[#allocation57_spill] sm:$0xff]  ;;  %v31887_v8 = vmul.f32 0.05, %v31884_v62 }
 0x381   :  { %34879 = vst [vmem:[#allocation11_spill] sm:$0xff] %v31469_v35  ;;  %v7856_v9 = vadd.f32 %v34881_v16, %v34880_v54  ;;  %27758 = vrcp.f32 %v7786_v24  ;;  %v34888_v35 = vld [vmem:[#allocation52_spill] sm:$0xff]  ;;  %v34890_v16 = vld [vmem:[#allocation85_spill] sm:$0xff]  ;;  %24778 = vmatmul.mubr.msk.f32.vlgmr.msra.gmra.mrb[156].mxu1 %vm108_vm0, %v31450_v34  ;;  %v31495_v24 = vmul.f32 %v27751_v7, %v31154_v47 }
 0x382   :  { %34884 = vst [vmem:[#allocation15_spill] sm:$0xff] %v31479_v21  ;;  %v7874_v58 = vadd.f32 %v34886_v60, %v34885_v0  ;;  %v31487_v11 = vmul.f32 %v34888_v35, %v34887_v63  ;;  %27760 = vrcp.f32 %v7804_v20  ;;  %v34891_v48 = vrot.slane %v34890_v16, 2  ;;  %26485 = vmatpush3.bf16.msra.mxu1 %v31365_v2  ;;  %v34894_v20 = vld [vmem:[#allocation44_spill] sm:$0xff]  ;;  %35010 = vst [vmem:[#allocation185_spill] sm:$0xff] %v31887_v8 }
 0x383   :  { %v7857_v54 = vrot.slane %v7856_v9, 1  ;;  %34892 = vst [vmem:[#allocation25_spill] sm:$0xff] %v31495_v24  ;;  %v31498_v0 = vmul.f32 %v27751_v7, %v31166_v51  ;;  %v7840_v60 = vadd.f32 %v7839_v36, %v7838_v28  ;;  %27762 = vrcp.f32 %v7822_v37  ;;  %24784 = vmatprep.mubr.msk.f32.mxu0 %vm108_vm0, %v31495_v24  ;;  %26487 = vmatprep.subr.bf16.mxu1 %v31367_v12  ;;  %v34898_v36 = vld [vmem:[#allocation49_spill] sm:$0xff] }
 0x384   :  { %34889 = vst [vmem:[#allocation50_spill] sm:$0xff] %v31487_v11  ;;  %v7892_v46 = vadd.f32 %v34891_v48, %v34890_v16  ;;  %v7875_v63 = vrot.slane %v7874_v58, 1  ;;  %v31503_v11 = vmul.f32 %v34895_v3, %v34894_v20  ;;  %v31506_v16 = vadd.f32 %v8015_v29, %v34874_v33  ;;  %v34899_v33 = vld [vmem:[#allocation63_spill] sm:$0xff] }
 0x385   :  { %34893 = vst [vmem:[#allocation29_spill] sm:$0xff] %v31498_v0  ;;  %v7858_v35 = vadd.f32 %v7857_v54, %v7856_v9  ;;  %27764 = vrcp.f32 %v7840_v60  ;;  %v34897_v51 = vrot.slane %v34810_v15, 2  ;;  %v27753_v9 = vpop.eup %27752  ;;  %24785 = vmatmul.mubr.msk.f32.vlgmr.msra.gmra.mrb[158].mxu0 %vm108_vm0, %v31498_v0  ;;  %v31518_v29 = vmul.f32 %v34899_v33, %v34898_v36  ;;  %v34908_v36 = vld [vmem:[#allocation13_spill] sm:$0xff] }
 0x386   :  { %v7893_v40 = vrot.slane %v7892_v46, 1  ;;  %34896 = vst [vmem:[#allocation55_spill] sm:$0xff] %v31503_v11  ;;  %v7876_v47 = vadd.f32 %v7875_v63, %v7874_v58  ;;  %v34901_v7 = vrot.slane %v34825_v19, 2  ;;  %v27755_v48 = vpop.eup %27754  ;;  %v31526_v58 = vld [vmem:[%s33933_s0] sm:$0xff] }
 0x387   :  { %v7910_v37 = vadd.f32 %v34897_v51, %v34810_v15  ;;  %27766 = vrcp.f32 %v7858_v35  ;;  %34900 = vst [vmem:[#allocation28_spill] sm:$0xff] %v31518_v29  ;;  %24898 = vmatprep.mubr.msk.f32.mxu0 %vm108_vm0, %v31526_v58  ;;  %v34902_v15 = vld [vmem:[#allocation10_spill] sm:$0xff]  ;;  %v31540_v20 = vmul.f32 %v27755_v48, %v31228_v38  ;;  %v8017_v51 = vrot.slane %v31506_v16, 2  ;;  %v34917_v29 = vld [vmem:[#allocation77_spill] sm:$0xff] }
 0x388   :  { %v7894_v28 = vadd.f32 %v7893_v40, %v7892_v46  ;;  %v7928_v54 = vadd.f32 %v34901_v7, %v34825_v19  ;;  %v31531_v60 = vmul.f32 %v27753_v9, %v34902_v15  ;;  %v34904_v46 = vld [vmem:[#allocation2_spill] sm:$0xff]  ;;  %27768 = vrcp.f32 %v7876_v47  ;;  %v27757_v40 = vpop.eup %27756  ;;  %v34910_v7 = vld [vmem:[#allocation3_spill] sm:$0xff] }
 0x389   :  { %v31534_v63 = vmul.f32 %v27753_v9, %v34904_v46  ;;  %v7911_v35 = vrot.slane %v7910_v37, 1  ;;  %v31537_v19 = vmul.f32 %v27755_v48, %v31217_v1  ;;  %34907 = vst [vmem:[#allocation26_spill] sm:$0xff] %v31540_v20  ;;  %v31544_v33 = vmul.f32 %v27757_v40, %v34908_v36  ;;  %v34912_v1 = vld [vmem:[#allocation56_spill] sm:$0xff]  ;;  %v34913_v46 = vld [vmem:[#allocation70_spill] sm:$0xff] }
 0x38a   :  { %34903 = vst [vmem:[#allocation40_spill] sm:$0xff] %v31531_v60  ;;  %27770 = vrcp.f32 %v7894_v28  ;;  %v7929_v3 = vrot.slane %v7928_v54, 1  ;;  %v31547_v15 = vmul.f32 %v27757_v40, %v34910_v7  ;;  %v31553_v2 = vmul.f32 %v34913_v46, %v34912_v1  ;;  %v34916_v48 = vld [vmem:[#allocation62_spill] sm:$0xff] }
 0x38b   :  { %34905 = vst [vmem:[#allocation100_spill] sm:$0xff] %v31534_v63  ;;  %34906 = vst [vmem:[#allocation61_spill] sm:$0xff] %v31537_v19  ;;  %v7912_v9 = vadd.f32 %v7911_v35, %v7910_v37  ;;  %24791 = vmatprep.mubr.msk.f32.mxu1 %vm108_vm0, %v31537_v19  ;;  %v34915_v38 = vrot.slane %v34836_v42, 2  ;;  %v31560_v36 = vmul.f32 %v34917_v29, %v34916_v48  ;;  %v27759_v11 = vpop.eup %27758  ;;  %v34919_v37 = vrot.slane %v34842_v25, 2  ;;  %v34920_v35 = vld [vmem:[#allocation67_spill] sm:$0xff]  ;;  %v34921_v40 = vld [vmem:[#allocation86_spill] sm:$0xff] }
 0x38c   :  { %34909 = vst [vmem:[#allocation41_spill] sm:$0xff] %v31544_v33  ;;  %34911 = vst [vmem:[#allocation69_spill] sm:$0xff] %v31547_v15  ;;  %v7930_v47 = vadd.f32 %v7929_v3, %v7928_v54  ;;  %24792 = vmatmul.mubr.msk.f32.vlgmr.msra.gmra.mrb[158].mxu1 %vm108_vm0, %v31540_v20  ;;  %v31569_v3 = vmul.f32 %v34921_v40, %v34920_v35  ;;  %v27761_v1 = vpop.eup %27760  ;;  %v34924_v29 = vld [vmem:[#allocation16_spill] sm:$0xff]  ;;  %v34930_v35 = vld [vmem:[#allocation22_spill] sm:$0xff] }
 0x38d   :  { %34914 = vst [vmem:[#allocation24_spill] sm:$0xff] %v31553_v2  ;;  %v7946_v28 = vadd.f32 %v34915_v38, %v34836_v42  ;;  %34918 = vst [vmem:[#allocation45_spill] sm:$0xff] %v31560_v36  ;;  %27772 = vrcp.f32 %v7912_v9  ;;  %v7964_v54 = vadd.f32 %v34919_v37, %v34842_v25  ;;  %v34923_v42 = vrot.slane %v34854_v50, 2  ;;  %26489 = vmatpush3.bf16.msra.mxu1 %v31367_v12  ;;  %v34926_v38 = vld [vmem:[#allocation5_spill] sm:$0xff]  ;;  %v34928_v25 = vld [vmem:[#allocation14_spill] sm:$0xff] }
 0x38e   :  { %34922 = vst [vmem:[#allocation78_spill] sm:$0xff] %v31569_v3  ;;  %v31576_v46 = vmul.f32 %v27759_v11, %v34924_v29  ;;  %v31579_v9 = vmul.f32 %v27759_v11, %v34926_v38  ;;  %27774 = vrcp.f32 %v7930_v47  ;;  %v31582_v37 = vmul.f32 %v27761_v1, %v34928_v25  ;;  %v34932_v2 = vld [vmem:[#allocation76_spill] sm:$0xff]  ;;  %v34933_v12 = vld [vmem:[#allocation93_spill] sm:$0xff] }
 0x38f   :  { %v7982_v7 = vadd.f32 %v34923_v42, %v34854_v50  ;;  %v7947_v48 = vrot.slane %v7946_v28, 1  ;;  %v31585_v40 = vmul.f32 %v27761_v1, %v34930_v35  ;;  %v7965_v3 = vrot.slane %v7964_v54, 1  ;;  %v27763_v50 = vpop.eup %27762  ;;  %v34936_v47 = vld [vmem:[#allocation84_spill] sm:$0xff]  ;;  %v34937_v38 = vld [vmem:[#allocation105_spill] sm:$0xff]  ;;  %v34941_v35 = vld [vmem:[#allocation18_spill] sm:$0xff] }
 0x390   :  { %34925 = vst [vmem:[#allocation38_spill] sm:$0xff] %v31576_v46  ;;  %34927 = vst [vmem:[#allocation52_spill] sm:$0xff] %v31579_v9  ;;  %v31589_v21 = vmul.f32 %v34933_v12, %v34932_v2  ;;  %v34935_v11 = vrot.slane %v31231_v14, 2  ;;  %v31596_v9 = vmul.f32 %v34937_v38, %v34936_v47  ;;  %v27765_v25 = vpop.eup %27764  ;;  %v34943_v2 = vld [vmem:[#allocation34_spill] sm:$0xff]  ;;  %v34947_v47 = vld [vmem:[#allocation35_spill] sm:$0xff] }
 0x391   :  { %34929 = vst [vmem:[#allocation85_spill] sm:$0xff] %v31582_v37  ;;  %34931 = vst [vmem:[#allocation44_spill] sm:$0xff] %v31585_v40  ;;  %v7983_v36 = vrot.slane %v7982_v7, 1  ;;  %v7948_v42 = vadd.f32 %v7947_v48, %v7946_v28  ;;  %v34939_v37 = vld [vmem:[#allocation23_spill] sm:$0xff]  ;;  %v31602_v40 = vmul.f32 %v27763_v50, %v34941_v35  ;;  %v7966_v28 = vadd.f32 %v7965_v3, %v7964_v54  ;;  %v27767_v46 = vpop.eup %27766  ;;  %v34951_v3 = vld [vmem:[#allocation42_spill] sm:$0xff] }
 0x392   :  { %34934 = vst [vmem:[#allocation57_spill] sm:$0xff] %v31589_v21  ;;  %v8000_v29 = vadd.f32 %v34935_v11, %v31231_v14  ;;  %34938 = vst [vmem:[#allocation49_spill] sm:$0xff] %v31596_v9  ;;  %v31599_v1 = vmul.f32 %v27763_v50, %v34939_v37  ;;  %v31605_v12 = vmul.f32 %v27765_v25, %v34943_v2  ;;  %v34945_v21 = vld [vmem:[#allocation21_spill] sm:$0xff]  ;;  %v27769_v11 = vpop.eup %27768  ;;  %v34949_v37 = vld [vmem:[#allocation30_spill] sm:$0xff] }
 0x393   :  { %34942 = vst [vmem:[#allocation10_spill] sm:$0xff] %v31602_v40  ;;  %v7984_v48 = vadd.f32 %v7983_v36, %v7982_v7  ;;  %v31608_v15 = vmul.f32 %v27765_v25, %v34945_v21  ;;  %27776 = vrcp.f32 %v7948_v42  ;;  %v31611_v38 = vmul.f32 %v27767_v46, %v34947_v47  ;;  %v34953_v50 = vld [vmem:[#allocation43_spill] sm:$0xff]  ;;  %v34957_v2 = vld [vmem:[#allocation48_spill] sm:$0xff] }
 0x394   :  { %34940 = vst [vmem:[#allocation63_spill] sm:$0xff] %v31599_v1  ;;  %34944 = vst [vmem:[#allocation2_spill] sm:$0xff] %v31605_v12  ;;  %v8001_v14 = vrot.slane %v8000_v29, 1  ;;  %v31614_v9 = vmul.f32 %v27767_v46, %v34949_v37  ;;  %27778 = vrcp.f32 %v7966_v28  ;;  %v8018_v54 = vadd.f32 %v8017_v51, %v31506_v16  ;;  %v27771_v36 = vpop.eup %27770  ;;  %v34955_v42 = vld [vmem:[#allocation47_spill] sm:$0xff] }
 0x395   :  { %34946 = vst [vmem:[#allocation13_spill] sm:$0xff] %v31608_v15  ;;  %34948 = vst [vmem:[#allocation3_spill] sm:$0xff] %v31611_v38  ;;  %v31618_v7 = vmul.f32 %v27769_v11, %v34951_v3  ;;  %v31621_v35 = vmul.f32 %v27769_v11, %v34953_v50  ;;  %27780 = vrcp.f32 %v7984_v48  ;;  %v31624_v25 = vmul.f32 %v27771_v36, %v34955_v42  ;;  %v34959_v51 = vld [vmem:[#allocation51_spill] sm:$0xff]  ;;  %v34961_v3 = vld [vmem:[#allocation53_spill] sm:$0xff] }
 0x396   :  { %34950 = vst [vmem:[#allocation56_spill] sm:$0xff] %v31614_v9  ;;  %v8002_v21 = vadd.f32 %v8001_v14, %v8000_v29  ;;  %v31627_v47 = vmul.f32 %v27771_v36, %v34957_v2  ;;  %v8019_v46 = vrot.slane %v8018_v54, 1  ;;  %v34963_v11 = vld [vmem:[#allocation58_spill] sm:$0xff]  ;;  %v34965_v29 = vld [vmem:[#allocation60_spill] sm:$0xff]  ;;  %v34967_v42 = vld [vmem:[#allocation65_spill] sm:$0xff] }
 0x397   :  { %34952 = vst [vmem:[#allocation70_spill] sm:$0xff] %v31618_v7  ;;  %34954 = vst [vmem:[#allocation62_spill] sm:$0xff] %v31621_v35  ;;  %v27773_v28 = vpop.eup %27772 }
 0x398   :  { %34956 = vst [vmem:[#allocation77_spill] sm:$0xff] %v31624_v25  ;;  %34958 = vst [vmem:[#allocation67_spill] sm:$0xff] %v31627_v47  ;;  %27782 = vrcp.f32 %v8002_v21  ;;  %v8020_v37 = vadd.f32 %v8019_v46, %v8018_v54  ;;  %v27775_v16 = vpop.eup %27774  ;;  %v31630_v9 = vmul.f32 %v27773_v28, %v34959_v51  ;;  %v31633_v7 = vmul.f32 %v27773_v28, %v34961_v3  ;;  %v34969_v54 = vld [vmem:[#allocation66_spill] sm:$0xff]  ;;  %v34971_v51 = vld [vmem:[#allocation73_spill] sm:$0xff] }
 0x399   :  { %v31636_v48 = vmul.f32 %v27775_v16, %v34963_v11  ;;  %v31639_v14 = vmul.f32 %v27775_v16, %v34965_v29  ;;  %v34973_v28 = vld [vmem:[#allocation74_spill] sm:$0xff]  ;;  %v34975_v11 = vld [vmem:[#allocation81_spill] sm:$0xff]  ;;  %v34977_v16 = vld [vmem:[#allocation83_spill] sm:$0xff] }
 0x39a   :  { %34960 = vst [vmem:[#allocation86_spill] sm:$0xff] %v31630_v9  ;;  %34962 = vst [vmem:[#allocation16_spill] sm:$0xff] %v31633_v7  ;;  %27784 = vrcp.f32 %v8020_v37 }
 0x39b   :  { %34964 = vst [vmem:[#allocation5_spill] sm:$0xff] %v31636_v48  ;;  %34966 = vst [vmem:[#allocation14_spill] sm:$0xff] %v31639_v14  ;;  %v34979_v14 = vld [vmem:[#allocation88_spill] sm:$0xff] }
 0x39d   :  { %v27777_v36 = vpop.eup %27776 }
 0x39e   :  { %v27779_v50 = vpop.eup %27778  ;;  %v31642_v21 = vmul.f32 %v27777_v36, %v34967_v42  ;;  %v31645_v2 = vmul.f32 %v27777_v36, %v34969_v54 }
 0x39f   :  { %v27781_v46 = vpop.eup %27780  ;;  %v31648_v9 = vmul.f32 %v27779_v50, %v34971_v51  ;;  %v31651_v3 = vmul.f32 %v27779_v50, %v34973_v28  ;;  %v31674_v28 = vld [vmem:[%s33933_s0 + $0x8] sm:$0xff] }
 0x3a0   :  { %34968 = vst [vmem:[#allocation22_spill] sm:$0xff] %v31642_v21  ;;  %34970 = vst [vmem:[#allocation76_spill] sm:$0xff] %v31645_v2  ;;  %v31654_v48 = vmul.f32 %v27781_v46, %v34975_v11  ;;  %v31657_v37 = vmul.f32 %v27781_v46, %v34977_v16  ;;  %v34981_v21 = vld [vmem:[#allocation90_spill] sm:$0xff]  ;;  %v34983_v2 = vld [vmem:[#allocation96_spill] sm:$0xff]  ;;  %v31677_v46 = vmul.f32 0.05, %v31674_v28 }
 0x3a1   :  { %34972 = vst [vmem:[#allocation93_spill] sm:$0xff] %v31648_v9  ;;  %34974 = vst [vmem:[#allocation84_spill] sm:$0xff] %v31651_v3  ;;  %v34985_v9 = vld [vmem:[#allocation97_spill] sm:$0xff]  ;;  %v31680_v11 = vmul.f32 0.05, %v31526_v58 }
 0x3a2   :  { %34976 = vst [vmem:[#allocation105_spill] sm:$0xff] %v31654_v48  ;;  %34978 = vst [vmem:[#allocation23_spill] sm:$0xff] %v31657_v37  ;;  %v27783_v29 = vpop.eup %27782 }
 0x3a3   :  { %v31660_v42 = vmul.f32 %v27783_v29, %v34979_v14  ;;  %v31663_v36 = vmul.f32 %v27783_v29, %v34981_v21  ;;  %34987 = vst [vmem:[#allocation30_spill] sm:$0xff] %v31677_v46  ;;  %34988 = vst [vmem:[#allocation42_spill] sm:$0xff] %v31680_v11 }
 0x3a4   :  { %v27785_v54 = vpop.eup %27784 }
 0x3a5   :  { %34980 = vst [vmem:[#allocation18_spill] sm:$0xff] %v31660_v42  ;;  %34982 = vst [vmem:[#allocation34_spill] sm:$0xff] %v31663_v36  ;;  %v31666_v51 = vmul.f32 %v27785_v54, %v34983_v2  ;;  %v31669_v50 = vmul.f32 %v27785_v54, %v34985_v9  ;;  %v31713_v42 = vld [vmem:[%s33933_s0 + $0x20] sm:$0xff] }
 0x3a6   :  { %v31716_v37 = vmul.f32 0.05, %v31713_v42 }
 0x3a7   :  { %34984 = vst [vmem:[#allocation21_spill] sm:$0xff] %v31666_v51  ;;  %34986 = vst [vmem:[#allocation35_spill] sm:$0xff] %v31669_v50  ;;  %v31689_v50 = vld [vmem:[%s33933_s0 + $0x18] sm:$0xff] }
 0x3a8   :  { %v31692_v58 = vmul.f32 0.05, %v31689_v50  ;;  %34992 = vst [vmem:[#allocation51_spill] sm:$0xff] %v31716_v37 }
 0x3aa   :  { %34989 = vst [vmem:[#allocation43_spill] sm:$0xff] %v31692_v58 }
 0x3b1   :  { %v24576_v14 = vpop.f32.mrb[128].mxu0 }
 0x3b2   :  { %v10780_v21 = vmul.f32 0.95, %v24576_v14  ;;  %v8259_v16 = vpop.f32.mrb[129].mxu0  ;;  %v31697_v14 = vld [vmem:[%s33933_s0 + $0x10] sm:$0xff] }
 0x3b3   :  { %v10779_v29 = vmul.f32 0.95, %v8259_v16 }
 0x3b4   :  { %v10844_v2 = vadd.f32 %v10780_v21, %v31677_v46  ;;  %v31700_v21 = vmul.f32 0.05, %v31697_v14 }
 0x3b5   :  { %v10843_v9 = vadd.f32 %v10779_v29, %v31680_v11 }
 0x3b6   :  { %34990 = vst [vmem:[#allocation47_spill] sm:$0xff] %v31700_v21 }
 0x3b7   :  { %24798 = vmatprep.mubr.msk.f32.mxu1 %vm108_vm0, %v10843_v9  ;;  %v26494_v54 = vpack.c.bf16 %v10844_v2, %v10843_v9  ;;  %v31705_v9 = vld [vmem:[%s33933_s0 + $0x28] sm:$0xff] }
 0x3b8   :  { %24799 = vmatmul.mubr.msk.f32.vlgmr.msra.gmra.mrb[160].mxu1 %vm108_vm0, %v10844_v2 }
 0x3b9   :  { %26495 = vmatprep.subr.bf16.mxu1 %v26494_v54 }
 0x3ba   :  { %26497 = vmatpush3.bf16.msra.mxu1 %v26494_v54  ;;  %v31708_v54 = vmul.f32 0.05, %v31705_v9 }
 0x3bc   :  { %34991 = vst [vmem:[#allocation48_spill] sm:$0xff] %v31708_v54 }
 0x3c1   :  { %v24583_v16 = vpop.f32.mrb[128].mxu1 }
 0x3c2   :  { %v10782_v29 = vmul.f32 0.95, %v24583_v16  ;;  %v8340_v2 = vpop.f32.mrb[129].mxu1 }
 0x3c3   :  { %v10781_v51 = vmul.f32 0.95, %v8340_v2  ;;  %v24590_v36 = vpop.f32.mrb[130].mxu0 }
 0x3c4   :  { %v10846_v16 = vadd.f32 %v10782_v29, %v31692_v58  ;;  %v10784_v48 = vmul.f32 0.95, %v24590_v36  ;;  %v8421_v3 = vpop.f32.mrb[131].mxu0  ;;  %v31742_v36 = vld [vmem:[%s33933_s0 + $0x30] sm:$0xff] }
 0x3c5   :  { %v10845_v46 = vadd.f32 %v10781_v51, %v31700_v21  ;;  %v10783_v11 = vmul.f32 0.95, %v8421_v3  ;;  %v31745_v51 = vmul.f32 0.05, %v31742_v36 }
 0x3c6   :  { %v10848_v7 = vadd.f32 %v10784_v48, %v31708_v54  ;;  %v31734_v48 = vld [vmem:[%s33933_s0 + $0x38] sm:$0xff] }
 0x3c7   :  { %v10847_v2 = vadd.f32 %v10783_v11, %v31716_v37  ;;  %24801 = vmatprep.mubr.msk.f32.mxu1 %vm108_vm0, %v10845_v46  ;;  %v31723_v47 = vpack.c.bf16 %v10846_v16, %v10845_v46  ;;  %v31737_v3 = vmul.f32 0.05, %v31734_v48  ;;  %34994 = vst [vmem:[#allocation58_spill] sm:$0xff] %v31745_v51  ;;  %v31758_v37 = vld [vmem:[%s33933_s0 + $0x40] sm:$0xff] }
 0x3c8   :  { %24802 = vmatmul.mubr.msk.f32.gmra.mrb[162].mxu1 %vm108_vm0, %v10846_v16  ;;  %v31761_v58 = vmul.f32 0.05, %v31758_v37 }
 0x3c9   :  { %26499 = vmatprep.subr.bf16.mxu1 %v31723_v47  ;;  %24804 = vmatprep.mubr.msk.f32.mxu1 %vm108_vm0, %v10847_v2  ;;  %v31728_v29 = vpack.c.bf16 %v10848_v7, %v10847_v2  ;;  %34993 = vst [vmem:[#allocation53_spill] sm:$0xff] %v31737_v3 }
 0x3ca   :  { %34996 = vst [vmem:[#allocation65_spill] sm:$0xff] %v31761_v58 }
 0x3cc   :  { %24805 = vmatmul.mubr.msk.f32.gmra.mrb[164].mxu1 %vm108_vm0, %v10848_v7  ;;  %v31750_v7 = vld [vmem:[%s33933_s0 + $0x48] sm:$0xff] }
 0x3cd   :  { %v31753_v11 = vmul.f32 0.05, %v31750_v7 }
 0x3cf   :  { %34995 = vst [vmem:[#allocation60_spill] sm:$0xff] %v31753_v11 }
 0x3d3   :  { %v24597_v46 = vpop.f32.mrb[130].mxu1 }
 0x3d4   :  { %v10786_v16 = vmul.f32 0.95, %v24597_v46  ;;  %v8502_v2 = vpop.f32.mrb[131].mxu1  ;;  %v24604_v54 = vpop.f32.mrb[132].mxu0 }
 0x3d5   :  { %v10785_v21 = vmul.f32 0.95, %v8502_v2  ;;  %v10788_v25 = vmul.f32 0.95, %v24604_v54  ;;  %v8583_v35 = vpop.f32.mrb[133].mxu0  ;;  %v31801_v54 = vld [vmem:[%s33933_s0 + $0x50] sm:$0xff] }
 0x3d6   :  { %v10850_v38 = vadd.f32 %v10786_v16, %v31737_v3  ;;  %v10787_v15 = vmul.f32 0.95, %v8583_v35  ;;  %v31777_v35 = vld [vmem:[%s33933_s0 + $0x68] sm:$0xff]  ;;  %v31804_v16 = vmul.f32 0.05, %v31801_v54 }
 0x3d7   :  { %v10849_v12 = vadd.f32 %v10785_v21, %v31745_v51  ;;  %v10852_v46 = vadd.f32 %v10788_v25, %v31753_v11  ;;  %v31780_v21 = vmul.f32 0.05, %v31777_v35 }
 0x3d8   :  { %v10851_v40 = vadd.f32 %v10787_v15, %v31761_v58  ;;  %v31785_v15 = vld [vmem:[%s33933_s0 + $0x58] sm:$0xff]  ;;  %35000 = vst [vmem:[#allocation81_spill] sm:$0xff] %v31804_v16 }
 0x3d9   :  { %24807 = vmatprep.mubr.msk.f32.mxu1 %vm108_vm0, %v10849_v12  ;;  %v31768_v1 = vpack.c.bf16 %v10850_v38, %v10849_v12  ;;  %34997 = vst [vmem:[#allocation66_spill] sm:$0xff] %v31780_v21  ;;  %v31788_v12 = vmul.f32 0.05, %v31785_v15 }
 0x3da   :  { %24808 = vmatmul.mubr.msk.f32.gmra.mrb[166].mxu1 %vm108_vm0, %v10850_v38  ;;  %v31771_v33 = vpack.c.bf16 %v10852_v46, %v10851_v40 }
 0x3db   :  { %24810 = vmatprep.mubr.msk.f32.mxu1 %vm108_vm0, %v10851_v40  ;;  %34998 = vst [vmem:[#allocation73_spill] sm:$0xff] %v31788_v12  ;;  %v31793_v40 = vld [vmem:[%s33933_s0 + $0x60] sm:$0xff] }
 0x3dc   :  { %v31796_v25 = vmul.f32 0.05, %v31793_v40 }
 0x3dd   :  { %v24618_v38 = vpop.f32.mrb[134].mxu0 }
 0x3de   :  { %34999 = vst [vmem:[#allocation74_spill] sm:$0xff] %v31796_v25  ;;  %v24611_v2 = vpop.f32.mrb[132].mxu1  ;;  %v10792_v11 = vmul.f32 0.95, %v24618_v38  ;;  %v8745_v58 = vpop.f32.mrb[135].mxu0  ;;  %24811 = vmatmul.mubr.msk.f32.gmra.mrb[168].mxu1 %vm108_vm0, %v10852_v46 }
 0x3df   :  { %v10790_v3 = vmul.f32 0.95, %v24611_v2  ;;  %v8664_v51 = vpop.f32.mrb[133].mxu1  ;;  %v10791_v63 = vmul.f32 0.95, %v8745_v58  ;;  %v31821_v58 = vld [vmem:[%s33933_s0 + $0x78] sm:$0xff] }
 0x3e0   :  { %v10789_v60 = vmul.f32 0.95, %v8664_v51  ;;  %v10856_v20 = vadd.f32 %v10792_v11, %v31780_v21 }
 0x3e1   :  { %v10854_v19 = vadd.f32 %v10790_v3, %v31788_v12  ;;  %v10855_v0 = vadd.f32 %v10791_v63, %v31796_v25  ;;  %v31824_v3 = vmul.f32 0.05, %v31821_v58  ;;  %v31848_v25 = vld [vmem:[%s33933_s0 + $0x80] sm:$0xff] }
 0x3e2   :  { %v10853_v24 = vadd.f32 %v10789_v60, %v31804_v16  ;;  %v31830_v60 = vld [vmem:[%s33933_s0 + $0x70] sm:$0xff] }
 0x3e3   :  { %v31811_v34 = vpack.c.bf16 %v10856_v20, %v10855_v0  ;;  %35002 = vst [vmem:[#allocation88_spill] sm:$0xff] %v31824_v3 }
 0x3e4   :  { %24813 = vmatprep.mubr.msk.f32.mxu1 %vm108_vm0, %v10853_v24  ;;  %v31814_v38 = vpack.c.bf16 %v10854_v19, %v10853_v24  ;;  %v31833_v24 = vmul.f32 0.05, %v31830_v60 }
 0x3e5   :  { %35001 = vst [vmem:[#allocation83_spill] sm:$0xff] %v31811_v34  ;;  %24814 = vmatmul.mubr.msk.f32.gmra.mrb[170].mxu1 %vm108_vm0, %v10854_v19 }
 0x3e6   :  { %24816 = vmatprep.mubr.msk.f32.mxu1 %vm108_vm0, %v10855_v0  ;;  %35003 = vst [vmem:[#allocation90_spill] sm:$0xff] %v31833_v24 }
 0x3e9   :  { %24817 = vmatmul.mubr.msk.f32.gmra.mrb[172].mxu1 %vm108_vm0, %v10856_v20  ;;  %v31840_v20 = vld [vmem:[%s33933_s0 + $0x88] sm:$0xff] }
 0x3ea   :  { %v31843_v2 = vmul.f32 0.05, %v31840_v20 }
 0x3eb   :  { %v24625_v63 = vpop.f32.mrb[134].mxu1 }
 0x3ec   :  { %v10794_v0 = vmul.f32 0.95, %v24625_v63  ;;  %v8826_v19 = vpop.f32.mrb[135].mxu1  ;;  %35004 = vst [vmem:[#allocation96_spill] sm:$0xff] %v31843_v2  ;;  %v31851_v63 = vmul.f32 0.05, %v31848_v25 }
 0x3ed   :  { %v10793_v51 = vmul.f32 0.95, %v8826_v19 }
 0x3ee   :  { %v10858_v11 = vadd.f32 %v10794_v0, %v31824_v3  ;;  %35005 = vst [vmem:[#allocation97_spill] sm:$0xff] %v31851_v63 }
 0x3ef   :  { %v10857_v46 = vadd.f32 %v10793_v51, %v31833_v24 }
 0x3f0   :  { %v24632_v21 = vpop.f32.mrb[136].mxu0 }
 0x3f1   :  { %v10796_v0 = vmul.f32 0.95, %v24632_v21  ;;  %v8907_v19 = vpop.f32.mrb[137].mxu0  ;;  %24819 = vmatprep.mubr.msk.f32.mxu1 %vm108_vm0, %v10857_v46  ;;  %v31854_v51 = vpack.c.bf16 %v10858_v11, %v10857_v46  ;;  %v31866_v21 = vld [vmem:[%s33933_s0 + $0x98] sm:$0xff] }
 0x3f2   :  { %v10795_v3 = vmul.f32 0.95, %v8907_v19  ;;  %24820 = vmatmul.mubr.msk.f32.gmra.mrb[174].mxu1 %vm108_vm0, %v10858_v11  ;;  %v31869_v46 = vmul.f32 0.05, %v31866_v21  ;;  %v31874_v11 = vld [vmem:[%s33933_s0 + $0x90] sm:$0xff] }
 0x3f3   :  { %35006 = vst [vmem:[#allocation181_spill] sm:$0xff] %v31854_v51  ;;  %v10860_v24 = vadd.f32 %v10796_v0, %v31843_v2 }
 0x3f4   :  { %v10859_v12 = vadd.f32 %v10795_v3, %v31851_v63  ;;  %35008 = vst [vmem:[#allocation183_spill] sm:$0xff] %v31869_v46  ;;  %v31877_v3 = vmul.f32 0.05, %v31874_v11 }
 0x3f6   :  { %24822 = vmatprep.mubr.msk.f32.mxu1 %vm108_vm0, %v10859_v12  ;;  %v31860_v16 = vpack.c.bf16 %v10860_v24, %v10859_v12  ;;  %35009 = vst [vmem:[#allocation184_spill] sm:$0xff] %v31877_v3 }
 0x3f7   :  { %24823 = vmatmul.mubr.msk.f32.gmra.mrb[176].mxu1 %vm108_vm0, %v10860_v24 }
 0x3f8   :  { %35007 = vst [vmem:[#allocation182_spill] sm:$0xff] %v31860_v16 }
 0x3f9   :  { %v24639_v12 = vpop.f32.mrb[136].mxu1 }
 0x3fa   :  { %v10798_v0 = vmul.f32 0.95, %v24639_v12  ;;  %v8988_v19 = vpop.f32.mrb[137].mxu1  ;;  %v31895_v12 = vmul.f32 0.05, %v31892_v53 }
 0x3fb   :  { %v10797_v24 = vmul.f32 0.95, %v8988_v19 }
 0x3fc   :  { %v10862_v2 = vadd.f32 %v10798_v0, %v31869_v46  ;;  %35011 = vst [vmem:[#allocation186_spill] sm:$0xff] %v31895_v12 }
 0x3fd   :  { %v10861_v63 = vadd.f32 %v10797_v24, %v31877_v3 }
 0x3fe   :  { %v24646_v61 = vpop.f32.mrb[138].mxu0 }
 0x3ff   :  { %v10800_v0 = vmul.f32 0.95, %v24646_v61  ;;  %v9069_v19 = vpop.f32.mrb[139].mxu0  ;;  %24825 = vmatprep.mubr.msk.f32.mxu1 %vm108_vm0, %v10861_v63  ;;  %v31898_v24 = vpack.c.bf16 %v10862_v2, %v10861_v63  ;;  %v31910_v61 = vld [vmem:[%s33933_s0 + $0xb8] sm:$0xff] }
 0x400   :  { %v10799_v46 = vmul.f32 0.95, %v9069_v19  ;;  %24826 = vmatmul.mubr.msk.f32.gmra.mrb[178].mxu1 %vm108_vm0, %v10862_v2  ;;  %v31913_v63 = vmul.f32 0.05, %v31910_v61  ;;  %v31918_v2 = vld [vmem:[%s33933_s0 + $0xb0] sm:$0xff] }
 0x401   :  { %35012 = vst [vmem:[#allocation187_spill] sm:$0xff] %v31898_v24  ;;  %v10864_v3 = vadd.f32 %v10800_v0, %v31887_v8 }
 0x402   :  { %v10863_v31 = vadd.f32 %v10799_v46, %v31895_v12  ;;  %35014 = vst [vmem:[#allocation189_spill] sm:$0xff] %v31913_v63  ;;  %v31921_v46 = vmul.f32 0.05, %v31918_v2 }
 0x404   :  { %24828 = vmatprep.mubr.msk.f32.mxu1 %vm108_vm0, %v10863_v31  ;;  %v31904_v23 = vpack.c.bf16 %v10864_v3, %v10863_v31  ;;  %35015 = vst [vmem:[#allocation190_spill] sm:$0xff] %v31921_v46 }
 0x405   :  { %24829 = vmatmul.mubr.msk.f32.gmra.mrb[180].mxu1 %vm108_vm0, %v10864_v3 }
 0x406   :  { %35013 = vst [vmem:[#allocation188_spill] sm:$0xff] %v31904_v23 }
 0x407   :  { %v24653_v31 = vpop.f32.mrb[138].mxu1 }
 0x408   :  { %v10802_v0 = vmul.f32 0.95, %v24653_v31  ;;  %v9150_v19 = vpop.f32.mrb[139].mxu1  ;;  %v31939_v31 = vld [vmem:[%s33933_s0 + $0xc0] sm:$0xff] }
 0x409   :  { %v10801_v3 = vmul.f32 0.95, %v9150_v19 }
 0x40a   :  { %v10866_v8 = vadd.f32 %v10802_v0, %v31913_v63  ;;  %v31942_v0 = vmul.f32 0.05, %v31939_v31 }
 0x40b   :  { %v10865_v12 = vadd.f32 %v10801_v3, %v31921_v46 }
 0x40c   :  { %35018 = vst [vmem:[#allocation193_spill] sm:$0xff] %v31942_v0 }
 0x40d   :  { %24831 = vmatprep.mubr.msk.f32.mxu1 %vm108_vm0, %v10865_v12  ;;  %v31934_v52 = vpack.c.bf16 %v10866_v8, %v10865_v12 }
 0x40e   :  { %v24660_v45 = vpop.f32.mrb[140].mxu0  ;;  %24832 = vmatmul.mubr.msk.f32.gmra.mrb[182].mxu1 %vm108_vm0, %v10866_v8  ;;  %v31957_v8 = vmul.f32 0.05, %v31954_v13 }
 0x40f   :  { %35017 = vst [vmem:[#allocation192_spill] sm:$0xff] %v31934_v52  ;;  %v10804_v19 = vmul.f32 0.95, %v24660_v45  ;;  %v9231_v3 = vpop.f32.mrb[141].mxu0  ;;  %v31962_v45 = vld [vmem:[%s33933_s0 + $0xd0] sm:$0xff] }
 0x410   :  { %v10803_v63 = vmul.f32 0.95, %v9231_v3  ;;  %35020 = vst [vmem:[#allocation195_spill] sm:$0xff] %v31957_v8 }
 0x411   :  { %v10868_v46 = vadd.f32 %v10804_v19, %v31931_v30 }
 0x412   :  { %v10867_v18 = vadd.f32 %v10803_v63, %v31942_v0  ;;  %v31965_v63 = vmul.f32 0.05, %v31962_v45 }
 0x414   :  { %24834 = vmatprep.mubr.msk.f32.mxu1 %vm108_vm0, %v10867_v18  ;;  %v31948_v12 = vpack.c.bf16 %v10868_v46, %v10867_v18  ;;  %35021 = vst [vmem:[#allocation196_spill] sm:$0xff] %v31965_v63 }
 0x415   :  { %24835 = vmatmul.mubr.msk.f32.gmra.mrb[184].mxu1 %vm108_vm0, %v10868_v46  ;;  %v31970_v46 = vld [vmem:[%s33933_s0 + $0xe8] sm:$0xff] }
 0x416   :  { %35019 = vst [vmem:[#allocation194_spill] sm:$0xff] %v31948_v12  ;;  %35022 = vst [vmem:[#allocation197_spill] sm:$0xff] %v31970_v46  ;;  %v31973_v30 = vmul.f32 0.05, %v31970_v46 }
 0x418   :  { %v24667_v18 = vpop.f32.mrb[140].mxu1  ;;  %35023 = vst [vmem:[#allocation198_spill] sm:$0xff] %v31973_v30 }
 0x419   :  { %v10806_v19 = vmul.f32 0.95, %v24667_v18  ;;  %v9312_v3 = vpop.f32.mrb[141].mxu1 }
 0x41a   :  { %v10805_v0 = vmul.f32 0.95, %v9312_v3  ;;  %v24674_v43 = vpop.f32.mrb[142].mxu0 }
 0x41b   :  { %v10870_v18 = vadd.f32 %v10806_v19, %v31957_v8  ;;  %v10808_v17 = vmul.f32 0.95, %v24674_v43  ;;  %v9393_v27 = vpop.f32.mrb[143].mxu0 }
 0x41c   :  { %v10869_v57 = vadd.f32 %v10805_v0, %v31965_v63  ;;  %v10807_v44 = vmul.f32 0.95, %v9393_v27  ;;  %v31998_v27 = vld [vmem:[%s33933_s0 + $0xf8] sm:$0xff]  ;;  %v32024_v63 = vld [vmem:[%s33933_s0 + $0x100] sm:$0xff] }
 0x41d   :  { %v10872_v12 = vadd.f32 %v10808_v17, %v31973_v30  ;;  %35028 = vst [vmem:[#allocation203_spill] sm:$0xff] %v31998_v27  ;;  %v32001_v17 = vmul.f32 0.05, %v31998_v27  ;;  %35034 = vst [vmem:[#allocation209_spill] sm:$0xff] %v32024_v63 }
 0x41e   :  { %v10871_v3 = vadd.f32 %v10807_v44, %v31981_v55  ;;  %24837 = vmatprep.mubr.msk.f32.mxu1 %vm108_vm0, %v10869_v57  ;;  %v31988_v52 = vpack.c.bf16 %v10870_v18, %v10869_v57  ;;  %v32006_v44 = vld [vmem:[%s33933_s0 + $0xf0] sm:$0xff] }
 0x41f   :  { %24838 = vmatmul.mubr.msk.f32.gmra.mrb[186].mxu1 %vm108_vm0, %v10870_v18  ;;  %35029 = vst [vmem:[#allocation204_spill] sm:$0xff] %v32001_v17  ;;  %35030 = vst [vmem:[#allocation205_spill] sm:$0xff] %v32006_v44  ;;  %v32009_v57 = vmul.f32 0.05, %v32006_v44 }
 0x420   :  { %35026 = vst [vmem:[#allocation201_spill] sm:$0xff] %v31988_v52  ;;  %24840 = vmatprep.mubr.msk.f32.mxu1 %vm108_vm0, %v10871_v3  ;;  %v31992_v23 = vpack.c.bf16 %v10872_v12, %v10871_v3  ;;  %v32015_v3 = vld [vmem:[%s33933_s0 + $0x108] sm:$0xff] }
 0x421   :  { %35031 = vst [vmem:[#allocation206_spill] sm:$0xff] %v32009_v57  ;;  %35032 = vst [vmem:[#allocation207_spill] sm:$0xff] %v32015_v3  ;;  %v32018_v30 = vmul.f32 0.05, %v32015_v3  ;;  %v32083_v3 = vld [vmem:[%s33933_s0 + $0x130] sm:$0xff] }
 0x422   :  { %35027 = vst [vmem:[#allocation202_spill] sm:$0xff] %v31992_v23  ;;  %35048 = vst [vmem:[#allocation223_spill] sm:$0xff] %v32083_v3 }
 0x423   :  { %24841 = vmatmul.mubr.msk.f32.gmra.mrb[188].mxu1 %vm108_vm0, %v10872_v12  ;;  %35033 = vst [vmem:[#allocation208_spill] sm:$0xff] %v32018_v30 }
 0x425   :  { %v24681_v43 = vpop.f32.mrb[142].mxu1 }
 0x426   :  { %v10810_v0 = vmul.f32 0.95, %v24681_v43  ;;  %v9474_v19 = vpop.f32.mrb[143].mxu1  ;;  %v32027_v43 = vmul.f32 0.05, %v32024_v63 }
 0x427   :  { %v10809_v12 = vmul.f32 0.95, %v9474_v19 }
 0x428   :  { %v10874_v18 = vadd.f32 %v10810_v0, %v32001_v17  ;;  %35035 = vst [vmem:[#allocation210_spill] sm:$0xff] %v32027_v43 }
 0x429   :  { %v10873_v55 = vadd.f32 %v10809_v12, %v32009_v57 }
 0x42a   :  { %v24688_v8 = vpop.f32.mrb[144].mxu0 }
 0x42b   :  { %v10812_v0 = vmul.f32 0.95, %v24688_v8  ;;  %v9555_v19 = vpop.f32.mrb[145].mxu0  ;;  %24843 = vmatprep.mubr.msk.f32.mxu1 %vm108_vm0, %v10873_v55  ;;  %v32030_v23 = vpack.c.bf16 %v10874_v18, %v10873_v55  ;;  %v32041_v8 = vld [vmem:[%s33933_s0 + $0x118] sm:$0xff]  ;;  %v32050_v55 = vld [vmem:[%s33933_s0 + $0x110] sm:$0xff] }
 0x42c   :  { %v10811_v17 = vmul.f32 0.95, %v9555_v19  ;;  %24844 = vmatmul.mubr.msk.f32.gmra.mrb[190].mxu1 %vm108_vm0, %v10874_v18  ;;  %35038 = vst [vmem:[#allocation213_spill] sm:$0xff] %v32041_v8  ;;  %v32044_v19 = vmul.f32 0.05, %v32041_v8  ;;  %35040 = vst [vmem:[#allocation215_spill] sm:$0xff] %v32050_v55 }
 0x42d   :  { %35036 = vst [vmem:[#allocation211_spill] sm:$0xff] %v32030_v23  ;;  %v10876_v52 = vadd.f32 %v10812_v0, %v32018_v30  ;;  %v32058_v30 = vld [vmem:[%s33933_s0 + $0x128] sm:$0xff]  ;;  %v32066_v23 = vld [vmem:[%s33933_s0 + $0x120] sm:$0xff] }
 0x42e   :  { %v10875_v12 = vadd.f32 %v10811_v17, %v32027_v43  ;;  %35039 = vst [vmem:[#allocation214_spill] sm:$0xff] %v32044_v19  ;;  %v32053_v17 = vmul.f32 0.05, %v32050_v55  ;;  %35042 = vst [vmem:[#allocation217_spill] sm:$0xff] %v32058_v30  ;;  %v32061_v43 = vmul.f32 0.05, %v32058_v30 }
 0x42f   :  { %35044 = vst [vmem:[#allocation219_spill] sm:$0xff] %v32066_v23  ;;  %v32069_v8 = vmul.f32 0.05, %v32066_v23  ;;  %v32086_v23 = vmul.f32 0.05, %v32083_v3 }
 0x430   :  { %24846 = vmatprep.mubr.msk.f32.mxu1 %vm108_vm0, %v10875_v12  ;;  %v32036_v57 = vpack.c.bf16 %v10876_v52, %v10875_v12  ;;  %35041 = vst [vmem:[#allocation216_spill] sm:$0xff] %v32053_v17  ;;  %35043 = vst [vmem:[#allocation218_spill] sm:$0xff] %v32061_v43 }
 0x431   :  { %24847 = vmatmul.mubr.msk.f32.gmra.mrb[192].mxu1 %vm108_vm0, %v10876_v52  ;;  %35045 = vst [vmem:[#allocation220_spill] sm:$0xff] %v32069_v8  ;;  %35049 = vst [vmem:[#allocation224_spill] sm:$0xff] %v32086_v23 }
 0x432   :  { %35037 = vst [vmem:[#allocation212_spill] sm:$0xff] %v32036_v57  ;;  %v24695_v18 = vpop.f32.mrb[144].mxu1 }
 0x433   :  { %v10814_v0 = vmul.f32 0.95, %v24695_v18  ;;  %v9636_v12 = vpop.f32.mrb[145].mxu1  ;;  %v32074_v18 = vld [vmem:[%s33933_s0 + $0x138] sm:$0xff] }
 0x434   :  { %v10813_v52 = vmul.f32 0.95, %v9636_v12  ;;  %v24702_v57 = vpop.f32.mrb[146].mxu0  ;;  %35046 = vst [vmem:[#allocation221_spill] sm:$0xff] %v32074_v18  ;;  %v32077_v55 = vmul.f32 0.05, %v32074_v18 }
 0x435   :  { %v10878_v30 = vadd.f32 %v10814_v0, %v32044_v19  ;;  %v10816_v12 = vmul.f32 0.95, %v24702_v57  ;;  %v9717_v24 = vpop.f32.mrb[147].mxu0  ;;  %v32095_v19 = vld [vmem:[%s33933_s0 + $0x148] sm:$0xff] }
 0x436   :  { %35047 = vst [vmem:[#allocation222_spill] sm:$0xff] %v32077_v55  ;;  %v10877_v63 = vadd.f32 %v10813_v52, %v32053_v17  ;;  %v10815_v16 = vmul.f32 0.95, %v9717_v24  ;;  %35050 = vst [vmem:[#allocation225_spill] sm:$0xff] %v32095_v19  ;;  %v32098_v3 = vmul.f32 0.05, %v32095_v19 }
 0x437   :  { %v10880_v44 = vadd.f32 %v10816_v12, %v32061_v43 }
 0x438   :  { %v24709_v27 = vpop.f32.mrb[146].mxu1  ;;  %v10879_v0 = vadd.f32 %v10815_v16, %v32069_v8  ;;  %24849 = vmatprep.mubr.msk.f32.mxu1 %vm108_vm0, %v10877_v63  ;;  %35051 = vst [vmem:[#allocation226_spill] sm:$0xff] %v32098_v3  ;;  %v32100_v52 = vpack.c.bf16 %v10878_v30, %v10877_v63  ;;  %v32107_v16 = vld [vmem:[%s33933_s0 + $0x140] sm:$0xff] }
 0x439   :  { %v10818_v18 = vmul.f32 0.95, %v24709_v27  ;;  %v9798_v51 = vpop.f32.mrb[147].mxu1  ;;  %24850 = vmatmul.mubr.msk.f32.gmra.mrb[194].mxu1 %vm108_vm0, %v10878_v30  ;;  %35053 = vst [vmem:[#allocation228_spill] sm:$0xff] %v32107_v16 }
 0x43a   :  { %v10817_v57 = vmul.f32 0.95, %v9798_v51  ;;  %35052 = vst [vmem:[#allocation227_spill] sm:$0xff] %v32100_v52  ;;  %v32110_v51 = vmul.f32 0.05, %v32107_v16  ;;  %24852 = vmatprep.mubr.msk.f32.mxu1 %vm108_vm0, %v10879_v0  ;;  %v32114_v8 = vpack.c.bf16 %v10880_v44, %v10879_v0  ;;  %v32162_v16 = vld [vmem:[%s33933_s0 + $0x178] sm:$0xff] }
 0x43b   :  { %v10882_v24 = vadd.f32 %v10818_v18, %v32077_v55  ;;  %v24716_v27 = vpop.f32.mrb[148].mxu0  ;;  %v32119_v18 = vld [vmem:[%s33933_s0 + $0x150] sm:$0xff]  ;;  %v32154_v52 = vmul.f32 0.05, %v31176_v49  ;;  %35067 = vst [vmem:[#allocation242_spill] sm:$0xff] %v32162_v16 }
 0x43c   :  { %35054 = vst [vmem:[#allocation229_spill] sm:$0xff] %v32110_v51  ;;  %v10881_v12 = vadd.f32 %v10817_v57, %v32086_v23  ;;  %v10820_v43 = vmul.f32 0.95, %v24716_v27  ;;  %v9879_v63 = vpop.f32.mrb[149].mxu0  ;;  %35055 = vst [vmem:[#allocation230_spill] sm:$0xff] %v32114_v8  ;;  %v32128_v57 = vld [vmem:[%s33933_s0 + $0x168] sm:$0xff] }
 0x43d   :  { %v10819_v30 = vmul.f32 0.95, %v9879_v63  ;;  %35056 = vst [vmem:[#allocation231_spill] sm:$0xff] %v32119_v18  ;;  %v32122_v55 = vmul.f32 0.05, %v32119_v18  ;;  %35058 = vst [vmem:[#allocation233_spill] sm:$0xff] %v32128_v57  ;;  %24853 = vmatmul.mubr.msk.f32.gmra.mrb[196].mxu1 %vm108_vm0, %v10880_v44 }
 0x43e   :  { %v10884_v17 = vadd.f32 %v10820_v43, %v32098_v3  ;;  %v32131_v27 = vmul.f32 0.05, %v32128_v57  ;;  %v32133_v0 = vpack.c.bf16 %v10882_v24, %v10881_v12  ;;  %v32138_v63 = vld [vmem:[%s33933_s0 + $0x158] sm:$0xff]  ;;  %v32148_v8 = vld [vmem:[%s33933_s0 + $0x160] sm:$0xff]  ;;  %35065 = vst [vmem:[#allocation240_spill] sm:$0xff] %v32154_v52  ;;  %24855 = vmatprep.mubr.msk.f32.mxu1 %vm108_vm0, %v10881_v12 }
 0x43f   :  { %35057 = vst [vmem:[#allocation232_spill] sm:$0xff] %v32122_v55  ;;  %35061 = vst [vmem:[#allocation236_spill] sm:$0xff] %v32138_v63  ;;  %v32141_v23 = vmul.f32 0.05, %v32138_v63  ;;  %v10883_v43 = vadd.f32 %v10819_v30, %v32110_v51  ;;  %v24730_v3 = vpop.f32.mrb[150].mxu0 }
 0x440   :  { %35059 = vst [vmem:[#allocation234_spill] sm:$0xff] %v32131_v27  ;;  %35060 = vst [vmem:[#allocation235_spill] sm:$0xff] %v32133_v0  ;;  %v32151_v0 = vmul.f32 0.05, %v32148_v8  ;;  %v24723_v57 = vpop.f32.mrb[148].mxu1  ;;  %v10041_v18 = vpop.f32.mrb[151].mxu0 }
 0x441   :  { %35062 = vst [vmem:[#allocation237_spill] sm:$0xff] %v32141_v23  ;;  %35063 = vst [vmem:[#allocation238_spill] sm:$0xff] %v32148_v8  ;;  %v10824_v63 = vmul.f32 0.95, %v24730_v3  ;;  %v10822_v44 = vmul.f32 0.95, %v24723_v57  ;;  %v32157_v51 = vpack.c.bf16 %v10884_v17, %v10883_v43  ;;  %24856 = vmatmul.mubr.msk.f32.gmra.mrb[198].mxu1 %vm108_vm0, %v10882_v24 }
 0x442   :  { %35064 = vst [vmem:[#allocation239_spill] sm:$0xff] %v32151_v0  ;;  %v9960_v19 = vpop.f32.mrb[149].mxu1  ;;  %v10823_v30 = vmul.f32 0.95, %v10041_v18  ;;  %v32165_v8 = vmul.f32 0.05, %v32162_v16  ;;  %24858 = vmatprep.mubr.msk.f32.mxu1 %vm108_vm0, %v10883_v43 }
 0x443   :  { %35066 = vst [vmem:[#allocation241_spill] sm:$0xff] %v32157_v51  ;;  %v10821_v49 = vmul.f32 0.95, %v9960_v19  ;;  %v32168_v46 = vadd.f32 %v10824_v63, %v32131_v27  ;;  %v32171_v3 = vmul.f32 0.05, %v31210_v41  ;;  %v10886_v18 = vadd.f32 %v10822_v44, %v32141_v23  ;;  %v24744_v51 = vpop.f32.mrb[152].mxu0 }
 0x444   :  { %35068 = vst [vmem:[#allocation243_spill] sm:$0xff] %v32165_v8  ;;  %v32174_v12 = vmul.f32 0.05, %v31252_v26  ;;  %v10887_v57 = vadd.f32 %v10823_v30, %v32151_v0  ;;  %v32180_v16 = vmul.f32 0.05, %v31205_v4  ;;  %v24737_v41 = vpop.f32.mrb[150].mxu1 }
 0x445   :  { %35069 = vst [vmem:[#allocation244_spill] sm:$0xff] %v32171_v3  ;;  %v32183_v19 = vmul.f32 0.05, %v31257_v59  ;;  %v10885_v63 = vadd.f32 %v10821_v49, %v32122_v55  ;;  %v10828_v26 = vmul.f32 0.95, %v24744_v51  ;;  %v10203_v27 = vpop.f32.mrb[153].mxu0  ;;  %24859 = vmatmul.mubr.msk.f32.gmra.mrb[200].mxu1 %vm108_vm0, %v10884_v17 }
 0x446   :  { %35070 = vst [vmem:[#allocation245_spill] sm:$0xff] %v32174_v12  ;;  %35071 = vst [vmem:[#allocation246_spill] sm:$0xff] %v32180_v16  ;;  %v10826_v22 = vmul.f32 0.95, %v24737_v41  ;;  %v10122_v24 = vpop.f32.mrb[151].mxu1  ;;  %v32188_v44 = vpack.c.bf16 %v32168_v46, %v10887_v57 }
 0x447   :  { %35072 = vst [vmem:[#allocation247_spill] sm:$0xff] %v32183_v19  ;;  %v10827_v34 = vmul.f32 0.95, %v10203_v27  ;;  %v10825_v30 = vmul.f32 0.95, %v10122_v24  ;;  %v32191_v4 = vadd.f32 %v10828_v26, %v32171_v3  ;;  %v32196_v0 = vpack.c.bf16 %v10886_v18, %v10885_v63  ;;  %24861 = vmatprep.mubr.msk.f32.mxu1 %vm108_vm0, %v10885_v63 }
 0x448   :  { %35073 = vst [vmem:[#allocation248_spill] sm:$0xff] %v32188_v44  ;;  %v32194_v59 = vmul.f32 0.05, %v31271_v5  ;;  %v32199_v43 = vmul.f32 0.05, %v31290_v39  ;;  %v10890_v51 = vadd.f32 %v10826_v22, %v32165_v8  ;;  %v24758_v49 = vpop.f32.mrb[154].mxu0 }
 0x449   :  { %v32204_v27 = vadd.f32 %v10827_v34, %v32180_v16  ;;  %v32207_v41 = vmul.f32 0.05, %v31266_v6  ;;  %v10889_v5 = vadd.f32 %v10825_v30, %v32154_v52  ;;  %v10832_v26 = vmul.f32 0.95, %v24758_v49  ;;  %v10365_v24 = vpop.f32.mrb[155].mxu0  ;;  %v8181_v22 = vld [vmem:[%s33937_s5] sm:$0xff]  ;;  %24862 = vmatmul.mubr.msk.f32.gmra.mrb[202].mxu1 %vm108_vm0, %v10886_v18 }
 0x44a   :  { %35074 = vst [vmem:[#allocation249_spill] sm:$0xff] %v32194_v59  ;;  %35075 = vst [vmem:[#allocation250_spill] sm:$0xff] %v32199_v43  ;;  %v32212_v39 = vmul.f32 0.05, %v31325_v56  ;;  %v10831_v17 = vmul.f32 0.95, %v10365_v24  ;;  %24864 = vmatprep.mubr.msk.f32.mxu1 %vm108_vm0, %v10887_v57 }
 0x44b   :  { %35076 = vst [vmem:[#allocation251_spill] sm:$0xff] %v32207_v41  ;;  %v8182_v6 = vld [vmem:[%s33937_s5 + $0x8] sm:$0xff]  ;;  %v8183_v34 = vld [vmem:[%s33938_s7] sm:$0xff]  ;;  %v32225_v63 = vpack.c.bf16 %v32191_v4, %v32204_v27  ;;  %v32228_v49 = vadd.f32 %v10832_v26, %v32194_v59  ;;  %v32230_v24 = vpack.c.bf16 %v10890_v51, %v10889_v5  ;;  %v32245_v26 = vld [vmem:[%s33933_s0 + $0x1b8] sm:$0xff] }
 0x44c   :  { %35077 = vst [vmem:[#allocation252_spill] sm:$0xff] %v32212_v39  ;;  %v24751_v3 = vpop.f32.mrb[152].mxu1  ;;  %v8184_v16 = vld [vmem:[%s33938_s7 + $0x8] sm:$0xff]  ;;  %v8185_v8 = vadd.f32 %v8183_v34, %v8181_v22  ;;  %v32237_v23 = vadd.f32 %v10831_v17, %v32207_v41  ;;  %v32248_v59 = vmul.f32 0.05, %v32245_v26 }
 0x44d   :  { %35078 = vst [vmem:[#allocation253_spill] sm:$0xff] %v32225_v63  ;;  %v10830_v56 = vmul.f32 0.95, %v24751_v3  ;;  %v10284_v30 = vpop.f32.mrb[153].mxu1  ;;  %35079 = vst [vmem:[#allocation254_spill] sm:$0xff] %v32230_v24  ;;  %v8186_v63 = vadd.f32 %v8184_v16, %v8182_v6  ;;  %24865 = vmatmul.mubr.msk.f32.gmra.mrb[204].mxu1 %vm108_vm0, %v32168_v46  ;;  %v32278_v46 = vld [vmem:[%s33933_s0 + $0x1d0] sm:$0xff] }
 0x44e   :  { %v10829_v52 = vmul.f32 0.95, %v10284_v30  ;;  %v24772_v55 = vpop.f32.mrb[156].mxu0  ;;  %v32240_v3 = vmul.f32 0.05, %v31320_v32  ;;  %35081 = vst [vmem:[#allocation256_spill] sm:$0xff] %v32248_v59  ;;  %v32255_v16 = vpack.c.bf16 %v32228_v49, %v32237_v23  ;;  %24867 = vmatprep.mubr.msk.f32.mxu1 %vm108_vm0, %v10889_v5 }
 0x44f   :  { %v10894_v18 = vadd.f32 %v10830_v56, %v32183_v19  ;;  %v10836_v22 = vmul.f32 0.95, %v24772_v55  ;;  %v10527_v17 = vpop.f32.mrb[157].mxu0  ;;  %v26490_v41 = vpack.c.bf16 %v8186_v63, %v8185_v8  ;;  %v32268_v8 = vld [vmem:[%s33933_s0 + $0x1d8] sm:$0xff] }
 0x450   :  { %35080 = vst [vmem:[#allocation255_spill] sm:$0xff] %v32240_v3  ;;  %v10893_v34 = vadd.f32 %v10829_v52, %v32174_v12  ;;  %v24765_v30 = vpop.f32.mrb[154].mxu1  ;;  %v10835_v32 = vmul.f32 0.95, %v10527_v17  ;;  %v32271_v63 = vmul.f32 0.05, %v32268_v8 }
 0x451   :  { %v10834_v6 = vmul.f32 0.95, %v24765_v30  ;;  %v10446_v24 = vpop.f32.mrb[155].mxu1  ;;  %v32258_v44 = vadd.f32 %v10836_v22, %v32212_v39  ;;  %26491 = vmatprep.subr.bf16.mxu0 %v26490_v41  ;;  %24868 = vmatmul.mubr.msk.f32.gmra.mrb[206].mxu1 %vm108_vm0, %v10890_v51 }
 0x452   :  { %v10833_v57 = vmul.f32 0.95, %v10446_v24  ;;  %v10899_v55 = vadd.f32 %v10835_v32, %v32240_v3  ;;  %v32263_v52 = vpack.c.bf16 %v10894_v18, %v10893_v34  ;;  %35082 = vst [vmem:[#allocation257_spill] sm:$0xff] %v32271_v63  ;;  %26493 = vmatpush3.bf16.msra.mxu0 %v26490_v41  ;;  %v32281_v24 = vmul.f32 0.05, %v32278_v46  ;;  %v32291_v41 = vld [vmem:[%s33933_s0 + $0x1e8] sm:$0xff]  ;;  %24870 = vmatprep.mubr.msk.f32.mxu1 %vm108_vm0, %v32204_v27 }
 0x453   :  { %v10898_v56 = vadd.f32 %v10834_v6, %v32248_v59  ;;  %v32294_v6 = vmul.f32 0.05, %v32291_v41 }
 0x454   :  { %v10897_v22 = vadd.f32 %v10833_v57, %v32199_v43  ;;  %v24779_v17 = vpop.f32.mrb[156].mxu1  ;;  %v32285_v30 = vpack.c.bf16 %v32258_v44, %v10899_v55 }
 0x455   :  { %v10838_v32 = vmul.f32 0.95, %v24779_v17  ;;  %v10608_v39 = vpop.f32.mrb[157].mxu1  ;;  %35083 = vst [vmem:[#allocation258_spill] sm:$0xff] %v32294_v6  ;;  %24899 = vmatmul.mubr.msk.f32.vlgmr.msra.gmra.mrb[160].mxu0 %vm108_vm0, %v31674_v28  ;;  %24871 = vmatmul.mubr.msk.f32.gmra.mrb[208].mxu1 %vm108_vm0, %v32191_v4 }
 0x456   :  { %v10837_v5 = vmul.f32 0.95, %v10608_v39  ;;  %v32298_v57 = vpack.c.bf16 %v10898_v56, %v10897_v22  ;;  %v32306_v39 = vld [vmem:[%s33933_s0 + $0x1e0] sm:$0xff]  ;;  %24901 = vmatprep.mubr.msk.f32.mxu0 %vm108_vm0, %v31697_v14  ;;  %24873 = vmatprep.mubr.msk.f32.mxu1 %vm108_vm0, %v10893_v34 }
 0x457   :  { %v10902_v17 = vadd.f32 %v10838_v32, %v32271_v63  ;;  %v32309_v3 = vmul.f32 0.05, %v32306_v39  ;;  %v32324_v63 = vld [vmem:[%s33933_s0 + $0x1f8] sm:$0xff] }
 0x458   :  { %v24786_v51 = vpop.f32.mrb[158].mxu0  ;;  %v10901_v28 = vadd.f32 %v10837_v5, %v32281_v24  ;;  %v32327_v14 = vmul.f32 0.05, %v32324_v63 }
 0x459   :  { %v10840_v59 = vmul.f32 0.95, %v24786_v51  ;;  %v10689_v43 = vpop.f32.mrb[159].mxu0  ;;  %24902 = vmatmul.mubr.msk.f32.gmra.mrb[162].mxu0 %vm108_vm0, %v31689_v50  ;;  %v32336_v50 = vld [vmem:[%s33933_s0 + $0x1f0] sm:$0xff]  ;;  %24874 = vmatmul.mubr.msk.f32.gmra.mrb[210].mxu1 %vm108_vm0, %v10894_v18 }
 0x45a   :  { %v10839_v19 = vmul.f32 0.95, %v10689_v43  ;;  %v32319_v32 = vpack.c.bf16 %v10902_v17, %v10901_v28  ;;  %35084 = vst [vmem:[#allocation259_spill] sm:$0xff] %v32327_v14  ;;  %24904 = vmatprep.mubr.msk.f32.mxu0 %vm108_vm0, %v31713_v42  ;;  %v32339_v4 = vmul.f32 0.05, %v32336_v50  ;;  %24876 = vmatprep.mubr.msk.f32.mxu1 %vm108_vm0, %v32237_v23  ;;  %v35085_v23 = vld [vmem:[#allocation128_spill] sm:$0xff] }
 0x45b   :  { %v10904_v27 = vadd.f32 %v10840_v59, %v32294_v6 }
 0x45c   :  { %v10903_v43 = vadd.f32 %v10839_v19, %v32309_v3 }
 0x45d   :  { %24905 = vmatmul.mubr.msk.f32.gmra.mrb[164].mxu0 %vm108_vm0, %v31705_v9  ;;  %24877 = vmatmul.mubr.msk.f32.gmra.mrb[212].mxu1 %vm108_vm0, %v32228_v49  ;;  %v35087_v9 = vld [vmem:[#allocation136_spill] sm:$0xff]  ;;  %v35115_v49 = vld [vmem:[#allocation121_spill] sm:$0xff] }
 0x45e   :  { %v32341_v6 = vpack.c.bf16 %v10904_v27, %v10903_v43  ;;  %24907 = vmatprep.mubr.msk.f32.mxu0 %vm108_vm0, %v31742_v36  ;;  %24879 = vmatprep.mubr.msk.f32.mxu1 %vm108_vm0, %v10897_v22  ;;  %v35089_v36 = vld [vmem:[#allocation138_spill] sm:$0xff]  ;;  %v35118_v22 = vld [vmem:[#allocation188_spill] sm:$0xff] }
 0x45f   :  { %v24793_v59 = vpop.f32.mrb[158].mxu1 }
 0x460   :  { %v10842_v5 = vmul.f32 0.95, %v24793_v59  ;;  %v10770_v51 = vpop.f32.mrb[159].mxu1  ;;  %v35123_v59 = vld [vmem:[#allocation192_spill] sm:$0xff] }
 0x461   :  { %v10841_v34 = vmul.f32 0.95, %v10770_v51  ;;  %24908 = vmatmul.mubr.msk.f32.gmra.mrb[166].mxu0 %vm108_vm0, %v31734_v48  ;;  %24880 = vmatmul.mubr.msk.f32.gmra.mrb[214].mxu1 %vm108_vm0, %v10898_v56  ;;  %v35088_v48 = vld [vmem:[#allocation137_spill] sm:$0xff]  ;;  %v35117_v56 = vld [vmem:[#allocation111_spill] sm:$0xff] }
 0x462   :  { %v10906_v42 = vadd.f32 %v10842_v5, %v32327_v14  ;;  %24910 = vmatprep.mubr.msk.f32.mxu0 %vm108_vm0, %v31758_v37  ;;  %24882 = vmatprep.mubr.msk.f32.mxu1 %vm108_vm0, %v10899_v55  ;;  %v35086_v37 = vld [vmem:[#allocation129_spill] sm:$0xff]  ;;  %v35124_v5 = vld [vmem:[#allocation223_spill] sm:$0xff] }
 0x463   :  { %v10905_v19 = vadd.f32 %v10841_v34, %v32339_v4  ;;  %v35116_v55 = vld [vmem:[#allocation213_spill] sm:$0xff] }
 0x464   :  { %v35125_v51 = vld [vmem:[#allocation145_spill] sm:$0xff] }
 0x465   :  { %v32356_v18 = vpack.c.bf16 %v10906_v42, %v10905_v19  ;;  %24911 = vmatmul.mubr.msk.f32.gmra.mrb[168].mxu0 %vm108_vm0, %v31750_v7  ;;  %24883 = vmatmul.mubr.msk.f32.gmra.mrb[216].mxu1 %vm108_vm0, %v32258_v44  ;;  %v35095_v7 = vld [vmem:[#allocation72_spill] sm:$0xff]  ;;  %v35114_v44 = vld [vmem:[#allocation215_spill] sm:$0xff]  ;;  %v35126_v34 = vld [vmem:[#allocation221_spill] sm:$0xff] }
 0x466   :  { %24913 = vmatprep.mubr.msk.f32.mxu0 %vm108_vm0, %v31801_v54  ;;  %24885 = vmatprep.mubr.msk.f32.mxu1 %vm108_vm0, %v10901_v28  ;;  %v35103_v54 = vld [vmem:[#allocation99_spill] sm:$0xff]  ;;  %v35120_v28 = vld [vmem:[#allocation113_spill] sm:$0xff] }
 0x469   :  { %24914 = vmatmul.mubr.msk.f32.gmra.mrb[170].mxu0 %vm108_vm0, %v31785_v15  ;;  %24886 = vmatmul.mubr.msk.f32.gmra.mrb[218].mxu1 %vm108_vm0, %v10902_v17  ;;  %v35099_v15 = vld [vmem:[#allocation197_spill] sm:$0xff]  ;;  %v35119_v17 = vld [vmem:[#allocation219_spill] sm:$0xff] }
 0x46a   :  { %24916 = vmatprep.mubr.msk.f32.mxu0 %vm108_vm0, %v31793_v40  ;;  %24888 = vmatprep.mubr.msk.f32.mxu1 %vm108_vm0, %v10903_v43  ;;  %v35100_v40 = vld [vmem:[#allocation98_spill] sm:$0xff]  ;;  %v35122_v43 = vld [vmem:[#allocation116_spill] sm:$0xff] }
 0x46d   :  { %24917 = vmatmul.mubr.msk.f32.gmra.mrb[172].mxu0 %vm108_vm0, %v31777_v35  ;;  %24889 = vmatmul.mubr.msk.f32.gmra.mrb[220].mxu1 %vm108_vm0, %v10904_v27  ;;  %v35098_v35 = vld [vmem:[#allocation120_spill] sm:$0xff]  ;;  %v35121_v27 = vld [vmem:[#allocation217_spill] sm:$0xff] }
 0x46e   :  { %24919 = vmatprep.mubr.msk.f32.mxu0 %vm108_vm0, %v31830_v60  ;;  %24891 = vmatprep.mubr.msk.f32.mxu1 %vm108_vm0, %v10905_v19 }
 0x471   :  { %24920 = vmatmul.mubr.msk.f32.gmra.mrb[174].mxu0 %vm108_vm0, %v31821_v58  ;;  %24892 = vmatmul.mubr.msk.f32.gmra.mrb[222].mxu1 %vm108_vm0, %v10906_v42  ;;  %v35105_v58 = vld [vmem:[#allocation104_spill] sm:$0xff] }
 0x472   :  { %24922 = vmatprep.mubr.msk.f32.mxu0 %vm108_vm0, %v31848_v25  ;;  %24998 = vmatprep.mubr.msk.f32.mxu1 %vm108_vm0, %v35085_v23  ;;  %v35102_v25 = vld [vmem:[#allocation205_spill] sm:$0xff]  ;;  %v35127_v42 = vld [vmem:[#allocation68_spill] sm:$0xff]  ;;  %v35129_v23 = vld [vmem:[#allocation194_spill] sm:$0xff] }
 0x475   :  { %24923 = vmatmul.mubr.msk.f32.gmra.mrb[176].mxu0 %vm108_vm0, %v31840_v20  ;;  %24999 = vmatmul.mubr.msk.f32.vlgmr.msra.gmra.mrb[224].mxu1 %vm108_vm0, %v35086_v37  ;;  %v35107_v20 = vld [vmem:[#allocation182_spill] sm:$0xff] }
 0x476   :  { %24925 = vmatprep.mubr.msk.f32.mxu0 %vm108_vm0, %v31874_v11  ;;  %26501 = vmatpush3.bf16.msra.mxu1 %v31723_v47  ;;  %v35090_v47 = vld [vmem:[#allocation139_spill] sm:$0xff]  ;;  %v35109_v11 = vld [vmem:[#allocation209_spill] sm:$0xff] }
 0x477   :  { %25005 = vmatprep.mubr.msk.f32.mxu1 %vm108_vm0, %v35087_v9  ;;  %26503 = vmatprep.subr.bf16.mxu1 %v31728_v29  ;;  %v35131_v9 = vld [vmem:[#allocation228_spill] sm:$0xff] }
 0x479   :  { %24926 = vmatmul.mubr.msk.f32.gmra.mrb[178].mxu0 %vm108_vm0, %v31866_v21  ;;  %25006 = vmatmul.mubr.msk.f32.vlgmr.msra.gmra.mrb[226].mxu1 %vm108_vm0, %v35088_v48  ;;  %v35132_v48 = vld [vmem:[#allocation130_spill] sm:$0xff] }
 0x47a   :  { %24928 = vmatprep.mubr.msk.f32.mxu0 %vm108_vm0, %v31892_v53  ;;  %26505 = vmatpush3.bf16.msra.mxu1 %v31728_v29  ;;  %v35091_v53 = vld [vmem:[#allocation142_spill] sm:$0xff]  ;;  %v35093_v29 = vld [vmem:[#allocation144_spill] sm:$0xff] }
 0x47b   :  { %25012 = vmatprep.mubr.msk.f32.mxu1 %vm108_vm0, %v35089_v36  ;;  %26507 = vmatprep.subr.bf16.mxu1 %v31768_v1  ;;  %v35133_v36 = vld [vmem:[#allocation225_spill] sm:$0xff] }
 0x47d   :  { %24929 = vmatmul.mubr.msk.f32.gmra.mrb[180].mxu0 %vm108_vm0, %v31884_v62  ;;  %25013 = vmatmul.mubr.msk.f32.vlgmr.msra.gmra.mrb[228].mxu1 %vm108_vm0, %v35090_v47  ;;  %v35092_v62 = vld [vmem:[#allocation143_spill] sm:$0xff] }
 0x47e   :  { %24931 = vmatprep.mubr.msk.f32.mxu0 %vm108_vm0, %v31918_v2  ;;  %26509 = vmatpush3.bf16.msra.mxu1 %v31768_v1  ;;  %v35094_v1 = vld [vmem:[#allocation115_spill] sm:$0xff] }
 0x47f   :  { %25019 = vmatprep.mubr.msk.f32.mxu1 %vm108_vm0, %v35091_v53  ;;  %26511 = vmatprep.subr.bf16.mxu1 %v31771_v33  ;;  %v35111_v2 = vld [vmem:[#allocation207_spill] sm:$0xff] }
 0x480   :  { %v35134_v47 = vld [vmem:[#allocation75_spill] sm:$0xff] }
 0x481   :  { %24932 = vmatmul.mubr.msk.f32.gmra.mrb[182].mxu0 %vm108_vm0, %v31910_v61  ;;  %25020 = vmatmul.mubr.msk.f32.vlgmr.msra.gmra.mrb[230].mxu1 %vm108_vm0, %v35092_v62  ;;  %v35110_v61 = vld [vmem:[#allocation106_spill] sm:$0xff]  ;;  %v35136_v62 = vld [vmem:[#allocation201_spill] sm:$0xff] }
 0x482   :  { %24934 = vmatprep.mubr.msk.f32.mxu0 %vm108_vm0, %v31939_v31  ;;  %26513 = vmatpush3.bf16.msra.mxu1 %v31771_v33  ;;  %v35097_v33 = vld [vmem:[#allocation199_spill] sm:$0xff]  ;;  %v35112_v31 = vld [vmem:[#allocation108_spill] sm:$0xff] }
 0x483   :  { %25026 = vmatprep.mubr.msk.f32.mxu1 %vm108_vm0, %v35093_v29  ;;  %26515 = vmatprep.subr.bf16.mxu1 %v31814_v38 }
 0x485   :  { %24935 = vmatmul.mubr.msk.f32.gmra.mrb[184].mxu0 %vm108_vm0, %v31928_v10  ;;  %25027 = vmatmul.mubr.msk.f32.vlgmr.msra.gmra.mrb[232].mxu1 %vm108_vm0, %v35094_v1  ;;  %v35096_v10 = vld [vmem:[#allocation83_spill] sm:$0xff] }
 0x486   :  { %24937 = vmatprep.mubr.msk.f32.mxu0 %vm108_vm0, %v31962_v45  ;;  %26517 = vmatpush3.bf16.msra.mxu1 %v31814_v38  ;;  %v35104_v38 = vld [vmem:[#allocation203_spill] sm:$0xff] }
 0x487   :  { %25033 = vmatprep.mubr.msk.f32.mxu1 %vm108_vm0, %v35095_v7  ;;  %26519 = vmatprep.subr.bf16.mxu1 %v35096_v10  ;;  %v35113_v45 = vld [vmem:[#allocation187_spill] sm:$0xff]  ;;  %v35139_v7 = vld [vmem:[#allocation122_spill] sm:$0xff] }
 0x488   :  { %v35138_v1 = vld [vmem:[#allocation231_spill] sm:$0xff] }
 0x489   :  { %24938 = vmatmul.mubr.msk.f32.gmra.mrb[186].mxu0 %vm108_vm0, %v31954_v13  ;;  %25034 = vmatmul.mubr.msk.f32.vlgmr.msra.gmra.mrb[234].mxu1 %vm108_vm0, %v35098_v35  ;;  %v35101_v13 = vld [vmem:[#allocation181_spill] sm:$0xff]  ;;  %v35142_v35 = vld [vmem:[#allocation202_spill] sm:$0xff] }
 0x48a   :  { %24940 = vmatprep.mubr.msk.f32.mxu0 %vm108_vm0, %v35097_v33  ;;  %26521 = vmatpush3.bf16.msra.mxu1 %v35096_v10  ;;  %v35140_v10 = vld [vmem:[#allocation236_spill] sm:$0xff]  ;;  %v35141_v33 = vld [vmem:[#allocation134_spill] sm:$0xff] }
 0x48b   :  { %25040 = vmatprep.mubr.msk.f32.mxu1 %vm108_vm0, %v35100_v40  ;;  %26523 = vmatprep.subr.bf16.mxu1 %v35101_v13  ;;  %v32460_v60 = vpop.f32.mrb[160].mxu1  ;;  %v35144_v40 = vld [vmem:[#allocation135_spill] sm:$0xff] }
 0x48c   :  { %35106 = vst [vmem:[#allocation128_spill] sm:$0xff] %v32460_v60  ;;  %v32463_v21 = vpop.f32.mrb[161].mxu1 }
 0x48d   :  { %24941 = vmatmul.mubr.msk.f32.gmra.mrb[188].mxu0 %vm108_vm0, %v35099_v15  ;;  %25041 = vmatmul.mubr.msk.f32.vlgmr.msra.gmra.mrb[236].mxu1 %vm108_vm0, %v35103_v54  ;;  %35108 = vst [vmem:[#allocation129_spill] sm:$0xff] %v32463_v21  ;;  %v35143_v15 = vld [vmem:[#allocation238_spill] sm:$0xff]  ;;  %v35147_v54 = vld [vmem:[#allocation211_spill] sm:$0xff] }
 0x48e   :  { %24943 = vmatprep.mubr.msk.f32.mxu0 %vm108_vm0, %v35102_v25  ;;  %26525 = vmatpush3.bf16.msra.mxu1 %v35101_v13  ;;  %v35145_v13 = vld [vmem:[#allocation233_spill] sm:$0xff]  ;;  %v35146_v25 = vld [vmem:[#allocation148_spill] sm:$0xff]  ;;  %v35321_v21 = vld [vmem:[#allocation71_spill] sm:$0xff] }
 0x48f   :  { %25047 = vmatprep.mubr.msk.f32.mxu1 %vm108_vm0, %v35105_v58  ;;  %26527 = vmatprep.subr.bf16.mxu1 %v35107_v20  ;;  %v35148_v58 = vld [vmem:[#allocation149_spill] sm:$0xff] }
 0x491   :  { %24944 = vmatmul.mubr.msk.f32.gmra.mrb[190].mxu0 %vm108_vm0, %v35104_v38  ;;  %25048 = vmatmul.mubr.msk.f32.vlgmr.msra.gmra.mrb[238].mxu1 %vm108_vm0, %v35110_v61  ;;  %v27906_v38 = vld [vmem:[%s33933_s0 + $0x170] sm:$0xff] }
 0x492   :  { %24946 = vmatprep.mubr.msk.f32.mxu0 %vm108_vm0, %v35109_v11  ;;  %26529 = vmatpush3.bf16.msra.mxu1 %v35107_v20  ;;  %v35149_v20 = vld [vmem:[#allocation242_spill] sm:$0xff]  ;;  %v35151_v61 = vld [vmem:[#allocation212_spill] sm:$0xff] }
 0x493   :  { %25054 = vmatprep.mubr.msk.f32.mxu1 %vm108_vm0, %v35112_v31  ;;  %26531 = vmatprep.subr.bf16.mxu1 %v35113_v45  ;;  %v35150_v11 = vld [vmem:[#allocation150_spill] sm:$0xff] }
 0x495   :  { %24947 = vmatmul.mubr.msk.f32.gmra.mrb[192].mxu0 %vm108_vm0, %v35111_v2  ;;  %25055 = vmatmul.mubr.msk.f32.vlgmr.msra.gmra.mrb[240].mxu1 %vm108_vm0, %v35115_v49  ;;  %v27907_v2 = vld [vmem:[%s33933_s0 + $0x180] sm:$0xff]  ;;  %v27908_v49 = vld [vmem:[%s33933_s0 + $0x188] sm:$0xff] }
 0x496   :  { %24949 = vmatprep.mubr.msk.f32.mxu0 %vm108_vm0, %v35114_v44  ;;  %26533 = vmatpush3.bf16.msra.mxu1 %v35113_v45  ;;  %v35153_v45 = vld [vmem:[#allocation151_spill] sm:$0xff] }
 0x497   :  { %25061 = vmatprep.mubr.msk.f32.mxu1 %vm108_vm0, %v35117_v56  ;;  %26535 = vmatprep.subr.bf16.mxu1 %v35118_v22  ;;  %v35156_v56 = vld [vmem:[#allocation227_spill] sm:$0xff] }
 0x499   :  { %24950 = vmatmul.mubr.msk.f32.gmra.mrb[194].mxu0 %vm108_vm0, %v35116_v55  ;;  %25062 = vmatmul.mubr.msk.f32.vlgmr.msra.gmra.mrb[242].mxu1 %vm108_vm0, %v35120_v28  ;;  %v35155_v55 = vld [vmem:[#allocation154_spill] sm:$0xff]  ;;  %v35158_v28 = vld [vmem:[#allocation155_spill] sm:$0xff] }
 0x49a   :  { %24952 = vmatprep.mubr.msk.f32.mxu0 %vm108_vm0, %v35119_v17  ;;  %26537 = vmatpush3.bf16.msra.mxu1 %v35118_v22  ;;  %v27909_v22 = vld [vmem:[%s33933_s0 + $0x190] sm:$0xff] }
 0x49b   :  { %25068 = vmatprep.mubr.msk.f32.mxu1 %vm108_vm0, %v35122_v43  ;;  %26539 = vmatprep.subr.bf16.mxu1 %v35123_v59  ;;  %v32504_v19 = vpop.f32.mrb[162].mxu1  ;;  %v27910_v43 = vld [vmem:[%s33933_s0 + $0x198] sm:$0xff] }
 0x49c   :  { %35128 = vst [vmem:[#allocation136_spill] sm:$0xff] %v32504_v19  ;;  %v32507_v37 = vpop.f32.mrb[163].mxu1 }
 0x49d   :  { %24953 = vmatmul.mubr.msk.f32.gmra.mrb[196].mxu0 %vm108_vm0, %v35121_v27  ;;  %25069 = vmatmul.mubr.msk.f32.vlgmr.msra.gmra.mrb[244].mxu1 %vm108_vm0, %v35125_v51  ;;  %35130 = vst [vmem:[#allocation137_spill] sm:$0xff] %v32507_v37  ;;  %v27911_v51 = vld [vmem:[%s33933_s0 + $0x1a0] sm:$0xff] }
 0x49e   :  { %24955 = vmatprep.mubr.msk.f32.mxu0 %vm108_vm0, %v35124_v5  ;;  %26541 = vmatpush3.bf16.msra.mxu1 %v35123_v59  ;;  %v35160_v59 = vld [vmem:[#allocation156_spill] sm:$0xff]  ;;  %v35161_v5 = vld [vmem:[#allocation230_spill] sm:$0xff] }
 0x49f   :  { %25075 = vmatprep.mubr.msk.f32.mxu1 %vm108_vm0, %v35127_v42  ;;  %26543 = vmatprep.subr.bf16.mxu1 %v35129_v23  ;;  %v32518_v53 = vpop.f32.mrb[164].mxu1  ;;  %v27912_v42 = vld [vmem:[%s33933_s0 + $0x1a8] sm:$0xff]  ;;  %v35320_v37 = vld [vmem:[#allocation30_spill] sm:$0xff] }
 0x4a0   :  { %35135 = vst [vmem:[#allocation138_spill] sm:$0xff] %v32518_v53  ;;  %v32521_v29 = vpop.f32.mrb[165].mxu1  ;;  %v22496_v53 = vld [vmem:[%s33938_s7 + $0x10] sm:$0xff] }
 0x4a1   :  { %24956 = vmatmul.mubr.msk.f32.gmra.mrb[198].mxu0 %vm108_vm0, %v35126_v34  ;;  %25076 = vmatmul.mubr.msk.f32.vlgmr.msra.gmra.mrb[246].mxu1 %vm108_vm0, %v35132_v48  ;;  %35137 = vst [vmem:[#allocation139_spill] sm:$0xff] %v32521_v29  ;;  %v35162_v34 = vld [vmem:[#allocation157_spill] sm:$0xff]  ;;  %v35165_v48 = vld [vmem:[#allocation235_spill] sm:$0xff] }
 0x4a2   :  { %24958 = vmatprep.mubr.msk.f32.mxu0 %vm108_vm0, %v35131_v9  ;;  %26545 = vmatpush3.bf16.msra.mxu1 %v35129_v23  ;;  %v35163_v23 = vld [vmem:[#allocation159_spill] sm:$0xff] }
 0x4a3   :  { %25082 = vmatprep.mubr.msk.f32.mxu1 %vm108_vm0, %v35134_v47  ;;  %26547 = vmatprep.subr.bf16.mxu1 %v35136_v62  ;;  %v27913_v47 = vld [vmem:[%s33933_s0 + $0x1b0] sm:$0xff] }
 0x4a5   :  { %24959 = vmatmul.mubr.msk.f32.gmra.mrb[200].mxu0 %vm108_vm0, %v35133_v36  ;;  %25083 = vmatmul.mubr.msk.f32.vlgmr.msra.gmra.mrb[248].mxu1 %vm108_vm0, %v35139_v7 }
 0x4a6   :  { %24961 = vmatprep.mubr.msk.f32.mxu0 %vm108_vm0, %v35138_v1  ;;  %26549 = vmatpush3.bf16.msra.mxu1 %v35136_v62  ;;  %v35167_v62 = vld [vmem:[#allocation160_spill] sm:$0xff]  ;;  %v35168_v1 = vld [vmem:[#allocation162_spill] sm:$0xff] }
 0x4a7   :  { %25089 = vmatprep.mubr.msk.f32.mxu1 %vm108_vm0, %v35141_v33  ;;  %26551 = vmatprep.subr.bf16.mxu1 %v35142_v35 }
 0x4a9   :  { %24962 = vmatmul.mubr.msk.f32.gmra.mrb[202].mxu0 %vm108_vm0, %v35140_v10  ;;  %25090 = vmatmul.mubr.msk.f32.vlgmr.msra.gmra.mrb[250].mxu1 %vm108_vm0, %v35144_v40  ;;  %v35170_v10 = vld [vmem:[#allocation241_spill] sm:$0xff]  ;;  %v35173_v40 = vld [vmem:[#allocation91_spill] sm:$0xff] }
 0x4aa   :  { %24964 = vmatprep.mubr.msk.f32.mxu0 %vm108_vm0, %v35143_v15  ;;  %26553 = vmatpush3.bf16.msra.mxu1 %v35142_v35  ;;  %v27914_v35 = vld [vmem:[%s33933_s0 + $0x1c0] sm:$0xff]  ;;  %v35172_v15 = vld [vmem:[#allocation163_spill] sm:$0xff] }
 0x4ab   :  { %25096 = vmatprep.mubr.msk.f32.mxu1 %vm108_vm0, %v35146_v25  ;;  %26555 = vmatprep.subr.bf16.mxu1 %v35147_v54  ;;  %v35175_v25 = vld [vmem:[#allocation168_spill] sm:$0xff] }
 0x4ad   :  { %24965 = vmatmul.mubr.msk.f32.gmra.mrb[204].mxu0 %vm108_vm0, %v35145_v13  ;;  %25097 = vmatmul.mubr.msk.f32.vlgmr.msra.gmra.mrb[252].mxu1 %vm108_vm0, %v35148_v58  ;;  %v32559_v31 = vpop.f32.mrb[166].mxu1  ;;  %v35174_v13 = vld [vmem:[#allocation94_spill] sm:$0xff] }
 0x4ae   :  { %24967 = vmatprep.mubr.msk.f32.mxu0 %vm108_vm0, %v27906_v38  ;;  %26557 = vmatpush3.bf16.msra.mxu1 %v35147_v54  ;;  %35152 = vst [vmem:[#allocation142_spill] sm:$0xff] %v32559_v31  ;;  %v32563_v44 = vpop.f32.mrb[167].mxu1  ;;  %v35177_v38 = vld [vmem:[#allocation248_spill] sm:$0xff] }
 0x4af   :  { %25103 = vmatprep.mubr.msk.f32.mxu1 %vm108_vm0, %v35150_v11  ;;  %26559 = vmatprep.subr.bf16.mxu1 %v35151_v61  ;;  %35154 = vst [vmem:[#allocation143_spill] sm:$0xff] %v32563_v44 }
 0x4b1   :  { %24968 = vmatmul.mubr.msk.f32.gmra.mrb[206].mxu0 %vm108_vm0, %v35149_v20  ;;  %25104 = vmatmul.mubr.msk.f32.vlgmr.msra.gmra.mrb[254].mxu1 %vm108_vm0, %v35153_v45  ;;  %v32577_v17 = vpop.f32.mrb[168].mxu1  ;;  %v35186_v45 = vld [vmem:[#allocation253_spill] sm:$0xff] }
 0x4b2   :  { %24970 = vmatprep.mubr.msk.f32.mxu0 %vm108_vm0, %v27907_v2  ;;  %26561 = vmatpush3.bf16.msra.mxu1 %v35151_v61  ;;  %35157 = vst [vmem:[#allocation144_spill] sm:$0xff] %v32577_v17  ;;  %v32581_v27 = vpop.f32.mrb[169].mxu1  ;;  %v35184_v61 = vld [vmem:[#allocation167_spill] sm:$0xff]  ;;  %v35316_v17 = vld [vmem:[#allocation14_spill] sm:$0xff] }
 0x4b3   :  { %25110 = vmatprep.mubr.msk.f32.mxu1 %vm108_vm0, %v35155_v55  ;;  %26563 = vmatprep.subr.bf16.mxu1 %v35156_v56  ;;  %35159 = vst [vmem:[#allocation115_spill] sm:$0xff] %v32581_v27  ;;  %v35188_v55 = vld [vmem:[#allocation172_spill] sm:$0xff] }
 0x4b5   :  { %24971 = vmatmul.mubr.msk.f32.gmra.mrb[208].mxu0 %vm108_vm0, %v27908_v49  ;;  %25111 = vmatmul.mubr.msk.f32.vlgmr.msra.gmra.mrb[0].mxu1 %vm108_vm0, %v35158_v28  ;;  %v35187_v49 = vld [vmem:[#allocation176_spill] sm:$0xff]  ;;  %v35192_v28 = vld [vmem:[#allocation37_spill] sm:$0xff] }
 0x4b6   :  { %24973 = vmatprep.mubr.msk.f32.mxu0 %vm108_vm0, %v27909_v22  ;;  %26565 = vmatpush3.bf16.msra.mxu1 %v35156_v56  ;;  %v35190_v56 = vld [vmem:[#allocation173_spill] sm:$0xff] }
 0x4b7   :  { %25117 = vmatprep.mubr.msk.f32.mxu1 %vm108_vm0, %v35160_v59  ;;  %26567 = vmatprep.subr.bf16.mxu1 %v35161_v5 }
 0x4b8   :  { %v32604_v9 = vpop.f32.mrb[170].mxu1 }
 0x4b9   :  { %24974 = vmatmul.mubr.msk.f32.gmra.mrb[210].mxu0 %vm108_vm0, %v27910_v43  ;;  %25118 = vmatmul.mubr.msk.f32.vlgmr.msra.gmra.mrb[2].mxu1 %vm108_vm0, %v35162_v34  ;;  %35164 = vst [vmem:[#allocation72_spill] sm:$0xff] %v32604_v9  ;;  %v32607_v36 = vpop.f32.mrb[171].mxu1  ;;  %v35193_v43 = vld [vmem:[#allocation6_spill] sm:$0xff]  ;;  %v35198_v34 = vld [vmem:[#allocation33_spill] sm:$0xff] }
 0x4ba   :  { %24976 = vmatprep.mubr.msk.f32.mxu0 %vm108_vm0, %v27911_v51  ;;  %26569 = vmatpush3.bf16.msra.mxu1 %v35161_v5  ;;  %35166 = vst [vmem:[#allocation83_spill] sm:$0xff] %v32607_v36  ;;  %v35195_v5 = vld [vmem:[#allocation178_spill] sm:$0xff]  ;;  %v35313_v36 = vld [vmem:[#allocation64_spill] sm:$0xff] }
 0x4bb   :  { %25124 = vmatprep.mubr.msk.f32.mxu1 %vm108_vm0, %v35163_v23  ;;  %26571 = vmatprep.subr.bf16.mxu1 %v35165_v48 }
 0x4bc   :  { %v32620_v7 = vpop.f32.mrb[172].mxu1 }
 0x4bd   :  { %24977 = vmatmul.mubr.msk.f32.gmra.mrb[212].mxu0 %vm108_vm0, %v27912_v42  ;;  %25125 = vmatmul.mubr.msk.f32.vlgmr.msra.gmra.mrb[4].mxu1 %vm108_vm0, %v35167_v62  ;;  %35169 = vst [vmem:[#allocation199_spill] sm:$0xff] %v32620_v7  ;;  %v32623_v33 = vpop.f32.mrb[173].mxu1  ;;  %v35199_v42 = vld [vmem:[#allocation8_spill] sm:$0xff] }
 0x4be   :  { %24979 = vmatprep.mubr.msk.f32.mxu0 %vm108_vm0, %v27913_v47  ;;  %26573 = vmatpush3.bf16.msra.mxu1 %v35165_v48  ;;  %35171 = vst [vmem:[#allocation120_spill] sm:$0xff] %v32623_v33  ;;  %v35204_v47 = vld [vmem:[#allocation123_spill] sm:$0xff]  ;;  %v35308_v33 = vld [vmem:[#allocation16_spill] sm:$0xff] }
 0x4bf   :  { %25131 = vmatprep.mubr.msk.f32.mxu1 %vm108_vm0, %v35168_v1  ;;  %26575 = vmatprep.subr.bf16.mxu1 %v35170_v10  ;;  %v35207_v1 = vld [vmem:[#allocation25_spill] sm:$0xff] }
 0x4c1   :  { %24980 = vmatmul.mubr.msk.f32.gmra.mrb[214].mxu0 %vm108_vm0, %v32245_v26  ;;  %25132 = vmatmul.mubr.msk.f32.vlgmr.msra.gmra.mrb[6].mxu1 %vm108_vm0, %v35172_v15  ;;  %v27915_v26 = vld [vmem:[%s33933_s0 + $0x1c8] sm:$0xff]  ;;  %v35211_v15 = vld [vmem:[#allocation124_spill] sm:$0xff] }
 0x4c2   :  { %24982 = vmatprep.mubr.msk.f32.mxu0 %vm108_vm0, %v27914_v35  ;;  %26577 = vmatpush3.bf16.msra.mxu1 %v35170_v10  ;;  %v35210_v35 = vld [vmem:[#allocation61_spill] sm:$0xff] }
 0x4c3   :  { %25138 = vmatprep.mubr.msk.f32.mxu1 %vm108_vm0, %v35173_v40  ;;  %26579 = vmatprep.subr.bf16.mxu1 %v32196_v0  ;;  %v35214_v40 = vld [vmem:[#allocation80_spill] sm:$0xff] }
 0x4c5   :  { %24983 = vmatmul.mubr.msk.f32.gmra.mrb[216].mxu0 %vm108_vm0, %v27915_v26  ;;  %25139 = vmatmul.mubr.msk.f32.vlgmr.msra.gmra.mrb[8].mxu1 %vm108_vm0, %v35174_v13  ;;  %v32648_v54 = vpop.f32.mrb[174].mxu1  ;;  %v35212_v26 = vld [vmem:[#allocation26_spill] sm:$0xff] }
 0x4c6   :  { %24985 = vmatprep.mubr.msk.f32.mxu0 %vm108_vm0, %v32278_v46  ;;  %26581 = vmatpush3.bf16.msra.mxu1 %v32196_v0  ;;  %35176 = vst [vmem:[#allocation197_spill] sm:$0xff] %v32648_v54  ;;  %v32651_v58 = vpop.f32.mrb[175].mxu1  ;;  %v35179_v46 = vld [vmem:[#allocation169_spill] sm:$0xff]  ;;  %v35180_v0 = vld [vmem:[#allocation166_spill] sm:$0xff] }
 0x4c7   :  { %25145 = vmatprep.mubr.msk.f32.mxu1 %vm108_vm0, %v35175_v25  ;;  %26583 = vmatprep.subr.bf16.mxu1 %v35177_v38  ;;  %35178 = vst [vmem:[#allocation98_spill] sm:$0xff] %v32651_v58  ;;  %v35303_v58 = vld [vmem:[#allocation59_spill] sm:$0xff] }
 0x4c9   :  { %24986 = vmatmul.mubr.msk.f32.gmra.mrb[218].mxu0 %vm108_vm0, %v32268_v8  ;;  %25146 = vmatmul.mubr.msk.f32.vlgmr.msra.gmra.mrb[10].mxu1 %vm108_vm0, %v35179_v46  ;;  %v35181_v8 = vld [vmem:[#allocation254_spill] sm:$0xff] }
 0x4ca   :  { %24988 = vmatprep.mubr.msk.f32.mxu0 %vm108_vm0, %v32306_v39  ;;  %26585 = vmatpush3.bf16.msra.mxu1 %v35177_v38  ;;  %v32663_v20 = vpop.f32.mrb[176].mxu1  ;;  %v22366_v39 = vld [vmem:[%s33937_s5 + $0x20] sm:$0xff]  ;;  %v35218_v38 = vld [vmem:[#allocation40_spill] sm:$0xff] }
 0x4cb   :  { %25152 = vmatprep.mubr.msk.f32.mxu1 %vm108_vm0, %v35180_v0  ;;  %26587 = vmatprep.subr.bf16.mxu1 %v35181_v8  ;;  %35182 = vst [vmem:[#allocation181_spill] sm:$0xff] %v32663_v20  ;;  %v32667_v11 = vpop.f32.mrb[177].mxu1  ;;  %v35219_v46 = vld [vmem:[#allocation82_spill] sm:$0xff] }
 0x4cc   :  { %35183 = vst [vmem:[#allocation205_spill] sm:$0xff] %v32667_v11  ;;  %v35298_v11 = vld [vmem:[#allocation67_spill] sm:$0xff] }
 0x4cd   :  { %24989 = vmatmul.mubr.msk.f32.gmra.mrb[220].mxu0 %vm108_vm0, %v32291_v41  ;;  %v22367_v41 = vld [vmem:[%s33937_s5 + $0x28] sm:$0xff]  ;;  %25153 = vmatmul.mubr.msk.f32.vlgmr.msra.gmra.mrb[12].mxu1 %vm108_vm0, %v35184_v61  ;;  %v35224_v61 = vld [vmem:[#allocation133_spill] sm:$0xff] }
 0x4ce   :  { %24991 = vmatprep.mubr.msk.f32.mxu0 %vm108_vm0, %v32336_v50  ;;  %v26622_v2 = vpack.c.bf16 %v22367_v41, %v22366_v39  ;;  %26589 = vmatpush3.bf16.msra.mxu1 %v35181_v8  ;;  %v35185_v50 = vld [vmem:[#allocation175_spill] sm:$0xff]  ;;  %v35222_v39 = vld [vmem:[#allocation100_spill] sm:$0xff] }
 0x4cf   :  { %25159 = vmatprep.mubr.msk.f32.mxu1 %vm108_vm0, %v35185_v50  ;;  %26591 = vmatprep.subr.bf16.mxu1 %v35186_v45  ;;  %v35223_v41 = vld [vmem:[#allocation19_spill] sm:$0xff]  ;;  %v35226_v50 = vld [vmem:[#allocation41_spill] sm:$0xff] }
 0x4d0   :  { %26623 = vmatprep.subr.bf16.mxu0 %v26622_v2 }
 0x4d1   :  { %24992 = vmatmul.mubr.msk.f32.gmra.mrb[222].mxu0 %vm108_vm0, %v32324_v63  ;;  %25160 = vmatmul.mubr.msk.f32.vlgmr.msra.gmra.mrb[14].mxu1 %vm108_vm0, %v35187_v49 }
 0x4d2   :  { %26625 = vmatpush3.bf16.msra.mxu0 %v26622_v2  ;;  %26593 = vmatpush3.bf16.msra.mxu1 %v35186_v45  ;;  %v35225_v2 = vld [vmem:[#allocation17_spill] sm:$0xff]  ;;  %v35227_v45 = vld [vmem:[#allocation140_spill] sm:$0xff] }
 0x4d3   :  { %25166 = vmatprep.mubr.msk.f32.mxu1 %vm108_vm0, %v35188_v55  ;;  %26595 = vmatprep.subr.bf16.mxu1 %v32263_v52  ;;  %v32689_v63 = vpop.f32.mrb[178].mxu1  ;;  %v35229_v55 = vld [vmem:[#allocation69_spill] sm:$0xff] }
 0x4d4   :  { %35189 = vst [vmem:[#allocation99_spill] sm:$0xff] %v32689_v63  ;;  %v32693_v22 = vpop.f32.mrb[179].mxu1 }
 0x4d5   :  { %25167 = vmatmul.mubr.msk.f32.vlgmr.msra.gmra.mrb[16].mxu1 %vm108_vm0, %v35190_v56  ;;  %35191 = vst [vmem:[#allocation203_spill] sm:$0xff] %v32693_v22  ;;  %v35293_v22 = vld [vmem:[#allocation54_spill] sm:$0xff] }
 0x4d6   :  { %26597 = vmatpush3.bf16.msra.mxu1 %v32263_v52  ;;  %25173 = vmatprep.mubr.msk.f32.mxu1 %vm108_vm0, %v35192_v28  ;;  %v35197_v52 = vld [vmem:[#allocation147_spill] sm:$0xff]  ;;  %v35231_v28 = vld [vmem:[#allocation102_spill] sm:$0xff] }
 0x4d7   :  { %26599 = vmatprep.subr.bf16.mxu1 %v32255_v16 }
 0x4d8   :  { %v32701_v59 = vpop.f32.mrb[180].mxu1 }
 0x4d9   :  { %25174 = vmatmul.mubr.msk.f32.vlgmr.msra.gmra.mrb[18].mxu1 %vm108_vm0, %v35193_v43  ;;  %35194 = vst [vmem:[#allocation104_spill] sm:$0xff] %v32701_v59  ;;  %v32706_v51 = vpop.f32.mrb[181].mxu1  ;;  %v35232_v43 = vld [vmem:[#allocation89_spill] sm:$0xff] }
 0x4da   :  { %26601 = vmatpush3.bf16.msra.mxu1 %v32255_v16  ;;  %25180 = vmatprep.mubr.msk.f32.mxu1 %vm108_vm0, %v35195_v5  ;;  %35196 = vst [vmem:[#allocation182_spill] sm:$0xff] %v32706_v51  ;;  %v35200_v16 = vld [vmem:[#allocation9_spill] sm:$0xff]  ;;  %v35288_v51 = vld [vmem:[#allocation62_spill] sm:$0xff] }
 0x4db   :  { %26603 = vmatprep.subr.bf16.mxu1 %v32298_v57 }
 0x4dd   :  { %25181 = vmatmul.mubr.msk.f32.vlgmr.msra.gmra.mrb[20].mxu1 %vm108_vm0, %v35197_v52  ;;  %v35234_v52 = vld [vmem:[#allocation20_spill] sm:$0xff] }
 0x4de   :  { %26605 = vmatpush3.bf16.msra.mxu1 %v32298_v57  ;;  %25187 = vmatprep.mubr.msk.f32.mxu1 %vm108_vm0, %v35198_v34  ;;  %v35203_v57 = vld [vmem:[#allocation110_spill] sm:$0xff] }
 0x4df   :  { %26607 = vmatprep.subr.bf16.mxu1 %v32285_v30 }
 0x4e1   :  { %25188 = vmatmul.mubr.msk.f32.vlgmr.msra.gmra.mrb[22].mxu1 %vm108_vm0, %v35199_v42  ;;  %v32720_v23 = vpop.f32.mrb[182].mxu1  ;;  %v35236_v42 = vld [vmem:[#allocation38_spill] sm:$0xff] }
 0x4e2   :  { %26609 = vmatpush3.bf16.msra.mxu1 %v32285_v30  ;;  %25194 = vmatprep.mubr.msk.f32.mxu1 %vm108_vm0, %v35200_v16  ;;  %35201 = vst [vmem:[#allocation209_spill] sm:$0xff] %v32720_v23  ;;  %v32723_v48 = vpop.f32.mrb[183].mxu1  ;;  %v35205_v30 = vld [vmem:[#allocation112_spill] sm:$0xff] }
 0x4e3   :  { %26611 = vmatprep.subr.bf16.mxu1 %v32319_v32  ;;  %35202 = vst [vmem:[#allocation106_spill] sm:$0xff] %v32723_v48  ;;  %v35237_v16 = vld [vmem:[#allocation92_spill] sm:$0xff]  ;;  %v35283_v48 = vld [vmem:[#allocation46_spill] sm:$0xff] }
 0x4e5   :  { %25195 = vmatmul.mubr.msk.f32.vlgmr.msra.gmra.mrb[24].mxu1 %vm108_vm0, %v35203_v57  ;;  %v35238_v57 = vld [vmem:[#allocation52_spill] sm:$0xff] }
 0x4e6   :  { %26613 = vmatpush3.bf16.msra.mxu1 %v32319_v32  ;;  %25201 = vmatprep.mubr.msk.f32.mxu1 %vm108_vm0, %v35204_v47  ;;  %v35209_v32 = vld [vmem:[#allocation29_spill] sm:$0xff]  ;;  %v35239_v47 = vld [vmem:[#allocation12_spill] sm:$0xff] }
 0x4e7   :  { %26615 = vmatprep.subr.bf16.mxu1 %v32341_v6 }
 0x4e8   :  { %v32733_v62 = vpop.f32.mrb[184].mxu1 }
 0x4e9   :  { %25202 = vmatmul.mubr.msk.f32.vlgmr.msra.gmra.mrb[26].mxu1 %vm108_vm0, %v35205_v30  ;;  %35206 = vst [vmem:[#allocation207_spill] sm:$0xff] %v32733_v62  ;;  %v32738_v10 = vpop.f32.mrb[185].mxu1  ;;  %v35240_v30 = vld [vmem:[#allocation141_spill] sm:$0xff] }
 0x4ea   :  { %26617 = vmatpush3.bf16.msra.mxu1 %v32341_v6  ;;  %25208 = vmatprep.mubr.msk.f32.mxu1 %vm108_vm0, %v35207_v1  ;;  %35208 = vst [vmem:[#allocation108_spill] sm:$0xff] %v32738_v10  ;;  %v35213_v6 = vld [vmem:[#allocation4_spill] sm:$0xff] }
 0x4eb   :  { %26619 = vmatprep.subr.bf16.mxu1 %v32356_v18  ;;  %v35278_v10 = vld [vmem:[#allocation56_spill] sm:$0xff] }
 0x4ed   :  { %25209 = vmatmul.mubr.msk.f32.vlgmr.msra.gmra.mrb[28].mxu1 %vm108_vm0, %v35209_v32 }
 0x4ee   :  { %26621 = vmatpush3.bf16.msra.mxu1 %v32356_v18  ;;  %25215 = vmatprep.mubr.msk.f32.mxu1 %vm108_vm0, %v35210_v35  ;;  %v35217_v18 = vld [vmem:[#allocation7_spill] sm:$0xff] }
 0x4ef   :  { %26627 = vmatprep.subr.bf16.mxu1 %v35211_v15  ;;  %v35243_v35 = vld [vmem:[#allocation31_spill] sm:$0xff] }
 0x4f1   :  { %25216 = vmatmul.mubr.msk.f32.vlgmr.msra.gmra.mrb[30].mxu1 %vm108_vm0, %v35212_v26  ;;  %v35245_v26 = vld [vmem:[#allocation117_spill] sm:$0xff] }
 0x4f2   :  { %26629 = vmatpush3.bf16.msra.mxu1 %v35211_v15  ;;  %25322 = vmatprep.mubr.msk.f32.mxu1 %vm108_vm0, %v35213_v6  ;;  %v32753_v13 = vpop.f32.mrb[186].mxu1  ;;  %v35244_v15 = vld [vmem:[#allocation85_spill] sm:$0xff] }
 0x4f3   :  { %26631 = vmatprep.subr.bf16.mxu1 %v35214_v40  ;;  %35215 = vst [vmem:[#allocation187_spill] sm:$0xff] %v32753_v13  ;;  %v32755_v25 = vpop.f32.mrb[187].mxu1 }
 0x4f4   :  { %35216 = vst [vmem:[#allocation215_spill] sm:$0xff] %v32755_v25  ;;  %v35273_v25 = vld [vmem:[#allocation39_spill] sm:$0xff] }
 0x4f5   :  { %25323 = vmatmul.mubr.msk.f32.vlgmr.msra.gmra.mrb[32].mxu1 %vm108_vm0, %v35217_v18 }
 0x4f6   :  { %26633 = vmatpush3.bf16.msra.mxu1 %v35214_v40  ;;  %25329 = vmatprep.mubr.msk.f32.mxu1 %vm108_vm0, %v35218_v38  ;;  %v32763_v0 = vpop.f32.mrb[188].mxu1 }
 0x4f7   :  { %26635 = vmatprep.subr.bf16.mxu1 %v35219_v46  ;;  %35220 = vst [vmem:[#allocation121_spill] sm:$0xff] %v32763_v0  ;;  %v32765_v8 = vpop.f32.mrb[189].mxu1 }
 0x4f8   :  { %35221 = vst [vmem:[#allocation213_spill] sm:$0xff] %v32765_v8  ;;  %v35268_v8 = vld [vmem:[#allocation13_spill] sm:$0xff] }
 0x4f9   :  { %25330 = vmatmul.mubr.msk.f32.vlgmr.msra.gmra.mrb[34].mxu1 %vm108_vm0, %v35222_v39 }
 0x4fa   :  { %26637 = vmatpush3.bf16.msra.mxu1 %v35219_v46  ;;  %25336 = vmatprep.mubr.msk.f32.mxu1 %vm108_vm0, %v35223_v41 }
 0x4fb   :  { %26639 = vmatprep.subr.bf16.mxu1 %v35224_v61 }
 0x4fd   :  { %25337 = vmatmul.mubr.msk.f32.vlgmr.msra.gmra.mrb[36].mxu1 %vm108_vm0, %v35225_v2 }
 0x4fe   :  { %26641 = vmatpush3.bf16.msra.mxu1 %v35224_v61  ;;  %25343 = vmatprep.mubr.msk.f32.mxu1 %vm108_vm0, %v35226_v50  ;;  %v35248_v61 = vld [vmem:[#allocation44_spill] sm:$0xff] }
 0x4ff   :  { %26643 = vmatprep.subr.bf16.mxu1 %v35227_v45  ;;  %v32779_v49 = vpop.f32.mrb[190].mxu1 }
 0x500   :  { %35228 = vst [vmem:[#allocation111_spill] sm:$0xff] %v32779_v49  ;;  %v32783_v56 = vpop.f32.mrb[191].mxu1 }
 0x501   :  { %25344 = vmatmul.mubr.msk.f32.vlgmr.msra.gmra.mrb[38].mxu1 %vm108_vm0, %v35229_v55  ;;  %35230 = vst [vmem:[#allocation188_spill] sm:$0xff] %v32783_v56  ;;  %v35263_v56 = vld [vmem:[#allocation27_spill] sm:$0xff] }
 0x502   :  { %26645 = vmatpush3.bf16.msra.mxu1 %v35227_v45  ;;  %25350 = vmatprep.mubr.msk.f32.mxu1 %vm108_vm0, %v35231_v28  ;;  %v35249_v45 = vld [vmem:[#allocation132_spill] sm:$0xff] }
 0x503   :  { %26647 = vmatprep.subr.bf16.mxu1 %v35232_v43 }
 0x504   :  { %v32789_v5 = vpop.f32.mrb[192].mxu1 }
 0x505   :  { %35233 = vst [vmem:[#allocation219_spill] sm:$0xff] %v32789_v5  ;;  %25351 = vmatmul.mubr.msk.f32.vlgmr.msra.gmra.mrb[40].mxu1 %vm108_vm0, %v35234_v52  ;;  %v32793_v34 = vpop.f32.mrb[193].mxu1 }
 0x506   :  { %35235 = vst [vmem:[#allocation113_spill] sm:$0xff] %v32793_v34  ;;  %26649 = vmatpush3.bf16.msra.mxu1 %v35232_v43  ;;  %25357 = vmatprep.mubr.msk.f32.mxu1 %vm108_vm0, %v35236_v42  ;;  %v35250_v43 = vld [vmem:[#allocation118_spill] sm:$0xff] }
 0x507   :  { %26651 = vmatprep.subr.bf16.mxu1 %v35237_v16  ;;  %v35258_v34 = vld [vmem:[#allocation10_spill] sm:$0xff] }
 0x509   :  { %25358 = vmatmul.mubr.msk.f32.vlgmr.msra.gmra.mrb[42].mxu1 %vm108_vm0, %v35238_v57 }
 0x50a   :  { %26653 = vmatpush3.bf16.msra.mxu1 %v35237_v16  ;;  %25364 = vmatprep.mubr.msk.f32.mxu1 %vm108_vm0, %v35239_v47 }
 0x50b   :  { %26655 = vmatprep.subr.bf16.mxu1 %v35240_v30 }
 0x50c   :  { %v32805_v1 = vpop.f32.mrb[194].mxu1 }
 0x50d   :  { %35241 = vst [vmem:[#allocation217_spill] sm:$0xff] %v32805_v1  ;;  %v32807_v32 = vpop.f32.mrb[195].mxu1  ;;  %25365 = vmatmul.mubr.msk.f32.vlgmr.msra.gmra.mrb[44].mxu1 %vm108_vm0, %v35243_v35 }
 0x50e   :  { %35242 = vst [vmem:[#allocation116_spill] sm:$0xff] %v32807_v32  ;;  %26657 = vmatpush3.bf16.msra.mxu1 %v35240_v30  ;;  %25371 = vmatprep.mubr.msk.f32.mxu1 %vm108_vm0, %v35244_v15  ;;  %v35253_v32 = vld [vmem:[#allocation32_spill] sm:$0xff] }
 0x50f   :  { %26659 = vmatprep.subr.bf16.mxu1 %v35245_v26 }
 0x510   :  { %v32815_v40 = vpop.f32.mrb[196].mxu1 }
 0x511   :  { %35246 = vst [vmem:[#allocation192_spill] sm:$0xff] %v32815_v40  ;;  %v32817_v46 = vpop.f32.mrb[197].mxu1  ;;  %25372 = vmatmul.mubr.msk.f32.vlgmr.msra.gmra.mrb[46].mxu1 %vm108_vm0, %v35248_v61  ;;  %v35255_v40 = vld [vmem:[#allocation103_spill] sm:$0xff] }
 0x512   :  { %35247 = vst [vmem:[#allocation223_spill] sm:$0xff] %v32817_v46  ;;  %26661 = vmatpush3.bf16.msra.mxu1 %v35245_v26  ;;  %25378 = vmatprep.mubr.msk.f32.mxu1 %vm108_vm0, %v35249_v45  ;;  %v35254_v46 = vld [vmem:[#allocation63_spill] sm:$0xff] }
 0x513   :  { %26663 = vmatprep.subr.bf16.mxu1 %v35250_v43 }
 0x514   :  { %v32825_v16 = vpop.f32.mrb[198].mxu1 }
 0x515   :  { %35251 = vst [vmem:[#allocation145_spill] sm:$0xff] %v32825_v16  ;;  %v32827_v30 = vpop.f32.mrb[199].mxu1  ;;  %25379 = vmatmul.mubr.msk.f32.vlgmr.msra.gmra.mrb[48].mxu1 %vm108_vm0, %v35253_v32  ;;  %v35260_v16 = vld [vmem:[#allocation109_spill] sm:$0xff] }
 0x516   :  { %35252 = vst [vmem:[#allocation221_spill] sm:$0xff] %v32827_v30  ;;  %26665 = vmatpush3.bf16.msra.mxu1 %v35250_v43  ;;  %25385 = vmatprep.mubr.msk.f32.mxu1 %vm108_vm0, %v35254_v46  ;;  %v35259_v30 = vld [vmem:[#allocation36_spill] sm:$0xff] }
 0x517   :  { %26667 = vmatprep.subr.bf16.mxu1 %v35255_v40 }
 0x518   :  { %v32835_v26 = vpop.f32.mrb[200].mxu1 }
 0x519   :  { %35256 = vst [vmem:[#allocation68_spill] sm:$0xff] %v32835_v26  ;;  %v32837_v1 = vpop.f32.mrb[201].mxu1  ;;  %25386 = vmatmul.mubr.msk.f32.vlgmr.msra.gmra.mrb[50].mxu1 %vm108_vm0, %v35258_v34  ;;  %v35265_v26 = vld [vmem:[#allocation114_spill] sm:$0xff] }
 0x51a   :  { %35257 = vst [vmem:[#allocation194_spill] sm:$0xff] %v32837_v1  ;;  %26669 = vmatpush3.bf16.msra.mxu1 %v35255_v40  ;;  %25392 = vmatprep.mubr.msk.f32.mxu1 %vm108_vm0, %v35259_v30  ;;  %v35264_v1 = vld [vmem:[#allocation2_spill] sm:$0xff] }
 0x51b   :  { %26671 = vmatprep.subr.bf16.mxu1 %v35260_v16 }
 0x51c   :  { %v32845_v43 = vpop.f32.mrb[202].mxu1 }
 0x51d   :  { %35261 = vst [vmem:[#allocation228_spill] sm:$0xff] %v32845_v43  ;;  %v32847_v5 = vpop.f32.mrb[203].mxu1  ;;  %25393 = vmatmul.mubr.msk.f32.vlgmr.msra.gmra.mrb[52].mxu1 %vm108_vm0, %v35263_v56  ;;  %v35270_v43 = vld [vmem:[#allocation119_spill] sm:$0xff] }
 0x51e   :  { %35262 = vst [vmem:[#allocation130_spill] sm:$0xff] %v32847_v5  ;;  %26673 = vmatpush3.bf16.msra.mxu1 %v35260_v16  ;;  %25399 = vmatprep.mubr.msk.f32.mxu1 %vm108_vm0, %v35264_v1  ;;  %v35269_v5 = vld [vmem:[#allocation11_spill] sm:$0xff] }
 0x51f   :  { %26675 = vmatprep.subr.bf16.mxu1 %v35265_v26 }
 0x520   :  { %v32855_v40 = vpop.f32.mrb[204].mxu1 }
 0x521   :  { %35266 = vst [vmem:[#allocation225_spill] sm:$0xff] %v32855_v40  ;;  %v32857_v49 = vpop.f32.mrb[205].mxu1  ;;  %25400 = vmatmul.mubr.msk.f32.vlgmr.msra.gmra.mrb[54].mxu1 %vm108_vm0, %v35268_v8  ;;  %v35275_v40 = vld [vmem:[#allocation146_spill] sm:$0xff] }
 0x522   :  { %35267 = vst [vmem:[#allocation75_spill] sm:$0xff] %v32857_v49  ;;  %26677 = vmatpush3.bf16.msra.mxu1 %v35265_v26  ;;  %25406 = vmatprep.mubr.msk.f32.mxu1 %vm108_vm0, %v35269_v5  ;;  %v35274_v49 = vld [vmem:[#allocation3_spill] sm:$0xff]  ;;  %v35369_v5 = vld [vmem:[#allocation189_spill] sm:$0xff] }
 0x523   :  { %26679 = vmatprep.subr.bf16.mxu1 %v35270_v43 }
 0x524   :  { %v32865_v16 = vpop.f32.mrb[206].mxu1 }
 0x525   :  { %35271 = vst [vmem:[#allocation201_spill] sm:$0xff] %v32865_v16  ;;  %v32867_v0 = vpop.f32.mrb[207].mxu1  ;;  %25407 = vmatmul.mubr.msk.f32.vlgmr.msra.gmra.mrb[56].mxu1 %vm108_vm0, %v35273_v25  ;;  %v35280_v16 = vld [vmem:[#allocation131_spill] sm:$0xff] }
 0x526   :  { %35272 = vst [vmem:[#allocation231_spill] sm:$0xff] %v32867_v0  ;;  %26681 = vmatpush3.bf16.msra.mxu1 %v35270_v43  ;;  %25413 = vmatprep.mubr.msk.f32.mxu1 %vm108_vm0, %v35274_v49  ;;  %v35279_v0 = vld [vmem:[#allocation15_spill] sm:$0xff] }
 0x527   :  { %26683 = vmatprep.subr.bf16.mxu1 %v35275_v40  ;;  %v35365_v25 = vld [vmem:[#allocation35_spill] sm:$0xff] }
 0x528   :  { %v32875_v26 = vpop.f32.mrb[208].mxu1 }
 0x529   :  { %35276 = vst [vmem:[#allocation122_spill] sm:$0xff] %v32875_v26  ;;  %v32877_v13 = vpop.f32.mrb[209].mxu1  ;;  %25414 = vmatmul.mubr.msk.f32.vlgmr.msra.gmra.mrb[58].mxu1 %vm108_vm0, %v35278_v10  ;;  %v35285_v26 = vld [vmem:[#allocation125_spill] sm:$0xff] }
 0x52a   :  { %35277 = vst [vmem:[#allocation236_spill] sm:$0xff] %v32877_v13  ;;  %26685 = vmatpush3.bf16.msra.mxu1 %v35275_v40  ;;  %25420 = vmatprep.mubr.msk.f32.mxu1 %vm108_vm0, %v35279_v0  ;;  %v35284_v13 = vld [vmem:[#allocation70_spill] sm:$0xff] }
 0x52b   :  { %26687 = vmatprep.subr.bf16.mxu1 %v35280_v16 }
 0x52c   :  { %v32885_v43 = vpop.f32.mrb[210].mxu1 }
 0x52d   :  { %35281 = vst [vmem:[#allocation134_spill] sm:$0xff] %v32885_v43  ;;  %v32887_v62 = vpop.f32.mrb[211].mxu1  ;;  %25421 = vmatmul.mubr.msk.f32.vlgmr.msra.gmra.mrb[60].mxu1 %vm108_vm0, %v35283_v48  ;;  %v35290_v43 = vld [vmem:[#allocation126_spill] sm:$0xff] }
 0x52e   :  { %35282 = vst [vmem:[#allocation202_spill] sm:$0xff] %v32887_v62  ;;  %26689 = vmatpush3.bf16.msra.mxu1 %v35280_v16  ;;  %25427 = vmatprep.mubr.msk.f32.mxu1 %vm108_vm0, %v35284_v13  ;;  %v35289_v62 = vld [vmem:[#allocation50_spill] sm:$0xff] }
 0x52f   :  { %26691 = vmatprep.subr.bf16.mxu1 %v35285_v26 }
 0x530   :  { %v32895_v40 = vpop.f32.mrb[212].mxu1 }
 0x531   :  { %35286 = vst [vmem:[#allocation238_spill] sm:$0xff] %v32895_v40  ;;  %v32897_v23 = vpop.f32.mrb[213].mxu1  ;;  %25428 = vmatmul.mubr.msk.f32.vlgmr.msra.gmra.mrb[62].mxu1 %vm108_vm0, %v35288_v51  ;;  %v35295_v40 = vld [vmem:[#allocation127_spill] sm:$0xff] }
 0x532   :  { %35287 = vst [vmem:[#allocation135_spill] sm:$0xff] %v32897_v23  ;;  %26693 = vmatpush3.bf16.msra.mxu1 %v35285_v26  ;;  %25434 = vmatprep.mubr.msk.f32.mxu1 %vm108_vm0, %v35289_v62  ;;  %v35294_v23 = vld [vmem:[#allocation77_spill] sm:$0xff] }
 0x533   :  { %26695 = vmatprep.subr.bf16.mxu1 %v35290_v43 }
 0x534   :  { %v32905_v16 = vpop.f32.mrb[214].mxu1 }
 0x535   :  { %35291 = vst [vmem:[#allocation233_spill] sm:$0xff] %v32905_v16  ;;  %v32907_v59 = vpop.f32.mrb[215].mxu1  ;;  %25435 = vmatmul.mubr.msk.f32.vlgmr.msra.gmra.mrb[64].mxu1 %vm108_vm0, %v35293_v22  ;;  %v35300_v16 = vld [vmem:[#allocation152_spill] sm:$0xff] }
 0x536   :  { %35292 = vst [vmem:[#allocation148_spill] sm:$0xff] %v32907_v59  ;;  %26697 = vmatpush3.bf16.msra.mxu1 %v35290_v43  ;;  %25441 = vmatprep.mubr.msk.f32.mxu1 %vm108_vm0, %v35294_v23  ;;  %v35299_v59 = vld [vmem:[#allocation55_spill] sm:$0xff] }
 0x537   :  { %26699 = vmatprep.subr.bf16.mxu1 %v35295_v40 }
 0x538   :  { %v32915_v26 = vpop.f32.mrb[216].mxu1 }
 0x539   :  { %35296 = vst [vmem:[#allocation211_spill] sm:$0xff] %v32915_v26  ;;  %v32917_v63 = vpop.f32.mrb[217].mxu1  ;;  %25442 = vmatmul.mubr.msk.f32.vlgmr.msra.gmra.mrb[66].mxu1 %vm108_vm0, %v35298_v11  ;;  %v35305_v26 = vld [vmem:[#allocation153_spill] sm:$0xff] }
 0x53a   :  { %35297 = vst [vmem:[#allocation149_spill] sm:$0xff] %v32917_v63  ;;  %26701 = vmatpush3.bf16.msra.mxu1 %v35295_v40  ;;  %25448 = vmatprep.mubr.msk.f32.mxu1 %vm108_vm0, %v35299_v59  ;;  %v35304_v63 = vld [vmem:[#allocation86_spill] sm:$0xff] }
 0x53b   :  { %26703 = vmatprep.subr.bf16.mxu1 %v35300_v16 }
 0x53c   :  { %v32925_v43 = vpop.f32.mrb[218].mxu1 }
 0x53d   :  { %35301 = vst [vmem:[#allocation242_spill] sm:$0xff] %v32925_v43  ;;  %v32927_v20 = vpop.f32.mrb[219].mxu1  ;;  %25449 = vmatmul.mubr.msk.f32.vlgmr.msra.gmra.mrb[68].mxu1 %vm108_vm0, %v35303_v58  ;;  %v35310_v43 = vld [vmem:[#allocation158_spill] sm:$0xff] }
 0x53e   :  { %35302 = vst [vmem:[#allocation150_spill] sm:$0xff] %v32927_v20  ;;  %26705 = vmatpush3.bf16.msra.mxu1 %v35300_v16  ;;  %25455 = vmatprep.mubr.msk.f32.mxu1 %vm108_vm0, %v35304_v63  ;;  %v35309_v20 = vld [vmem:[#allocation28_spill] sm:$0xff] }
 0x53f   :  { %26707 = vmatprep.subr.bf16.mxu1 %v35305_v26 }
 0x540   :  { %v32935_v40 = vpop.f32.mrb[220].mxu1 }
 0x541   :  { %35306 = vst [vmem:[#allocation212_spill] sm:$0xff] %v32935_v40  ;;  %v32937_v54 = vpop.f32.mrb[221].mxu1  ;;  %25456 = vmatmul.mubr.msk.f32.vlgmr.msra.gmra.mrb[70].mxu1 %vm108_vm0, %v35308_v33  ;;  %v35315_v40 = vld [vmem:[#allocation161_spill] sm:$0xff] }
 0x542   :  { %35307 = vst [vmem:[#allocation151_spill] sm:$0xff] %v32937_v54  ;;  %26709 = vmatpush3.bf16.msra.mxu1 %v35305_v26  ;;  %25462 = vmatprep.mubr.msk.f32.mxu1 %vm108_vm0, %v35309_v20  ;;  %v35314_v54 = vld [vmem:[#allocation5_spill] sm:$0xff] }
 0x543   :  { %26711 = vmatprep.subr.bf16.mxu1 %v35310_v43 }
 0x544   :  { %v32945_v16 = vpop.f32.mrb[222].mxu1 }
 0x545   :  { %35311 = vst [vmem:[#allocation154_spill] sm:$0xff] %v32945_v16  ;;  %v32947_v7 = vpop.f32.mrb[223].mxu1  ;;  %25463 = vmatmul.mubr.msk.f32.vlgmr.msra.gmra.mrb[72].mxu1 %vm108_vm0, %v35313_v36  ;;  %v35318_v16 = vld [vmem:[#allocation164_spill] sm:$0xff] }
 0x546   :  { %35312 = vst [vmem:[#allocation227_spill] sm:$0xff] %v32947_v7  ;;  %26713 = vmatpush3.bf16.msra.mxu1 %v35310_v43  ;;  %25469 = vmatprep.mubr.msk.f32.mxu1 %vm108_vm0, %v35314_v54  ;;  %v35317_v7 = vld [vmem:[#allocation24_spill] sm:$0xff]  ;;  %v35319_v43 = vld [vmem:[#allocation42_spill] sm:$0xff] }
 0x547   :  { %26715 = vmatprep.subr.bf16.mxu1 %v35315_v40 }
 0x548   :  { %v25000_v26 = vpop.f32.mrb[224].mxu1 }
 0x549   :  { %v14273_v9 = vmul.f32 0.95, %v25000_v26  ;;  %v11938_v27 = vpop.f32.mrb[225].mxu1  ;;  %25470 = vmatmul.mubr.msk.f32.vlgmr.msra.gmra.mrb[74].mxu1 %vm108_vm0, %v35316_v17  ;;  %v22497_v26 = vld [vmem:[%s33938_s7 + $0x18] sm:$0xff]  ;;  %v35323_v17 = vld [vmem:[#allocation47_spill] sm:$0xff] }
 0x54a   :  { %v14272_v44 = vmul.f32 0.95, %v11938_v27  ;;  %26717 = vmatpush3.bf16.msra.mxu1 %v35315_v40  ;;  %25476 = vmatprep.mubr.msk.f32.mxu1 %vm108_vm0, %v35317_v7  ;;  %v26754_v60 = vpack.c.bf16 %v22497_v26, %v22496_v53  ;;  %v35326_v26 = vld [vmem:[#allocation76_spill] sm:$0xff] }
 0x54b   :  { %26719 = vmatprep.subr.bf16.mxu1 %v35318_v16  ;;  %v14337_v27 = vadd.f32 %v14273_v9, %v35320_v37  ;;  %v35324_v9 = vld [vmem:[#allocation165_spill] sm:$0xff] }
 0x54c   :  { %v14336_v31 = vadd.f32 %v14272_v44, %v35319_v43  ;;  %v25007_v29 = vpop.f32.mrb[226].mxu1  ;;  %v35322_v44 = vld [vmem:[#allocation22_spill] sm:$0xff]  ;;  %26755 = vmatprep.subr.bf16.mxu0 %v26754_v60 }
 0x54d   :  { %v14275_v19 = vmul.f32 0.95, %v25007_v29  ;;  %v12013_v40 = vpop.f32.mrb[227].mxu1  ;;  %25477 = vmatmul.mubr.msk.f32.vlgmr.msra.gmra.mrb[76].mxu1 %vm108_vm0, %v35321_v21  ;;  %v35325_v29 = vld [vmem:[#allocation43_spill] sm:$0xff] }
 0x54e   :  { %v14274_v7 = vmul.f32 0.95, %v12013_v40  ;;  %25222 = vmatprep.mubr.msk.f32.mxu0 %vm108_vm0, %v14336_v31  ;;  %26721 = vmatpush3.bf16.msra.mxu1 %v35318_v16  ;;  %v35327_v16 = vld [vmem:[#allocation45_spill] sm:$0xff] }
 0x54f   :  { %25483 = vmatprep.mubr.msk.f32.mxu1 %vm108_vm0, %v35322_v44  ;;  %25223 = vmatmul.mubr.msk.f32.vlgmr.msra.gmra.mrb[160].mxu0 %vm108_vm0, %v14337_v27  ;;  %v14339_v20 = vadd.f32 %v14275_v19, %v35325_v29  ;;  %v35329_v19 = vld [vmem:[#allocation170_spill] sm:$0xff] }
 0x550   :  { %v14338_v54 = vadd.f32 %v14274_v7, %v35323_v17  ;;  %v25014_v36 = vpop.f32.mrb[228].mxu1  ;;  %26723 = vmatprep.subr.bf16.mxu1 %v35324_v9  ;;  %26757 = vmatpush3.bf16.msra.mxu0 %v26754_v60  ;;  %v35328_v7 = vld [vmem:[#allocation51_spill] sm:$0xff] }
 0x551   :  { %v14277_v21 = vmul.f32 0.95, %v25014_v36  ;;  %v12088_v53 = vpop.f32.mrb[229].mxu1  ;;  %25484 = vmatmul.mubr.msk.f32.vlgmr.msra.gmra.mrb[78].mxu1 %vm108_vm0, %v35326_v26  ;;  %v35330_v36 = vld [vmem:[#allocation48_spill] sm:$0xff]  ;;  %v35331_v60 = vld [vmem:[#allocation79_spill] sm:$0xff] }
 0x552   :  { %v14276_v31 = vmul.f32 0.95, %v12088_v53  ;;  %25225 = vmatprep.mubr.msk.f32.mxu0 %vm108_vm0, %v14338_v54  ;;  %26725 = vmatpush3.bf16.msra.mxu1 %v35324_v9  ;;  %v35332_v9 = vld [vmem:[#allocation93_spill] sm:$0xff] }
 0x553   :  { %25490 = vmatprep.mubr.msk.f32.mxu1 %vm108_vm0, %v35327_v16  ;;  %25226 = vmatmul.mubr.msk.f32.gmra.mrb[162].mxu0 %vm108_vm0, %v14339_v20  ;;  %v14341_v44 = vadd.f32 %v14277_v21, %v35330_v36  ;;  %v35333_v20 = vld [vmem:[#allocation58_spill] sm:$0xff]  ;;  %v35334_v16 = vld [vmem:[#allocation171_spill] sm:$0xff]  ;;  %v35335_v21 = vld [vmem:[#allocation53_spill] sm:$0xff] }
 0x554   :  { %v14340_v27 = vadd.f32 %v14276_v31, %v35328_v7  ;;  %v25021_v40 = vpop.f32.mrb[230].mxu1  ;;  %26727 = vmatprep.subr.bf16.mxu1 %v35329_v19 }
 0x555   :  { %v14279_v33 = vmul.f32 0.95, %v25021_v40  ;;  %v12163_v26 = vpop.f32.mrb[231].mxu1  ;;  %25491 = vmatmul.mubr.msk.f32.vlgmr.msra.gmra.mrb[80].mxu1 %vm108_vm0, %v35331_v60  ;;  %v35336_v60 = vld [vmem:[#allocation84_spill] sm:$0xff] }
 0x556   :  { %v14278_v54 = vmul.f32 0.95, %v12163_v26  ;;  %25228 = vmatprep.mubr.msk.f32.mxu0 %vm108_vm0, %v14340_v27  ;;  %26729 = vmatpush3.bf16.msra.mxu1 %v35329_v19  ;;  %v35337_v27 = vld [vmem:[#allocation78_spill] sm:$0xff] }
 0x557   :  { %25497 = vmatprep.mubr.msk.f32.mxu1 %vm108_vm0, %v35332_v9  ;;  %25229 = vmatmul.mubr.msk.f32.gmra.mrb[164].mxu0 %vm108_vm0, %v14341_v44  ;;  %v14343_v40 = vadd.f32 %v14279_v33, %v35335_v21  ;;  %v35338_v44 = vld [vmem:[#allocation65_spill] sm:$0xff]  ;;  %v35339_v9 = vld [vmem:[#allocation174_spill] sm:$0xff]  ;;  %v35340_v33 = vld [vmem:[#allocation60_spill] sm:$0xff] }
 0x558   :  { %v14342_v53 = vadd.f32 %v14278_v54, %v35333_v20  ;;  %v25028_v31 = vpop.f32.mrb[232].mxu1  ;;  %26731 = vmatprep.subr.bf16.mxu1 %v35334_v16 }
 0x559   :  { %v14281_v63 = vmul.f32 0.95, %v25028_v31  ;;  %v12238_v58 = vpop.f32.mrb[233].mxu1  ;;  %25498 = vmatmul.mubr.msk.f32.vlgmr.msra.gmra.mrb[82].mxu1 %vm108_vm0, %v35336_v60  ;;  %v35341_v60 = vld [vmem:[#allocation87_spill] sm:$0xff] }
 0x55a   :  { %v14280_v26 = vmul.f32 0.95, %v12238_v58  ;;  %25231 = vmatprep.mubr.msk.f32.mxu0 %vm108_vm0, %v14342_v53  ;;  %26733 = vmatpush3.bf16.msra.mxu1 %v35334_v16  ;;  %v35342_v16 = vld [vmem:[#allocation105_spill] sm:$0xff] }
 0x55b   :  { %25504 = vmatprep.mubr.msk.f32.mxu1 %vm108_vm0, %v35337_v27  ;;  %25232 = vmatmul.mubr.msk.f32.gmra.mrb[166].mxu0 %vm108_vm0, %v14343_v40  ;;  %v14345_v31 = vadd.f32 %v14281_v63, %v35340_v33  ;;  %v35343_v53 = vld [vmem:[#allocation81_spill] sm:$0xff] }
 0x55c   :  { %v14344_v19 = vadd.f32 %v14280_v26, %v35338_v44  ;;  %v25035_v54 = vpop.f32.mrb[234].mxu1  ;;  %26735 = vmatprep.subr.bf16.mxu1 %v35339_v9  ;;  %v35344_v27 = vld [vmem:[#allocation101_spill] sm:$0xff] }
 0x55d   :  { %v14283_v59 = vmul.f32 0.95, %v25035_v54  ;;  %v12313_v11 = vpop.f32.mrb[235].mxu1  ;;  %25505 = vmatmul.mubr.msk.f32.vlgmr.msra.gmra.mrb[84].mxu1 %vm108_vm0, %v35341_v60  ;;  %v35345_v63 = vld [vmem:[#allocation73_spill] sm:$0xff]  ;;  %v35346_v60 = vld [vmem:[#allocation23_spill] sm:$0xff] }
 0x55e   :  { %v14282_v58 = vmul.f32 0.95, %v12313_v11  ;;  %25234 = vmatprep.mubr.msk.f32.mxu0 %vm108_vm0, %v14344_v19  ;;  %26737 = vmatpush3.bf16.msra.mxu1 %v35339_v9  ;;  %v35347_v9 = vld [vmem:[#allocation57_spill] sm:$0xff]  ;;  %v35348_v19 = vld [vmem:[#allocation74_spill] sm:$0xff] }
 0x55f   :  { %25511 = vmatprep.mubr.msk.f32.mxu1 %vm108_vm0, %v35342_v16  ;;  %25235 = vmatmul.mubr.msk.f32.gmra.mrb[168].mxu0 %vm108_vm0, %v14345_v31  ;;  %v14347_v54 = vadd.f32 %v14283_v59, %v35345_v63  ;;  %v35349_v16 = vld [vmem:[#allocation177_spill] sm:$0xff]  ;;  %v35350_v59 = vld [vmem:[#allocation66_spill] sm:$0xff] }
 0x560   :  { %v14346_v40 = vadd.f32 %v14282_v58, %v35343_v53  ;;  %v25042_v26 = vpop.f32.mrb[236].mxu1  ;;  %26739 = vmatprep.subr.bf16.mxu1 %v35344_v27 }
 0x561   :  { %v14285_v23 = vmul.f32 0.95, %v25042_v26  ;;  %v12388_v22 = vpop.f32.mrb[237].mxu1  ;;  %25512 = vmatmul.mubr.msk.f32.vlgmr.msra.gmra.mrb[86].mxu1 %vm108_vm0, %v35346_v60  ;;  %v35351_v60 = vld [vmem:[#allocation95_spill] sm:$0xff] }
 0x562   :  { %v14284_v11 = vmul.f32 0.95, %v12388_v22  ;;  %25237 = vmatprep.mubr.msk.f32.mxu0 %vm108_vm0, %v14346_v40  ;;  %26741 = vmatpush3.bf16.msra.mxu1 %v35344_v27  ;;  %v35352_v27 = vld [vmem:[#allocation18_spill] sm:$0xff] }
 0x563   :  { %25518 = vmatprep.mubr.msk.f32.mxu1 %vm108_vm0, %v35347_v9  ;;  %25238 = vmatmul.mubr.msk.f32.gmra.mrb[170].mxu0 %vm108_vm0, %v14347_v54  ;;  %v14349_v26 = vadd.f32 %v14285_v23, %v35350_v59  ;;  %v35353_v40 = vld [vmem:[#allocation90_spill] sm:$0xff]  ;;  %v35354_v9 = vld [vmem:[#allocation179_spill] sm:$0xff]  ;;  %v35355_v23 = vld [vmem:[#allocation88_spill] sm:$0xff] }
 0x564   :  { %v14348_v31 = vadd.f32 %v14284_v11, %v35348_v19  ;;  %v25049_v58 = vpop.f32.mrb[238].mxu1  ;;  %26743 = vmatprep.subr.bf16.mxu1 %v35349_v16 }
 0x565   :  { %v14287_v62 = vmul.f32 0.95, %v25049_v58  ;;  %v12463_v51 = vpop.f32.mrb[239].mxu1  ;;  %25519 = vmatmul.mubr.msk.f32.vlgmr.msra.gmra.mrb[88].mxu1 %vm108_vm0, %v35351_v60  ;;  %v35356_v60 = vld [vmem:[#allocation34_spill] sm:$0xff] }
 0x566   :  { %v14286_v22 = vmul.f32 0.95, %v12463_v51  ;;  %25240 = vmatprep.mubr.msk.f32.mxu0 %vm108_vm0, %v14348_v31  ;;  %26745 = vmatpush3.bf16.msra.mxu1 %v35349_v16  ;;  %v35357_v16 = vld [vmem:[#allocation49_spill] sm:$0xff] }
 0x567   :  { %25525 = vmatprep.mubr.msk.f32.mxu1 %vm108_vm0, %v35352_v27  ;;  %25241 = vmatmul.mubr.msk.f32.gmra.mrb[172].mxu0 %vm108_vm0, %v14349_v26  ;;  %v14351_v58 = vadd.f32 %v14287_v62, %v35355_v23  ;;  %v35358_v31 = vld [vmem:[#allocation97_spill] sm:$0xff]  ;;  %v35359_v27 = vld [vmem:[#allocation180_spill] sm:$0xff] }
 0x568   :  { %v14350_v54 = vadd.f32 %v14286_v22, %v35353_v40  ;;  %v25056_v11 = vpop.f32.mrb[240].mxu1  ;;  %26747 = vmatprep.subr.bf16.mxu1 %v35354_v9  ;;  %v35360_v62 = vld [vmem:[#allocation96_spill] sm:$0xff] }
 0x569   :  { %v14289_v13 = vmul.f32 0.95, %v25056_v11  ;;  %v12538_v48 = vpop.f32.mrb[241].mxu1  ;;  %25526 = vmatmul.mubr.msk.f32.vlgmr.msra.gmra.mrb[90].mxu1 %vm108_vm0, %v35356_v60  ;;  %v35361_v60 = vld [vmem:[#allocation107_spill] sm:$0xff] }
 0x56a   :  { %v14288_v51 = vmul.f32 0.95, %v12538_v48  ;;  %25243 = vmatprep.mubr.msk.f32.mxu0 %vm108_vm0, %v14350_v54  ;;  %26749 = vmatpush3.bf16.msra.mxu1 %v35354_v9  ;;  %v35362_v9 = vld [vmem:[#allocation21_spill] sm:$0xff]  ;;  %v35363_v54 = vld [vmem:[#allocation184_spill] sm:$0xff] }
 0x56b   :  { %25532 = vmatprep.mubr.msk.f32.mxu1 %vm108_vm0, %v35357_v16  ;;  %25244 = vmatmul.mubr.msk.f32.gmra.mrb[174].mxu0 %vm108_vm0, %v14351_v58  ;;  %v14353_v11 = vadd.f32 %v14289_v13, %v35360_v62  ;;  %v35364_v16 = vld [vmem:[#allocation183_spill] sm:$0xff] }
 0x56c   :  { %v14352_v26 = vadd.f32 %v14288_v51, %v35358_v31  ;;  %v25063_v22 = vpop.f32.mrb[242].mxu1  ;;  %26751 = vmatprep.subr.bf16.mxu1 %v35359_v27 }
 0x56d   :  { %v14291_v0 = vmul.f32 0.95, %v25063_v22  ;;  %v12613_v10 = vpop.f32.mrb[243].mxu1  ;;  %25533 = vmatmul.mubr.msk.f32.vlgmr.msra.gmra.mrb[92].mxu1 %vm108_vm0, %v35361_v60 }
 0x56e   :  { %v14290_v48 = vmul.f32 0.95, %v12613_v10  ;;  %25246 = vmatprep.mubr.msk.f32.mxu0 %vm108_vm0, %v14352_v26  ;;  %26753 = vmatpush3.bf16.msra.mxu1 %v35359_v27  ;;  %v35366_v27 = vld [vmem:[#allocation186_spill] sm:$0xff] }
 0x56f   :  { %25539 = vmatprep.mubr.msk.f32.mxu1 %vm108_vm0, %v35362_v9  ;;  %25247 = vmatmul.mubr.msk.f32.gmra.mrb[176].mxu0 %vm108_vm0, %v14353_v11  ;;  %v14355_v13 = vadd.f32 %v14291_v0, %v35364_v16 }
 0x570   :  { %v14354_v58 = vadd.f32 %v14290_v48, %v35363_v54  ;;  %v25070_v51 = vpop.f32.mrb[244].mxu1  ;;  %v35367_v48 = vld [vmem:[#allocation185_spill] sm:$0xff] }
 0x571   :  { %v14293_v22 = vmul.f32 0.95, %v25070_v51  ;;  %v12688_v49 = vpop.f32.mrb[245].mxu1  ;;  %25540 = vmatmul.mubr.msk.f32.vlgmr.msra.gmra.mrb[94].mxu1 %vm108_vm0, %v35365_v25 }
 0x572   :  { %v14292_v10 = vmul.f32 0.95, %v12688_v49  ;;  %25249 = vmatprep.mubr.msk.f32.mxu0 %vm108_vm0, %v14354_v58  ;;  %25646 = vmatprep.mubr.msk.f32.mxu1 %vm108_vm0, %v35213_v6  ;;  %v35368_v49 = vld [vmem:[#allocation190_spill] sm:$0xff] }
 0x573   :  { %25250 = vmatmul.mubr.msk.f32.gmra.mrb[178].mxu0 %vm108_vm0, %v14355_v13  ;;  %v14357_v9 = vadd.f32 %v14293_v22, %v35367_v48  ;;  %v35370_v22 = vld [vmem:[#allocation193_spill] sm:$0xff] }
 0x574   :  { %v14356_v26 = vadd.f32 %v14292_v10, %v35366_v27  ;;  %v25077_v11 = vpop.f32.mrb[246].mxu1 }
 0x575   :  { %v14295_v60 = vmul.f32 0.95, %v25077_v11  ;;  %v12763_v0 = vpop.f32.mrb[247].mxu1 }
 0x576   :  { %v14294_v51 = vmul.f32 0.95, %v12763_v0  ;;  %25252 = vmatprep.mubr.msk.f32.mxu0 %vm108_vm0, %v14356_v26  ;;  %v35371_v0 = vld [vmem:[#allocation191_spill] sm:$0xff] }
 0x577   :  { %25253 = vmatmul.mubr.msk.f32.gmra.mrb[180].mxu0 %vm108_vm0, %v14357_v9  ;;  %v14359_v8 = vadd.f32 %v14295_v60, %v35369_v5  ;;  %v35372_v60 = vld [vmem:[#allocation196_spill] sm:$0xff] }
 0x578   :  { %v14358_v25 = vadd.f32 %v14294_v51, %v35368_v49  ;;  %v25084_v58 = vpop.f32.mrb[248].mxu1 }
 0x579   :  { %v14297_v6 = vmul.f32 0.95, %v25084_v58  ;;  %v12838_v1 = vpop.f32.mrb[249].mxu1 }
 0x57a   :  { %v14296_v13 = vmul.f32 0.95, %v12838_v1  ;;  %25255 = vmatprep.mubr.msk.f32.mxu0 %vm108_vm0, %v14358_v25  ;;  %v35373_v1 = vld [vmem:[#allocation195_spill] sm:$0xff] }
 0x57b   :  { %25256 = vmatmul.mubr.msk.f32.gmra.mrb[182].mxu0 %vm108_vm0, %v14359_v8  ;;  %v14361_v56 = vadd.f32 %v14297_v6, %v35371_v0  ;;  %v35374_v6 = vld [vmem:[#allocation200_spill] sm:$0xff] }
 0x57c   :  { %v14360_v10 = vadd.f32 %v14296_v13, %v35370_v22  ;;  %v25091_v11 = vpop.f32.mrb[250].mxu1 }
 0x57d   :  { %v14299_v26 = vmul.f32 0.95, %v25091_v11  ;;  %v12913_v30 = vpop.f32.mrb[251].mxu1 }
 0x57e   :  { %v14298_v9 = vmul.f32 0.95, %v12913_v30  ;;  %25258 = vmatprep.mubr.msk.f32.mxu0 %vm108_vm0, %v14360_v10  ;;  %v35375_v30 = vld [vmem:[#allocation198_spill] sm:$0xff] }
 0x57f   :  { %25259 = vmatmul.mubr.msk.f32.gmra.mrb[184].mxu0 %vm108_vm0, %v14361_v56  ;;  %v14363_v34 = vadd.f32 %v14299_v26, %v35373_v1  ;;  %v35376_v26 = vld [vmem:[#allocation206_spill] sm:$0xff] }
 0x580   :  { %v14362_v51 = vadd.f32 %v14298_v9, %v35372_v60  ;;  %v25098_v58 = vpop.f32.mrb[252].mxu1 }
 0x581   :  { %v14301_v25 = vmul.f32 0.95, %v25098_v58  ;;  %v12988_v49 = vpop.f32.mrb[253].mxu1 }
 0x582   :  { %v14300_v8 = vmul.f32 0.95, %v12988_v49  ;;  %25261 = vmatprep.mubr.msk.f32.mxu0 %vm108_vm0, %v14362_v51  ;;  %v35377_v49 = vld [vmem:[#allocation204_spill] sm:$0xff] }
 0x583   :  { %25262 = vmatmul.mubr.msk.f32.gmra.mrb[186].mxu0 %vm108_vm0, %v14363_v34  ;;  %v14365_v22 = vadd.f32 %v14301_v25, %v35375_v30  ;;  %v35378_v25 = vld [vmem:[#allocation210_spill] sm:$0xff] }
 0x584   :  { %v14364_v13 = vadd.f32 %v14300_v8, %v35374_v6  ;;  %v25105_v11 = vpop.f32.mrb[254].mxu1 }
 0x585   :  { %v14303_v10 = vmul.f32 0.95, %v25105_v11  ;;  %v13063_v0 = vpop.f32.mrb[255].mxu1 }
 0x586   :  { %v14302_v56 = vmul.f32 0.95, %v13063_v0  ;;  %25264 = vmatprep.mubr.msk.f32.mxu0 %vm108_vm0, %v14364_v13  ;;  %v35379_v0 = vld [vmem:[#allocation208_spill] sm:$0xff] }
 0x587   :  { %25265 = vmatmul.mubr.msk.f32.gmra.mrb[188].mxu0 %vm108_vm0, %v14365_v22  ;;  %v14367_v60 = vadd.f32 %v14303_v10, %v35377_v49  ;;  %v35380_v10 = vld [vmem:[#allocation216_spill] sm:$0xff] }
 0x588   :  { %v14366_v9 = vadd.f32 %v14302_v56, %v35376_v26  ;;  %v25112_v58 = vpop.f32.mrb[0].mxu1 }
 0x589   :  { %v14305_v51 = vmul.f32 0.95, %v25112_v58  ;;  %v13138_v1 = vpop.f32.mrb[1].mxu1 }
 0x58a   :  { %v14304_v34 = vmul.f32 0.95, %v13138_v1  ;;  %25267 = vmatprep.mubr.msk.f32.mxu0 %vm108_vm0, %v14366_v9  ;;  %v35381_v1 = vld [vmem:[#allocation214_spill] sm:$0xff] }
 0x58b   :  { %25268 = vmatmul.mubr.msk.f32.gmra.mrb[190].mxu0 %vm108_vm0, %v14367_v60  ;;  %v14369_v6 = vadd.f32 %v14305_v51, %v35379_v0  ;;  %v35382_v51 = vld [vmem:[#allocation220_spill] sm:$0xff] }
 0x58c   :  { %v14368_v8 = vadd.f32 %v14304_v34, %v35378_v25  ;;  %v25119_v11 = vpop.f32.mrb[2].mxu1 }
 0x58d   :  { %v14307_v13 = vmul.f32 0.95, %v25119_v11  ;;  %v13213_v30 = vpop.f32.mrb[3].mxu1 }
 0x58e   :  { %v14306_v22 = vmul.f32 0.95, %v13213_v30  ;;  %25270 = vmatprep.mubr.msk.f32.mxu0 %vm108_vm0, %v14368_v8  ;;  %v35383_v30 = vld [vmem:[#allocation218_spill] sm:$0xff] }
 0x58f   :  { %25271 = vmatmul.mubr.msk.f32.gmra.mrb[192].mxu0 %vm108_vm0, %v14369_v6  ;;  %v14371_v26 = vadd.f32 %v14307_v13, %v35381_v1  ;;  %v35384_v13 = vld [vmem:[#allocation224_spill] sm:$0xff] }
 0x590   :  { %v14370_v56 = vadd.f32 %v14306_v22, %v35380_v10  ;;  %v25126_v58 = vpop.f32.mrb[4].mxu1 }
 0x591   :  { %v14309_v9 = vmul.f32 0.95, %v25126_v58  ;;  %v13288_v49 = vpop.f32.mrb[5].mxu1 }
 0x592   :  { %v14308_v60 = vmul.f32 0.95, %v13288_v49  ;;  %25273 = vmatprep.mubr.msk.f32.mxu0 %vm108_vm0, %v14370_v56  ;;  %v35385_v49 = vld [vmem:[#allocation222_spill] sm:$0xff] }
 0x593   :  { %25274 = vmatmul.mubr.msk.f32.gmra.mrb[194].mxu0 %vm108_vm0, %v14371_v26  ;;  %v14373_v25 = vadd.f32 %v14309_v9, %v35383_v30  ;;  %v35386_v9 = vld [vmem:[#allocation229_spill] sm:$0xff] }
 0x594   :  { %v14372_v34 = vadd.f32 %v14308_v60, %v35382_v51  ;;  %v25133_v11 = vpop.f32.mrb[6].mxu1 }
 0x595   :  { %v14311_v8 = vmul.f32 0.95, %v25133_v11  ;;  %v13363_v0 = vpop.f32.mrb[7].mxu1 }
 0x596   :  { %v14310_v6 = vmul.f32 0.95, %v13363_v0  ;;  %25276 = vmatprep.mubr.msk.f32.mxu0 %vm108_vm0, %v14372_v34  ;;  %v35387_v0 = vld [vmem:[#allocation226_spill] sm:$0xff] }
 0x597   :  { %25277 = vmatmul.mubr.msk.f32.gmra.mrb[196].mxu0 %vm108_vm0, %v14373_v25  ;;  %v14375_v10 = vadd.f32 %v14311_v8, %v35385_v49  ;;  %v35388_v8 = vld [vmem:[#allocation232_spill] sm:$0xff] }
 0x598   :  { %v14374_v22 = vadd.f32 %v14310_v6, %v35384_v13  ;;  %v25140_v58 = vpop.f32.mrb[8].mxu1 }
 0x599   :  { %v14313_v56 = vmul.f32 0.95, %v25140_v58  ;;  %v13438_v1 = vpop.f32.mrb[9].mxu1 }
 0x59a   :  { %v14312_v26 = vmul.f32 0.95, %v13438_v1  ;;  %25279 = vmatprep.mubr.msk.f32.mxu0 %vm108_vm0, %v14374_v22  ;;  %v35389_v1 = vld [vmem:[#allocation237_spill] sm:$0xff] }
 0x59b   :  { %25280 = vmatmul.mubr.msk.f32.gmra.mrb[198].mxu0 %vm108_vm0, %v14375_v10  ;;  %v14377_v51 = vadd.f32 %v14313_v56, %v35387_v0  ;;  %v35390_v56 = vld [vmem:[#allocation239_spill] sm:$0xff] }
 0x59c   :  { %v14376_v60 = vadd.f32 %v14312_v26, %v35386_v9  ;;  %v25147_v11 = vpop.f32.mrb[10].mxu1 }
 0x59d   :  { %v14315_v34 = vmul.f32 0.95, %v25147_v11  ;;  %v13513_v30 = vpop.f32.mrb[11].mxu1 }
 0x59e   :  { %v14314_v25 = vmul.f32 0.95, %v13513_v30  ;;  %25282 = vmatprep.mubr.msk.f32.mxu0 %vm108_vm0, %v14376_v60  ;;  %v35391_v30 = vld [vmem:[#allocation234_spill] sm:$0xff] }
 0x59f   :  { %25283 = vmatmul.mubr.msk.f32.gmra.mrb[200].mxu0 %vm108_vm0, %v14377_v51  ;;  %v14379_v13 = vadd.f32 %v14315_v34, %v35389_v1  ;;  %v35392_v34 = vld [vmem:[#allocation240_spill] sm:$0xff] }
 0x5a0   :  { %v14378_v6 = vadd.f32 %v14314_v25, %v35388_v8  ;;  %v25154_v58 = vpop.f32.mrb[12].mxu1 }
 0x5a1   :  { %v14317_v22 = vmul.f32 0.95, %v25154_v58  ;;  %v13588_v49 = vpop.f32.mrb[13].mxu1 }
 0x5a2   :  { %v14316_v10 = vmul.f32 0.95, %v13588_v49  ;;  %25285 = vmatprep.mubr.msk.f32.mxu0 %vm108_vm0, %v14378_v6  ;;  %v35393_v49 = vld [vmem:[#allocation243_spill] sm:$0xff] }
 0x5a3   :  { %25286 = vmatmul.mubr.msk.f32.gmra.mrb[202].mxu0 %vm108_vm0, %v14379_v13  ;;  %v14381_v9 = vadd.f32 %v14317_v22, %v35391_v30  ;;  %v35394_v22 = vld [vmem:[#allocation246_spill] sm:$0xff] }
 0x5a4   :  { %v14380_v26 = vadd.f32 %v14316_v10, %v35390_v56  ;;  %v25161_v11 = vpop.f32.mrb[14].mxu1 }
 0x5a5   :  { %v14319_v60 = vmul.f32 0.95, %v25161_v11  ;;  %v13663_v0 = vpop.f32.mrb[15].mxu1 }
 0x5a6   :  { %v14318_v51 = vmul.f32 0.95, %v13663_v0  ;;  %25288 = vmatprep.mubr.msk.f32.mxu0 %vm108_vm0, %v14380_v26  ;;  %v35395_v0 = vld [vmem:[#allocation244_spill] sm:$0xff] }
 0x5a7   :  { %25289 = vmatmul.mubr.msk.f32.gmra.mrb[204].mxu0 %vm108_vm0, %v14381_v9  ;;  %v14383_v8 = vadd.f32 %v14319_v60, %v35393_v49 }
 0x5a8   :  { %v14382_v25 = vadd.f32 %v14318_v51, %v35392_v34  ;;  %v25168_v58 = vpop.f32.mrb[16].mxu1 }
 0x5a9   :  { %v14321_v6 = vmul.f32 0.95, %v25168_v58  ;;  %v13738_v1 = vpop.f32.mrb[17].mxu1 }
 0x5aa   :  { %v14320_v13 = vmul.f32 0.95, %v13738_v1  ;;  %25291 = vmatprep.mubr.msk.f32.mxu0 %vm108_vm0, %v14382_v25  ;;  %v35396_v1 = vld [vmem:[#allocation247_spill] sm:$0xff] }
 0x5ab   :  { %25292 = vmatmul.mubr.msk.f32.gmra.mrb[206].mxu0 %vm108_vm0, %v14383_v8  ;;  %v14385_v56 = vadd.f32 %v14321_v6, %v35395_v0  ;;  %v35397_v6 = vld [vmem:[#allocation251_spill] sm:$0xff] }
 0x5ac   :  { %v14384_v10 = vadd.f32 %v14320_v13, %v35394_v22  ;;  %v25175_v11 = vpop.f32.mrb[18].mxu1 }
 0x5ad   :  { %v14323_v26 = vmul.f32 0.95, %v25175_v11  ;;  %v13813_v30 = vpop.f32.mrb[19].mxu1 }
 0x5ae   :  { %v14322_v9 = vmul.f32 0.95, %v13813_v30  ;;  %25294 = vmatprep.mubr.msk.f32.mxu0 %vm108_vm0, %v14384_v10  ;;  %v35398_v30 = vld [vmem:[#allocation249_spill] sm:$0xff] }
 0x5af   :  { %25295 = vmatmul.mubr.msk.f32.gmra.mrb[208].mxu0 %vm108_vm0, %v14385_v56  ;;  %v14387_v58 = vadd.f32 %v14323_v26, %v35396_v1  ;;  %v35399_v26 = vld [vmem:[#allocation250_spill] sm:$0xff] }
 0x5b0   :  { %v14386_v60 = vadd.f32 %v14322_v9, %v32174_v12  ;;  %v25182_v51 = vpop.f32.mrb[20].mxu1 }
 0x5b1   :  { %v14325_v25 = vmul.f32 0.95, %v25182_v51  ;;  %v13888_v34 = vpop.f32.mrb[21].mxu1 }
 0x5b2   :  { %v14324_v8 = vmul.f32 0.95, %v13888_v34  ;;  %25297 = vmatprep.mubr.msk.f32.mxu0 %vm108_vm0, %v14386_v60  ;;  %v35400_v34 = vld [vmem:[#allocation256_spill] sm:$0xff] }
 0x5b3   :  { %25298 = vmatmul.mubr.msk.f32.gmra.mrb[210].mxu0 %vm108_vm0, %v14387_v58  ;;  %v14389_v22 = vadd.f32 %v14325_v25, %v35398_v30  ;;  %v35401_v25 = vld [vmem:[#allocation255_spill] sm:$0xff] }
 0x5b4   :  { %v14388_v13 = vadd.f32 %v14324_v8, %v35397_v6  ;;  %v25189_v11 = vpop.f32.mrb[22].mxu1 }
 0x5b5   :  { %v14327_v10 = vmul.f32 0.95, %v25189_v11  ;;  %v13963_v0 = vpop.f32.mrb[23].mxu1 }
 0x5b6   :  { %v14326_v56 = vmul.f32 0.95, %v13963_v0  ;;  %25300 = vmatprep.mubr.msk.f32.mxu0 %vm108_vm0, %v14388_v13  ;;  %v35402_v0 = vld [vmem:[#allocation252_spill] sm:$0xff] }
 0x5b7   :  { %25301 = vmatmul.mubr.msk.f32.gmra.mrb[212].mxu0 %vm108_vm0, %v14389_v22  ;;  %v14391_v12 = vadd.f32 %v14327_v10, %v35400_v34 }
 0x5b8   :  { %v14390_v9 = vadd.f32 %v14326_v56, %v35399_v26  ;;  %v25196_v51 = vpop.f32.mrb[24].mxu1 }
 0x5b9   :  { %v14329_v60 = vmul.f32 0.95, %v25196_v51  ;;  %v14038_v1 = vpop.f32.mrb[25].mxu1 }
 0x5ba   :  { %v14328_v58 = vmul.f32 0.95, %v14038_v1  ;;  %25303 = vmatprep.mubr.msk.f32.mxu0 %vm108_vm0, %v14390_v9  ;;  %v35403_v1 = vld [vmem:[#allocation257_spill] sm:$0xff] }
 0x5bb   :  { %25304 = vmatmul.mubr.msk.f32.gmra.mrb[214].mxu0 %vm108_vm0, %v14391_v12  ;;  %v14393_v6 = vadd.f32 %v14329_v60, %v35402_v0 }
 0x5bc   :  { %v14392_v8 = vadd.f32 %v14328_v58, %v35401_v25  ;;  %v25203_v11 = vpop.f32.mrb[26].mxu1 }
 0x5bd   :  { %v14331_v13 = vmul.f32 0.95, %v25203_v11  ;;  %v14113_v30 = vpop.f32.mrb[27].mxu1 }
 0x5be   :  { %v14330_v22 = vmul.f32 0.95, %v14113_v30  ;;  %25306 = vmatprep.mubr.msk.f32.mxu0 %vm108_vm0, %v14392_v8  ;;  %v35404_v30 = vld [vmem:[#allocation258_spill] sm:$0xff] }
 0x5bf   :  { %25307 = vmatmul.mubr.msk.f32.gmra.mrb[216].mxu0 %vm108_vm0, %v14393_v6  ;;  %v14395_v51 = vadd.f32 %v14331_v13, %v35403_v1 }
 0x5c0   :  { %v14394_v10 = vadd.f32 %v14330_v22, %v32281_v24  ;;  %v25210_v56 = vpop.f32.mrb[28].mxu1 }
 0x5c1   :  { %v14333_v9 = vmul.f32 0.95, %v25210_v56  ;;  %v14188_v26 = vpop.f32.mrb[29].mxu1 }
 0x5c2   :  { %v14332_v12 = vmul.f32 0.95, %v14188_v26  ;;  %25309 = vmatprep.mubr.msk.f32.mxu0 %vm108_vm0, %v14394_v10 }
 0x5c3   :  { %25310 = vmatmul.mubr.msk.f32.gmra.mrb[218].mxu0 %vm108_vm0, %v14395_v51  ;;  %v14397_v11 = vadd.f32 %v14333_v9, %v35404_v30 }
 0x5c4   :  { %v14396_v60 = vadd.f32 %v14332_v12, %v32309_v3  ;;  %v25217_v58 = vpop.f32.mrb[30].mxu1 }
 0x5c5   :  { %v14335_v8 = vmul.f32 0.95, %v25217_v58  ;;  %v14263_v25 = vpop.f32.mrb[31].mxu1 }
 0x5c6   :  { %v14334_v6 = vmul.f32 0.95, %v14263_v25  ;;  %25312 = vmatprep.mubr.msk.f32.mxu0 %vm108_vm0, %v14396_v60 }
 0x5c7   :  { %25313 = vmatmul.mubr.msk.f32.gmra.mrb[220].mxu0 %vm108_vm0, %v14397_v11  ;;  %v14399_v26 = vadd.f32 %v14335_v8, %v32327_v14 }
 0x5c8   :  { %v14398_v13 = vadd.f32 %v14334_v6, %v32339_v4  ;;  %v25324_v22 = vpop.f32.mrb[32].mxu1 }
 0x5c9   :  { %v17637_v10 = vmul.f32 0.95, %v25324_v22  ;;  %v15116_v56 = vpop.f32.mrb[33].mxu1 }
 0x5ca   :  { %v17636_v51 = vmul.f32 0.95, %v15116_v56  ;;  %25315 = vmatprep.mubr.msk.f32.mxu0 %vm108_vm0, %v14398_v13 }
 0x5cb   :  { %v17701_v12 = vadd.f32 %v17637_v10, %v35320_v37  ;;  %25316 = vmatmul.mubr.msk.f32.gmra.mrb[222].mxu0 %vm108_vm0, %v14399_v26  ;;  %v22626_v26 = vld [vmem:[%s33938_s7 + $0x20] sm:$0xff]  ;;  %v22627_v10 = vld [vmem:[%s33938_s7 + $0x28] sm:$0xff] }
 0x5cc   :  { %v17700_v25 = vadd.f32 %v17636_v51, %v35319_v43  ;;  %v25331_v9 = vpop.f32.mrb[34].mxu1 }
 0x5cd   :  { %v17639_v60 = vmul.f32 0.95, %v25331_v9  ;;  %v15197_v58 = vpop.f32.mrb[35].mxu1 }
 0x5ce   :  { %v17638_v11 = vmul.f32 0.95, %v15197_v58  ;;  %25546 = vmatprep.mubr.msk.f32.mxu0 %vm108_vm0, %v17700_v25  ;;  %v26758_v6 = vpack.c.bf16 %v17701_v12, %v17700_v25  ;;  %v26886_v25 = vpack.c.bf16 %v22627_v10, %v22626_v26 }
 0x5cf   :  { %v17703_v8 = vadd.f32 %v17639_v60, %v35325_v29  ;;  %25547 = vmatmul.mubr.msk.f32.vlgmr.msra.gmra.mrb[160].mxu0 %vm108_vm0, %v17701_v12 }
 0x5d0   :  { %v17702_v22 = vadd.f32 %v17638_v11, %v35323_v17  ;;  %v25338_v13 = vpop.f32.mrb[36].mxu1  ;;  %26759 = vmatprep.subr.bf16.mxu1 %v26758_v6  ;;  %26887 = vmatprep.subr.bf16.mxu0 %v26886_v25 }
 0x5d1   :  { %v17641_v56 = vmul.f32 0.95, %v25338_v13  ;;  %v15278_v51 = vpop.f32.mrb[37].mxu1  ;;  %26761 = vmatpush3.bf16.msra.mxu1 %v26758_v6  ;;  %26889 = vmatpush3.bf16.msra.mxu0 %v26886_v25 }
 0x5d2   :  { %v17640_v9 = vmul.f32 0.95, %v15278_v51  ;;  %25549 = vmatprep.mubr.msk.f32.mxu0 %vm108_vm0, %v17702_v22  ;;  %v26762_v12 = vpack.c.bf16 %v17703_v8, %v17702_v22 }
 0x5d3   :  { %v17705_v60 = vadd.f32 %v17641_v56, %v35330_v36  ;;  %25550 = vmatmul.mubr.msk.f32.gmra.mrb[162].mxu0 %vm108_vm0, %v17703_v8 }
 0x5d4   :  { %v17704_v58 = vadd.f32 %v17640_v9, %v35328_v7  ;;  %v25345_v11 = vpop.f32.mrb[38].mxu1  ;;  %25647 = vmatmul.mubr.msk.f32.vlgmr.msra.gmra.mrb[96].mxu1 %vm108_vm0, %v35217_v18  ;;  %26763 = vmatprep.subr.bf16.mxu1 %v26762_v12 }
 0x5d5   :  { %v17643_v13 = vmul.f32 0.95, %v25345_v11  ;;  %v15359_v29 = vpop.f32.mrb[39].mxu1  ;;  %26765 = vmatpush3.bf16.msra.mxu1 %v26762_v12  ;;  %25653 = vmatprep.mubr.msk.f32.mxu1 %vm108_vm0, %v35218_v38 }
 0x5d6   :  { %v17642_v6 = vmul.f32 0.95, %v15359_v29  ;;  %25552 = vmatprep.mubr.msk.f32.mxu0 %vm108_vm0, %v17704_v58  ;;  %v26766_v22 = vpack.c.bf16 %v17705_v60, %v17704_v58 }
 0x5d7   :  { %v17707_v8 = vadd.f32 %v17643_v13, %v35335_v21  ;;  %25553 = vmatmul.mubr.msk.f32.gmra.mrb[164].mxu0 %vm108_vm0, %v17705_v60 }
 0x5d8   :  { %v17706_v26 = vadd.f32 %v17642_v6, %v35333_v20  ;;  %v25352_v10 = vpop.f32.mrb[40].mxu1  ;;  %25654 = vmatmul.mubr.msk.f32.vlgmr.msra.gmra.mrb[98].mxu1 %vm108_vm0, %v35222_v39  ;;  %26767 = vmatprep.subr.bf16.mxu1 %v26766_v22 }
 0x5d9   :  { %v17645_v18 = vmul.f32 0.95, %v25352_v10  ;;  %v15440_v56 = vpop.f32.mrb[41].mxu1  ;;  %26769 = vmatpush3.bf16.msra.mxu1 %v26766_v22  ;;  %25660 = vmatprep.mubr.msk.f32.mxu1 %vm108_vm0, %v35223_v41 }
 0x5da   :  { %v17644_v38 = vmul.f32 0.95, %v15440_v56  ;;  %25555 = vmatprep.mubr.msk.f32.mxu0 %vm108_vm0, %v17706_v26  ;;  %v26770_v29 = vpack.c.bf16 %v17707_v8, %v17706_v26 }
 0x5db   :  { %v17709_v51 = vadd.f32 %v17645_v18, %v35340_v33  ;;  %25556 = vmatmul.mubr.msk.f32.gmra.mrb[166].mxu0 %vm108_vm0, %v17707_v8 }
 0x5dc   :  { %v17708_v25 = vadd.f32 %v17644_v38, %v35338_v44  ;;  %v25359_v9 = vpop.f32.mrb[42].mxu1  ;;  %25661 = vmatmul.mubr.msk.f32.vlgmr.msra.gmra.mrb[100].mxu1 %vm108_vm0, %v35225_v2  ;;  %26771 = vmatprep.subr.bf16.mxu1 %v26770_v29 }
 0x5dd   :  { %v17647_v39 = vmul.f32 0.95, %v25359_v9  ;;  %v15521_v12 = vpop.f32.mrb[43].mxu1  ;;  %26773 = vmatpush3.bf16.msra.mxu1 %v26770_v29  ;;  %25667 = vmatprep.mubr.msk.f32.mxu1 %vm108_vm0, %v35226_v50 }
 0x5de   :  { %v17646_v41 = vmul.f32 0.95, %v15521_v12  ;;  %25558 = vmatprep.mubr.msk.f32.mxu0 %vm108_vm0, %v17708_v25  ;;  %v26774_v60 = vpack.c.bf16 %v17709_v51, %v17708_v25 }
 0x5df   :  { %v17711_v58 = vadd.f32 %v17647_v39, %v35345_v63  ;;  %25559 = vmatmul.mubr.msk.f32.gmra.mrb[168].mxu0 %vm108_vm0, %v17709_v51 }
 0x5e0   :  { %v17710_v11 = vadd.f32 %v17646_v41, %v35343_v53  ;;  %v25366_v13 = vpop.f32.mrb[44].mxu1  ;;  %25668 = vmatmul.mubr.msk.f32.vlgmr.msra.gmra.mrb[102].mxu1 %vm108_vm0, %v35229_v55  ;;  %26775 = vmatprep.subr.bf16.mxu1 %v26774_v60 }
 0x5e1   :  { %v17649_v2 = vmul.f32 0.95, %v25366_v13  ;;  %v15602_v6 = vpop.f32.mrb[45].mxu1  ;;  %26777 = vmatpush3.bf16.msra.mxu1 %v26774_v60  ;;  %25674 = vmatprep.mubr.msk.f32.mxu1 %vm108_vm0, %v35231_v28 }
 0x5e2   :  { %v17648_v50 = vmul.f32 0.95, %v15602_v6  ;;  %25561 = vmatprep.mubr.msk.f32.mxu0 %vm108_vm0, %v17710_v11  ;;  %v26778_v22 = vpack.c.bf16 %v17711_v58, %v17710_v11 }
 0x5e3   :  { %v17713_v8 = vadd.f32 %v17649_v2, %v35350_v59  ;;  %25562 = vmatmul.mubr.msk.f32.gmra.mrb[170].mxu0 %vm108_vm0, %v17711_v58 }
 0x5e4   :  { %v17712_v26 = vadd.f32 %v17648_v50, %v35348_v19  ;;  %v25373_v10 = vpop.f32.mrb[46].mxu1  ;;  %25675 = vmatmul.mubr.msk.f32.vlgmr.msra.gmra.mrb[104].mxu1 %vm108_vm0, %v35234_v52  ;;  %26779 = vmatprep.subr.bf16.mxu1 %v26778_v22 }
 0x5e5   :  { %v17651_v55 = vmul.f32 0.95, %v25373_v10  ;;  %v15683_v18 = vpop.f32.mrb[47].mxu1  ;;  %26781 = vmatpush3.bf16.msra.mxu1 %v26778_v22  ;;  %25681 = vmatprep.mubr.msk.f32.mxu1 %vm108_vm0, %v35236_v42 }
 0x5e6   :  { %v17650_v28 = vmul.f32 0.95, %v15683_v18  ;;  %25564 = vmatprep.mubr.msk.f32.mxu0 %vm108_vm0, %v17712_v26  ;;  %v26782_v56 = vpack.c.bf16 %v17713_v8, %v17712_v26 }
 0x5e7   :  { %v17715_v38 = vadd.f32 %v17651_v55, %v35355_v23  ;;  %25565 = vmatmul.mubr.msk.f32.gmra.mrb[172].mxu0 %vm108_vm0, %v17713_v8 }
 0x5e8   :  { %v17714_v29 = vadd.f32 %v17650_v28, %v35353_v40  ;;  %v25380_v51 = vpop.f32.mrb[48].mxu1  ;;  %25682 = vmatmul.mubr.msk.f32.vlgmr.msra.gmra.mrb[106].mxu1 %vm108_vm0, %v35238_v57  ;;  %26783 = vmatprep.subr.bf16.mxu1 %v26782_v56  ;;  %v35405_v28 = vld [vmem:[#allocation190_spill] sm:$0xff] }
 0x5e9   :  { %v17653_v52 = vmul.f32 0.95, %v25380_v51  ;;  %v15764_v25 = vpop.f32.mrb[49].mxu1  ;;  %26785 = vmatpush3.bf16.msra.mxu1 %v26782_v56  ;;  %25688 = vmatprep.mubr.msk.f32.mxu1 %vm108_vm0, %v35239_v47 }
 0x5ea   :  { %v17652_v42 = vmul.f32 0.95, %v15764_v25  ;;  %25567 = vmatprep.mubr.msk.f32.mxu0 %vm108_vm0, %v17714_v29  ;;  %v26786_v9 = vpack.c.bf16 %v17715_v38, %v17714_v29  ;;  %v35406_v29 = vld [vmem:[#allocation10_spill] sm:$0xff] }
 0x5eb   :  { %v17717_v39 = vadd.f32 %v17653_v52, %v35360_v62  ;;  %25568 = vmatmul.mubr.msk.f32.gmra.mrb[174].mxu0 %vm108_vm0, %v17715_v38  ;;  %v35407_v52 = vld [vmem:[#allocation36_spill] sm:$0xff] }
 0x5ec   :  { %v17716_v12 = vadd.f32 %v17652_v42, %v35358_v31  ;;  %v25387_v41 = vpop.f32.mrb[50].mxu1  ;;  %25689 = vmatmul.mubr.msk.f32.vlgmr.msra.gmra.mrb[108].mxu1 %vm108_vm0, %v35243_v35  ;;  %26787 = vmatprep.subr.bf16.mxu1 %v26786_v9  ;;  %v35408_v42 = vld [vmem:[#allocation191_spill] sm:$0xff] }
 0x5ed   :  { %v17655_v57 = vmul.f32 0.95, %v25387_v41  ;;  %v15845_v60 = vpop.f32.mrb[51].mxu1  ;;  %26789 = vmatpush3.bf16.msra.mxu1 %v26786_v9  ;;  %25695 = vmatprep.mubr.msk.f32.mxu1 %vm108_vm0, %v35244_v15 }
 0x5ee   :  { %v17654_v47 = vmul.f32 0.95, %v15845_v60  ;;  %25570 = vmatprep.mubr.msk.f32.mxu0 %vm108_vm0, %v17716_v12  ;;  %v26790_v58 = vpack.c.bf16 %v17717_v39, %v17716_v12 }
 0x5ef   :  { %v17719_v11 = vadd.f32 %v17655_v57, %v35364_v16  ;;  %25571 = vmatmul.mubr.msk.f32.gmra.mrb[176].mxu0 %vm108_vm0, %v17717_v39  ;;  %v35409_v39 = vld [vmem:[#allocation193_spill] sm:$0xff]  ;;  %v35410_v57 = vld [vmem:[#allocation27_spill] sm:$0xff] }
 0x5f0   :  { %v17718_v13 = vadd.f32 %v17654_v47, %v35363_v54  ;;  %v25394_v2 = vpop.f32.mrb[52].mxu1  ;;  %25696 = vmatmul.mubr.msk.f32.vlgmr.msra.gmra.mrb[110].mxu1 %vm108_vm0, %v35248_v61  ;;  %26791 = vmatprep.subr.bf16.mxu1 %v26790_v58 }
 0x5f1   :  { %v17657_v35 = vmul.f32 0.95, %v25394_v2  ;;  %v15926_v6 = vpop.f32.mrb[53].mxu1  ;;  %26793 = vmatpush3.bf16.msra.mxu1 %v26790_v58  ;;  %25702 = vmatprep.mubr.msk.f32.mxu1 %vm108_vm0, %v35249_v45  ;;  %v35411_v58 = vld [vmem:[#allocation2_spill] sm:$0xff]  ;;  %v35412_v2 = vld [vmem:[#allocation195_spill] sm:$0xff] }
 0x5f2   :  { %v17656_v15 = vmul.f32 0.95, %v15926_v6  ;;  %25573 = vmatprep.mubr.msk.f32.mxu0 %vm108_vm0, %v17718_v13  ;;  %v26794_v50 = vpack.c.bf16 %v17719_v11, %v17718_v13  ;;  %v35413_v6 = vld [vmem:[#allocation196_spill] sm:$0xff] }
 0x5f3   :  { %v17721_v22 = vadd.f32 %v17657_v35, %v35367_v48  ;;  %25574 = vmatmul.mubr.msk.f32.gmra.mrb[178].mxu0 %vm108_vm0, %v17719_v11 }
 0x5f4   :  { %v17720_v8 = vadd.f32 %v17656_v15, %v35366_v27  ;;  %v25401_v26 = vpop.f32.mrb[54].mxu1  ;;  %25703 = vmatmul.mubr.msk.f32.vlgmr.msra.gmra.mrb[112].mxu1 %vm108_vm0, %v35253_v32  ;;  %26795 = vmatprep.subr.bf16.mxu1 %v26794_v50 }
 0x5f5   :  { %v17659_v61 = vmul.f32 0.95, %v25401_v26  ;;  %v16007_v10 = vpop.f32.mrb[55].mxu1  ;;  %26797 = vmatpush3.bf16.msra.mxu1 %v26794_v50  ;;  %25709 = vmatprep.mubr.msk.f32.mxu1 %vm108_vm0, %v35254_v46 }
 0x5f6   :  { %v17658_v45 = vmul.f32 0.95, %v16007_v10  ;;  %25576 = vmatprep.mubr.msk.f32.mxu0 %vm108_vm0, %v17720_v8  ;;  %v26798_v55 = vpack.c.bf16 %v17721_v22, %v17720_v8 }
 0x5f7   :  { %v17723_v18 = vadd.f32 %v17659_v61, %v35369_v5  ;;  %25577 = vmatmul.mubr.msk.f32.gmra.mrb[180].mxu0 %vm108_vm0, %v17721_v22  ;;  %v35414_v22 = vld [vmem:[#allocation13_spill] sm:$0xff]  ;;  %v35415_v61 = vld [vmem:[#allocation11_spill] sm:$0xff] }
 0x5f8   :  { %v17722_v56 = vadd.f32 %v17658_v45, %v35405_v28  ;;  %v25408_v38 = vpop.f32.mrb[56].mxu1  ;;  %25710 = vmatmul.mubr.msk.f32.vlgmr.msra.gmra.mrb[114].mxu1 %vm108_vm0, %v35406_v29  ;;  %26799 = vmatprep.subr.bf16.mxu1 %v26798_v55 }
 0x5f9   :  { %v17661_v32 = vmul.f32 0.95, %v25408_v38  ;;  %v16088_v51 = vpop.f32.mrb[57].mxu1  ;;  %26801 = vmatpush3.bf16.msra.mxu1 %v26798_v55  ;;  %25716 = vmatprep.mubr.msk.f32.mxu1 %vm108_vm0, %v35407_v52  ;;  %v35416_v55 = vld [vmem:[#allocation198_spill] sm:$0xff] }
 0x5fa   :  { %v17660_v46 = vmul.f32 0.95, %v16088_v51  ;;  %25579 = vmatprep.mubr.msk.f32.mxu0 %vm108_vm0, %v17722_v56  ;;  %v26802_v25 = vpack.c.bf16 %v17723_v18, %v17722_v56  ;;  %v35417_v56 = vld [vmem:[#allocation200_spill] sm:$0xff] }
 0x5fb   :  { %v17725_v9 = vadd.f32 %v17661_v32, %v35408_v42  ;;  %25580 = vmatmul.mubr.msk.f32.gmra.mrb[182].mxu0 %vm108_vm0, %v17723_v18  ;;  %v35418_v32 = vld [vmem:[#allocation39_spill] sm:$0xff] }
 0x5fc   :  { %v17724_v12 = vadd.f32 %v17660_v46, %v35409_v39  ;;  %v25415_v41 = vpop.f32.mrb[58].mxu1  ;;  %25717 = vmatmul.mubr.msk.f32.vlgmr.msra.gmra.mrb[116].mxu1 %vm108_vm0, %v35410_v57  ;;  %26803 = vmatprep.subr.bf16.mxu1 %v26802_v25  ;;  %v35419_v46 = vld [vmem:[#allocation3_spill] sm:$0xff]  ;;  %v35421_v57 = vld [vmem:[#allocation206_spill] sm:$0xff] }
 0x5fd   :  { %v17663_v60 = vmul.f32 0.95, %v25415_v41  ;;  %v16169_v47 = vpop.f32.mrb[59].mxu1  ;;  %26805 = vmatpush3.bf16.msra.mxu1 %v26802_v25  ;;  %25723 = vmatprep.mubr.msk.f32.mxu1 %vm108_vm0, %v35411_v58  ;;  %v35422_v58 = vld [vmem:[#allocation56_spill] sm:$0xff] }
 0x5fe   :  { %v17662_v11 = vmul.f32 0.95, %v16169_v47  ;;  %25582 = vmatprep.mubr.msk.f32.mxu0 %vm108_vm0, %v17724_v12  ;;  %v26806_v13 = vpack.c.bf16 %v17725_v9, %v17724_v12  ;;  %v35420_v12 = vld [vmem:[#allocation204_spill] sm:$0xff] }
 0x5ff   :  { %v17727_v35 = vadd.f32 %v17663_v60, %v35412_v2  ;;  %25583 = vmatmul.mubr.msk.f32.gmra.mrb[184].mxu0 %vm108_vm0, %v17725_v9 }
 0x600   :  { %v17726_v15 = vadd.f32 %v17662_v11, %v35413_v6  ;;  %v25422_v50 = vpop.f32.mrb[60].mxu1  ;;  %25724 = vmatmul.mubr.msk.f32.vlgmr.msra.gmra.mrb[118].mxu1 %vm108_vm0, %v35414_v22  ;;  %26807 = vmatprep.subr.bf16.mxu1 %v26806_v13  ;;  %v35424_v22 = vld [vmem:[#allocation208_spill] sm:$0xff] }
 0x601   :  { %v17665_v8 = vmul.f32 0.95, %v25422_v50  ;;  %v16250_v26 = vpop.f32.mrb[61].mxu1  ;;  %26809 = vmatpush3.bf16.msra.mxu1 %v26806_v13  ;;  %25730 = vmatprep.mubr.msk.f32.mxu1 %vm108_vm0, %v35415_v61 }
 0x602   :  { %v17664_v10 = vmul.f32 0.95, %v16250_v26  ;;  %25585 = vmatprep.mubr.msk.f32.mxu0 %vm108_vm0, %v17726_v15  ;;  %v26810_v45 = vpack.c.bf16 %v17727_v35, %v17726_v15  ;;  %v35425_v26 = vld [vmem:[#allocation210_spill] sm:$0xff] }
 0x603   :  { %v17729_v18 = vadd.f32 %v17665_v8, %v35416_v55  ;;  %25586 = vmatmul.mubr.msk.f32.gmra.mrb[186].mxu0 %vm108_vm0, %v17727_v35  ;;  %v35423_v35 = vld [vmem:[#allocation15_spill] sm:$0xff] }
 0x604   :  { %v17728_v38 = vadd.f32 %v17664_v10, %v35417_v56  ;;  %v25429_v29 = vpop.f32.mrb[62].mxu1  ;;  %25731 = vmatmul.mubr.msk.f32.vlgmr.msra.gmra.mrb[120].mxu1 %vm108_vm0, %v35418_v32  ;;  %26811 = vmatprep.subr.bf16.mxu1 %v26810_v45 }
 0x605   :  { %v17667_v51 = vmul.f32 0.95, %v25429_v29  ;;  %v16331_v52 = vpop.f32.mrb[63].mxu1  ;;  %26813 = vmatpush3.bf16.msra.mxu1 %v26810_v45  ;;  %25737 = vmatprep.mubr.msk.f32.mxu1 %vm108_vm0, %v35419_v46  ;;  %v35426_v45 = vld [vmem:[#allocation46_spill] sm:$0xff] }
 0x606   :  { %v17666_v25 = vmul.f32 0.95, %v16331_v52  ;;  %25588 = vmatprep.mubr.msk.f32.mxu0 %vm108_vm0, %v17728_v38  ;;  %v26814_v9 = vpack.c.bf16 %v17729_v18, %v17728_v38  ;;  %v35427_v29 = vld [vmem:[#allocation70_spill] sm:$0xff] }
 0x607   :  { %v17731_v41 = vadd.f32 %v17667_v51, %v35420_v12  ;;  %25589 = vmatmul.mubr.msk.f32.gmra.mrb[188].mxu0 %vm108_vm0, %v17729_v18  ;;  %v35428_v52 = vld [vmem:[#allocation214_spill] sm:$0xff] }
 0x608   :  { %v17730_v60 = vadd.f32 %v17666_v25, %v35421_v57  ;;  %v25436_v47 = vpop.f32.mrb[64].mxu1  ;;  %25738 = vmatmul.mubr.msk.f32.vlgmr.msra.gmra.mrb[122].mxu1 %vm108_vm0, %v35422_v58  ;;  %26815 = vmatprep.subr.bf16.mxu1 %v26814_v9  ;;  %v35429_v25 = vld [vmem:[#allocation216_spill] sm:$0xff] }
 0x609   :  { %v17669_v11 = vmul.f32 0.95, %v25436_v47  ;;  %v16412_v13 = vpop.f32.mrb[65].mxu1  ;;  %26817 = vmatpush3.bf16.msra.mxu1 %v26814_v9  ;;  %25744 = vmatprep.mubr.msk.f32.mxu1 %vm108_vm0, %v35423_v35 }
 0x60a   :  { %v17668_v15 = vmul.f32 0.95, %v16412_v13  ;;  %25591 = vmatprep.mubr.msk.f32.mxu0 %vm108_vm0, %v17730_v60  ;;  %v26818_v50 = vpack.c.bf16 %v17731_v41, %v17730_v60  ;;  %v35430_v60 = vld [vmem:[#allocation62_spill] sm:$0xff] }
 0x60b   :  { %v17733_v8 = vadd.f32 %v17669_v11, %v35424_v22  ;;  %25592 = vmatmul.mubr.msk.f32.gmra.mrb[190].mxu0 %vm108_vm0, %v17731_v41  ;;  %v35431_v11 = vld [vmem:[#allocation50_spill] sm:$0xff] }
 0x60c   :  { %v17732_v61 = vadd.f32 %v17668_v15, %v35425_v26  ;;  %v25443_v10 = vpop.f32.mrb[66].mxu1  ;;  %25745 = vmatmul.mubr.msk.f32.vlgmr.msra.gmra.mrb[124].mxu1 %vm108_vm0, %v35426_v45  ;;  %26819 = vmatprep.subr.bf16.mxu1 %v26818_v50  ;;  %v35432_v15 = vld [vmem:[#allocation218_spill] sm:$0xff] }
 0x60d   :  { %v17671_v18 = vmul.f32 0.95, %v25443_v10  ;;  %v16493_v38 = vpop.f32.mrb[67].mxu1  ;;  %26821 = vmatpush3.bf16.msra.mxu1 %v26818_v50  ;;  %25751 = vmatprep.mubr.msk.f32.mxu1 %vm108_vm0, %v35427_v29  ;;  %v35434_v45 = vld [vmem:[#allocation54_spill] sm:$0xff]  ;;  %v35435_v29 = vld [vmem:[#allocation77_spill] sm:$0xff] }
 0x60e   :  { %v17670_v32 = vmul.f32 0.95, %v16493_v38  ;;  %25594 = vmatprep.mubr.msk.f32.mxu0 %vm108_vm0, %v17732_v61  ;;  %v26822_v51 = vpack.c.bf16 %v17733_v8, %v17732_v61 }
 0x60f   :  { %v17735_v46 = vadd.f32 %v17671_v18, %v35428_v52  ;;  %25595 = vmatmul.mubr.msk.f32.gmra.mrb[192].mxu0 %vm108_vm0, %v17733_v8  ;;  %v35433_v8 = vld [vmem:[#allocation220_spill] sm:$0xff] }
 0x610   :  { %v17734_v9 = vadd.f32 %v17670_v32, %v35429_v25  ;;  %v25450_v41 = vpop.f32.mrb[68].mxu1  ;;  %25752 = vmatmul.mubr.msk.f32.vlgmr.msra.gmra.mrb[126].mxu1 %vm108_vm0, %v35430_v60  ;;  %26823 = vmatprep.subr.bf16.mxu1 %v26822_v51 }
 0x611   :  { %v17673_v47 = vmul.f32 0.95, %v25450_v41  ;;  %v16574_v58 = vpop.f32.mrb[69].mxu1  ;;  %26825 = vmatpush3.bf16.msra.mxu1 %v26822_v51  ;;  %25758 = vmatprep.mubr.msk.f32.mxu1 %vm108_vm0, %v35431_v11 }
 0x612   :  { %v17672_v13 = vmul.f32 0.95, %v16574_v58  ;;  %25597 = vmatprep.mubr.msk.f32.mxu0 %vm108_vm0, %v17734_v9  ;;  %v26826_v35 = vpack.c.bf16 %v17735_v46, %v17734_v9  ;;  %v35436_v9 = vld [vmem:[#allocation222_spill] sm:$0xff]  ;;  %v35438_v58 = vld [vmem:[#allocation67_spill] sm:$0xff] }
 0x613   :  { %v17737_v50 = vadd.f32 %v17673_v47, %v35432_v15  ;;  %25598 = vmatmul.mubr.msk.f32.gmra.mrb[194].mxu0 %vm108_vm0, %v17735_v46  ;;  %v35437_v46 = vld [vmem:[#allocation224_spill] sm:$0xff] }
 0x614   :  { %v17736_v61 = vadd.f32 %v17672_v13, %v35433_v8  ;;  %v25457_v10 = vpop.f32.mrb[70].mxu1  ;;  %25759 = vmatmul.mubr.msk.f32.vlgmr.msra.gmra.mrb[128].mxu1 %vm108_vm0, %v35434_v45  ;;  %26827 = vmatprep.subr.bf16.mxu1 %v26826_v35  ;;  %v35440_v45 = vld [vmem:[#allocation226_spill] sm:$0xff] }
 0x615   :  { %v17675_v18 = vmul.f32 0.95, %v25457_v10  ;;  %v16655_v38 = vpop.f32.mrb[71].mxu1  ;;  %26829 = vmatpush3.bf16.msra.mxu1 %v26826_v35  ;;  %25765 = vmatprep.mubr.msk.f32.mxu1 %vm108_vm0, %v35435_v29  ;;  %v35439_v35 = vld [vmem:[#allocation55_spill] sm:$0xff] }
 0x616   :  { %v17674_v32 = vmul.f32 0.95, %v16655_v38  ;;  %25600 = vmatprep.mubr.msk.f32.mxu0 %vm108_vm0, %v17736_v61  ;;  %v26830_v51 = vpack.c.bf16 %v17737_v50, %v17736_v61 }
 0x617   :  { %v17739_v41 = vadd.f32 %v17675_v18, %v35436_v9  ;;  %25601 = vmatmul.mubr.msk.f32.gmra.mrb[196].mxu0 %vm108_vm0, %v17737_v50  ;;  %v35441_v50 = vld [vmem:[#allocation229_spill] sm:$0xff] }
 0x618   :  { %v17738_v60 = vadd.f32 %v17674_v32, %v35437_v46  ;;  %v25464_v47 = vpop.f32.mrb[72].mxu1  ;;  %25766 = vmatmul.mubr.msk.f32.vlgmr.msra.gmra.mrb[130].mxu1 %vm108_vm0, %v35438_v58  ;;  %26831 = vmatprep.subr.bf16.mxu1 %v26830_v51  ;;  %v35442_v32 = vld [vmem:[#allocation59_spill] sm:$0xff]  ;;  %v35443_v58 = vld [vmem:[#allocation86_spill] sm:$0xff] }
 0x619   :  { %v17677_v11 = vmul.f32 0.95, %v25464_v47  ;;  %v16736_v13 = vpop.f32.mrb[73].mxu1  ;;  %26833 = vmatpush3.bf16.msra.mxu1 %v26830_v51  ;;  %25772 = vmatprep.mubr.msk.f32.mxu1 %vm108_vm0, %v35439_v35 }
 0x61a   :  { %v17676_v10 = vmul.f32 0.95, %v16736_v13  ;;  %25603 = vmatprep.mubr.msk.f32.mxu0 %vm108_vm0, %v17738_v60  ;;  %v26834_v61 = vpack.c.bf16 %v17739_v41, %v17738_v60 }
 0x61b   :  { %v17741_v18 = vadd.f32 %v17677_v11, %v35440_v45  ;;  %25604 = vmatmul.mubr.msk.f32.gmra.mrb[198].mxu0 %vm108_vm0, %v17739_v41  ;;  %v35444_v11 = vld [vmem:[#allocation237_spill] sm:$0xff]  ;;  %v35445_v41 = vld [vmem:[#allocation232_spill] sm:$0xff] }
 0x61c   :  { %v17740_v38 = vadd.f32 %v17676_v10, %v35441_v50  ;;  %v25471_v29 = vpop.f32.mrb[74].mxu1  ;;  %25773 = vmatmul.mubr.msk.f32.vlgmr.msra.gmra.mrb[132].mxu1 %vm108_vm0, %v35442_v32  ;;  %26835 = vmatprep.subr.bf16.mxu1 %v26834_v61  ;;  %v35446_v50 = vld [vmem:[#allocation16_spill] sm:$0xff] }
 0x61d   :  { %v17679_v47 = vmul.f32 0.95, %v25471_v29  ;;  %v16817_v51 = vpop.f32.mrb[75].mxu1  ;;  %26837 = vmatpush3.bf16.msra.mxu1 %v26834_v61  ;;  %25779 = vmatprep.mubr.msk.f32.mxu1 %vm108_vm0, %v35443_v58  ;;  %v35447_v32 = vld [vmem:[#allocation28_spill] sm:$0xff] }
 0x61e   :  { %v17678_v13 = vmul.f32 0.95, %v16817_v51  ;;  %25606 = vmatprep.mubr.msk.f32.mxu0 %vm108_vm0, %v17740_v38  ;;  %v26838_v60 = vpack.c.bf16 %v17741_v18, %v17740_v38 }
 0x61f   :  { %v17743_v35 = vadd.f32 %v17679_v47, %v35444_v11  ;;  %25607 = vmatmul.mubr.msk.f32.gmra.mrb[200].mxu0 %vm108_vm0, %v17741_v18  ;;  %v35448_v47 = vld [vmem:[#allocation234_spill] sm:$0xff]  ;;  %v35449_v18 = vld [vmem:[#allocation239_spill] sm:$0xff] }
 0x620   :  { %v17742_v10 = vadd.f32 %v17678_v13, %v35445_v41  ;;  %v25478_v45 = vpop.f32.mrb[76].mxu1  ;;  %25780 = vmatmul.mubr.msk.f32.vlgmr.msra.gmra.mrb[134].mxu1 %vm108_vm0, %v35446_v50  ;;  %26839 = vmatprep.subr.bf16.mxu1 %v26838_v60  ;;  %v35450_v41 = vld [vmem:[#allocation64_spill] sm:$0xff] }
 0x621   :  { %v17681_v29 = vmul.f32 0.95, %v25478_v45  ;;  %v16898_v61 = vpop.f32.mrb[77].mxu1  ;;  %26841 = vmatpush3.bf16.msra.mxu1 %v26838_v60  ;;  %25786 = vmatprep.mubr.msk.f32.mxu1 %vm108_vm0, %v35447_v32  ;;  %v35451_v60 = vld [vmem:[#allocation5_spill] sm:$0xff] }
 0x622   :  { %v17680_v51 = vmul.f32 0.95, %v16898_v61  ;;  %25609 = vmatprep.mubr.msk.f32.mxu0 %vm108_vm0, %v17742_v10  ;;  %v26842_v38 = vpack.c.bf16 %v17743_v35, %v17742_v10 }
 0x623   :  { %v17745_v58 = vadd.f32 %v17681_v29, %v35448_v47  ;;  %25610 = vmatmul.mubr.msk.f32.gmra.mrb[202].mxu0 %vm108_vm0, %v17743_v35  ;;  %v35452_v35 = vld [vmem:[#allocation240_spill] sm:$0xff]  ;;  %v35453_v47 = vld [vmem:[#allocation14_spill] sm:$0xff] }
 0x624   :  { %v17744_v13 = vadd.f32 %v17680_v51, %v35449_v18  ;;  %v25485_v11 = vpop.f32.mrb[78].mxu1  ;;  %25787 = vmatmul.mubr.msk.f32.vlgmr.msra.gmra.mrb[136].mxu1 %vm108_vm0, %v35450_v41  ;;  %26843 = vmatprep.subr.bf16.mxu1 %v26842_v38 }
 0x625   :  { %v17683_v45 = vmul.f32 0.95, %v25485_v11  ;;  %v16979_v50 = vpop.f32.mrb[79].mxu1  ;;  %26845 = vmatpush3.bf16.msra.mxu1 %v26842_v38  ;;  %25793 = vmatprep.mubr.msk.f32.mxu1 %vm108_vm0, %v35451_v60  ;;  %v35454_v38 = vld [vmem:[#allocation24_spill] sm:$0xff] }
 0x626   :  { %v17682_v61 = vmul.f32 0.95, %v16979_v50  ;;  %25612 = vmatprep.mubr.msk.f32.mxu0 %vm108_vm0, %v17744_v13  ;;  %v26846_v10 = vpack.c.bf16 %v17745_v58, %v17744_v13 }
 0x627   :  { %v17747_v29 = vadd.f32 %v17683_v45, %v35393_v49  ;;  %25613 = vmatmul.mubr.msk.f32.gmra.mrb[204].mxu0 %vm108_vm0, %v17745_v58  ;;  %v35455_v45 = vld [vmem:[#allocation244_spill] sm:$0xff]  ;;  %v35456_v58 = vld [vmem:[#allocation246_spill] sm:$0xff] }
 0x628   :  { %v17746_v32 = vadd.f32 %v17682_v61, %v35452_v35  ;;  %v25492_v51 = vpop.f32.mrb[80].mxu1  ;;  %25794 = vmatmul.mubr.msk.f32.vlgmr.msra.gmra.mrb[138].mxu1 %vm108_vm0, %v35453_v47  ;;  %26847 = vmatprep.subr.bf16.mxu1 %v26846_v10  ;;  %v35457_v35 = vld [vmem:[#allocation71_spill] sm:$0xff] }
 0x629   :  { %v17685_v11 = vmul.f32 0.95, %v25492_v51  ;;  %v17060_v41 = vpop.f32.mrb[81].mxu1  ;;  %26849 = vmatpush3.bf16.msra.mxu1 %v26846_v10  ;;  %25800 = vmatprep.mubr.msk.f32.mxu1 %vm108_vm0, %v35454_v38  ;;  %v35458_v51 = vld [vmem:[#allocation22_spill] sm:$0xff] }
 0x62a   :  { %v17684_v50 = vmul.f32 0.95, %v17060_v41  ;;  %25615 = vmatprep.mubr.msk.f32.mxu0 %vm108_vm0, %v17746_v32  ;;  %v26850_v13 = vpack.c.bf16 %v17747_v29, %v17746_v32 }
 0x62b   :  { %v17749_v60 = vadd.f32 %v17685_v11, %v35455_v45  ;;  %25616 = vmatmul.mubr.msk.f32.gmra.mrb[206].mxu0 %vm108_vm0, %v17747_v29  ;;  %v35459_v11 = vld [vmem:[#allocation247_spill] sm:$0xff]  ;;  %v35460_v29 = vld [vmem:[#allocation245_spill] sm:$0xff] }
 0x62c   :  { %v17748_v61 = vadd.f32 %v17684_v50, %v35456_v58  ;;  %v25499_v49 = vpop.f32.mrb[82].mxu1  ;;  %25801 = vmatmul.mubr.msk.f32.vlgmr.msra.gmra.mrb[140].mxu1 %vm108_vm0, %v35457_v35  ;;  %26851 = vmatprep.subr.bf16.mxu1 %v26850_v13  ;;  %v35461_v58 = vld [vmem:[#allocation76_spill] sm:$0xff] }
 0x62d   :  { %v17687_v47 = vmul.f32 0.95, %v25499_v49  ;;  %v17141_v10 = vpop.f32.mrb[83].mxu1  ;;  %26853 = vmatpush3.bf16.msra.mxu1 %v26850_v13  ;;  %25807 = vmatprep.mubr.msk.f32.mxu1 %vm108_vm0, %v35458_v51  ;;  %v35462_v13 = vld [vmem:[#allocation45_spill] sm:$0xff] }
 0x62e   :  { %v17686_v41 = vmul.f32 0.95, %v17141_v10  ;;  %25618 = vmatprep.mubr.msk.f32.mxu0 %vm108_vm0, %v17748_v61  ;;  %v26854_v32 = vpack.c.bf16 %v17749_v60, %v17748_v61 }
 0x62f   :  { %v17751_v38 = vadd.f32 %v17687_v47, %v35459_v11  ;;  %25619 = vmatmul.mubr.msk.f32.gmra.mrb[208].mxu0 %vm108_vm0, %v17749_v60  ;;  %v35463_v47 = vld [vmem:[#allocation249_spill] sm:$0xff]  ;;  %v35464_v60 = vld [vmem:[#allocation251_spill] sm:$0xff] }
 0x630   :  { %v17750_v50 = vadd.f32 %v17686_v41, %v35460_v29  ;;  %v25506_v45 = vpop.f32.mrb[84].mxu1  ;;  %25808 = vmatmul.mubr.msk.f32.vlgmr.msra.gmra.mrb[142].mxu1 %vm108_vm0, %v35461_v58  ;;  %26855 = vmatprep.subr.bf16.mxu1 %v26854_v32  ;;  %v35465_v29 = vld [vmem:[#allocation79_spill] sm:$0xff] }
 0x631   :  { %v17689_v49 = vmul.f32 0.95, %v25506_v45  ;;  %v17222_v35 = vpop.f32.mrb[85].mxu1  ;;  %26857 = vmatpush3.bf16.msra.mxu1 %v26854_v32  ;;  %25814 = vmatprep.mubr.msk.f32.mxu1 %vm108_vm0, %v35462_v13  ;;  %v35466_v32 = vld [vmem:[#allocation93_spill] sm:$0xff] }
 0x632   :  { %v17688_v10 = vmul.f32 0.95, %v17222_v35  ;;  %25621 = vmatprep.mubr.msk.f32.mxu0 %vm108_vm0, %v17750_v50  ;;  %v26858_v61 = vpack.c.bf16 %v17751_v38, %v17750_v50 }
 0x633   :  { %v17753_v51 = vadd.f32 %v17689_v49, %v35463_v47  ;;  %25622 = vmatmul.mubr.msk.f32.gmra.mrb[210].mxu0 %vm108_vm0, %v17751_v38  ;;  %v35467_v38 = vld [vmem:[#allocation250_spill] sm:$0xff]  ;;  %v35468_v47 = vld [vmem:[#allocation84_spill] sm:$0xff] }
 0x634   :  { %v17752_v41 = vadd.f32 %v17688_v10, %v35464_v60  ;;  %v25513_v11 = vpop.f32.mrb[86].mxu1  ;;  %25815 = vmatmul.mubr.msk.f32.vlgmr.msra.gmra.mrb[144].mxu1 %vm108_vm0, %v35465_v29  ;;  %26859 = vmatprep.subr.bf16.mxu1 %v26858_v61 }
 0x635   :  { %v17691_v45 = vmul.f32 0.95, %v25513_v11  ;;  %v17303_v58 = vpop.f32.mrb[87].mxu1  ;;  %26861 = vmatpush3.bf16.msra.mxu1 %v26858_v61  ;;  %25821 = vmatprep.mubr.msk.f32.mxu1 %vm108_vm0, %v35466_v32  ;;  %v35469_v61 = vld [vmem:[#allocation78_spill] sm:$0xff] }
 0x636   :  { %v17690_v35 = vmul.f32 0.95, %v17303_v58  ;;  %25624 = vmatprep.mubr.msk.f32.mxu0 %vm108_vm0, %v17752_v41  ;;  %v26862_v50 = vpack.c.bf16 %v17753_v51, %v17752_v41 }
 0x637   :  { %v17755_v49 = vadd.f32 %v17691_v45, %v35400_v34  ;;  %25625 = vmatmul.mubr.msk.f32.gmra.mrb[212].mxu0 %vm108_vm0, %v17753_v51  ;;  %v35470_v51 = vld [vmem:[#allocation255_spill] sm:$0xff] }
 0x638   :  { %v17754_v13 = vadd.f32 %v17690_v35, %v35467_v38  ;;  %v25520_v10 = vpop.f32.mrb[88].mxu1  ;;  %25822 = vmatmul.mubr.msk.f32.vlgmr.msra.gmra.mrb[146].mxu1 %vm108_vm0, %v35468_v47  ;;  %26863 = vmatprep.subr.bf16.mxu1 %v26862_v50  ;;  %v35471_v34 = vld [vmem:[#allocation87_spill] sm:$0xff] }
 0x639   :  { %v17693_v11 = vmul.f32 0.95, %v25520_v10  ;;  %v17384_v29 = vpop.f32.mrb[89].mxu1  ;;  %26865 = vmatpush3.bf16.msra.mxu1 %v26862_v50  ;;  %25828 = vmatprep.mubr.msk.f32.mxu1 %vm108_vm0, %v35469_v61  ;;  %v35472_v10 = vld [vmem:[#allocation105_spill] sm:$0xff] }
 0x63a   :  { %v17692_v58 = vmul.f32 0.95, %v17384_v29  ;;  %25627 = vmatprep.mubr.msk.f32.mxu0 %vm108_vm0, %v17754_v13  ;;  %v26866_v41 = vpack.c.bf16 %v17755_v49, %v17754_v13 }
 0x63b   :  { %v17757_v45 = vadd.f32 %v17693_v11, %v35402_v0  ;;  %25628 = vmatmul.mubr.msk.f32.gmra.mrb[214].mxu0 %vm108_vm0, %v17755_v49 }
 0x63c   :  { %v17756_v32 = vadd.f32 %v17692_v58, %v35470_v51  ;;  %v25527_v35 = vpop.f32.mrb[90].mxu1  ;;  %25829 = vmatmul.mubr.msk.f32.vlgmr.msra.gmra.mrb[148].mxu1 %vm108_vm0, %v35471_v34  ;;  %26867 = vmatprep.subr.bf16.mxu1 %v26866_v41  ;;  %v35473_v58 = vld [vmem:[#allocation23_spill] sm:$0xff] }
 0x63d   :  { %v17695_v47 = vmul.f32 0.95, %v25527_v35  ;;  %v17465_v50 = vpop.f32.mrb[91].mxu1  ;;  %26869 = vmatpush3.bf16.msra.mxu1 %v26866_v41  ;;  %25835 = vmatprep.mubr.msk.f32.mxu1 %vm108_vm0, %v35472_v10  ;;  %v35474_v35 = vld [vmem:[#allocation57_spill] sm:$0xff] }
 0x63e   :  { %v17694_v29 = vmul.f32 0.95, %v17465_v50  ;;  %25630 = vmatprep.mubr.msk.f32.mxu0 %vm108_vm0, %v17756_v32  ;;  %v26870_v13 = vpack.c.bf16 %v17757_v45, %v17756_v32 }
 0x63f   :  { %v17759_v11 = vadd.f32 %v17695_v47, %v35403_v1  ;;  %25631 = vmatmul.mubr.msk.f32.gmra.mrb[216].mxu0 %vm108_vm0, %v17757_v45 }
 0x640   :  { %v17758_v49 = vadd.f32 %v17694_v29, %v32281_v24  ;;  %v25534_v61 = vpop.f32.mrb[92].mxu1  ;;  %25836 = vmatmul.mubr.msk.f32.vlgmr.msra.gmra.mrb[150].mxu1 %vm108_vm0, %v35473_v58  ;;  %26871 = vmatprep.subr.bf16.mxu1 %v26870_v13  ;;  %v35475_v29 = vld [vmem:[#allocation95_spill] sm:$0xff]  ;;  %v35476_v58 = vld [vmem:[#allocation18_spill] sm:$0xff] }
 0x641   :  { %v17697_v34 = vmul.f32 0.95, %v25534_v61  ;;  %v17546_v41 = vpop.f32.mrb[93].mxu1  ;;  %26873 = vmatpush3.bf16.msra.mxu1 %v26870_v13  ;;  %25842 = vmatprep.mubr.msk.f32.mxu1 %vm108_vm0, %v35474_v35  ;;  %v35477_v35 = vld [vmem:[#allocation34_spill] sm:$0xff] }
 0x642   :  { %v17696_v50 = vmul.f32 0.95, %v17546_v41  ;;  %25633 = vmatprep.mubr.msk.f32.mxu0 %vm108_vm0, %v17758_v49  ;;  %v26874_v32 = vpack.c.bf16 %v17759_v11, %v17758_v49 }
 0x643   :  { %v17761_v47 = vadd.f32 %v17697_v34, %v35404_v30  ;;  %25634 = vmatmul.mubr.msk.f32.gmra.mrb[218].mxu0 %vm108_vm0, %v17759_v11 }
 0x644   :  { %v17760_v45 = vadd.f32 %v17696_v50, %v32309_v3  ;;  %v25541_v10 = vpop.f32.mrb[94].mxu1  ;;  %25843 = vmatmul.mubr.msk.f32.vlgmr.msra.gmra.mrb[152].mxu1 %vm108_vm0, %v35475_v29  ;;  %26875 = vmatprep.subr.bf16.mxu1 %v26874_v32  ;;  %v35478_v50 = vld [vmem:[#allocation49_spill] sm:$0xff] }
 0x645   :  { %v17699_v61 = vmul.f32 0.95, %v25541_v10  ;;  %v17627_v13 = vpop.f32.mrb[95].mxu1  ;;  %26877 = vmatpush3.bf16.msra.mxu1 %v26874_v32  ;;  %25849 = vmatprep.mubr.msk.f32.mxu1 %vm108_vm0, %v35476_v58  ;;  %v35481_v10 = vld [vmem:[#allocation35_spill] sm:$0xff] }
 0x646   :  { %v17698_v41 = vmul.f32 0.95, %v17627_v13  ;;  %25636 = vmatprep.mubr.msk.f32.mxu0 %vm108_vm0, %v17760_v45  ;;  %v26878_v49 = vpack.c.bf16 %v17761_v47, %v17760_v45  ;;  %v35479_v45 = vld [vmem:[#allocation107_spill] sm:$0xff] }
 0x647   :  { %v17763_v34 = vadd.f32 %v17699_v61, %v32327_v14  ;;  %25637 = vmatmul.mubr.msk.f32.gmra.mrb[220].mxu0 %vm108_vm0, %v17761_v47  ;;  %v35480_v47 = vld [vmem:[#allocation21_spill] sm:$0xff] }
 0x648   :  { %v17762_v11 = vadd.f32 %v17698_v41, %v32339_v4  ;;  %25850 = vmatmul.mubr.msk.f32.vlgmr.msra.gmra.mrb[154].mxu1 %vm108_vm0, %v35477_v35  ;;  %26879 = vmatprep.subr.bf16.mxu1 %v26878_v49 }
 0x649   :  { %26881 = vmatpush3.bf16.msra.mxu1 %v26878_v49  ;;  %25856 = vmatprep.mubr.msk.f32.mxu1 %vm108_vm0, %v35478_v50 }
 0x64a   :  { %25639 = vmatprep.mubr.msk.f32.mxu0 %vm108_vm0, %v17762_v11  ;;  %v26882_v32 = vpack.c.bf16 %v17763_v34, %v17762_v11 }
 0x64b   :  { %25640 = vmatmul.mubr.msk.f32.gmra.mrb[222].mxu0 %vm108_vm0, %v17763_v34 }
 0x64c   :  { %25857 = vmatmul.mubr.msk.f32.vlgmr.msra.gmra.mrb[156].mxu1 %vm108_vm0, %v35479_v45  ;;  %26883 = vmatprep.subr.bf16.mxu1 %v26882_v32 }
 0x64d   :  { %26885 = vmatpush3.bf16.msra.mxu1 %v26882_v32  ;;  %25863 = vmatprep.mubr.msk.f32.mxu1 %vm108_vm0, %v35480_v47  ;;  %v35482_v47 = vld [vmem:[#allocation43_spill] sm:$0xff] }
 0x650   :  { %25864 = vmatmul.mubr.msk.f32.vlgmr.msra.gmra.mrb[158].mxu1 %vm108_vm0, %v35481_v10 }
 0x6a7   :  { %v25648_v29 = vpop.f32.mrb[96].mxu1 }
 0x6a8   :  { %v20809_v61 = vmul.f32 0.95, %v25648_v29  ;;  %v18474_v13 = vpop.f32.mrb[97].mxu1 }
 0x6a9   :  { %v20808_v58 = vmul.f32 0.95, %v18474_v13 }
 0x6aa   :  { %v20873_v34 = vadd.f32 %v20809_v61, %v35320_v37 }
 0x6ab   :  { %v20872_v41 = vadd.f32 %v20808_v58, %v35319_v43  ;;  %v25655_v49 = vpop.f32.mrb[98].mxu1 }
 0x6ac   :  { %v20811_v11 = vmul.f32 0.95, %v25655_v49  ;;  %v18549_v35 = vpop.f32.mrb[99].mxu1 }
 0x6ad   :  { %v20810_v50 = vmul.f32 0.95, %v18549_v35  ;;  %25870 = vmatprep.mubr.msk.f32.mxu0 %vm108_vm0, %v20872_v41 }
 0x6ae   :  { %25871 = vmatmul.mubr.msk.f32.vlgmr.msra.gmra.mrb[160].mxu0 %vm108_vm0, %v20873_v34  ;;  %v20875_v10 = vadd.f32 %v20811_v11, %v35482_v47 }
 0x6af   :  { %v20874_v32 = vadd.f32 %v20810_v50, %v35323_v17  ;;  %v25662_v45 = vpop.f32.mrb[100].mxu1 }
 0x6b0   :  { %v20813_v29 = vmul.f32 0.95, %v25662_v45  ;;  %v18624_v14 = vpop.f32.mrb[101].mxu1 }
 0x6b1   :  { %v20812_v13 = vmul.f32 0.95, %v18624_v14  ;;  %25873 = vmatprep.mubr.msk.f32.mxu0 %vm108_vm0, %v20874_v32 }
 0x6b2   :  { %25874 = vmatmul.mubr.msk.f32.gmra.mrb[162].mxu0 %vm108_vm0, %v20875_v10  ;;  %v20877_v61 = vadd.f32 %v20813_v29, %v35330_v36 }
 0x6b3   :  { %v20876_v37 = vadd.f32 %v20812_v13, %v35328_v7  ;;  %v25669_v43 = vpop.f32.mrb[102].mxu1 }
 0x6b4   :  { %v20815_v58 = vmul.f32 0.95, %v25669_v43  ;;  %v18699_v41 = vpop.f32.mrb[103].mxu1 }
 0x6b5   :  { %v20814_v49 = vmul.f32 0.95, %v18699_v41  ;;  %25876 = vmatprep.mubr.msk.f32.mxu0 %vm108_vm0, %v20876_v37 }
 0x6b6   :  { %25877 = vmatmul.mubr.msk.f32.gmra.mrb[164].mxu0 %vm108_vm0, %v20877_v61  ;;  %v20879_v14 = vadd.f32 %v20815_v58, %v35335_v21 }
 0x6b7   :  { %v20878_v17 = vadd.f32 %v20814_v49, %v35333_v20  ;;  %v25676_v34 = vpop.f32.mrb[104].mxu1 }
 0x6b8   :  { %v20817_v11 = vmul.f32 0.95, %v25676_v34  ;;  %v18774_v35 = vpop.f32.mrb[105].mxu1 }
 0x6b9   :  { %v20816_v50 = vmul.f32 0.95, %v18774_v35  ;;  %25879 = vmatprep.mubr.msk.f32.mxu0 %vm108_vm0, %v20878_v17 }
 0x6ba   :  { %25880 = vmatmul.mubr.msk.f32.gmra.mrb[166].mxu0 %vm108_vm0, %v20879_v14  ;;  %v20881_v32 = vadd.f32 %v20817_v11, %v35340_v33 }
 0x6bb   :  { %v20880_v7 = vadd.f32 %v20816_v50, %v35338_v44  ;;  %v25683_v36 = vpop.f32.mrb[106].mxu1 }
 0x6bc   :  { %v20819_v45 = vmul.f32 0.95, %v25683_v36  ;;  %v18849_v47 = vpop.f32.mrb[107].mxu1 }
 0x6bd   :  { %v20818_v10 = vmul.f32 0.95, %v18849_v47  ;;  %25882 = vmatprep.mubr.msk.f32.mxu0 %vm108_vm0, %v20880_v7 }
 0x6be   :  { %25883 = vmatmul.mubr.msk.f32.gmra.mrb[168].mxu0 %vm108_vm0, %v20881_v32  ;;  %v20883_v29 = vadd.f32 %v20819_v45, %v35345_v63 }
 0x6bf   :  { %v20882_v20 = vadd.f32 %v20818_v10, %v35343_v53  ;;  %v25690_v21 = vpop.f32.mrb[108].mxu1 }
 0x6c0   :  { %v20821_v13 = vmul.f32 0.95, %v25690_v21  ;;  %v18924_v37 = vpop.f32.mrb[109].mxu1 }
 0x6c1   :  { %v20820_v43 = vmul.f32 0.95, %v18924_v37  ;;  %25885 = vmatprep.mubr.msk.f32.mxu0 %vm108_vm0, %v20882_v20 }
 0x6c2   :  { %25886 = vmatmul.mubr.msk.f32.gmra.mrb[170].mxu0 %vm108_vm0, %v20883_v29  ;;  %v20885_v61 = vadd.f32 %v20821_v13, %v35350_v59 }
 0x6c3   :  { %v20884_v44 = vadd.f32 %v20820_v43, %v35348_v19  ;;  %v25697_v33 = vpop.f32.mrb[110].mxu1 }
 0x6c4   :  { %v20823_v58 = vmul.f32 0.95, %v25697_v33  ;;  %v18999_v41 = vpop.f32.mrb[111].mxu1 }
 0x6c5   :  { %v20822_v49 = vmul.f32 0.95, %v18999_v41  ;;  %25888 = vmatprep.mubr.msk.f32.mxu0 %vm108_vm0, %v20884_v44 }
 0x6c6   :  { %25889 = vmatmul.mubr.msk.f32.gmra.mrb[172].mxu0 %vm108_vm0, %v20885_v61  ;;  %v20887_v17 = vadd.f32 %v20823_v58, %v35355_v23 }
 0x6c7   :  { %v20886_v53 = vadd.f32 %v20822_v49, %v35353_v40  ;;  %v25704_v63 = vpop.f32.mrb[112].mxu1 }
 0x6c8   :  { %v20825_v34 = vmul.f32 0.95, %v25704_v63  ;;  %v19074_v14 = vpop.f32.mrb[113].mxu1 }
 0x6c9   :  { %v20824_v11 = vmul.f32 0.95, %v19074_v14  ;;  %25891 = vmatprep.mubr.msk.f32.mxu0 %vm108_vm0, %v20886_v53 }
 0x6ca   :  { %25892 = vmatmul.mubr.msk.f32.gmra.mrb[174].mxu0 %vm108_vm0, %v20887_v17  ;;  %v20889_v35 = vadd.f32 %v20825_v34, %v35360_v62 }
 0x6cb   :  { %v20888_v19 = vadd.f32 %v20824_v11, %v35358_v31  ;;  %v25711_v59 = vpop.f32.mrb[114].mxu1 }
 0x6cc   :  { %v20827_v50 = vmul.f32 0.95, %v25711_v59  ;;  %v19149_v7 = vpop.f32.mrb[115].mxu1 }
 0x6cd   :  { %v20826_v36 = vmul.f32 0.95, %v19149_v7  ;;  %25894 = vmatprep.mubr.msk.f32.mxu0 %vm108_vm0, %v20888_v19 }
 0x6ce   :  { %25895 = vmatmul.mubr.msk.f32.gmra.mrb[176].mxu0 %vm108_vm0, %v20889_v35  ;;  %v20891_v32 = vadd.f32 %v20827_v50, %v35364_v16 }
 0x6cf   :  { %v20890_v40 = vadd.f32 %v20826_v36, %v35363_v54  ;;  %v25718_v23 = vpop.f32.mrb[116].mxu1 }
 0x6d0   :  { %v20829_v45 = vmul.f32 0.95, %v25718_v23  ;;  %v19224_v47 = vpop.f32.mrb[117].mxu1 }
 0x6d1   :  { %v20828_v10 = vmul.f32 0.95, %v19224_v47  ;;  %25897 = vmatprep.mubr.msk.f32.mxu0 %vm108_vm0, %v20890_v40 }
 0x6d2   :  { %25898 = vmatmul.mubr.msk.f32.gmra.mrb[178].mxu0 %vm108_vm0, %v20891_v32  ;;  %v20893_v20 = vadd.f32 %v20829_v45, %v35367_v48 }
 0x6d3   :  { %v20892_v31 = vadd.f32 %v20828_v10, %v35366_v27  ;;  %v25725_v62 = vpop.f32.mrb[118].mxu1 }
 0x6d4   :  { %v20831_v21 = vmul.f32 0.95, %v25725_v62  ;;  %v19299_v29 = vpop.f32.mrb[119].mxu1 }
 0x6d5   :  { %v20830_v13 = vmul.f32 0.95, %v19299_v29  ;;  %25900 = vmatprep.mubr.msk.f32.mxu0 %vm108_vm0, %v20892_v31 }
 0x6d6   :  { %25901 = vmatmul.mubr.msk.f32.gmra.mrb[180].mxu0 %vm108_vm0, %v20893_v20  ;;  %v20895_v37 = vadd.f32 %v20831_v21, %v35369_v5 }
 0x6d7   :  { %v20894_v16 = vadd.f32 %v20830_v13, %v35405_v28  ;;  %v25732_v54 = vpop.f32.mrb[120].mxu1 }
 0x6d8   :  { %v20833_v43 = vmul.f32 0.95, %v25732_v54  ;;  %v19374_v44 = vpop.f32.mrb[121].mxu1 }
 0x6d9   :  { %v20832_v33 = vmul.f32 0.95, %v19374_v44  ;;  %25903 = vmatprep.mubr.msk.f32.mxu0 %vm108_vm0, %v20894_v16 }
 0x6da   :  { %25904 = vmatmul.mubr.msk.f32.gmra.mrb[182].mxu0 %vm108_vm0, %v20895_v37  ;;  %v20897_v61 = vadd.f32 %v20833_v43, %v35408_v42 }
 0x6db   :  { %v20896_v27 = vadd.f32 %v20832_v33, %v35409_v39  ;;  %v25739_v48 = vpop.f32.mrb[122].mxu1  ;;  %v35484_v33 = vld [vmem:[#allocation226_spill] sm:$0xff] }
 0x6dc   :  { %v20835_v58 = vmul.f32 0.95, %v25739_v48  ;;  %v19449_v41 = vpop.f32.mrb[123].mxu1 }
 0x6dd   :  { %v20834_v49 = vmul.f32 0.95, %v19449_v41  ;;  %25906 = vmatprep.mubr.msk.f32.mxu0 %vm108_vm0, %v20896_v27 }
 0x6de   :  { %25907 = vmatmul.mubr.msk.f32.gmra.mrb[184].mxu0 %vm108_vm0, %v20897_v61  ;;  %v20899_v53 = vadd.f32 %v20835_v58, %v35412_v2 }
 0x6df   :  { %v20898_v5 = vadd.f32 %v20834_v49, %v35413_v6  ;;  %v25746_v28 = vpop.f32.mrb[124].mxu1  ;;  %v35486_v49 = vld [vmem:[#allocation237_spill] sm:$0xff] }
 0x6e0   :  { %v20837_v63 = vmul.f32 0.95, %v25746_v28  ;;  %v19524_v17 = vpop.f32.mrb[125].mxu1 }
 0x6e1   :  { %v20836_v34 = vmul.f32 0.95, %v19524_v17  ;;  %25909 = vmatprep.mubr.msk.f32.mxu0 %vm108_vm0, %v20898_v5 }
 0x6e2   :  { %25910 = vmatmul.mubr.msk.f32.gmra.mrb[186].mxu0 %vm108_vm0, %v20899_v53  ;;  %v20901_v14 = vadd.f32 %v20837_v63, %v35416_v55 }
 0x6e3   :  { %v20900_v42 = vadd.f32 %v20836_v34, %v35417_v56  ;;  %v25753_v39 = vpop.f32.mrb[126].mxu1 }
 0x6e4   :  { %v20839_v11 = vmul.f32 0.95, %v25753_v39  ;;  %v19599_v19 = vpop.f32.mrb[127].mxu1 }
 0x6e5   :  { %v20838_v59 = vmul.f32 0.95, %v19599_v19  ;;  %25912 = vmatprep.mubr.msk.f32.mxu0 %vm108_vm0, %v20900_v42  ;;  %v35487_v42 = vld [vmem:[#allocation234_spill] sm:$0xff] }
 0x6e6   :  { %25913 = vmatmul.mubr.msk.f32.gmra.mrb[188].mxu0 %vm108_vm0, %v20901_v14  ;;  %v20903_v35 = vadd.f32 %v20839_v11, %v35420_v12 }
 0x6e7   :  { %v20902_v2 = vadd.f32 %v20838_v59, %v35421_v57  ;;  %v25760_v6 = vpop.f32.mrb[128].mxu1  ;;  %v35488_v59 = vld [vmem:[#allocation240_spill] sm:$0xff] }
 0x6e8   :  { %v20841_v50 = vmul.f32 0.95, %v25760_v6  ;;  %v19674_v7 = vpop.f32.mrb[129].mxu1 }
 0x6e9   :  { %v20840_v36 = vmul.f32 0.95, %v19674_v7  ;;  %25915 = vmatprep.mubr.msk.f32.mxu0 %vm108_vm0, %v20902_v2 }
 0x6ea   :  { %25916 = vmatmul.mubr.msk.f32.gmra.mrb[190].mxu0 %vm108_vm0, %v20903_v35  ;;  %v20905_v40 = vadd.f32 %v20841_v50, %v35424_v22  ;;  %v35489_v35 = vld [vmem:[#allocation243_spill] sm:$0xff] }
 0x6eb   :  { %v20904_v55 = vadd.f32 %v20840_v36, %v35425_v26  ;;  %v25767_v56 = vpop.f32.mrb[130].mxu1 }
 0x6ec   :  { %v20843_v23 = vmul.f32 0.95, %v25767_v56  ;;  %v19749_v32 = vpop.f32.mrb[131].mxu1 }
 0x6ed   :  { %v20842_v45 = vmul.f32 0.95, %v19749_v32  ;;  %25918 = vmatprep.mubr.msk.f32.mxu0 %vm108_vm0, %v20904_v55 }
 0x6ee   :  { %25919 = vmatmul.mubr.msk.f32.gmra.mrb[192].mxu0 %vm108_vm0, %v20905_v40  ;;  %v20907_v47 = vadd.f32 %v20843_v23, %v35428_v52  ;;  %v35491_v23 = vld [vmem:[#allocation244_spill] sm:$0xff] }
 0x6ef   :  { %v20906_v12 = vadd.f32 %v20842_v45, %v35429_v25  ;;  %v25774_v57 = vpop.f32.mrb[132].mxu1 }
 0x6f0   :  { %v20845_v10 = vmul.f32 0.95, %v25774_v57  ;;  %v19824_v31 = vpop.f32.mrb[133].mxu1 }
 0x6f1   :  { %v20844_v62 = vmul.f32 0.95, %v19824_v31  ;;  %25921 = vmatprep.mubr.msk.f32.mxu0 %vm108_vm0, %v20906_v12 }
 0x6f2   :  { %25922 = vmatmul.mubr.msk.f32.gmra.mrb[194].mxu0 %vm108_vm0, %v20907_v47  ;;  %v20909_v20 = vadd.f32 %v20845_v10, %v35432_v15  ;;  %v35483_v15 = vld [vmem:[#allocation229_spill] sm:$0xff] }
 0x6f3   :  { %v20908_v22 = vadd.f32 %v20844_v62, %v35433_v8  ;;  %v25781_v26 = vpop.f32.mrb[134].mxu1  ;;  %v35492_v47 = vld [vmem:[#allocation245_spill] sm:$0xff]  ;;  %v35493_v62 = vld [vmem:[#allocation247_spill] sm:$0xff] }
 0x6f4   :  { %v20847_v21 = vmul.f32 0.95, %v25781_v26  ;;  %v19899_v29 = vpop.f32.mrb[135].mxu1 }
 0x6f5   :  { %v20846_v13 = vmul.f32 0.95, %v19899_v29  ;;  %25924 = vmatprep.mubr.msk.f32.mxu0 %vm108_vm0, %v20908_v22 }
 0x6f6   :  { %25925 = vmatmul.mubr.msk.f32.gmra.mrb[196].mxu0 %vm108_vm0, %v20909_v20  ;;  %v20911_v16 = vadd.f32 %v20847_v21, %v35436_v9  ;;  %v35485_v9 = vld [vmem:[#allocation232_spill] sm:$0xff] }
 0x6f7   :  { %v20910_v52 = vadd.f32 %v20846_v13, %v35437_v46  ;;  %v25788_v25 = vpop.f32.mrb[136].mxu1 }
 0x6f8   :  { %v20849_v54 = vmul.f32 0.95, %v25788_v25  ;;  %v19974_v37 = vpop.f32.mrb[137].mxu1 }
 0x6f9   :  { %v20848_v43 = vmul.f32 0.95, %v19974_v37  ;;  %25927 = vmatprep.mubr.msk.f32.mxu0 %vm108_vm0, %v20910_v52  ;;  %v35494_v52 = vld [vmem:[#allocation249_spill] sm:$0xff] }
 0x6fa   :  { %25928 = vmatmul.mubr.msk.f32.gmra.mrb[198].mxu0 %vm108_vm0, %v20911_v16  ;;  %v20913_v27 = vadd.f32 %v20849_v54, %v35484_v33 }
 0x6fb   :  { %v20912_v8 = vadd.f32 %v20848_v43, %v35483_v15  ;;  %v25795_v44 = vpop.f32.mrb[138].mxu1 }
 0x6fc   :  { %v20851_v48 = vmul.f32 0.95, %v25795_v44  ;;  %v20049_v61 = vpop.f32.mrb[139].mxu1 }
 0x6fd   :  { %v20850_v58 = vmul.f32 0.95, %v20049_v61  ;;  %25930 = vmatprep.mubr.msk.f32.mxu0 %vm108_vm0, %v20912_v8  ;;  %v35495_v8 = vld [vmem:[#allocation256_spill] sm:$0xff] }
 0x6fe   :  { %25931 = vmatmul.mubr.msk.f32.gmra.mrb[200].mxu0 %vm108_vm0, %v20913_v27  ;;  %v20915_v5 = vadd.f32 %v20851_v48, %v35486_v49 }
 0x6ff   :  { %v20914_v46 = vadd.f32 %v20850_v58, %v35485_v9  ;;  %v25802_v41 = vpop.f32.mrb[140].mxu1 }
 0x700   :  { %v20853_v28 = vmul.f32 0.95, %v25802_v41  ;;  %v20124_v53 = vpop.f32.mrb[141].mxu1 }
 0x701   :  { %v20852_v63 = vmul.f32 0.95, %v20124_v53  ;;  %25933 = vmatprep.mubr.msk.f32.mxu0 %vm108_vm0, %v20914_v46 }
 0x702   :  { %25934 = vmatmul.mubr.msk.f32.gmra.mrb[202].mxu0 %vm108_vm0, %v20915_v5  ;;  %v20917_v39 = vadd.f32 %v20853_v28, %v35487_v42 }
 0x703   :  { %v20916_v17 = vadd.f32 %v20852_v63, %v35449_v18  ;;  %v25809_v34 = vpop.f32.mrb[142].mxu1  ;;  %v35490_v18 = vld [vmem:[#allocation246_spill] sm:$0xff] }
 0x704   :  { %v20855_v14 = vmul.f32 0.95, %v25809_v34  ;;  %v20199_v11 = vpop.f32.mrb[143].mxu1 }
 0x705   :  { %v20854_v19 = vmul.f32 0.95, %v20199_v11  ;;  %25936 = vmatprep.mubr.msk.f32.mxu0 %vm108_vm0, %v20916_v17  ;;  %v21584_v11 = vlaneseq }
 0x706   :  { %25937 = vmatmul.mubr.msk.f32.gmra.mrb[204].mxu0 %vm108_vm0, %v20917_v39  ;;  %v20919_v50 = vadd.f32 %v20855_v14, %v35489_v35  ;;  %v35497_v35 = vld [vmem:[#allocation128_spill] sm:$0xff] }
 0x707   :  { %v20918_v2 = vadd.f32 %v20854_v19, %v35488_v59  ;;  %v25816_v6 = vpop.f32.mrb[144].mxu1  ;;  %v21581_v19 = vld [vmem:[%s33940_s8] sm:$0x1] }
 0x708   :  { %v20857_v7 = vmul.f32 0.95, %v25816_v6  ;;  %v20274_v36 = vpop.f32.mrb[145].mxu1 }
 0x709   :  { %v20856_v55 = vmul.f32 0.95, %v20274_v36  ;;  %25939 = vmatprep.mubr.msk.f32.mxu0 %vm108_vm0, %v20918_v2  ;;  %v35498_v36 = vld [vmem:[#allocation129_spill] sm:$0xff] }
 0x70a   :  { %25940 = vmatmul.mubr.msk.f32.gmra.mrb[206].mxu0 %vm108_vm0, %v20919_v50  ;;  %v20921_v32 = vadd.f32 %v20857_v7, %v35491_v23  ;;  %v35499_v23 = vld [vmem:[#allocation136_spill] sm:$0xff] }
 0x70b   :  { %v20920_v56 = vadd.f32 %v20856_v55, %v35490_v18  ;;  %v25823_v40 = vpop.f32.mrb[146].mxu1 }
 0x70c   :  { %v20859_v45 = vmul.f32 0.95, %v25823_v40  ;;  %v20349_v12 = vpop.f32.mrb[147].mxu1 }
 0x70d   :  { %v20858_v57 = vmul.f32 0.95, %v20349_v12  ;;  %25942 = vmatprep.mubr.msk.f32.mxu0 %vm108_vm0, %v20920_v56  ;;  %v35500_v12 = vld [vmem:[#allocation137_spill] sm:$0xff] }
 0x70e   :  { %25943 = vmatmul.mubr.msk.f32.gmra.mrb[208].mxu0 %vm108_vm0, %v20921_v32  ;;  %v20923_v22 = vadd.f32 %v20859_v45, %v35493_v62  ;;  %v35501_v62 = vld [vmem:[#allocation138_spill] sm:$0xff] }
 0x70f   :  { %v20922_v10 = vadd.f32 %v20858_v57, %v35492_v47  ;;  %v25830_v31 = vpop.f32.mrb[148].mxu1 }
 0x710   :  { %v20861_v26 = vmul.f32 0.95, %v25830_v31  ;;  %v20424_v20 = vpop.f32.mrb[149].mxu1 }
 0x711   :  { %v20860_v21 = vmul.f32 0.95, %v20424_v20  ;;  %25945 = vmatprep.mubr.msk.f32.mxu0 %vm108_vm0, %v20922_v10  ;;  %v35502_v20 = vld [vmem:[#allocation139_spill] sm:$0xff] }
 0x712   :  { %25946 = vmatmul.mubr.msk.f32.gmra.mrb[210].mxu0 %vm108_vm0, %v20923_v22  ;;  %v20925_v25 = vadd.f32 %v20861_v26, %v35494_v52 }
 0x713   :  { %v20924_v29 = vadd.f32 %v20860_v21, %v35464_v60  ;;  %v25837_v13 = vpop.f32.mrb[150].mxu1 }
 0x714   :  { %v20863_v16 = vmul.f32 0.95, %v25837_v13  ;;  %v20499_v54 = vpop.f32.mrb[151].mxu1 }
 0x715   :  { %v20862_v37 = vmul.f32 0.95, %v20499_v54  ;;  %25948 = vmatprep.mubr.msk.f32.mxu0 %vm108_vm0, %v20924_v29 }
 0x716   :  { %25949 = vmatmul.mubr.msk.f32.gmra.mrb[212].mxu0 %vm108_vm0, %v20925_v25  ;;  %v20927_v44 = vadd.f32 %v20863_v16, %v35495_v8  ;;  %v35503_v25 = vld [vmem:[#allocation142_spill] sm:$0xff] }
 0x717   :  { %v20926_v43 = vadd.f32 %v20862_v37, %v35467_v38  ;;  %v25844_v15 = vpop.f32.mrb[152].mxu1  ;;  %v35504_v37 = vld [vmem:[#allocation143_spill] sm:$0xff] }
 0x718   :  { %v20865_v33 = vmul.f32 0.95, %v25844_v15  ;;  %v20574_v27 = vpop.f32.mrb[153].mxu1 }
 0x719   :  { %v20864_v48 = vmul.f32 0.95, %v20574_v27  ;;  %25951 = vmatprep.mubr.msk.f32.mxu0 %vm108_vm0, %v20926_v43 }
 0x71a   :  { %25952 = vmatmul.mubr.msk.f32.gmra.mrb[214].mxu0 %vm108_vm0, %v20927_v44  ;;  %v20929_v58 = vadd.f32 %v20865_v33, %v35402_v0  ;;  %v35505_v33 = vld [vmem:[#allocation144_spill] sm:$0xff] }
 0x71b   :  { %v20928_v60 = vadd.f32 %v20864_v48, %v35470_v51  ;;  %v25851_v61 = vpop.f32.mrb[154].mxu1 }
 0x71c   :  { %v20867_v9 = vmul.f32 0.95, %v25851_v61  ;;  %v20649_v46 = vpop.f32.mrb[155].mxu1 }
 0x71d   :  { %v20866_v41 = vmul.f32 0.95, %v20649_v46  ;;  %25954 = vmatprep.mubr.msk.f32.mxu0 %vm108_vm0, %v20928_v60  ;;  %v35506_v60 = vld [vmem:[#allocation115_spill] sm:$0xff] }
 0x71e   :  { %25955 = vmatmul.mubr.msk.f32.gmra.mrb[216].mxu0 %vm108_vm0, %v20929_v58  ;;  %v20931_v5 = vadd.f32 %v20867_v9, %v35403_v1  ;;  %v35496_v1 = vld [vmem:[#allocation259_spill] sm:$0xff] }
 0x71f   :  { %v20930_v38 = vadd.f32 %v20866_v41, %v32281_v24  ;;  %v25858_v49 = vpop.f32.mrb[156].mxu1  ;;  %v35507_v41 = vld [vmem:[#allocation72_spill] sm:$0xff] }
 0x720   :  { %v20869_v28 = vmul.f32 0.95, %v25858_v49  ;;  %v20724_v53 = vpop.f32.mrb[157].mxu1 }
 0x721   :  { %v20868_v63 = vmul.f32 0.95, %v20724_v53  ;;  %25957 = vmatprep.mubr.msk.f32.mxu0 %vm108_vm0, %v20930_v38 }
 0x722   :  { %25958 = vmatmul.mubr.msk.f32.gmra.mrb[218].mxu0 %vm108_vm0, %v20931_v5  ;;  %v20933_v17 = vadd.f32 %v20869_v28, %v35404_v30  ;;  %v21580_v30 = vld [vmem:[%s33939_s6] sm:$0x1]  ;;  %v35508_v5 = vld [vmem:[#allocation83_spill] sm:$0xff] }
 0x723   :  { %v20932_v0 = vadd.f32 %v20868_v63, %v32309_v3  ;;  %v25865_v51 = vpop.f32.mrb[158].mxu1  ;;  %v21585_v3 = vshrl.u32 %v21584_v11, 7  ;;  %v21582_v59 = vadd.f32 %v21581_v19, %v21580_v30  ;;  %v35511_v11 = vld [vmem:[#allocation197_spill] sm:$0xff]  ;;  %v35512_v19 = vld [vmem:[#allocation98_spill] sm:$0xff] }
 0x724   :  { %v20871_v34 = vmul.f32 0.95, %v25865_v51  ;;  %v20799_v42 = vpop.f32.mrb[159].mxu1  ;;  %v35509_v51 = vld [vmem:[#allocation199_spill] sm:$0xff] }
 0x725   :  { %v20870_v39 = vmul.f32 0.95, %v20799_v42  ;;  %25960 = vmatprep.mubr.msk.f32.mxu0 %vm108_vm0, %v20932_v0  ;;  %v21586_v2 = vsub.s32 0, %v21585_v3  ;;  %v35510_v42 = vld [vmem:[#allocation120_spill] sm:$0xff] }
 0x726   :  { %25961 = vmatmul.mubr.msk.f32.gmra.mrb[220].mxu0 %vm108_vm0, %v20933_v17  ;;  %v20935_v14 = vadd.f32 %v20871_v34, %v35496_v1 }
 0x727   :  { %v20934_v24 = vadd.f32 %v20870_v39, %v32339_v4  ;;  %v33546_v6 = vrot.slane %v21582_v59, %v21586_v2 }
 0x729   :  { %25963 = vmatprep.mubr.msk.f32.mxu0 %vm108_vm0, %v20934_v24 }
 0x72a   :  { %25964 = vmatmul.mubr.msk.f32.gmra.mrb[222].mxu0 %vm108_vm0, %v20935_v14 }
 0x781   :  { %v25872_v4 = vpop.f32.mrb[160].mxu0 }
 0x782   :  { %v26890_v50 = vadd.f32 %v25872_v4, %v35497_v35  ;;  %v21197_v7 = vpop.f32.mrb[161].mxu0 }
 0x783   :  { %v26891_v55 = vadd.f32 %v21197_v7, %v35498_v36 }
 0x784   :  { %v21590_v18 = vadd.f32 %v26890_v50, %v33546_v6  ;;  %v35513_v50 = vld [vmem:[#allocation181_spill] sm:$0xff] }
 0x785   :  { %v21589_v56 = vadd.f32 %v26891_v55, %v33546_v6  ;;  %v25875_v40 = vpop.f32.mrb[162].mxu0  ;;  %v35514_v55 = vld [vmem:[#allocation205_spill] sm:$0xff] }
 0x786   :  { %21655 = vst.msk [vmem:[%s33941_s9 + $0x8] sm:$0xff] %vm21653_vm2, %v21590_v18  ;;  %v26892_v32 = vadd.f32 %v25875_v40, %v35499_v23  ;;  %v21207_v45 = vpop.f32.mrb[163].mxu0 }
 0x787   :  { %21654 = vst.msk [vmem:[%s33941_s9] sm:$0xff] %vm21653_vm2, %v21589_v56  ;;  %v26893_v57 = vadd.f32 %v21207_v45, %v35500_v12 }
 0x788   :  { %v21592_v47 = vadd.f32 %v26892_v32, %v33546_v6  ;;  %v35515_v32 = vld [vmem:[#allocation99_spill] sm:$0xff] }
 0x789   :  { %v21591_v10 = vadd.f32 %v26893_v57, %v33546_v6  ;;  %v25878_v31 = vpop.f32.mrb[164].mxu0  ;;  %v35516_v57 = vld [vmem:[#allocation203_spill] sm:$0xff] }
 0x78a   :  { %21657 = vst.msk [vmem:[%s33941_s9 + $0x18] sm:$0xff] %vm21653_vm2, %v21592_v47  ;;  %v26894_v22 = vadd.f32 %v25878_v31, %v35501_v62  ;;  %v21217_v26 = vpop.f32.mrb[165].mxu0 }
 0x78b   :  { %21656 = vst.msk [vmem:[%s33941_s9 + $0x10] sm:$0xff] %vm21653_vm2, %v21591_v10  ;;  %v26895_v21 = vadd.f32 %v21217_v26, %v35502_v20 }
 0x78c   :  { %v21594_v29 = vadd.f32 %v26894_v22, %v33546_v6  ;;  %v35517_v22 = vld [vmem:[#allocation104_spill] sm:$0xff] }
 0x78d   :  { %v21593_v13 = vadd.f32 %v26895_v21, %v33546_v6  ;;  %v25881_v52 = vpop.f32.mrb[166].mxu0  ;;  %v35518_v21 = vld [vmem:[#allocation182_spill] sm:$0xff] }
 0x78e   :  { %21659 = vst.msk [vmem:[%s33941_s9 + $0x28] sm:$0xff] %vm21653_vm2, %v21594_v29  ;;  %v26896_v16 = vadd.f32 %v25881_v52, %v35503_v25  ;;  %v21227_v54 = vpop.f32.mrb[167].mxu0 }
 0x78f   :  { %21658 = vst.msk [vmem:[%s33941_s9 + $0x20] sm:$0xff] %vm21653_vm2, %v21593_v13  ;;  %v26897_v43 = vadd.f32 %v21227_v54, %v35504_v37 }
 0x790   :  { %v21596_v15 = vadd.f32 %v26896_v16, %v33546_v6  ;;  %v35519_v16 = vld [vmem:[#allocation209_spill] sm:$0xff] }
 0x791   :  { %v21595_v8 = vadd.f32 %v26897_v43, %v33546_v6  ;;  %v25884_v44 = vpop.f32.mrb[168].mxu0  ;;  %v35520_v43 = vld [vmem:[#allocation106_spill] sm:$0xff] }
 0x792   :  { %21661 = vst.msk [vmem:[%s33941_s9 + $0x38] sm:$0xff] %vm21653_vm2, %v21596_v15  ;;  %v26898_v27 = vadd.f32 %v25884_v44, %v35505_v33  ;;  %v21237_v48 = vpop.f32.mrb[169].mxu0 }
 0x793   :  { %21660 = vst.msk [vmem:[%s33941_s9 + $0x30] sm:$0xff] %vm21653_vm2, %v21595_v8  ;;  %v26899_v61 = vadd.f32 %v21237_v48, %v35506_v60 }
 0x794   :  { %v21598_v58 = vadd.f32 %v26898_v27, %v33546_v6  ;;  %v35521_v27 = vld [vmem:[#allocation207_spill] sm:$0xff] }
 0x795   :  { %v21597_v9 = vadd.f32 %v26899_v61, %v33546_v6  ;;  %v25887_v46 = vpop.f32.mrb[170].mxu0  ;;  %v35522_v61 = vld [vmem:[#allocation108_spill] sm:$0xff] }
 0x796   :  { %21663 = vst.msk [vmem:[%s33941_s9 + $0x48] sm:$0xff] %vm21653_vm2, %v21598_v58  ;;  %v26900_v38 = vadd.f32 %v25887_v46, %v35507_v41  ;;  %v21247_v49 = vpop.f32.mrb[171].mxu0 }
 0x797   :  { %21662 = vst.msk [vmem:[%s33941_s9 + $0x40] sm:$0xff] %vm21653_vm2, %v21597_v9  ;;  %v26901_v28 = vadd.f32 %v21247_v49, %v35508_v5 }
 0x798   :  { %v21600_v53 = vadd.f32 %v26900_v38, %v33546_v6  ;;  %v35523_v38 = vld [vmem:[#allocation187_spill] sm:$0xff] }
 0x799   :  { %v21599_v63 = vadd.f32 %v26901_v28, %v33546_v6  ;;  %v25890_v0 = vpop.f32.mrb[172].mxu0  ;;  %v35524_v28 = vld [vmem:[#allocation215_spill] sm:$0xff] }
 0x79a   :  { %21665 = vst.msk [vmem:[%s33941_s9 + $0x58] sm:$0xff] %vm21653_vm2, %v21600_v53  ;;  %v26902_v17 = vadd.f32 %v25890_v0, %v35509_v51  ;;  %v21257_v34 = vpop.f32.mrb[173].mxu0 }
 0x79b   :  { %21664 = vst.msk [vmem:[%s33941_s9 + $0x50] sm:$0xff] %vm21653_vm2, %v21599_v63  ;;  %v26903_v39 = vadd.f32 %v21257_v34, %v35510_v42 }
 0x79c   :  { %v21602_v24 = vadd.f32 %v26902_v17, %v33546_v6  ;;  %v35525_v17 = vld [vmem:[#allocation121_spill] sm:$0xff] }
 0x79d   :  { %v21601_v1 = vadd.f32 %v26903_v39, %v33546_v6  ;;  %v25893_v14 = vpop.f32.mrb[174].mxu0  ;;  %v35526_v39 = vld [vmem:[#allocation213_spill] sm:$0xff] }
 0x79e   :  { %21667 = vst.msk [vmem:[%s33941_s9 + $0x68] sm:$0xff] %vm21653_vm2, %v21602_v24  ;;  %v26904_v3 = vadd.f32 %v25893_v14, %v35511_v11  ;;  %v21267_v30 = vpop.f32.mrb[175].mxu0 }
 0x79f   :  { %21666 = vst.msk [vmem:[%s33941_s9 + $0x60] sm:$0xff] %vm21653_vm2, %v21601_v1  ;;  %v26905_v59 = vadd.f32 %v21267_v30, %v35512_v19 }
 0x7a0   :  { %v21604_v2 = vadd.f32 %v26904_v3, %v33546_v6  ;;  %v35527_v3 = vld [vmem:[#allocation111_spill] sm:$0xff] }
 0x7a1   :  { %v21603_v4 = vadd.f32 %v26905_v59, %v33546_v6  ;;  %v25896_v35 = vpop.f32.mrb[176].mxu0  ;;  %v35528_v59 = vld [vmem:[#allocation188_spill] sm:$0xff] }
 0x7a2   :  { %21669 = vst.msk [vmem:[%s33941_s9 + $0x78] sm:$0xff] %vm21653_vm2, %v21604_v2  ;;  %v26906_v7 = vadd.f32 %v25896_v35, %v35513_v50  ;;  %v21277_v36 = vpop.f32.mrb[177].mxu0 }
 0x7a3   :  { %21668 = vst.msk [vmem:[%s33941_s9 + $0x70] sm:$0xff] %vm21653_vm2, %v21603_v4  ;;  %v26907_v18 = vadd.f32 %v21277_v36, %v35514_v55 }
 0x7a4   :  { %v21606_v56 = vadd.f32 %v26906_v7, %v33546_v6  ;;  %v35529_v7 = vld [vmem:[#allocation219_spill] sm:$0xff] }
 0x7a5   :  { %v21605_v40 = vadd.f32 %v26907_v18, %v33546_v6  ;;  %v25899_v23 = vpop.f32.mrb[178].mxu0  ;;  %v35530_v18 = vld [vmem:[#allocation113_spill] sm:$0xff] }
 0x7a6   :  { %21671 = vst.msk [vmem:[%s33941_s9 + $0x88] sm:$0xff] %vm21653_vm2, %v21606_v56  ;;  %v26908_v45 = vadd.f32 %v25899_v23, %v35515_v32  ;;  %v21287_v12 = vpop.f32.mrb[179].mxu0 }
 0x7a7   :  { %21670 = vst.msk [vmem:[%s33941_s9 + $0x80] sm:$0xff] %vm21653_vm2, %v21605_v40  ;;  %v26909_v47 = vadd.f32 %v21287_v12, %v35516_v57 }
 0x7a8   :  { %v21608_v10 = vadd.f32 %v26908_v45, %v33546_v6  ;;  %v35531_v45 = vld [vmem:[#allocation217_spill] sm:$0xff] }
 0x7a9   :  { %v21607_v31 = vadd.f32 %v26909_v47, %v33546_v6  ;;  %v25902_v62 = vpop.f32.mrb[180].mxu0  ;;  %v35532_v47 = vld [vmem:[#allocation116_spill] sm:$0xff] }
 0x7aa   :  { %21673 = vst.msk [vmem:[%s33941_s9 + $0x98] sm:$0xff] %vm21653_vm2, %v21608_v10  ;;  %v26910_v26 = vadd.f32 %v25902_v62, %v35517_v22  ;;  %v21297_v20 = vpop.f32.mrb[181].mxu0 }
 0x7ab   :  { %21672 = vst.msk [vmem:[%s33941_s9 + $0x90] sm:$0xff] %vm21653_vm2, %v21607_v31  ;;  %v26911_v29 = vadd.f32 %v21297_v20, %v35518_v21 }
 0x7ac   :  { %v21610_v13 = vadd.f32 %v26910_v26, %v33546_v6  ;;  %v35533_v26 = vld [vmem:[#allocation192_spill] sm:$0xff] }
 0x7ad   :  { %v21609_v52 = vadd.f32 %v26911_v29, %v33546_v6  ;;  %v25905_v25 = vpop.f32.mrb[182].mxu0  ;;  %v35534_v29 = vld [vmem:[#allocation223_spill] sm:$0xff] }
 0x7ae   :  { %21675 = vst.msk [vmem:[%s33941_s9 + $0xa8] sm:$0xff] %vm21653_vm2, %v21610_v13  ;;  %v26912_v54 = vadd.f32 %v25905_v25, %v35519_v16  ;;  %v21307_v37 = vpop.f32.mrb[183].mxu0 }
 0x7af   :  { %21674 = vst.msk [vmem:[%s33941_s9 + $0xa0] sm:$0xff] %vm21653_vm2, %v21609_v52  ;;  %v26913_v15 = vadd.f32 %v21307_v37, %v35520_v43 }
 0x7b0   :  { %v21612_v8 = vadd.f32 %v26912_v54, %v33546_v6  ;;  %v35535_v54 = vld [vmem:[#allocation145_spill] sm:$0xff] }
 0x7b1   :  { %v21611_v44 = vadd.f32 %v26913_v15, %v33546_v6  ;;  %v25908_v33 = vpop.f32.mrb[184].mxu0  ;;  %v35536_v15 = vld [vmem:[#allocation221_spill] sm:$0xff] }
 0x7b2   :  { %21677 = vst.msk [vmem:[%s33941_s9 + $0xb8] sm:$0xff] %vm21653_vm2, %v21612_v8  ;;  %v26914_v48 = vadd.f32 %v25908_v33, %v35521_v27  ;;  %v21317_v60 = vpop.f32.mrb[185].mxu0 }
 0x7b3   :  { %21676 = vst.msk [vmem:[%s33941_s9 + $0xb0] sm:$0xff] %vm21653_vm2, %v21611_v44  ;;  %v26915_v58 = vadd.f32 %v21317_v60, %v35522_v61 }
 0x7b4   :  { %v21614_v9 = vadd.f32 %v26914_v48, %v33546_v6  ;;  %v35537_v48 = vld [vmem:[#allocation68_spill] sm:$0xff] }
 0x7b5   :  { %v21613_v46 = vadd.f32 %v26915_v58, %v33546_v6  ;;  %v25911_v41 = vpop.f32.mrb[186].mxu0  ;;  %v35538_v58 = vld [vmem:[#allocation194_spill] sm:$0xff] }
 0x7b6   :  { %21679 = vst.msk [vmem:[%s33941_s9 + $0xc8] sm:$0xff] %vm21653_vm2, %v21614_v9  ;;  %v26916_v49 = vadd.f32 %v25911_v41, %v35523_v38  ;;  %v21327_v5 = vpop.f32.mrb[187].mxu0 }
 0x7b7   :  { %21678 = vst.msk [vmem:[%s33941_s9 + $0xc0] sm:$0xff] %vm21653_vm2, %v21613_v46  ;;  %v26917_v53 = vadd.f32 %v21327_v5, %v35524_v28 }
 0x7b8   :  { %v21616_v63 = vadd.f32 %v26916_v49, %v33546_v6  ;;  %v35539_v49 = vld [vmem:[#allocation228_spill] sm:$0xff] }
 0x7b9   :  { %v21615_v0 = vadd.f32 %v26917_v53, %v33546_v6  ;;  %v25914_v51 = vpop.f32.mrb[188].mxu0  ;;  %v35540_v53 = vld [vmem:[#allocation130_spill] sm:$0xff] }
 0x7ba   :  { %21681 = vst.msk [vmem:[%s33941_s9 + $0xd8] sm:$0xff] %vm21653_vm2, %v21616_v63  ;;  %v26918_v34 = vadd.f32 %v25914_v51, %v35525_v17  ;;  %v21337_v42 = vpop.f32.mrb[189].mxu0 }
 0x7bb   :  { %21680 = vst.msk [vmem:[%s33941_s9 + $0xd0] sm:$0xff] %vm21653_vm2, %v21615_v0  ;;  %v26919_v24 = vadd.f32 %v21337_v42, %v35526_v39 }
 0x7bc   :  { %v21618_v1 = vadd.f32 %v26918_v34, %v33546_v6  ;;  %v35541_v34 = vld [vmem:[#allocation225_spill] sm:$0xff] }
 0x7bd   :  { %v21617_v14 = vadd.f32 %v26919_v24, %v33546_v6  ;;  %v25917_v11 = vpop.f32.mrb[190].mxu0  ;;  %v35542_v24 = vld [vmem:[#allocation75_spill] sm:$0xff] }
 0x7be   :  { %21683 = vst.msk [vmem:[%s33941_s9 + $0xe8] sm:$0xff] %vm21653_vm2, %v21618_v1  ;;  %v26920_v30 = vadd.f32 %v25917_v11, %v35527_v3  ;;  %v21347_v19 = vpop.f32.mrb[191].mxu0 }
 0x7bf   :  { %21682 = vst.msk [vmem:[%s33941_s9 + $0xe0] sm:$0xff] %vm21653_vm2, %v21617_v14  ;;  %v26921_v2 = vadd.f32 %v21347_v19, %v35528_v59 }
 0x7c0   :  { %v21620_v4 = vadd.f32 %v26920_v30, %v33546_v6  ;;  %v35543_v30 = vld [vmem:[#allocation201_spill] sm:$0xff] }
 0x7c1   :  { %v21619_v35 = vadd.f32 %v26921_v2, %v33546_v6  ;;  %v25920_v50 = vpop.f32.mrb[192].mxu0  ;;  %v35544_v2 = vld [vmem:[#allocation231_spill] sm:$0xff] }
 0x7c2   :  { %21685 = vst.msk [vmem:[%s33941_s9 + $0xf8] sm:$0xff] %vm21653_vm2, %v21620_v4  ;;  %v26922_v36 = vadd.f32 %v25920_v50, %v35529_v7  ;;  %v21357_v55 = vpop.f32.mrb[193].mxu0 }
 0x7c3   :  { %21684 = vst.msk [vmem:[%s33941_s9 + $0xf0] sm:$0xff] %vm21653_vm2, %v21619_v35  ;;  %v26923_v56 = vadd.f32 %v21357_v55, %v35530_v18 }
 0x7c4   :  { %v21622_v40 = vadd.f32 %v26922_v36, %v33546_v6  ;;  %v35545_v36 = vld [vmem:[#allocation122_spill] sm:$0xff] }
 0x7c5   :  { %v21621_v23 = vadd.f32 %v26923_v56, %v33546_v6  ;;  %v25923_v32 = vpop.f32.mrb[194].mxu0  ;;  %v35546_v56 = vld [vmem:[#allocation236_spill] sm:$0xff] }
 0x7c6   :  { %21687 = vst.msk [vmem:[%s33941_s9 + $0x108] sm:$0xff] %vm21653_vm2, %v21622_v40  ;;  %v26924_v12 = vadd.f32 %v25923_v32, %v35531_v45  ;;  %v21367_v57 = vpop.f32.mrb[195].mxu0 }
 0x7c7   :  { %21686 = vst.msk [vmem:[%s33941_s9 + $0x100] sm:$0xff] %vm21653_vm2, %v21621_v23  ;;  %v26925_v10 = vadd.f32 %v21367_v57, %v35532_v47 }
 0x7c8   :  { %v21624_v31 = vadd.f32 %v26924_v12, %v33546_v6  ;;  %v35547_v12 = vld [vmem:[#allocation134_spill] sm:$0xff] }
 0x7c9   :  { %v21623_v62 = vadd.f32 %v26925_v10, %v33546_v6  ;;  %v25926_v22 = vpop.f32.mrb[196].mxu0  ;;  %v35548_v10 = vld [vmem:[#allocation202_spill] sm:$0xff] }
 0x7ca   :  { %21689 = vst.msk [vmem:[%s33941_s9 + $0x118] sm:$0xff] %vm21653_vm2, %v21624_v31  ;;  %v26926_v20 = vadd.f32 %v25926_v22, %v35533_v26  ;;  %v21377_v21 = vpop.f32.mrb[197].mxu0 }
 0x7cb   :  { %21688 = vst.msk [vmem:[%s33941_s9 + $0x110] sm:$0xff] %vm21653_vm2, %v21623_v62  ;;  %v26927_v13 = vadd.f32 %v21377_v21, %v35534_v29 }
 0x7cc   :  { %v21626_v52 = vadd.f32 %v26926_v20, %v33546_v6  ;;  %v35549_v20 = vld [vmem:[#allocation238_spill] sm:$0xff] }
 0x7cd   :  { %v21625_v25 = vadd.f32 %v26927_v13, %v33546_v6  ;;  %v25929_v16 = vpop.f32.mrb[198].mxu0  ;;  %v35550_v13 = vld [vmem:[#allocation135_spill] sm:$0xff] }
 0x7ce   :  { %21691 = vst.msk [vmem:[%s33941_s9 + $0x128] sm:$0xff] %vm21653_vm2, %v21626_v52  ;;  %v26928_v37 = vadd.f32 %v25929_v16, %v35535_v54  ;;  %v21387_v43 = vpop.f32.mrb[199].mxu0 }
 0x7cf   :  { %21690 = vst.msk [vmem:[%s33941_s9 + $0x120] sm:$0xff] %vm21653_vm2, %v21625_v25  ;;  %v26929_v8 = vadd.f32 %v21387_v43, %v35536_v15 }
 0x7d0   :  { %v21628_v44 = vadd.f32 %v26928_v37, %v33546_v6  ;;  %v35551_v37 = vld [vmem:[#allocation233_spill] sm:$0xff] }
 0x7d1   :  { %v21627_v33 = vadd.f32 %v26929_v8, %v33546_v6  ;;  %v25932_v27 = vpop.f32.mrb[200].mxu0  ;;  %v35552_v8 = vld [vmem:[#allocation148_spill] sm:$0xff] }
 0x7d2   :  { %21693 = vst.msk [vmem:[%s33941_s9 + $0x138] sm:$0xff] %vm21653_vm2, %v21628_v44  ;;  %v26930_v60 = vadd.f32 %v25932_v27, %v35537_v48  ;;  %v21397_v61 = vpop.f32.mrb[201].mxu0 }
 0x7d3   :  { %21692 = vst.msk [vmem:[%s33941_s9 + $0x130] sm:$0xff] %vm21653_vm2, %v21627_v33  ;;  %v26931_v9 = vadd.f32 %v21397_v61, %v35538_v58 }
 0x7d4   :  { %v21630_v46 = vadd.f32 %v26930_v60, %v33546_v6  ;;  %v35553_v60 = vld [vmem:[#allocation211_spill] sm:$0xff] }
 0x7d5   :  { %v21629_v41 = vadd.f32 %v26931_v9, %v33546_v6  ;;  %v25935_v38 = vpop.f32.mrb[202].mxu0  ;;  %v35554_v9 = vld [vmem:[#allocation149_spill] sm:$0xff] }
 0x7d6   :  { %21695 = vst.msk [vmem:[%s33941_s9 + $0x148] sm:$0xff] %vm21653_vm2, %v21630_v46  ;;  %v26932_v5 = vadd.f32 %v25935_v38, %v35539_v49  ;;  %v21407_v28 = vpop.f32.mrb[203].mxu0 }
 0x7d7   :  { %21694 = vst.msk [vmem:[%s33941_s9 + $0x140] sm:$0xff] %vm21653_vm2, %v21629_v41  ;;  %v26933_v63 = vadd.f32 %v21407_v28, %v35540_v53 }
 0x7d8   :  { %v21632_v0 = vadd.f32 %v26932_v5, %v33546_v6  ;;  %v35555_v5 = vld [vmem:[#allocation242_spill] sm:$0xff] }
 0x7d9   :  { %v21631_v51 = vadd.f32 %v26933_v63, %v33546_v6  ;;  %v25938_v17 = vpop.f32.mrb[204].mxu0  ;;  %v35556_v63 = vld [vmem:[#allocation150_spill] sm:$0xff] }
 0x7da   :  { %21697 = vst.msk [vmem:[%s33941_s9 + $0x158] sm:$0xff] %vm21653_vm2, %v21632_v0  ;;  %v26934_v42 = vadd.f32 %v25938_v17, %v35541_v34  ;;  %v21417_v39 = vpop.f32.mrb[205].mxu0 }
 0x7db   :  { %21696 = vst.msk [vmem:[%s33941_s9 + $0x150] sm:$0xff] %vm21653_vm2, %v21631_v51  ;;  %v26935_v1 = vadd.f32 %v21417_v39, %v35542_v24 }
 0x7dc   :  { %v21634_v14 = vadd.f32 %v26934_v42, %v33546_v6  ;;  %v35557_v42 = vld [vmem:[#allocation212_spill] sm:$0xff] }
 0x7dd   :  { %v21633_v11 = vadd.f32 %v26935_v1, %v33546_v6  ;;  %v25941_v3 = vpop.f32.mrb[206].mxu0  ;;  %v35558_v1 = vld [vmem:[#allocation151_spill] sm:$0xff] }
 0x7de   :  { %21699 = vst.msk [vmem:[%s33941_s9 + $0x168] sm:$0xff] %vm21653_vm2, %v21634_v14  ;;  %v26936_v19 = vadd.f32 %v25941_v3, %v35543_v30  ;;  %v21427_v59 = vpop.f32.mrb[207].mxu0 }
 0x7df   :  { %21698 = vst.msk [vmem:[%s33941_s9 + $0x160] sm:$0xff] %vm21653_vm2, %v21633_v11  ;;  %v26937_v4 = vadd.f32 %v21427_v59, %v35544_v2 }
 0x7e0   :  { %v21636_v35 = vadd.f32 %v26936_v19, %v33546_v6  ;;  %v35559_v19 = vld [vmem:[#allocation154_spill] sm:$0xff] }
 0x7e1   :  { %v21635_v50 = vadd.f32 %v26937_v4, %v33546_v6  ;;  %v25944_v7 = vpop.f32.mrb[208].mxu0  ;;  %v35560_v4 = vld [vmem:[#allocation227_spill] sm:$0xff] }
 0x7e2   :  { %21701 = vst.msk [vmem:[%s33941_s9 + $0x178] sm:$0xff] %vm21653_vm2, %v21636_v35  ;;  %v26938_v55 = vadd.f32 %v25944_v7, %v35545_v36  ;;  %v21437_v18 = vpop.f32.mrb[209].mxu0 }
 0x7e3   :  { %21700 = vst.msk [vmem:[%s33941_s9 + $0x170] sm:$0xff] %vm21653_vm2, %v21635_v50  ;;  %v26939_v40 = vadd.f32 %v21437_v18, %v35546_v56 }
 0x7e4   :  { %v21638_v23 = vadd.f32 %v26938_v55, %v33546_v6 }
 0x7e5   :  { %v21637_v32 = vadd.f32 %v26939_v40, %v33546_v6  ;;  %v25947_v45 = vpop.f32.mrb[210].mxu0 }
 0x7e6   :  { %21703 = vst.msk [vmem:[%s33941_s9 + $0x188] sm:$0xff] %vm21653_vm2, %v21638_v23  ;;  %v26940_v57 = vadd.f32 %v25947_v45, %v35547_v12  ;;  %v21447_v47 = vpop.f32.mrb[211].mxu0 }
 0x7e7   :  { %21702 = vst.msk [vmem:[%s33941_s9 + $0x180] sm:$0xff] %vm21653_vm2, %v21637_v32  ;;  %v26941_v31 = vadd.f32 %v21447_v47, %v35548_v10 }
 0x7e8   :  { %v21640_v62 = vadd.f32 %v26940_v57, %v33546_v6 }
 0x7e9   :  { %v21639_v22 = vadd.f32 %v26941_v31, %v33546_v6  ;;  %v25950_v26 = vpop.f32.mrb[212].mxu0 }
 0x7ea   :  { %21705 = vst.msk [vmem:[%s33941_s9 + $0x198] sm:$0xff] %vm21653_vm2, %v21640_v62  ;;  %v26942_v21 = vadd.f32 %v25950_v26, %v35549_v20  ;;  %v21457_v29 = vpop.f32.mrb[213].mxu0 }
 0x7eb   :  { %21704 = vst.msk [vmem:[%s33941_s9 + $0x190] sm:$0xff] %vm21653_vm2, %v21639_v22  ;;  %v26943_v52 = vadd.f32 %v21457_v29, %v35550_v13 }
 0x7ec   :  { %v21642_v25 = vadd.f32 %v26942_v21, %v33546_v6 }
 0x7ed   :  { %v21641_v16 = vadd.f32 %v26943_v52, %v33546_v6  ;;  %v25953_v54 = vpop.f32.mrb[214].mxu0 }
 0x7ee   :  { %21707 = vst.msk [vmem:[%s33941_s9 + $0x1a8] sm:$0xff] %vm21653_vm2, %v21642_v25  ;;  %v26944_v43 = vadd.f32 %v25953_v54, %v35551_v37  ;;  %v21467_v15 = vpop.f32.mrb[215].mxu0 }
 0x7ef   :  { %21706 = vst.msk [vmem:[%s33941_s9 + $0x1a0] sm:$0xff] %vm21653_vm2, %v21641_v16  ;;  %v26945_v44 = vadd.f32 %v21467_v15, %v35552_v8 }
 0x7f0   :  { %v21644_v33 = vadd.f32 %v26944_v43, %v33546_v6 }
 0x7f1   :  { %v21643_v27 = vadd.f32 %v26945_v44, %v33546_v6  ;;  %v25956_v48 = vpop.f32.mrb[216].mxu0 }
 0x7f2   :  { %21709 = vst.msk [vmem:[%s33941_s9 + $0x1b8] sm:$0xff] %vm21653_vm2, %v21644_v33  ;;  %v26946_v61 = vadd.f32 %v25956_v48, %v35553_v60  ;;  %v21477_v58 = vpop.f32.mrb[217].mxu0 }
 0x7f3   :  { %21708 = vst.msk [vmem:[%s33941_s9 + $0x1b0] sm:$0xff] %vm21653_vm2, %v21643_v27  ;;  %v26947_v46 = vadd.f32 %v21477_v58, %v35554_v9 }
 0x7f4   :  { %v21646_v41 = vadd.f32 %v26946_v61, %v33546_v6 }
 0x7f5   :  { %v21645_v38 = vadd.f32 %v26947_v46, %v33546_v6  ;;  %v25959_v49 = vpop.f32.mrb[218].mxu0 }
 0x7f6   :  { %21711 = vst.msk [vmem:[%s33941_s9 + $0x1c8] sm:$0xff] %vm21653_vm2, %v21646_v41  ;;  %v26948_v28 = vadd.f32 %v25959_v49, %v35555_v5  ;;  %v21487_v53 = vpop.f32.mrb[219].mxu0 }
 0x7f7   :  { %21710 = vst.msk [vmem:[%s33941_s9 + $0x1c0] sm:$0xff] %vm21653_vm2, %v21645_v38  ;;  %v26949_v0 = vadd.f32 %v21487_v53, %v35556_v63 }
 0x7f8   :  { %v21648_v51 = vadd.f32 %v26948_v28, %v33546_v6 }
 0x7f9   :  { %v21647_v17 = vadd.f32 %v26949_v0, %v33546_v6  ;;  %v25962_v34 = vpop.f32.mrb[220].mxu0 }
 0x7fa   :  { %21713 = vst.msk [vmem:[%s33941_s9 + $0x1d8] sm:$0xff] %vm21653_vm2, %v21648_v51  ;;  %v26950_v39 = vadd.f32 %v25962_v34, %v35557_v42  ;;  %v21497_v24 = vpop.f32.mrb[221].mxu0 }
 0x7fb   :  { %21712 = vst.msk [vmem:[%s33941_s9 + $0x1d0] sm:$0xff] %vm21653_vm2, %v21647_v17  ;;  %v26951_v14 = vadd.f32 %v21497_v24, %v35558_v1 }
 0x7fc   :  { %v21650_v11 = vadd.f32 %v26950_v39, %v33546_v6 }
 0x7fd   :  { %v21649_v3 = vadd.f32 %v26951_v14, %v33546_v6  ;;  %v25965_v30 = vpop.f32.mrb[222].mxu0 }
 0x7fe   :  { %21715 = vst.msk [vmem:[%s33941_s9 + $0x1e8] sm:$0xff] %vm21653_vm2, %v21650_v11  ;;  %v26952_v59 = vadd.f32 %v25965_v30, %v35559_v19  ;;  %v21507_v2 = vpop.f32.mrb[223].mxu0 }
 0x7ff   :  { %21714 = vst.msk [vmem:[%s33941_s9 + $0x1e0] sm:$0xff] %vm21653_vm2, %v21649_v3  ;;  %v26953_v35 = vadd.f32 %v21507_v2, %v35560_v4 }
 0x800   :  { %v21652_v50 = vadd.f32 %v26952_v59, %v33546_v6 }
 0x801   :  { %v21651_v7 = vadd.f32 %v26953_v35, %v33546_v6 }
 0x802   :  { %21717 = vst.msk [vmem:[%s33941_s9 + $0x1f8] sm:$0xff] %vm21653_vm2, %v21652_v50 }
 0x803   :  { %21716 = vst.msk [vmem:[%s33941_s9 + $0x1f0] sm:$0xff] %vm21653_vm2, %v21651_v7 }

</bundles_post_ra>
